<compile_context>
chip_gen: v7x
topology: tpu7x:2x2x1
jax: 0.10.0
libtpu: 0.0.40
codegen_flags: <defaults>
</compile_context>

<pallas_src>
import functools

import jax
import jax.numpy as jnp
from jax.experimental import pallas as pl
from jax.experimental.pallas import tpu as pltpu


def _pick_tile(total, candidates=(1024, 512, 256, 128)):
    for t in candidates:
        if total >= t and total % t == 0:
            return t
    return total


# ----------------------------------------------------------------------------
# Kernel 1: 3x3 conv (same padding) + bias + ReLU as ONE MXU matmul per tile.
# im2col is built host-side in bf16 in the fused-K layout (HW, 9*Cin) so the
# kernel issues a single dot with K = 9*Cin (full MXU K-fill) instead of 9
# accumulated K=Cin dots.
# TODO(synk): forming the (T, 9*Cin) staging buffer inside the kernel from the
# padded image would also remove the im2col HBM round-trip.
# ----------------------------------------------------------------------------
def _conv3x3_kernel(cols_ref, w_ref, b_ref, o_ref, *, relu):
    # cols_ref: (1, T, 9*Cin) bf16   w_ref: (9*Cin, Cout) bf16
    # b_ref:    (1, Cout) f32        o_ref: (1, T, Cout) bf16
    acc = jnp.dot(cols_ref[0], w_ref[...], preferred_element_type=jnp.float32)
    acc = acc + b_ref[...]
    if relu:
        acc = jnp.maximum(acc, 0.0)
    o_ref[0] = acc.astype(o_ref.dtype)


def conv3x3_relu(x, w, b, relu=True):
    """x: (N,H,W,Cin), w: (3,3,Cin,Cout) f32, b: (Cout,) f32 -> (N,H,W,Cout) bf16."""
    N, H, W, Cin = x.shape
    Cout = w.shape[-1]
    HW = H * W
    K = 9 * Cin

    xb = x.astype(jnp.bfloat16)
    xp = jnp.pad(xb, ((0, 0), (1, 1), (1, 1), (0, 0)))
    # fused-K im2col (tap-major, matches w.reshape(9*Cin, Cout) flattening order)
    cols = jnp.concatenate(
        [xp[:, kh:kh + H, kw:kw + W, :].reshape(N, HW, Cin)
         for kh in range(3) for kw in range(3)], axis=-1)            # (N, HW, 9*Cin)
    wf = w.astype(jnp.bfloat16).reshape(K, Cout)

    T = _pick_tile(HW)
    out = pl.pallas_call(
        functools.partial(_conv3x3_kernel, relu=relu),
        out_shape=jax.ShapeDtypeStruct((N, HW, Cout), jnp.bfloat16),
        grid=(N, HW // T),
        in_specs=[
            pl.BlockSpec((1, T, K), lambda n, t: (n, t, 0)),
            pl.BlockSpec((K, Cout), lambda n, t: (0, 0)),
            pl.BlockSpec((1, Cout), lambda n, t: (0, 0)),
        ],
        out_specs=pl.BlockSpec((1, T, Cout), lambda n, t: (n, t, 0)),
        compiler_params=pltpu.CompilerParams(
            dimension_semantics=("parallel", "parallel")),
    )(cols, wf, b.reshape(1, Cout).astype(jnp.float32))
    return out.reshape(N, H, W, Cout)


# ----------------------------------------------------------------------------
# Kernel 2: lane-dense, tiled L1 (mean absolute error) reduction.
# ----------------------------------------------------------------------------
def _l1_sum_kernel(a_ref, b_ref, o_ref):
    @pl.when(pl.program_id(0) == 0)
    def _():
        o_ref[0, 0] = jnp.float32(0.0)
    d = a_ref[...].astype(jnp.float32) - b_ref[...].astype(jnp.float32)
    o_ref[0, 0] += jnp.sum(jnp.abs(d))


def l1_mean(a, b):
    """Mean |a - b| over all elements; inputs reshaped to a lane-dense (rows,128)
    view and reduced with a tiled grid + SMEM scalar accumulator."""
    assert a.shape == b.shape
    total = a.size
    LANE = 128
    rows = pl.cdiv(total, LANE)
    TR = 2048
    if rows <= TR:
        rows_p = ((rows + 7) // 8) * 8
        tile_rows, ntiles = rows_p, 1
    else:
        rows_p = ((rows + TR - 1) // TR) * TR
        tile_rows, ntiles = TR, rows_p // TR
    pad = rows_p * LANE - total
    a2 = jnp.pad(a.reshape(-1), (0, pad)).reshape(rows_p, LANE)
    b2 = jnp.pad(b.reshape(-1), (0, pad)).reshape(rows_p, LANE)

    s = pl.pallas_call(
        _l1_sum_kernel,
        out_shape=jax.ShapeDtypeStruct((1, 1), jnp.float32),
        grid=(ntiles,),
        in_specs=[pl.BlockSpec((tile_rows, LANE), lambda i: (i, 0))] * 2,
        out_specs=pl.BlockSpec(memory_space=pltpu.MemorySpace.SMEM),
        compiler_params=pltpu.CompilerParams(dimension_semantics=("arbitrary",)),
    )(a2, b2)
    return s[0, 0] / total


# ----------------------------------------------------------------------------
# Kernel 3: fused style (gram) + perceptual L1 reduction.
# Reads each (feat_res, feat_tar) pair ONCE.  Gram is computed by contracting
# over HW directly on the (HW, C) layout (C stays on the lane axis), with the
# per-image gram accumulated across HW tiles in VMEM scratch.
# ----------------------------------------------------------------------------
def _gram_per_kernel(fr_ref, ft_ref, style_ref, per_ref, gr_acc, gt_acc, *, scale):
    n = pl.program_id(0)
    t = pl.program_id(1)

    @pl.when((n == 0) & (t == 0))
    def _():
        style_ref[0, 0] = jnp.float32(0.0)
        per_ref[0, 0] = jnp.float32(0.0)

    @pl.when(t == 0)
    def _():
        gr_acc[...] = jnp.zeros_like(gr_acc)
        gt_acc[...] = jnp.zeros_like(gt_acc)

    fr = fr_ref[0]            # (T, C) bf16
    ft = ft_ref[0]
    per_ref[0, 0] += jnp.sum(
        jnp.abs(fr.astype(jnp.float32) - ft.astype(jnp.float32)))

    dn = (((0,), (0,)), ((), ()))        # contract over HW -> (C, C) gram
    gr_acc[...] += jax.lax.dot_general(fr, fr, dn, preferred_element_type=jnp.float32)
    gt_acc[...] += jax.lax.dot_general(ft, ft, dn, preferred_element_type=jnp.float32)

    @pl.when(t == pl.num_programs(1) - 1)
    def _():
        style_ref[0, 0] += jnp.sum(jnp.abs(gr_acc[...] - gt_acc[...])) * scale


def gram_perceptual_sums(feat_res, feat_tar):
    """feat_*: (N,H,W,C).  Returns (style_sum, per_sum) where
       style_sum = sum_n sum_{c,e} |G_r(n) - G_t(n)|,  G = F F^T / (H*W*C)
       per_sum   = sum |feat_res - feat_tar|."""
    N, H, W, C = feat_res.shape
    HW = H * W
    a = feat_res.reshape(N, HW, C)
    b = feat_tar.reshape(N, HW, C)
    T = _pick_tile(HW, candidates=(2048, 1024, 512, 256))
    scale = 1.0 / float(HW * C)

    style, per = pl.pallas_call(
        functools.partial(_gram_per_kernel, scale=scale),
        out_shape=(jax.ShapeDtypeStruct((1, 1), jnp.float32),
                   jax.ShapeDtypeStruct((1, 1), jnp.float32)),
        grid=(N, HW // T),
        in_specs=[pl.BlockSpec((1, T, C), lambda n, t: (n, t, 0))] * 2,
        out_specs=(pl.BlockSpec(memory_space=pltpu.MemorySpace.SMEM),
                   pl.BlockSpec(memory_space=pltpu.MemorySpace.SMEM)),
        scratch_shapes=[pltpu.VMEM((C, C), jnp.float32),
                        pltpu.VMEM((C, C), jnp.float32)],
        compiler_params=pltpu.CompilerParams(
            dimension_semantics=("arbitrary", "arbitrary")),
    )(a, b)
    return style[0, 0], per[0, 0]


# ----------------------------------------------------------------------------
# Kernel 4: total-variation stencil (I[h-1,w] + I[h,w-1] - 2 I[h,w]) * mask,
# mean absolute value.  (The conv2d call in the PyTorch reference is missing its
# weight arg; this implements the intended [[0,1,0],[1,-2,0],[0,0,0]] stencil.)
# Runs per (n,c) plane with W on the lane axis, accumulating into SMEM.
# ----------------------------------------------------------------------------
def _tv_kernel(xp_ref, m_ref, o_ref):
    @pl.when(pl.program_id(0) == 0)
    def _():
        o_ref[0, 0] = jnp.float32(0.0)
    x = xp_ref[0]                       # (H+1, W+1) f32, zero-padded top/left
    Hp, Wp = x.shape
    H, W = Hp - 1, Wp - 1
    up = x[0:H, 1:W + 1]
    left = x[1:H + 1, 0:W]
    mid = x[1:H + 1, 1:W + 1]
    var = up + left - 2.0 * mid
    o_ref[0, 0] += jnp.sum(jnp.abs(var) * m_ref[...])


def tv_mean(res_nchw, mask_hw):
    N, C, H, W = res_nchw.shape
    m = xtoy_size_mask(mask_hw, (H, W)).astype(jnp.float32)
    mbin = (m <= 127.0).astype(jnp.float32)                 # (H, W)
    planes = res_nchw.reshape(N * C, H, W).astype(jnp.float32)
    xp = jnp.pad(planes, ((0, 0), (1, 0), (1, 0)))          # zero pad top / left
    s = pl.pallas_call(
        _tv_kernel,
        out_shape=jax.ShapeDtypeStruct((1, 1), jnp.float32),
        grid=(N * C,),
        in_specs=[pl.BlockSpec((1, H + 1, W + 1), lambda i: (i, 0, 0)),
                  pl.BlockSpec((H, W), lambda i: (0, 0))],
        out_specs=pl.BlockSpec(memory_space=pltpu.MemorySpace.SMEM),
        compiler_params=pltpu.CompilerParams(dimension_semantics=("arbitrary",)),
    )(xp, mbin)
    return s[0, 0] / (N * C * H * W)


# ----------------------------------------------------------------------------
# Glue: xtoySize (undefined helper in source), max-pool, VGG feature extractor.
# ----------------------------------------------------------------------------
def xtoy_size_nchw(x_nchw, hw):
    # TODO(synk): xtoySize is not defined in the reference source; assume
    # nearest-neighbor resize of the target/mask to the result's spatial size.
    N, C, _, _ = x_nchw.shape
    H, W = hw
    return jax.image.resize(x_nchw, (N, C, H, W), method="nearest")


def xtoy_size_mask(mask_hw, hw):
    return jax.image.resize(mask_hw, hw, method="nearest")


def maxpool2x2(x):
    N, H, W, C = x.shape
    return jnp.max(x.reshape(N, H // 2, 2, W // 2, 2, C), axis=(2, 4))


def vgg_features(x_nhwc, p):
    """Synthetic VGG16 features[0:5], [5:10], [10:17] (conv/relu/.../maxpool)."""
    h = conv3x3_relu(x_nhwc, p["c1_1_w"], p["c1_1_b"])
    h = conv3x3_relu(h, p["c1_2_w"], p["c1_2_b"])
    f1 = maxpool2x2(h)
    h = conv3x3_relu(f1, p["c2_1_w"], p["c2_1_b"])
    h = conv3x3_relu(h, p["c2_2_w"], p["c2_2_b"])
    f2 = maxpool2x2(h)
    h = conv3x3_relu(f2, p["c3_1_w"], p["c3_1_b"])
    h = conv3x3_relu(h, p["c3_2_w"], p["c3_2_b"])
    h = conv3x3_relu(h, p["c3_3_w"], p["c3_3_b"])
    f3 = maxpool2x2(h)
    return [f1, f2, f3]


def init_vgg_params(key):
    # Deterministic He-init stand-in for the pretrained VGG16 weights.
    specs = [("c1_1", 3, 64), ("c1_2", 64, 64),
             ("c2_1", 64, 128), ("c2_2", 128, 128),
             ("c3_1", 128, 256), ("c3_2", 256, 256), ("c3_3", 256, 256)]
    params = {}
    for i, (name, cin, cout) in enumerate(specs):
        kw = jax.random.fold_in(key, i)
        std = (2.0 / (9.0 * cin)) ** 0.5
        params[name + "_w"] = jax.random.normal(kw, (3, 3, cin, cout), jnp.float32) * std
        params[name + "_b"] = jnp.zeros((cout,), jnp.float32)
    return params


# ----------------------------------------------------------------------------
# InpaintLoss forward.
# ----------------------------------------------------------------------------
def inpaint_loss(results_nchw, target_nchw, mask_hw, vgg_params,
                 s_layers=(0, 1, 2, 3, 4, 5), t_layers=(0, 1, 2),
                 w_l1=6.0, w_per=0.1, w_style=240.0, w_tv=0.1):
    results = [r.astype(jnp.float32) for r in results_nchw]
    target = target_nchw.astype(jnp.float32)
    targets = [xtoy_size_nchw(target, r.shape[2:4]) for r in results]

    loss_structure = jnp.float32(0.0)
    loss_texture = jnp.float32(0.0)

    if len(s_layers) > 0:
        recon = sum(l1_mean(results[i], targets[i]) for i in s_layers)
        loss_structure = recon / len(s_layers) * w_l1

    if len(t_layers) > 0:
        res_t = [jnp.transpose(results[i], (0, 2, 3, 1)) for i in t_layers]
        tar_t = [jnp.transpose(targets[i], (0, 2, 3, 1)) for i in t_layers]
        vgg_res = [vgg_features(r, vgg_params) for r in res_t]
        vgg_tar = [vgg_features(t, vgg_params) for t in tar_t]

        loss_per = jnp.float32(0.0)
        loss_style = jnp.float32(0.0)
        for res, tar in zip(vgg_res, vgg_tar):
            for fr, ft in zip(res, tar):
                N, H, W, C = fr.shape
                style_sum, per_sum = gram_perceptual_sums(fr, ft)
                loss_per = loss_per + per_sum / (N * H * W * C)
                loss_style = loss_style + style_sum / (N * C * C)
        loss_per = loss_per / len(vgg_res) * w_per
        loss_style = loss_style / len(vgg_res) * w_style

        loss_tv = sum(tv_mean(results[i], mask_hw) for i in t_layers) / len(t_layers) * w_tv
        loss_texture = loss_style + loss_per + loss_tv

    return loss_structure + loss_texture


if __name__ == "__main__":
    key = jax.random.PRNGKey(0)
    k_res, k_tar, k_mask = jax.random.split(key, 3)

    N, C, H, W = 2, 3, 16, 16
    # 6 result images (struct layers 0..5; texture layers 0..2), all NCHW.
    results = [jax.random.uniform(jax.random.fold_in(k_res, i), (N, C, H, W), jnp.float32)
               for i in range(6)]
    target = jax.random.uniform(k_tar, (N, C, H, W), jnp.float32)
    # Grayscale mask with values in [0, 255] (compared against 127 in TV loss).
    mask = (jax.random.uniform(k_mask, (H, W)) * 255.0).astype(jnp.float32)

    vgg_params = init_vgg_params(jax.random.PRNGKey(42))

    loss_fn = jax.jit(inpaint_loss)
    loss = loss_fn(results, target, mask, vgg_params)
    loss = jax.block_until_ready(loss)
    assert loss.shape == () and jnp.isfinite(loss)
    print("KERNEL_OK")
</pallas_src>

<mosaic_0001>
module attributes {stable_mosaic.version = 11 : i64} {
  func.func @_l1_sum_kernel(%arg0: i32, %arg1: memref<16x128xf32, #tpu.memory_space<vmem>>, %arg2: memref<16x128xf32, #tpu.memory_space<vmem>>, %arg3: memref<1x1xf32, #tpu.memory_space<smem>>) attributes {dimension_semantics = [#tpu.dimension_semantics<arbitrary>], iteration_bounds = array<i64: 1>, scalar_prefetch = 0 : i64, scratch_operands = 0 : i64, tpu.core_type = #tpu.core_type<tc>, window_params = [{transform_indices = @transform_0, window_bounds = array<i64: 16, 128>}, {transform_indices = @transform_1, window_bounds = array<i64: 16, 128>}, {transform_indices = @transform_2, window_bounds = array<i64: 1, 1>}]} {
    %c0_i32 = arith.constant 0 : i32
    %0 = arith.cmpi eq, %arg0, %c0_i32 : i32
    %1 = arith.extui %0 : i1 to i32
    %c0_i32_0 = arith.constant 0 : i32
    %2 = arith.cmpi ne, %1, %c0_i32_0 : i32
    scf.if %2 {
      %cst_8 = arith.constant 0.000000e+00 : f32
      %c0_9 = arith.constant 0 : index
      %c0_10 = arith.constant 0 : index
      %14 = memref.load %arg3[%c0_9, %c0_10] : memref<1x1xf32, #tpu.memory_space<smem>>
      memref.store %cst_8, %arg3[%c0_9, %c0_10] : memref<1x1xf32, #tpu.memory_space<smem>>
    } else {
    }
    %c0 = arith.constant 0 : index
    %c0_1 = arith.constant 0 : index
    %3 = vector.load %arg1[%c0, %c0_1] : memref<16x128xf32, #tpu.memory_space<vmem>>, vector<16x128xf32>
    %c0_2 = arith.constant 0 : index
    %c0_3 = arith.constant 0 : index
    %4 = vector.load %arg2[%c0_2, %c0_3] : memref<16x128xf32, #tpu.memory_space<vmem>>, vector<16x128xf32>
    %5 = arith.subf %3, %4 : vector<16x128xf32>
    %c0_4 = arith.constant 0 : index
    %c0_5 = arith.constant 0 : index
    %6 = memref.load %arg3[%c0_4, %c0_5] : memref<1x1xf32, #tpu.memory_space<smem>>
    %7 = math.absf %5 : vector<16x128xf32>
    %8 = vector.shape_cast %7 : vector<16x128xf32> to vector<1x16x128xf32>
    %cst = arith.constant dense<0.000000e+00> : vector<1xf32>
    %9 = vector.multi_reduction <add>, %8, %cst [1, 2] : vector<1x16x128xf32> to vector<1xf32>
    %10 = vector.shape_cast %9 : vector<1xf32> to vector<1x1x1xf32>
    %11 = vector.extract %10[0, 0, 0] : f32 from vector<1x1x1xf32>
    %12 = arith.addf %6, %11 : f32
    %c0_6 = arith.constant 0 : index
    %c0_7 = arith.constant 0 : index
    %13 = memref.load %arg3[%c0_6, %c0_7] : memref<1x1xf32, #tpu.memory_space<smem>>
    memref.store %12, %arg3[%c0_6, %c0_7] : memref<1x1xf32, #tpu.memory_space<smem>>
    return
  }
  func.func @transform_0(%arg0: i32) -> (i32, i32) {
    %c0_i32 = arith.constant 0 : i32
    %c0_i32_0 = arith.constant 0 : i32
    return %arg0, %c0_i32 : i32, i32
  }
  func.func @transform_1(%arg0: i32) -> (i32, i32) {
    %c0_i32 = arith.constant 0 : i32
    %c0_i32_0 = arith.constant 0 : i32
    return %arg0, %c0_i32 : i32, i32
  }
  func.func @transform_2(%arg0: i32) -> (i32, i32) {
    %c0_i32 = arith.constant 0 : i32
    %c0_i32_0 = arith.constant 0 : i32
    %c0_i32_1 = arith.constant 0 : i32
    return %c0_i32, %c0_i32_0 : i32, i32
  }
}

module attributes {stable_mosaic.version = 11 : i64} {
  func.func @_tv_kernel(%arg0: i32, %arg1: memref<1x17x17xf32, #tpu.memory_space<vmem>>, %arg2: memref<16x16xf32, #tpu.memory_space<vmem>>, %arg3: memref<1x1xf32, #tpu.memory_space<smem>>) attributes {dimension_semantics = [#tpu.dimension_semantics<arbitrary>], iteration_bounds = array<i64: 6>, scalar_prefetch = 0 : i64, scratch_operands = 0 : i64, tpu.core_type = #tpu.core_type<tc>, window_params = [{transform_indices = @transform_0, window_bounds = array<i64: 1, 17, 17>}, {pipeline_mode = #tpu.pipeline_mode<synchronous>, transform_indices = @transform_1, window_bounds = array<i64: 16, 16>}, {transform_indices = @transform_2, window_bounds = array<i64: 1, 1>}]} {
    %c0_i32 = arith.constant 0 : i32
    %0 = arith.cmpi eq, %arg0, %c0_i32 : i32
    %1 = arith.extui %0 : i1 to i32
    %c0_i32_0 = arith.constant 0 : i32
    %2 = arith.cmpi ne, %1, %c0_i32_0 : i32
    scf.if %2 {
      %cst_10 = arith.constant 0.000000e+00 : f32
      %c0_11 = arith.constant 0 : index
      %c0_12 = arith.constant 0 : index
      %22 = memref.load %arg3[%c0_11, %c0_12] : memref<1x1xf32, #tpu.memory_space<smem>>
      memref.store %cst_10, %arg3[%c0_11, %c0_12] : memref<1x1xf32, #tpu.memory_space<smem>>
    } else {
    }
    %c0 = arith.constant 0 : index
    %c0_1 = arith.constant 0 : index
    %c0_2 = arith.constant 0 : index
    %3 = vector.load %arg1[%c0, %c0_1, %c0_2] : memref<1x17x17xf32, #tpu.memory_space<vmem>>, vector<1x17x17xf32>
    %4 = vector.shape_cast %3 : vector<1x17x17xf32> to vector<17x17xf32>
    %5 = vector.extract_strided_slice %4 {offsets = [0, 1], sizes = [16, 16], strides = [1, 1]} : vector<17x17xf32> to vector<16x16xf32>
    %6 = vector.extract_strided_slice %4 {offsets = [1, 0], sizes = [16, 16], strides = [1, 1]} : vector<17x17xf32> to vector<16x16xf32>
    %7 = vector.extract_strided_slice %4 {offsets = [1, 1], sizes = [16, 16], strides = [1, 1]} : vector<17x17xf32> to vector<16x16xf32>
    %8 = arith.addf %5, %6 : vector<16x16xf32>
    %cst = arith.constant 2.000000e+00 : f32
    %9 = vector.broadcast %cst : f32 to vector<16x16xf32>
    %10 = arith.mulf %9, %7 : vector<16x16xf32>
    %11 = arith.subf %8, %10 : vector<16x16xf32>
    %c0_3 = arith.constant 0 : index
    %c0_4 = arith.constant 0 : index
    %12 = memref.load %arg3[%c0_3, %c0_4] : memref<1x1xf32, #tpu.memory_space<smem>>
    %13 = math.absf %11 : vector<16x16xf32>
    %c0_5 = arith.constant 0 : index
    %c0_6 = arith.constant 0 : index
    %14 = vector.load %arg2[%c0_5, %c0_6] : memref<16x16xf32, #tpu.memory_space<vmem>>, vector<16x16xf32>
    %15 = arith.mulf %13, %14 : vector<16x16xf32>
    %16 = vector.shape_cast %15 : vector<16x16xf32> to vector<1x16x16xf32>
    %cst_7 = arith.constant dense<0.000000e+00> : vector<1xf32>
    %17 = vector.multi_reduction <add>, %16, %cst_7 [1, 2] : vector<1x16x16xf32> to vector<1xf32>
    %18 = vector.shape_cast %17 : vector<1xf32> to vector<1x1x1xf32>
    %19 = vector.extract %18[0, 0, 0] : f32 from vector<1x1x1xf32>
    %20 = arith.addf %12, %19 : f32
    %c0_8 = arith.constant 0 : index
    %c0_9 = arith.constant 0 : index
    %21 = memref.load %arg3[%c0_8, %c0_9] : memref<1x1xf32, #tpu.memory_space<smem>>
    memref.store %20, %arg3[%c0_8, %c0_9] : memref<1x1xf32, #tpu.memory_space<smem>>
    return
  }
  func.func @transform_0(%arg0: i32) -> (i32, i32, i32) {
    %c0_i32 = arith.constant 0 : i32
    %c0_i32_0 = arith.constant 0 : i32
    %c0_i32_1 = arith.constant 0 : i32
    return %arg0, %c0_i32, %c0_i32_0 : i32, i32, i32
  }
  func.func @transform_1(%arg0: i32) -> (i32, i32) {
    %c0_i32 = arith.constant 0 : i32
    %c0_i32_0 = arith.constant 0 : i32
    %c0_i32_1 = arith.constant 0 : i32
    return %c0_i32, %c0_i32_0 : i32, i32
  }
  func.func @transform_2(%arg0: i32) -> (i32, i32) {
    %c0_i32 = arith.constant 0 : i32
    %c0_i32_0 = arith.constant 0 : i32
    %c0_i32_1 = arith.constant 0 : i32
    return %c0_i32, %c0_i32_0 : i32, i32
  }
}

module attributes {stable_mosaic.version = 11 : i64} {
  func.func @_conv3x3_kernel(%arg0: i32, %arg1: i32, %arg2: memref<1x256x27xbf16, #tpu.memory_space<vmem>>, %arg3: memref<27x64xbf16, #tpu.memory_space<vmem>>, %arg4: memref<1x64xf32, #tpu.memory_space<vmem>>, %arg5: memref<1x256x64xbf16, #tpu.memory_space<vmem>>) attributes {dimension_semantics = [#tpu.dimension_semantics<parallel>, #tpu.dimension_semantics<parallel>], iteration_bounds = array<i64: 2, 1>, scalar_prefetch = 0 : i64, scratch_operands = 0 : i64, tpu.core_type = #tpu.core_type<tc>, window_params = [{transform_indices = @transform_0, window_bounds = array<i64: 1, 256, 27>}, {pipeline_mode = #tpu.pipeline_mode<synchronous>, transform_indices = @transform_1, window_bounds = array<i64: 27, 64>}, {pipeline_mode = #tpu.pipeline_mode<synchronous>, transform_indices = @transform_2, window_bounds = array<i64: 1, 64>}, {transform_indices = @transform_3, window_bounds = array<i64: 1, 256, 64>}]} {
    %c0 = arith.constant 0 : index
    %c0_0 = arith.constant 0 : index
    %c0_1 = arith.constant 0 : index
    %0 = vector.load %arg2[%c0, %c0_0, %c0_1] : memref<1x256x27xbf16, #tpu.memory_space<vmem>>, vector<1x256x27xbf16>
    %1 = vector.shape_cast %0 : vector<1x256x27xbf16> to vector<256x27xbf16>
    %c0_2 = arith.constant 0 : index
    %c0_3 = arith.constant 0 : index
    %2 = vector.load %arg3[%c0_2, %c0_3] : memref<27x64xbf16, #tpu.memory_space<vmem>>, vector<27x64xbf16>
    %cst = arith.constant dense<0.000000e+00> : vector<256x64xf32>
    %3 = tpu.matmul %1, %2, %cst {dimension_numbers = #tpu.dot_dimension_numbers<[1], [0], [0], [1], [0, 0, 1, 1], [], []>} : vector<256x27xbf16>, vector<27x64xbf16>, vector<256x64xf32> -> vector<256x64xf32>
    %c0_4 = arith.constant 0 : index
    %c0_5 = arith.constant 0 : index
    %4 = vector.load %arg4[%c0_4, %c0_5] : memref<1x64xf32, #tpu.memory_space<vmem>>, vector<1x64xf32>
    %5 = vector.broadcast %4 : vector<1x64xf32> to vector<256x64xf32>
    %6 = arith.addf %3, %5 : vector<256x64xf32>
    %cst_6 = arith.constant 0.000000e+00 : f32
    %7 = vector.broadcast %cst_6 : f32 to vector<256x64xf32>
    %8 = arith.maximumf %6, %7 : vector<256x64xf32>
    %9 = arith.truncf %8 : vector<256x64xf32> to vector<256x64xbf16>
    %c0_7 = arith.constant 0 : index
    %c0_8 = arith.constant 0 : index
    %c0_9 = arith.constant 0 : index
    %10 = vector.load %arg5[%c0_7, %c0_8, %c0_9] : memref<1x256x64xbf16, #tpu.memory_space<vmem>>, vector<1x256x64xbf16>
    %11 = vector.shape_cast %10 : vector<1x256x64xbf16> to vector<256x64xbf16>
    %12 = vector.shape_cast %9 : vector<256x64xbf16> to vector<1x256x64xbf16>
    tpu.vector_store %arg5[%c0_7, %c0_8, %c0_9], %12 {strides = array<i32>} : memref<1x256x64xbf16, #tpu.memory_space<vmem>>, vector<1x256x64xbf16>,
    return
  }
  func.func @transform_0(%arg0: i32, %arg1: i32) -> (i32, i32, i32) {
    %c0_i32 = arith.constant 0 : i32
    %c0_i32_0 = arith.constant 0 : i32
    return %arg0, %arg1, %c0_i32 : i32, i32, i32
  }
  func.func @transform_1(%arg0: i32, %arg1: i32) -> (i32, i32) {
    %c0_i32 = arith.constant 0 : i32
    %c0_i32_0 = arith.constant 0 : i32
    %c0_i32_1 = arith.constant 0 : i32
    return %c0_i32, %c0_i32_0 : i32, i32
  }
  func.func @transform_2(%arg0: i32, %arg1: i32) -> (i32, i32) {
    %c0_i32 = arith.constant 0 : i32
    %c0_i32_0 = arith.constant 0 : i32
    %c0_i32_1 = arith.constant 0 : i32
    return %c0_i32, %c0_i32_0 : i32, i32
  }
  func.func @transform_3(%arg0: i32, %arg1: i32) -> (i32, i32, i32) {
    %c0_i32 = arith.constant 0 : i32
    %c0_i32_0 = arith.constant 0 : i32
    return %arg0, %arg1, %c0_i32 : i32, i32, i32
  }
}

module attributes {stable_mosaic.version = 11 : i64} {
  func.func @_conv3x3_kernel(%arg0: i32, %arg1: i32, %arg2: memref<1x256x576xbf16, #tpu.memory_space<vmem>>, %arg3: memref<576x64xbf16, #tpu.memory_space<vmem>>, %arg4: memref<1x64xf32, #tpu.memory_space<vmem>>, %arg5: memref<1x256x64xbf16, #tpu.memory_space<vmem>>) attributes {dimension_semantics = [#tpu.dimension_semantics<parallel>, #tpu.dimension_semantics<parallel>], iteration_bounds = array<i64: 2, 1>, scalar_prefetch = 0 : i64, scratch_operands = 0 : i64, tpu.core_type = #tpu.core_type<tc>, window_params = [{transform_indices = @transform_0, window_bounds = array<i64: 1, 256, 576>}, {pipeline_mode = #tpu.pipeline_mode<synchronous>, transform_indices = @transform_1, window_bounds = array<i64: 576, 64>}, {pipeline_mode = #tpu.pipeline_mode<synchronous>, transform_indices = @transform_2, window_bounds = array<i64: 1, 64>}, {transform_indices = @transform_3, window_bounds = array<i64: 1, 256, 64>}]} {
    %c0 = arith.constant 0 : index
    %c0_0 = arith.constant 0 : index
    %c0_1 = arith.constant 0 : index
    %0 = vector.load %arg2[%c0, %c0_0, %c0_1] : memref<1x256x576xbf16, #tpu.memory_space<vmem>>, vector<1x256x576xbf16>
    %1 = vector.shape_cast %0 : vector<1x256x576xbf16> to vector<256x576xbf16>
    %c0_2 = arith.constant 0 : index
    %c0_3 = arith.constant 0 : index
    %2 = vector.load %arg3[%c0_2, %c0_3] : memref<576x64xbf16, #tpu.memory_space<vmem>>, vector<576x64xbf16>
    %cst = arith.constant dense<0.000000e+00> : vector<256x64xf32>
    %3 = tpu.matmul %1, %2, %cst {dimension_numbers = #tpu.dot_dimension_numbers<[1], [0], [0], [1], [0, 0, 1, 1], [], []>} : vector<256x576xbf16>, vector<576x64xbf16>, vector<256x64xf32> -> vector<256x64xf32>
    %c0_4 = arith.constant 0 : index
    %c0_5 = arith.constant 0 : index
    %4 = vector.load %arg4[%c0_4, %c0_5] : memref<1x64xf32, #tpu.memory_space<vmem>>, vector<1x64xf32>
    %5 = vector.broadcast %4 : vector<1x64xf32> to vector<256x64xf32>
    %6 = arith.addf %3, %5 : vector<256x64xf32>
    %cst_6 = arith.constant 0.000000e+00 : f32
    %7 = vector.broadcast %cst_6 : f32 to vector<256x64xf32>
    %8 = arith.maximumf %6, %7 : vector<256x64xf32>
    %9 = arith.truncf %8 : vector<256x64xf32> to vector<256x64xbf16>
    %c0_7 = arith.constant 0 : index
    %c0_8 = arith.constant 0 : index
    %c0_9 = arith.constant 0 : index
    %10 = vector.load %arg5[%c0_7, %c0_8, %c0_9] : memref<1x256x64xbf16, #tpu.memory_space<vmem>>, vector<1x256x64xbf16>
    %11 = vector.shape_cast %10 : vector<1x256x64xbf16> to vector<256x64xbf16>
    %12 = vector.shape_cast %9 : vector<256x64xbf16> to vector<1x256x64xbf16>
    tpu.vector_store %arg5[%c0_7, %c0_8, %c0_9], %12 {strides = array<i32>} : memref<1x256x64xbf16, #tpu.memory_space<vmem>>, vector<1x256x64xbf16>,
    return
  }
  func.func @transform_0(%arg0: i32, %arg1: i32) -> (i32, i32, i32) {
    %c0_i32 = arith.constant 0 : i32
    %c0_i32_0 = arith.constant 0 : i32
    return %arg0, %arg1, %c0_i32 : i32, i32, i32
  }
  func.func @transform_1(%arg0: i32, %arg1: i32) -> (i32, i32) {
    %c0_i32 = arith.constant 0 : i32
    %c0_i32_0 = arith.constant 0 : i32
    %c0_i32_1 = arith.constant 0 : i32
    return %c0_i32, %c0_i32_0 : i32, i32
  }
  func.func @transform_2(%arg0: i32, %arg1: i32) -> (i32, i32) {
    %c0_i32 = arith.constant 0 : i32
    %c0_i32_0 = arith.constant 0 : i32
    %c0_i32_1 = arith.constant 0 : i32
    return %c0_i32, %c0_i32_0 : i32, i32
  }
  func.func @transform_3(%arg0: i32, %arg1: i32) -> (i32, i32, i32) {
    %c0_i32 = arith.constant 0 : i32
    %c0_i32_0 = arith.constant 0 : i32
    return %arg0, %arg1, %c0_i32 : i32, i32, i32
  }
}

module attributes {stable_mosaic.version = 11 : i64} {
  func.func @_conv3x3_kernel(%arg0: i32, %arg1: i32, %arg2: memref<1x64x576xbf16, #tpu.memory_space<vmem>>, %arg3: memref<576x128xbf16, #tpu.memory_space<vmem>>, %arg4: memref<1x128xf32, #tpu.memory_space<vmem>>, %arg5: memref<1x64x128xbf16, #tpu.memory_space<vmem>>) attributes {dimension_semantics = [#tpu.dimension_semantics<parallel>, #tpu.dimension_semantics<parallel>], iteration_bounds = array<i64: 2, 1>, scalar_prefetch = 0 : i64, scratch_operands = 0 : i64, tpu.core_type = #tpu.core_type<tc>, window_params = [{transform_indices = @transform_0, window_bounds = array<i64: 1, 64, 576>}, {pipeline_mode = #tpu.pipeline_mode<synchronous>, transform_indices = @transform_1, window_bounds = array<i64: 576, 128>}, {pipeline_mode = #tpu.pipeline_mode<synchronous>, transform_indices = @transform_2, window_bounds = array<i64: 1, 128>}, {transform_indices = @transform_3, window_bounds = array<i64: 1, 64, 128>}]} {
    %c0 = arith.constant 0 : index
    %c0_0 = arith.constant 0 : index
    %c0_1 = arith.constant 0 : index
    %0 = vector.load %arg2[%c0, %c0_0, %c0_1] : memref<1x64x576xbf16, #tpu.memory_space<vmem>>, vector<1x64x576xbf16>
    %1 = vector.shape_cast %0 : vector<1x64x576xbf16> to vector<64x576xbf16>
    %c0_2 = arith.constant 0 : index
    %c0_3 = arith.constant 0 : index
    %2 = vector.load %arg3[%c0_2, %c0_3] : memref<576x128xbf16, #tpu.memory_space<vmem>>, vector<576x128xbf16>
    %cst = arith.constant dense<0.000000e+00> : vector<64x128xf32>
    %3 = tpu.matmul %1, %2, %cst {dimension_numbers = #tpu.dot_dimension_numbers<[1], [0], [0], [1], [0, 0, 1, 1], [], []>} : vector<64x576xbf16>, vector<576x128xbf16>, vector<64x128xf32> -> vector<64x128xf32>
    %c0_4 = arith.constant 0 : index
    %c0_5 = arith.constant 0 : index
    %4 = vector.load %arg4[%c0_4, %c0_5] : memref<1x128xf32, #tpu.memory_space<vmem>>, vector<1x128xf32>
    %5 = vector.broadcast %4 : vector<1x128xf32> to vector<64x128xf32>
    %6 = arith.addf %3, %5 : vector<64x128xf32>
    %cst_6 = arith.constant 0.000000e+00 : f32
    %7 = vector.broadcast %cst_6 : f32 to vector<64x128xf32>
    %8 = arith.maximumf %6, %7 : vector<64x128xf32>
    %9 = arith.truncf %8 : vector<64x128xf32> to vector<64x128xbf16>
    %c0_7 = arith.constant 0 : index
    %c0_8 = arith.constant 0 : index
    %c0_9 = arith.constant 0 : index
    %10 = vector.load %arg5[%c0_7, %c0_8, %c0_9] : memref<1x64x128xbf16, #tpu.memory_space<vmem>>, vector<1x64x128xbf16>
    %11 = vector.shape_cast %10 : vector<1x64x128xbf16> to vector<64x128xbf16>
    %12 = vector.shape_cast %9 : vector<64x128xbf16> to vector<1x64x128xbf16>
    tpu.vector_store %arg5[%c0_7, %c0_8, %c0_9], %12 {strides = array<i32>} : memref<1x64x128xbf16, #tpu.memory_space<vmem>>, vector<1x64x128xbf16>,
    return
  }
  func.func @transform_0(%arg0: i32, %arg1: i32) -> (i32, i32, i32) {
    %c0_i32 = arith.constant 0 : i32
    %c0_i32_0 = arith.constant 0 : i32
    return %arg0, %arg1, %c0_i32 : i32, i32, i32
  }
  func.func @transform_1(%arg0: i32, %arg1: i32) -> (i32, i32) {
    %c0_i32 = arith.constant 0 : i32
    %c0_i32_0 = arith.constant 0 : i32
    %c0_i32_1 = arith.constant 0 : i32
    return %c0_i32, %c0_i32_0 : i32, i32
  }
  func.func @transform_2(%arg0: i32, %arg1: i32) -> (i32, i32) {
    %c0_i32 = arith.constant 0 : i32
    %c0_i32_0 = arith.constant 0 : i32
    %c0_i32_1 = arith.constant 0 : i32
    return %c0_i32, %c0_i32_0 : i32, i32
  }
  func.func @transform_3(%arg0: i32, %arg1: i32) -> (i32, i32, i32) {
    %c0_i32 = arith.constant 0 : i32
    %c0_i32_0 = arith.constant 0 : i32
    return %arg0, %arg1, %c0_i32 : i32, i32, i32
  }
}

module attributes {stable_mosaic.version = 11 : i64} {
  func.func @_conv3x3_kernel(%arg0: i32, %arg1: i32, %arg2: memref<1x64x1152xbf16, #tpu.memory_space<vmem>>, %arg3: memref<1152x128xbf16, #tpu.memory_space<vmem>>, %arg4: memref<1x128xf32, #tpu.memory_space<vmem>>, %arg5: memref<1x64x128xbf16, #tpu.memory_space<vmem>>) attributes {dimension_semantics = [#tpu.dimension_semantics<parallel>, #tpu.dimension_semantics<parallel>], iteration_bounds = array<i64: 2, 1>, scalar_prefetch = 0 : i64, scratch_operands = 0 : i64, tpu.core_type = #tpu.core_type<tc>, window_params = [{transform_indices = @transform_0, window_bounds = array<i64: 1, 64, 1152>}, {pipeline_mode = #tpu.pipeline_mode<synchronous>, transform_indices = @transform_1, window_bounds = array<i64: 1152, 128>}, {pipeline_mode = #tpu.pipeline_mode<synchronous>, transform_indices = @transform_2, window_bounds = array<i64: 1, 128>}, {transform_indices = @transform_3, window_bounds = array<i64: 1, 64, 128>}]} {
    %c0 = arith.constant 0 : index
    %c0_0 = arith.constant 0 : index
    %c0_1 = arith.constant 0 : index
    %0 = vector.load %arg2[%c0, %c0_0, %c0_1] : memref<1x64x1152xbf16, #tpu.memory_space<vmem>>, vector<1x64x1152xbf16>
    %1 = vector.shape_cast %0 : vector<1x64x1152xbf16> to vector<64x1152xbf16>
    %c0_2 = arith.constant 0 : index
    %c0_3 = arith.constant 0 : index
    %2 = vector.load %arg3[%c0_2, %c0_3] : memref<1152x128xbf16, #tpu.memory_space<vmem>>, vector<1152x128xbf16>
    %cst = arith.constant dense<0.000000e+00> : vector<64x128xf32>
    %3 = tpu.matmul %1, %2, %cst {dimension_numbers = #tpu.dot_dimension_numbers<[1], [0], [0], [1], [0, 0, 1, 1], [], []>} : vector<64x1152xbf16>, vector<1152x128xbf16>, vector<64x128xf32> -> vector<64x128xf32>
    %c0_4 = arith.constant 0 : index
    %c0_5 = arith.constant 0 : index
    %4 = vector.load %arg4[%c0_4, %c0_5] : memref<1x128xf32, #tpu.memory_space<vmem>>, vector<1x128xf32>
    %5 = vector.broadcast %4 : vector<1x128xf32> to vector<64x128xf32>
    %6 = arith.addf %3, %5 : vector<64x128xf32>
    %cst_6 = arith.constant 0.000000e+00 : f32
    %7 = vector.broadcast %cst_6 : f32 to vector<64x128xf32>
    %8 = arith.maximumf %6, %7 : vector<64x128xf32>
    %9 = arith.truncf %8 : vector<64x128xf32> to vector<64x128xbf16>
    %c0_7 = arith.constant 0 : index
    %c0_8 = arith.constant 0 : index
    %c0_9 = arith.constant 0 : index
    %10 = vector.load %arg5[%c0_7, %c0_8, %c0_9] : memref<1x64x128xbf16, #tpu.memory_space<vmem>>, vector<1x64x128xbf16>
    %11 = vector.shape_cast %10 : vector<1x64x128xbf16> to vector<64x128xbf16>
    %12 = vector.shape_cast %9 : vector<64x128xbf16> to vector<1x64x128xbf16>
    tpu.vector_store %arg5[%c0_7, %c0_8, %c0_9], %12 {strides = array<i32>} : memref<1x64x128xbf16, #tpu.memory_space<vmem>>, vector<1x64x128xbf16>,
    return
  }
  func.func @transform_0(%arg0: i32, %arg1: i32) -> (i32, i32, i32) {
    %c0_i32 = arith.constant 0 : i32
    %c0_i32_0 = arith.constant 0 : i32
    return %arg0, %arg1, %c0_i32 : i32, i32, i32
  }
  func.func @transform_1(%arg0: i32, %arg1: i32) -> (i32, i32) {
    %c0_i32 = arith.constant 0 : i32
    %c0_i32_0 = arith.constant 0 : i32
    %c0_i32_1 = arith.constant 0 : i32
    return %c0_i32, %c0_i32_0 : i32, i32
  }
  func.func @transform_2(%arg0: i32, %arg1: i32) -> (i32, i32) {
    %c0_i32 = arith.constant 0 : i32
    %c0_i32_0 = arith.constant 0 : i32
    %c0_i32_1 = arith.constant 0 : i32
    return %c0_i32, %c0_i32_0 : i32, i32
  }
  func.func @transform_3(%arg0: i32, %arg1: i32) -> (i32, i32, i32) {
    %c0_i32 = arith.constant 0 : i32
    %c0_i32_0 = arith.constant 0 : i32
    return %arg0, %arg1, %c0_i32 : i32, i32, i32
  }
}

module attributes {stable_mosaic.version = 11 : i64} {
  func.func @_conv3x3_kernel(%arg0: i32, %arg1: i32, %arg2: memref<1x16x1152xbf16, #tpu.memory_space<vmem>>, %arg3: memref<1152x256xbf16, #tpu.memory_space<vmem>>, %arg4: memref<1x256xf32, #tpu.memory_space<vmem>>, %arg5: memref<1x16x256xbf16, #tpu.memory_space<vmem>>) attributes {dimension_semantics = [#tpu.dimension_semantics<parallel>, #tpu.dimension_semantics<parallel>], iteration_bounds = array<i64: 2, 1>, scalar_prefetch = 0 : i64, scratch_operands = 0 : i64, tpu.core_type = #tpu.core_type<tc>, window_params = [{transform_indices = @transform_0, window_bounds = array<i64: 1, 16, 1152>}, {pipeline_mode = #tpu.pipeline_mode<synchronous>, transform_indices = @transform_1, window_bounds = array<i64: 1152, 256>}, {pipeline_mode = #tpu.pipeline_mode<synchronous>, transform_indices = @transform_2, window_bounds = array<i64: 1, 256>}, {transform_indices = @transform_3, window_bounds = array<i64: 1, 16, 256>}]} {
    %c0 = arith.constant 0 : index
    %c0_0 = arith.constant 0 : index
    %c0_1 = arith.constant 0 : index
    %0 = vector.load %arg2[%c0, %c0_0, %c0_1] : memref<1x16x1152xbf16, #tpu.memory_space<vmem>>, vector<1x16x1152xbf16>
    %1 = vector.shape_cast %0 : vector<1x16x1152xbf16> to vector<16x1152xbf16>
    %c0_2 = arith.constant 0 : index
    %c0_3 = arith.constant 0 : index
    %2 = vector.load %arg3[%c0_2, %c0_3] : memref<1152x256xbf16, #tpu.memory_space<vmem>>, vector<1152x256xbf16>
    %cst = arith.constant dense<0.000000e+00> : vector<16x256xf32>
    %3 = tpu.matmul %1, %2, %cst {dimension_numbers = #tpu.dot_dimension_numbers<[1], [0], [0], [1], [0, 0, 1, 1], [], []>} : vector<16x1152xbf16>, vector<1152x256xbf16>, vector<16x256xf32> -> vector<16x256xf32>
    %c0_4 = arith.constant 0 : index
    %c0_5 = arith.constant 0 : index
    %4 = vector.load %arg4[%c0_4, %c0_5] : memref<1x256xf32, #tpu.memory_space<vmem>>, vector<1x256xf32>
    %5 = vector.broadcast %4 : vector<1x256xf32> to vector<16x256xf32>
    %6 = arith.addf %3, %5 : vector<16x256xf32>
    %cst_6 = arith.constant 0.000000e+00 : f32
    %7 = vector.broadcast %cst_6 : f32 to vector<16x256xf32>
    %8 = arith.maximumf %6, %7 : vector<16x256xf32>
    %9 = arith.truncf %8 : vector<16x256xf32> to vector<16x256xbf16>
    %c0_7 = arith.constant 0 : index
    %c0_8 = arith.constant 0 : index
    %c0_9 = arith.constant 0 : index
    %10 = vector.load %arg5[%c0_7, %c0_8, %c0_9] : memref<1x16x256xbf16, #tpu.memory_space<vmem>>, vector<1x16x256xbf16>
    %11 = vector.shape_cast %10 : vector<1x16x256xbf16> to vector<16x256xbf16>
    %12 = vector.shape_cast %9 : vector<16x256xbf16> to vector<1x16x256xbf16>
    tpu.vector_store %arg5[%c0_7, %c0_8, %c0_9], %12 {strides = array<i32>} : memref<1x16x256xbf16, #tpu.memory_space<vmem>>, vector<1x16x256xbf16>,
    return
  }
  func.func @transform_0(%arg0: i32, %arg1: i32) -> (i32, i32, i32) {
    %c0_i32 = arith.constant 0 : i32
    %c0_i32_0 = arith.constant 0 : i32
    return %arg0, %arg1, %c0_i32 : i32, i32, i32
  }
  func.func @transform_1(%arg0: i32, %arg1: i32) -> (i32, i32) {
    %c0_i32 = arith.constant 0 : i32
    %c0_i32_0 = arith.constant 0 : i32
    %c0_i32_1 = arith.constant 0 : i32
    return %c0_i32, %c0_i32_0 : i32, i32
  }
  func.func @transform_2(%arg0: i32, %arg1: i32) -> (i32, i32) {
    %c0_i32 = arith.constant 0 : i32
    %c0_i32_0 = arith.constant 0 : i32
    %c0_i32_1 = arith.constant 0 : i32
    return %c0_i32, %c0_i32_0 : i32, i32
  }
  func.func @transform_3(%arg0: i32, %arg1: i32) -> (i32, i32, i32) {
    %c0_i32 = arith.constant 0 : i32
    %c0_i32_0 = arith.constant 0 : i32
    return %arg0, %arg1, %c0_i32 : i32, i32, i32
  }
}

module attributes {stable_mosaic.version = 11 : i64} {
  func.func @_gram_per_kernel(%arg0: i32, %arg1: i32, %arg2: memref<1x64x64xbf16, #tpu.memory_space<vmem>>, %arg3: memref<1x64x64xbf16, #tpu.memory_space<vmem>>, %arg4: memref<1x1xf32, #tpu.memory_space<smem>>, %arg5: memref<1x1xf32, #tpu.memory_space<smem>>, %arg6: memref<64x64xf32, #tpu.memory_space<vmem>>, %arg7: memref<64x64xf32, #tpu.memory_space<vmem>>) attributes {dimension_semantics = [#tpu.dimension_semantics<arbitrary>, #tpu.dimension_semantics<arbitrary>], iteration_bounds = array<i64: 2, 1>, scalar_prefetch = 0 : i64, scratch_operands = 2 : i64, tpu.core_type = #tpu.core_type<tc>, window_params = [{transform_indices = @transform_0, window_bounds = array<i64: 1, 64, 64>}, {transform_indices = @transform_1, window_bounds = array<i64: 1, 64, 64>}, {transform_indices = @transform_2, window_bounds = array<i64: 1, 1>}, {transform_indices = @transform_3, window_bounds = array<i64: 1, 1>}]} {
    %c0_i32 = arith.constant 0 : i32
    %0 = arith.cmpi eq, %arg0, %c0_i32 : i32
    %c0_i32_0 = arith.constant 0 : i32
    %1 = arith.cmpi eq, %arg1, %c0_i32_0 : i32
    %2 = arith.andi %0, %1 : i1
    %3 = arith.extui %2 : i1 to i32
    %c0_i32_1 = arith.constant 0 : i32
    %4 = arith.cmpi ne, %3, %c0_i32_1 : i32
    scf.if %4 {
      %cst_25 = arith.constant 0.000000e+00 : f32
      %c0_26 = arith.constant 0 : index
      %c0_27 = arith.constant 0 : index
      %34 = memref.load %arg4[%c0_26, %c0_27] : memref<1x1xf32, #tpu.memory_space<smem>>
      memref.store %cst_25, %arg4[%c0_26, %c0_27] : memref<1x1xf32, #tpu.memory_space<smem>>
      %cst_28 = arith.constant 0.000000e+00 : f32
      %c0_29 = arith.constant 0 : index
      %c0_30 = arith.constant 0 : index
      %35 = memref.load %arg5[%c0_29, %c0_30] : memref<1x1xf32, #tpu.memory_space<smem>>
      memref.store %cst_28, %arg5[%c0_29, %c0_30] : memref<1x1xf32, #tpu.memory_space<smem>>
    } else {
    }
    %c0_i32_2 = arith.constant 0 : i32
    %5 = arith.cmpi eq, %arg1, %c0_i32_2 : i32
    %6 = arith.extui %5 : i1 to i32
    %c0_i32_3 = arith.constant 0 : i32
    %7 = arith.cmpi ne, %6, %c0_i32_3 : i32
    scf.if %7 {
      %cst_25 = arith.constant 0.000000e+00 : f32
      %34 = vector.broadcast %cst_25 : f32 to vector<64x64xf32>
      %c0_26 = arith.constant 0 : index
      %c0_27 = arith.constant 0 : index
      %35 = vector.load %arg6[%c0_26, %c0_27] : memref<64x64xf32, #tpu.memory_space<vmem>>, vector<64x64xf32>
      tpu.vector_store %arg6[%c0_26, %c0_27], %34 {strides = array<i32>} : memref<64x64xf32, #tpu.memory_space<vmem>>, vector<64x64xf32>,
      %cst_28 = arith.constant 0.000000e+00 : f32
      %36 = vector.broadcast %cst_28 : f32 to vector<64x64xf32>
      %c0_29 = arith.constant 0 : index
      %c0_30 = arith.constant 0 : index
      %37 = vector.load %arg7[%c0_29, %c0_30] : memref<64x64xf32, #tpu.memory_space<vmem>>, vector<64x64xf32>
      tpu.vector_store %arg7[%c0_29, %c0_30], %36 {strides = array<i32>} : memref<64x64xf32, #tpu.memory_space<vmem>>, vector<64x64xf32>,
    } else {
    }
    %c0 = arith.constant 0 : index
    %c0_4 = arith.constant 0 : index
    %c0_5 = arith.constant 0 : index
    %8 = vector.load %arg2[%c0, %c0_4, %c0_5] : memref<1x64x64xbf16, #tpu.memory_space<vmem>>, vector<1x64x64xbf16>
    %9 = vector.shape_cast %8 : vector<1x64x64xbf16> to vector<64x64xbf16>
    %c0_6 = arith.constant 0 : index
    %c0_7 = arith.constant 0 : index
    %c0_8 = arith.constant 0 : index
    %10 = vector.load %arg3[%c0_6, %c0_7, %c0_8] : memref<1x64x64xbf16, #tpu.memory_space<vmem>>, vector<1x64x64xbf16>
    %11 = vector.shape_cast %10 : vector<1x64x64xbf16> to vector<64x64xbf16>
    %c0_9 = arith.constant 0 : index
    %c0_10 = arith.constant 0 : index
    %12 = memref.load %arg5[%c0_9, %c0_10] : memref<1x1xf32, #tpu.memory_space<smem>>
    %13 = arith.extf %9 : vector<64x64xbf16> to vector<64x64xf32>
    %14 = arith.extf %11 : vector<64x64xbf16> to vector<64x64xf32>
    %15 = arith.subf %13, %14 : vector<64x64xf32>
    %16 = math.absf %15 : vector<64x64xf32>
    %17 = vector.shape_cast %16 : vector<64x64xf32> to vector<1x64x64xf32>
    %cst = arith.constant dense<0.000000e+00> : vector<1xf32>
    %18 = vector.multi_reduction <add>, %17, %cst [1, 2] : vector<1x64x64xf32> to vector<1xf32>
    %19 = vector.shape_cast %18 : vector<1xf32> to vector<1x1x1xf32>
    %20 = vector.extract %19[0, 0, 0] : f32 from vector<1x1x1xf32>
    %21 = arith.addf %12, %20 : f32
    %c0_11 = arith.constant 0 : index
    %c0_12 = arith.constant 0 : index
    %22 = memref.load %arg5[%c0_11, %c0_12] : memref<1x1xf32, #tpu.memory_space<smem>>
    memref.store %21, %arg5[%c0_11, %c0_12] : memref<1x1xf32, #tpu.memory_space<smem>>
    %c0_13 = arith.constant 0 : index
    %c0_14 = arith.constant 0 : index
    %23 = vector.load %arg6[%c0_13, %c0_14] : memref<64x64xf32, #tpu.memory_space<vmem>>, vector<64x64xf32>
    %cst_15 = arith.constant dense<0.000000e+00> : vector<64x64xf32>
    %24 = tpu.matmul %9, %9, %cst_15 {dimension_numbers = #tpu.dot_dimension_numbers<[0], [0], [1], [1], [0, 1, 1, 1], [], []>} : vector<64x64xbf16>, vector<64x64xbf16>, vector<64x64xf32> -> vector<64x64xf32>
    %25 = arith.addf %23, %24 : vector<64x64xf32>
    %c0_16 = arith.constant 0 : index
    %c0_17 = arith.constant 0 : index
    %26 = vector.load %arg6[%c0_16, %c0_17] : memref<64x64xf32, #tpu.memory_space<vmem>>, vector<64x64xf32>
    tpu.vector_store %arg6[%c0_16, %c0_17], %25 {strides = array<i32>} : memref<64x64xf32, #tpu.memory_space<vmem>>, vector<64x64xf32>,
    %c0_18 = arith.constant 0 : index
    %c0_19 = arith.constant 0 : index
    %27 = vector.load %arg7[%c0_18, %c0_19] : memref<64x64xf32, #tpu.memory_space<vmem>>, vector<64x64xf32>
    %cst_20 = arith.constant dense<0.000000e+00> : vector<64x64xf32>
    %28 = tpu.matmul %11, %11, %cst_20 {dimension_numbers = #tpu.dot_dimension_numbers<[0], [0], [1], [1], [0, 1, 1, 1], [], []>} : vector<64x64xbf16>, vector<64x64xbf16>, vector<64x64xf32> -> vector<64x64xf32>
    %29 = arith.addf %27, %28 : vector<64x64xf32>
    %c0_21 = arith.constant 0 : index
    %c0_22 = arith.constant 0 : index
    %30 = vector.load %arg7[%c0_21, %c0_22] : memref<64x64xf32, #tpu.memory_space<vmem>>, vector<64x64xf32>
    tpu.vector_store %arg7[%c0_21, %c0_22], %29 {strides = array<i32>} : memref<64x64xf32, #tpu.memory_space<vmem>>, vector<64x64xf32>,
    %c0_i32_23 = arith.constant 0 : i32
    %31 = arith.cmpi eq, %arg1, %c0_i32_23 : i32
    %32 = arith.extui %31 : i1 to i32
    %c0_i32_24 = arith.constant 0 : i32
    %33 = arith.cmpi ne, %32, %c0_i32_24 : i32
    scf.if %33 {
      %c0_25 = arith.constant 0 : index
      %c0_26 = arith.constant 0 : index
      %34 = memref.load %arg4[%c0_25, %c0_26] : memref<1x1xf32, #tpu.memory_space<smem>>
      %c0_27 = arith.constant 0 : index
      %c0_28 = arith.constant 0 : index
      %35 = vector.load %arg6[%c0_27, %c0_28] : memref<64x64xf32, #tpu.memory_space<vmem>>, vector<64x64xf32>
      %c0_29 = arith.constant 0 : index
      %c0_30 = arith.constant 0 : index
      %36 = vector.load %arg7[%c0_29, %c0_30] : memref<64x64xf32, #tpu.memory_space<vmem>>, vector<64x64xf32>
      %37 = arith.subf %35, %36 : vector<64x64xf32>
      %38 = math.absf %37 : vector<64x64xf32>
      %39 = vector.shape_cast %38 : vector<64x64xf32> to vector<1x64x64xf32>
      %cst_31 = arith.constant dense<0.000000e+00> : vector<1xf32>
      %40 = vector.multi_reduction <add>, %39, %cst_31 [1, 2] : vector<1x64x64xf32> to vector<1xf32>
      %41 = vector.shape_cast %40 : vector<1xf32> to vector<1x1x1xf32>
      %42 = vector.extract %41[0, 0, 0] : f32 from vector<1x1x1xf32>
      %cst_32 = arith.constant 2.44140625E-4 : f32
      %43 = arith.mulf %42, %cst_32 : f32
      %44 = arith.addf %34, %43 : f32
      %c0_33 = arith.constant 0 : index
      %c0_34 = arith.constant 0 : index
      %45 = memref.load %arg4[%c0_33, %c0_34] : memref<1x1xf32, #tpu.memory_space<smem>>
      memref.store %44, %arg4[%c0_33, %c0_34] : memref<1x1xf32, #tpu.memory_space<smem>>
    } else {
    }
    return
  }
  func.func @transform_0(%arg0: i32, %arg1: i32) -> (i32, i32, i32) {
    %c0_i32 = arith.constant 0 : i32
    %c0_i32_0 = arith.constant 0 : i32
    return %arg0, %arg1, %c0_i32 : i32, i32, i32
  }
  func.func @transform_1(%arg0: i32, %arg1: i32) -> (i32, i32, i32) {
    %c0_i32 = arith.constant 0 : i32
    %c0_i32_0 = arith.constant 0 : i32
    return %arg0, %arg1, %c0_i32 : i32, i32, i32
  }
  func.func @transform_2(%arg0: i32, %arg1: i32) -> (i32, i32) {
    %c0_i32 = arith.constant 0 : i32
    %c0_i32_0 = arith.constant 0 : i32
    %c0_i32_1 = arith.constant 0 : i32
    return %c0_i32, %c0_i32_0 : i32, i32
  }
  func.func @transform_3(%arg0: i32, %arg1: i32) -> (i32, i32) {
    %c0_i32 = arith.constant 0 : i32
    %c0_i32_0 = arith.constant 0 : i32
    %c0_i32_1 = arith.constant 0 : i32
    return %c0_i32, %c0_i32_0 : i32, i32
  }
}

module attributes {stable_mosaic.version = 11 : i64} {
  func.func @_gram_per_kernel(%arg0: i32, %arg1: i32, %arg2: memref<1x16x128xbf16, #tpu.memory_space<vmem>>, %arg3: memref<1x16x128xbf16, #tpu.memory_space<vmem>>, %arg4: memref<1x1xf32, #tpu.memory_space<smem>>, %arg5: memref<1x1xf32, #tpu.memory_space<smem>>, %arg6: memref<128x128xf32, #tpu.memory_space<vmem>>, %arg7: memref<128x128xf32, #tpu.memory_space<vmem>>) attributes {dimension_semantics = [#tpu.dimension_semantics<arbitrary>, #tpu.dimension_semantics<arbitrary>], iteration_bounds = array<i64: 2, 1>, scalar_prefetch = 0 : i64, scratch_operands = 2 : i64, tpu.core_type = #tpu.core_type<tc>, window_params = [{transform_indices = @transform_0, window_bounds = array<i64: 1, 16, 128>}, {transform_indices = @transform_1, window_bounds = array<i64: 1, 16, 128>}, {transform_indices = @transform_2, window_bounds = array<i64: 1, 1>}, {transform_indices = @transform_3, window_bounds = array<i64: 1, 1>}]} {
    %c0_i32 = arith.constant 0 : i32
    %0 = arith.cmpi eq, %arg0, %c0_i32 : i32
    %c0_i32_0 = arith.constant 0 : i32
    %1 = arith.cmpi eq, %arg1, %c0_i32_0 : i32
    %2 = arith.andi %0, %1 : i1
    %3 = arith.extui %2 : i1 to i32
    %c0_i32_1 = arith.constant 0 : i32
    %4 = arith.cmpi ne, %3, %c0_i32_1 : i32
    scf.if %4 {
      %cst_25 = arith.constant 0.000000e+00 : f32
      %c0_26 = arith.constant 0 : index
      %c0_27 = arith.constant 0 : index
      %34 = memref.load %arg4[%c0_26, %c0_27] : memref<1x1xf32, #tpu.memory_space<smem>>
      memref.store %cst_25, %arg4[%c0_26, %c0_27] : memref<1x1xf32, #tpu.memory_space<smem>>
      %cst_28 = arith.constant 0.000000e+00 : f32
      %c0_29 = arith.constant 0 : index
      %c0_30 = arith.constant 0 : index
      %35 = memref.load %arg5[%c0_29, %c0_30] : memref<1x1xf32, #tpu.memory_space<smem>>
      memref.store %cst_28, %arg5[%c0_29, %c0_30] : memref<1x1xf32, #tpu.memory_space<smem>>
    } else {
    }
    %c0_i32_2 = arith.constant 0 : i32
    %5 = arith.cmpi eq, %arg1, %c0_i32_2 : i32
    %6 = arith.extui %5 : i1 to i32
    %c0_i32_3 = arith.constant 0 : i32
    %7 = arith.cmpi ne, %6, %c0_i32_3 : i32
    scf.if %7 {
      %cst_25 = arith.constant 0.000000e+00 : f32
      %34 = vector.broadcast %cst_25 : f32 to vector<128x128xf32>
      %c0_26 = arith.constant 0 : index
      %c0_27 = arith.constant 0 : index
      %35 = vector.load %arg6[%c0_26, %c0_27] : memref<128x128xf32, #tpu.memory_space<vmem>>, vector<128x128xf32>
      tpu.vector_store %arg6[%c0_26, %c0_27], %34 {strides = array<i32>} : memref<128x128xf32, #tpu.memory_space<vmem>>, vector<128x128xf32>,
      %cst_28 = arith.constant 0.000000e+00 : f32
      %36 = vector.broadcast %cst_28 : f32 to vector<128x128xf32>
      %c0_29 = arith.constant 0 : index
      %c0_30 = arith.constant 0 : index
      %37 = vector.load %arg7[%c0_29, %c0_30] : memref<128x128xf32, #tpu.memory_space<vmem>>, vector<128x128xf32>
      tpu.vector_store %arg7[%c0_29, %c0_30], %36 {strides = array<i32>} : memref<128x128xf32, #tpu.memory_space<vmem>>, vector<128x128xf32>,
    } else {
    }
    %c0 = arith.constant 0 : index
    %c0_4 = arith.constant 0 : index
    %c0_5 = arith.constant 0 : index
    %8 = vector.load %arg2[%c0, %c0_4, %c0_5] : memref<1x16x128xbf16, #tpu.memory_space<vmem>>, vector<1x16x128xbf16>
    %9 = vector.shape_cast %8 : vector<1x16x128xbf16> to vector<16x128xbf16>
    %c0_6 = arith.constant 0 : index
    %c0_7 = arith.constant 0 : index
    %c0_8 = arith.constant 0 : index
    %10 = vector.load %arg3[%c0_6, %c0_7, %c0_8] : memref<1x16x128xbf16, #tpu.memory_space<vmem>>, vector<1x16x128xbf16>
    %11 = vector.shape_cast %10 : vector<1x16x128xbf16> to vector<16x128xbf16>
    %c0_9 = arith.constant 0 : index
    %c0_10 = arith.constant 0 : index
    %12 = memref.load %arg5[%c0_9, %c0_10] : memref<1x1xf32, #tpu.memory_space<smem>>
    %13 = arith.extf %9 : vector<16x128xbf16> to vector<16x128xf32>
    %14 = arith.extf %11 : vector<16x128xbf16> to vector<16x128xf32>
    %15 = arith.subf %13, %14 : vector<16x128xf32>
    %16 = math.absf %15 : vector<16x128xf32>
    %17 = vector.shape_cast %16 : vector<16x128xf32> to vector<1x16x128xf32>
    %cst = arith.constant dense<0.000000e+00> : vector<1xf32>
    %18 = vector.multi_reduction <add>, %17, %cst [1, 2] : vector<1x16x128xf32> to vector<1xf32>
    %19 = vector.shape_cast %18 : vector<1xf32> to vector<1x1x1xf32>
    %20 = vector.extract %19[0, 0, 0] : f32 from vector<1x1x1xf32>
    %21 = arith.addf %12, %20 : f32
    %c0_11 = arith.constant 0 : index
    %c0_12 = arith.constant 0 : index
    %22 = memref.load %arg5[%c0_11, %c0_12] : memref<1x1xf32, #tpu.memory_space<smem>>
    memref.store %21, %arg5[%c0_11, %c0_12] : memref<1x1xf32, #tpu.memory_space<smem>>
    %c0_13 = arith.constant 0 : index
    %c0_14 = arith.constant 0 : index
    %23 = vector.load %arg6[%c0_13, %c0_14] : memref<128x128xf32, #tpu.memory_space<vmem>>, vector<128x128xf32>
    %cst_15 = arith.constant dense<0.000000e+00> : vector<128x128xf32>
    %24 = tpu.matmul %9, %9, %cst_15 {dimension_numbers = #tpu.dot_dimension_numbers<[0], [0], [1], [1], [0, 1, 1, 1], [], []>} : vector<16x128xbf16>, vector<16x128xbf16>, vector<128x128xf32> -> vector<128x128xf32>
    %25 = arith.addf %23, %24 : vector<128x128xf32>
    %c0_16 = arith.constant 0 : index
    %c0_17 = arith.constant 0 : index
    %26 = vector.load %arg6[%c0_16, %c0_17] : memref<128x128xf32, #tpu.memory_space<vmem>>, vector<128x128xf32>
    tpu.vector_store %arg6[%c0_16, %c0_17], %25 {strides = array<i32>} : memref<128x128xf32, #tpu.memory_space<vmem>>, vector<128x128xf32>,
    %c0_18 = arith.constant 0 : index
    %c0_19 = arith.constant 0 : index
    %27 = vector.load %arg7[%c0_18, %c0_19] : memref<128x128xf32, #tpu.memory_space<vmem>>, vector<128x128xf32>
    %cst_20 = arith.constant dense<0.000000e+00> : vector<128x128xf32>
    %28 = tpu.matmul %11, %11, %cst_20 {dimension_numbers = #tpu.dot_dimension_numbers<[0], [0], [1], [1], [0, 1, 1, 1], [], []>} : vector<16x128xbf16>, vector<16x128xbf16>, vector<128x128xf32> -> vector<128x128xf32>
    %29 = arith.addf %27, %28 : vector<128x128xf32>
    %c0_21 = arith.constant 0 : index
    %c0_22 = arith.constant 0 : index
    %30 = vector.load %arg7[%c0_21, %c0_22] : memref<128x128xf32, #tpu.memory_space<vmem>>, vector<128x128xf32>
    tpu.vector_store %arg7[%c0_21, %c0_22], %29 {strides = array<i32>} : memref<128x128xf32, #tpu.memory_space<vmem>>, vector<128x128xf32>,
    %c0_i32_23 = arith.constant 0 : i32
    %31 = arith.cmpi eq, %arg1, %c0_i32_23 : i32
    %32 = arith.extui %31 : i1 to i32
    %c0_i32_24 = arith.constant 0 : i32
    %33 = arith.cmpi ne, %32, %c0_i32_24 : i32
    scf.if %33 {
      %c0_25 = arith.constant 0 : index
      %c0_26 = arith.constant 0 : index
      %34 = memref.load %arg4[%c0_25, %c0_26] : memref<1x1xf32, #tpu.memory_space<smem>>
      %c0_27 = arith.constant 0 : index
      %c0_28 = arith.constant 0 : index
      %35 = vector.load %arg6[%c0_27, %c0_28] : memref<128x128xf32, #tpu.memory_space<vmem>>, vector<128x128xf32>
      %c0_29 = arith.constant 0 : index
      %c0_30 = arith.constant 0 : index
      %36 = vector.load %arg7[%c0_29, %c0_30] : memref<128x128xf32, #tpu.memory_space<vmem>>, vector<128x128xf32>
      %37 = arith.subf %35, %36 : vector<128x128xf32>
      %38 = math.absf %37 : vector<128x128xf32>
      %39 = vector.shape_cast %38 : vector<128x128xf32> to vector<1x128x128xf32>
      %cst_31 = arith.constant dense<0.000000e+00> : vector<1xf32>
      %40 = vector.multi_reduction <add>, %39, %cst_31 [1, 2] : vector<1x128x128xf32> to vector<1xf32>
      %41 = vector.shape_cast %40 : vector<1xf32> to vector<1x1x1xf32>
      %42 = vector.extract %41[0, 0, 0] : f32 from vector<1x1x1xf32>
      %cst_32 = arith.constant 4.8828125E-4 : f32
      %43 = arith.mulf %42, %cst_32 : f32
      %44 = arith.addf %34, %43 : f32
      %c0_33 = arith.constant 0 : index
      %c0_34 = arith.constant 0 : index
      %45 = memref.load %arg4[%c0_33, %c0_34] : memref<1x1xf32, #tpu.memory_space<smem>>
      memref.store %44, %arg4[%c0_33, %c0_34] : memref<1x1xf32, #tpu.memory_space<smem>>
    } else {
    }
    return
  }
  func.func @transform_0(%arg0: i32, %arg1: i32) -> (i32, i32, i32) {
    %c0_i32 = arith.constant 0 : i32
    %c0_i32_0 = arith.constant 0 : i32
    return %arg0, %arg1, %c0_i32 : i32, i32, i32
  }
  func.func @transform_1(%arg0: i32, %arg1: i32) -> (i32, i32, i32) {
    %c0_i32 = arith.constant 0 : i32
    %c0_i32_0 = arith.constant 0 : i32
    return %arg0, %arg1, %c0_i32 : i32, i32, i32
  }
  func.func @transform_2(%arg0: i32, %arg1: i32) -> (i32, i32) {
    %c0_i32 = arith.constant 0 : i32
    %c0_i32_0 = arith.constant 0 : i32
    %c0_i32_1 = arith.constant 0 : i32
    return %c0_i32, %c0_i32_0 : i32, i32
  }
  func.func @transform_3(%arg0: i32, %arg1: i32) -> (i32, i32) {
    %c0_i32 = arith.constant 0 : i32
    %c0_i32_0 = arith.constant 0 : i32
    %c0_i32_1 = arith.constant 0 : i32
    return %c0_i32, %c0_i32_0 : i32, i32
  }
}

module attributes {stable_mosaic.version = 11 : i64} {
  func.func @_conv3x3_kernel(%arg0: i32, %arg1: i32, %arg2: memref<1x16x2304xbf16, #tpu.memory_space<vmem>>, %arg3: memref<2304x256xbf16, #tpu.memory_space<vmem>>, %arg4: memref<1x256xf32, #tpu.memory_space<vmem>>, %arg5: memref<1x16x256xbf16, #tpu.memory_space<vmem>>) attributes {dimension_semantics = [#tpu.dimension_semantics<parallel>, #tpu.dimension_semantics<parallel>], iteration_bounds = array<i64: 2, 1>, scalar_prefetch = 0 : i64, scratch_operands = 0 : i64, tpu.core_type = #tpu.core_type<tc>, window_params = [{transform_indices = @transform_0, window_bounds = array<i64: 1, 16, 2304>}, {pipeline_mode = #tpu.pipeline_mode<synchronous>, transform_indices = @transform_1, window_bounds = array<i64: 2304, 256>}, {pipeline_mode = #tpu.pipeline_mode<synchronous>, transform_indices = @transform_2, window_bounds = array<i64: 1, 256>}, {transform_indices = @transform_3, window_bounds = array<i64: 1, 16, 256>}]} {
    %c0 = arith.constant 0 : index
    %c0_0 = arith.constant 0 : index
    %c0_1 = arith.constant 0 : index
    %0 = vector.load %arg2[%c0, %c0_0, %c0_1] : memref<1x16x2304xbf16, #tpu.memory_space<vmem>>, vector<1x16x2304xbf16>
    %1 = vector.shape_cast %0 : vector<1x16x2304xbf16> to vector<16x2304xbf16>
    %c0_2 = arith.constant 0 : index
    %c0_3 = arith.constant 0 : index
    %2 = vector.load %arg3[%c0_2, %c0_3] : memref<2304x256xbf16, #tpu.memory_space<vmem>>, vector<2304x256xbf16>
    %cst = arith.constant dense<0.000000e+00> : vector<16x256xf32>
    %3 = tpu.matmul %1, %2, %cst {dimension_numbers = #tpu.dot_dimension_numbers<[1], [0], [0], [1], [0, 0, 1, 1], [], []>} : vector<16x2304xbf16>, vector<2304x256xbf16>, vector<16x256xf32> -> vector<16x256xf32>
    %c0_4 = arith.constant 0 : index
    %c0_5 = arith.constant 0 : index
    %4 = vector.load %arg4[%c0_4, %c0_5] : memref<1x256xf32, #tpu.memory_space<vmem>>, vector<1x256xf32>
    %5 = vector.broadcast %4 : vector<1x256xf32> to vector<16x256xf32>
    %6 = arith.addf %3, %5 : vector<16x256xf32>
    %cst_6 = arith.constant 0.000000e+00 : f32
    %7 = vector.broadcast %cst_6 : f32 to vector<16x256xf32>
    %8 = arith.maximumf %6, %7 : vector<16x256xf32>
    %9 = arith.truncf %8 : vector<16x256xf32> to vector<16x256xbf16>
    %c0_7 = arith.constant 0 : index
    %c0_8 = arith.constant 0 : index
    %c0_9 = arith.constant 0 : index
    %10 = vector.load %arg5[%c0_7, %c0_8, %c0_9] : memref<1x16x256xbf16, #tpu.memory_space<vmem>>, vector<1x16x256xbf16>
    %11 = vector.shape_cast %10 : vector<1x16x256xbf16> to vector<16x256xbf16>
    %12 = vector.shape_cast %9 : vector<16x256xbf16> to vector<1x16x256xbf16>
    tpu.vector_store %arg5[%c0_7, %c0_8, %c0_9], %12 {strides = array<i32>} : memref<1x16x256xbf16, #tpu.memory_space<vmem>>, vector<1x16x256xbf16>,
    return
  }
  func.func @transform_0(%arg0: i32, %arg1: i32) -> (i32, i32, i32) {
    %c0_i32 = arith.constant 0 : i32
    %c0_i32_0 = arith.constant 0 : i32
    return %arg0, %arg1, %c0_i32 : i32, i32, i32
  }
  func.func @transform_1(%arg0: i32, %arg1: i32) -> (i32, i32) {
    %c0_i32 = arith.constant 0 : i32
    %c0_i32_0 = arith.constant 0 : i32
    %c0_i32_1 = arith.constant 0 : i32
    return %c0_i32, %c0_i32_0 : i32, i32
  }
  func.func @transform_2(%arg0: i32, %arg1: i32) -> (i32, i32) {
    %c0_i32 = arith.constant 0 : i32
    %c0_i32_0 = arith.constant 0 : i32
    %c0_i32_1 = arith.constant 0 : i32
    return %c0_i32, %c0_i32_0 : i32, i32
  }
  func.func @transform_3(%arg0: i32, %arg1: i32) -> (i32, i32, i32) {
    %c0_i32 = arith.constant 0 : i32
    %c0_i32_0 = arith.constant 0 : i32
    return %arg0, %arg1, %c0_i32 : i32, i32, i32
  }
}

module attributes {stable_mosaic.version = 11 : i64} {
  func.func @_gram_per_kernel(%arg0: i32, %arg1: i32, %arg2: memref<1x4x256xbf16, #tpu.memory_space<vmem>>, %arg3: memref<1x4x256xbf16, #tpu.memory_space<vmem>>, %arg4: memref<1x1xf32, #tpu.memory_space<smem>>, %arg5: memref<1x1xf32, #tpu.memory_space<smem>>, %arg6: memref<256x256xf32, #tpu.memory_space<vmem>>, %arg7: memref<256x256xf32, #tpu.memory_space<vmem>>) attributes {dimension_semantics = [#tpu.dimension_semantics<arbitrary>, #tpu.dimension_semantics<arbitrary>], iteration_bounds = array<i64: 2, 1>, scalar_prefetch = 0 : i64, scratch_operands = 2 : i64, tpu.core_type = #tpu.core_type<tc>, window_params = [{transform_indices = @transform_0, window_bounds = array<i64: 1, 4, 256>}, {transform_indices = @transform_1, window_bounds = array<i64: 1, 4, 256>}, {transform_indices = @transform_2, window_bounds = array<i64: 1, 1>}, {transform_indices = @transform_3, window_bounds = array<i64: 1, 1>}]} {
    %c0_i32 = arith.constant 0 : i32
    %0 = arith.cmpi eq, %arg0, %c0_i32 : i32
    %c0_i32_0 = arith.constant 0 : i32
    %1 = arith.cmpi eq, %arg1, %c0_i32_0 : i32
    %2 = arith.andi %0, %1 : i1
    %3 = arith.extui %2 : i1 to i32
    %c0_i32_1 = arith.constant 0 : i32
    %4 = arith.cmpi ne, %3, %c0_i32_1 : i32
    scf.if %4 {
      %cst_25 = arith.constant 0.000000e+00 : f32
      %c0_26 = arith.constant 0 : index
      %c0_27 = arith.constant 0 : index
      %34 = memref.load %arg4[%c0_26, %c0_27] : memref<1x1xf32, #tpu.memory_space<smem>>
      memref.store %cst_25, %arg4[%c0_26, %c0_27] : memref<1x1xf32, #tpu.memory_space<smem>>
      %cst_28 = arith.constant 0.000000e+00 : f32
      %c0_29 = arith.constant 0 : index
      %c0_30 = arith.constant 0 : index
      %35 = memref.load %arg5[%c0_29, %c0_30] : memref<1x1xf32, #tpu.memory_space<smem>>
      memref.store %cst_28, %arg5[%c0_29, %c0_30] : memref<1x1xf32, #tpu.memory_space<smem>>
    } else {
    }
    %c0_i32_2 = arith.constant 0 : i32
    %5 = arith.cmpi eq, %arg1, %c0_i32_2 : i32
    %6 = arith.extui %5 : i1 to i32
    %c0_i32_3 = arith.constant 0 : i32
    %7 = arith.cmpi ne, %6, %c0_i32_3 : i32
    scf.if %7 {
      %cst_25 = arith.constant 0.000000e+00 : f32
      %34 = vector.broadcast %cst_25 : f32 to vector<256x256xf32>
      %c0_26 = arith.constant 0 : index
      %c0_27 = arith.constant 0 : index
      %35 = vector.load %arg6[%c0_26, %c0_27] : memref<256x256xf32, #tpu.memory_space<vmem>>, vector<256x256xf32>
      tpu.vector_store %arg6[%c0_26, %c0_27], %34 {strides = array<i32>} : memref<256x256xf32, #tpu.memory_space<vmem>>, vector<256x256xf32>,
      %cst_28 = arith.constant 0.000000e+00 : f32
      %36 = vector.broadcast %cst_28 : f32 to vector<256x256xf32>
      %c0_29 = arith.constant 0 : index
      %c0_30 = arith.constant 0 : index
      %37 = vector.load %arg7[%c0_29, %c0_30] : memref<256x256xf32, #tpu.memory_space<vmem>>, vector<256x256xf32>
      tpu.vector_store %arg7[%c0_29, %c0_30], %36 {strides = array<i32>} : memref<256x256xf32, #tpu.memory_space<vmem>>, vector<256x256xf32>,
    } else {
    }
    %c0 = arith.constant 0 : index
    %c0_4 = arith.constant 0 : index
    %c0_5 = arith.constant 0 : index
    %8 = vector.load %arg2[%c0, %c0_4, %c0_5] : memref<1x4x256xbf16, #tpu.memory_space<vmem>>, vector<1x4x256xbf16>
    %9 = vector.shape_cast %8 : vector<1x4x256xbf16> to vector<4x256xbf16>
    %c0_6 = arith.constant 0 : index
    %c0_7 = arith.constant 0 : index
    %c0_8 = arith.constant 0 : index
    %10 = vector.load %arg3[%c0_6, %c0_7, %c0_8] : memref<1x4x256xbf16, #tpu.memory_space<vmem>>, vector<1x4x256xbf16>
    %11 = vector.shape_cast %10 : vector<1x4x256xbf16> to vector<4x256xbf16>
    %c0_9 = arith.constant 0 : index
    %c0_10 = arith.constant 0 : index
    %12 = memref.load %arg5[%c0_9, %c0_10] : memref<1x1xf32, #tpu.memory_space<smem>>
    %13 = arith.extf %9 : vector<4x256xbf16> to vector<4x256xf32>
    %14 = arith.extf %11 : vector<4x256xbf16> to vector<4x256xf32>
    %15 = arith.subf %13, %14 : vector<4x256xf32>
    %16 = math.absf %15 : vector<4x256xf32>
    %17 = vector.shape_cast %16 : vector<4x256xf32> to vector<1x4x256xf32>
    %cst = arith.constant dense<0.000000e+00> : vector<1xf32>
    %18 = vector.multi_reduction <add>, %17, %cst [1, 2] : vector<1x4x256xf32> to vector<1xf32>
    %19 = vector.shape_cast %18 : vector<1xf32> to vector<1x1x1xf32>
    %20 = vector.extract %19[0, 0, 0] : f32 from vector<1x1x1xf32>
    %21 = arith.addf %12, %20 : f32
    %c0_11 = arith.constant 0 : index
    %c0_12 = arith.constant 0 : index
    %22 = memref.load %arg5[%c0_11, %c0_12] : memref<1x1xf32, #tpu.memory_space<smem>>
    memref.store %21, %arg5[%c0_11, %c0_12] : memref<1x1xf32, #tpu.memory_space<smem>>
    %c0_13 = arith.constant 0 : index
    %c0_14 = arith.constant 0 : index
    %23 = vector.load %arg6[%c0_13, %c0_14] : memref<256x256xf32, #tpu.memory_space<vmem>>, vector<256x256xf32>
    %cst_15 = arith.constant dense<0.000000e+00> : vector<256x256xf32>
    %24 = tpu.matmul %9, %9, %cst_15 {dimension_numbers = #tpu.dot_dimension_numbers<[0], [0], [1], [1], [0, 1, 1, 1], [], []>} : vector<4x256xbf16>, vector<4x256xbf16>, vector<256x256xf32> -> vector<256x256xf32>
    %25 = arith.addf %23, %24 : vector<256x256xf32>
    %c0_16 = arith.constant 0 : index
    %c0_17 = arith.constant 0 : index
    %26 = vector.load %arg6[%c0_16, %c0_17] : memref<256x256xf32, #tpu.memory_space<vmem>>, vector<256x256xf32>
    tpu.vector_store %arg6[%c0_16, %c0_17], %25 {strides = array<i32>} : memref<256x256xf32, #tpu.memory_space<vmem>>, vector<256x256xf32>,
    %c0_18 = arith.constant 0 : index
    %c0_19 = arith.constant 0 : index
    %27 = vector.load %arg7[%c0_18, %c0_19] : memref<256x256xf32, #tpu.memory_space<vmem>>, vector<256x256xf32>
    %cst_20 = arith.constant dense<0.000000e+00> : vector<256x256xf32>
    %28 = tpu.matmul %11, %11, %cst_20 {dimension_numbers = #tpu.dot_dimension_numbers<[0], [0], [1], [1], [0, 1, 1, 1], [], []>} : vector<4x256xbf16>, vector<4x256xbf16>, vector<256x256xf32> -> vector<256x256xf32>
    %29 = arith.addf %27, %28 : vector<256x256xf32>
    %c0_21 = arith.constant 0 : index
    %c0_22 = arith.constant 0 : index
    %30 = vector.load %arg7[%c0_21, %c0_22] : memref<256x256xf32, #tpu.memory_space<vmem>>, vector<256x256xf32>
    tpu.vector_store %arg7[%c0_21, %c0_22], %29 {strides = array<i32>} : memref<256x256xf32, #tpu.memory_space<vmem>>, vector<256x256xf32>,
    %c0_i32_23 = arith.constant 0 : i32
    %31 = arith.cmpi eq, %arg1, %c0_i32_23 : i32
    %32 = arith.extui %31 : i1 to i32
    %c0_i32_24 = arith.constant 0 : i32
    %33 = arith.cmpi ne, %32, %c0_i32_24 : i32
    scf.if %33 {
      %c0_25 = arith.constant 0 : index
      %c0_26 = arith.constant 0 : index
      %34 = memref.load %arg4[%c0_25, %c0_26] : memref<1x1xf32, #tpu.memory_space<smem>>
      %c0_27 = arith.constant 0 : index
      %c0_28 = arith.constant 0 : index
      %35 = vector.load %arg6[%c0_27, %c0_28] : memref<256x256xf32, #tpu.memory_space<vmem>>, vector<256x256xf32>
      %c0_29 = arith.constant 0 : index
      %c0_30 = arith.constant 0 : index
      %36 = vector.load %arg7[%c0_29, %c0_30] : memref<256x256xf32, #tpu.memory_space<vmem>>, vector<256x256xf32>
      %37 = arith.subf %35, %36 : vector<256x256xf32>
      %38 = math.absf %37 : vector<256x256xf32>
      %39 = vector.shape_cast %38 : vector<256x256xf32> to vector<1x256x256xf32>
      %cst_31 = arith.constant dense<0.000000e+00> : vector<1xf32>
      %40 = vector.multi_reduction <add>, %39, %cst_31 [1, 2] : vector<1x256x256xf32> to vector<1xf32>
      %41 = vector.shape_cast %40 : vector<1xf32> to vector<1x1x1xf32>
      %42 = vector.extract %41[0, 0, 0] : f32 from vector<1x1x1xf32>
      %cst_32 = arith.constant 9.765625E-4 : f32
      %43 = arith.mulf %42, %cst_32 : f32
      %44 = arith.addf %34, %43 : f32
      %c0_33 = arith.constant 0 : index
      %c0_34 = arith.constant 0 : index
      %45 = memref.load %arg4[%c0_33, %c0_34] : memref<1x1xf32, #tpu.memory_space<smem>>
      memref.store %44, %arg4[%c0_33, %c0_34] : memref<1x1xf32, #tpu.memory_space<smem>>
    } else {
    }
    return
  }
  func.func @transform_0(%arg0: i32, %arg1: i32) -> (i32, i32, i32) {
    %c0_i32 = arith.constant 0 : i32
    %c0_i32_0 = arith.constant 0 : i32
    return %arg0, %arg1, %c0_i32 : i32, i32, i32
  }
  func.func @transform_1(%arg0: i32, %arg1: i32) -> (i32, i32, i32) {
    %c0_i32 = arith.constant 0 : i32
    %c0_i32_0 = arith.constant 0 : i32
    return %arg0, %arg1, %c0_i32 : i32, i32, i32
  }
  func.func @transform_2(%arg0: i32, %arg1: i32) -> (i32, i32) {
    %c0_i32 = arith.constant 0 : i32
    %c0_i32_0 = arith.constant 0 : i32
    %c0_i32_1 = arith.constant 0 : i32
    return %c0_i32, %c0_i32_0 : i32, i32
  }
  func.func @transform_3(%arg0: i32, %arg1: i32) -> (i32, i32) {
    %c0_i32 = arith.constant 0 : i32
    %c0_i32_0 = arith.constant 0 : i32
    %c0_i32_1 = arith.constant 0 : i32
    return %c0_i32, %c0_i32_0 : i32, i32
  }
}

</mosaic_0001>

<bundles_post_ra>
// kernel: inpaint_loss.105
= control target key start
LH: loop header
LB: loop body
LE: loop exit
PB: predicated region body
PF: predicated region fallthrough
CT: control target
= control target key end

     0   :  { %7 = vsyncpa [#allocation3], 0  ;;  %s332_s9 = smov 0   ;;  %s374_s0 = inlined_call_operand.vmem [shape: f32[6,17,17], index: 0, kind: input, shape index: {}]   ;;  %s375_s1 = inlined_call_operand.vmem [shape: f32[16,16], index: 1, kind: input, shape index: {}]   ;;  %s376_s2 = inlined_call_operand.hbm [shape: f32[1,1], index: 2, kind: output, shape index: {}]  }
   0x1 LB: > { %s338_s10 = sadd.s32 4294967295, %s311_s9   ;;  %p258_p0 = scmp.ge.s32.totalorder %s311_s9, 1  ;;  %s311_s9 = sphi %s332_s9, %s13_s9  }
   0x2   : > { %p108_p1 = scmp.lt.s32.totalorder %s311_s9, 7 }
   0x4   : > { %p109_p2 = pnand %p258_p0, %p108_p1 }
   0x5   : > { %p125_p3 = scmp.lt.s32.totalorder (!%p109_p2), %s338_s10, 5  ;;  %v174_v0 = vld [vmem:[%s375_s1] sm:$0xff] (!%p109_p2)  ;;  %s313_s13 = smov (!%p109_p2), 1   ;;  %v175_v1 = vld [vmem:[%s375_s1 + $0x8] sm:$0xff] (!%p109_p2)  ;;  %vm142_vm0 = vcmask (!%p109_p2), 1046528   ;;  %vm194_vm1 = vcmask (!%p109_p2), 130048  }
   0x6   : > { %112 = sbr.rel (%p109_p2) target bundleno = 480 (0x1e0), region = 28  ;;  %178 = vrot.lane.b32.xlu1 (!%p109_p2), %v174_v0, %s313_s13  ;;  %s314_s21 = smov (!%p109_p2), 127  }
   0x7   : > { %p274_p4 = scmp.eq.s32.totalorder (!%p109_p2), %s338_s10, 0  ;;  %s315_s22 = smov (!%p109_p2), 0.0  }
   0x8   : > { %p275_p5 = scmp.eq.s32.totalorder (!%p109_p2), %s338_s10, 5  ;;  %s289_s28 = scalar_lea.hbm (!%p109_p2), %s376_s2, 16 }
   0x9   : > { %p290_p6 = scmp.ne.s32.totalorder (!%p109_p2), %s376_s2, %s289_s28  ;;  %p295_p9 = scmp.lt.u32.totalorder (!%p109_p2), %s289_s28, %s376_s2 }
   0xa   : > { %180 = vrot.lane.b32.xlu1 (!%p109_p2), %v175_v1, %s313_s13 }
   0xb   : > { %p291_p7 = pnand (!%p109_p2), %p290_p6, %p275_p5 }
   0xd   : > { %s126_s14 = scalar_select %p125_p3, %s338_s10, 5 }
   0xe   : > { %269 = sst [smem:[#allocation2]] (%p274_p4), %s315_s22  ;;  %p292_p8 = pneg %p291_p7 }
   0xf   : > { %s265_s17 = smul.u32 24, %s126_s14  ;;  %s171_s23 = sld [smem:[#allocation2]] }
  0x10   : > { %p297_p10 = pnand %p295_p9, %p292_p8 }
  0x11   : > { %s129_s20 = scalar_lea.vmem %s374_s0, %s265_s17 }
  0x12   : > { %v136_v2 = vld [vmem:[%s129_s20] sm:$0xff]  ;;  %v137_v3 = vld [vmem:[%s129_s20 + $0x8] sm:$0xff]  ;;  %v138_v4 = vld [vmem:[%s129_s20 + $0x10] sm:$0x1] }
  0x13   : > { %v143_v5 = vrot.slane %v136_v2, 1  ;;  %v144_v6 = vrot.slane %v137_v3, 1  ;;  %v146_v7 = vrot.slane %v138_v4, 1  ;;  %v158_v8 = vmul.f32 2.0, %v138_v4 }
  0x14   : > { %v157_v9 = vmul.f32 2.0, %v137_v3  ;;  %v156_v15 = vmul.f32 2.0, %v136_v2 }
  0x15   : > { %v145_v10 = vsel %vm142_vm0, %v143_v5, %v144_v6  ;;  %v165_v11 = vrot.slane %v158_v8, 1  ;;  %v147_v13 = vsel %vm142_vm0, %v144_v6, %v146_v7 }
  0x16   : > { %148 = vrot.lane.b32.xlu0 %v145_v10, %s313_s13  ;;  %v163_v12 = vrot.slane %v157_v9, 1  ;;  %v162_v16 = vrot.slane %v156_v15, 1 }
  0x18   : > { %v166_v14 = vsel %vm142_vm0, %v163_v12, %v165_v11  ;;  %v164_v17 = vsel %vm142_vm0, %v162_v16, %v163_v12 }
  0x1a   : > { %150 = vrot.lane.b32.xlu0 %v147_v13, %s313_s13 }
  0x78   : > { %v179_v20 = vpop.permute.xlu1 %178 }
  0x7c   : > { %v181_v27 = vpop.permute.xlu1 %180 }
  0x88   : > { %v149_v18 = vpop.permute.xlu0 %148 }
  0x89   : > { %v154_v19 = vadd.f32 %v149_v18, %v136_v2 }
  0x8b   : > { %v169_v21 = vsub.f32 %v154_v19, %v164_v17 }
  0x8c   : > { %v151_v22 = vpop.permute.xlu0 %150 }
  0x8d   : > { %v155_v23 = vadd.f32 %v151_v22, %v137_v3  ;;  %v172_v24 = vand.u32 2147483647, %v169_v21 }
  0x8f   : > { %v170_v25 = vsub.f32 %v155_v23, %v166_v14  ;;  %v184_v26 = vmul.f32 %v179_v20, %v172_v24 }
  0x91   : > { %188 = vrot.lane.b32.xlu0 %v184_v26, %s314_s21  ;;  %v173_v28 = vand.u32 2147483647, %v170_v25 }
  0x93   : > { %v185_v29 = vmul.f32 %v181_v27, %v173_v28 }
  0x95   : > { %190 = vrot.lane.b32.xlu1 %v185_v29, %s314_s21 }
 0x103   : > { %v189_v30 = vpop.permute.xlu0 %188 }
 0x104   : > { %v195_v32 = vsel %vm194_vm1, %v189_v30, 0.0 }
 0x107   : > { %v191_v31 = vpop.permute.xlu1 %190 }
 0x108   : > { %v196_v33 = vsel %vm194_vm1, %v191_v31, 0.0 }
 0x109   : > { %v197_v34 = vadd.f32 %v196_v33, %v195_v32 }
 0x10b   : > { %198 = vadd.xlane.f32.xlu0 %v197_v34 }
 0x198   : > { %v199_v35 = vpop.xlane.xlu0 %198 }
 0x199   : > { %v200_v36 = vrot.slane %v199_v35, 4 }
 0x19b   : > { %v201_v37 = vadd.f32 %v200_v36, %v199_v35 }
 0x19d   : > { %v202_v38 = vrot.slane %v201_v37, 2 }
 0x19f   : > { %v203_v39 = vadd.f32 %v202_v38, %v201_v37 }
 0x1a1   : > { %v204_v40 = vrot.slane %v203_v39, 1 }
 0x1a3   : > { %v205_v41 = vadd.f32 %v204_v40, %v203_v39 }
 0x1a5   : > { %266 = vpush %v205_v41 }
 0x1d6   : > { %s267_s24 = spop %266 }
 0x1d7   : > { %s207_s25 = sadd.f32 %s267_s24, %s171_s23 }
 0x1d9   : > { %209 = sst [smem:[#allocation2]] %s207_s25 }
 0x1da   : > { %300 = shalt.err (!%p297_p10)
}
 0x1db   : > { %s316_s5 = smov [#allocation2]  }
 0x1dc   : > { %271 = dma.smem_to_hbm (%p275_p5), %s316_s5, 16, %s376_s2, [#allocation3]  }
 0x1dd   : > { %306 = dma.done.wait (%p275_p5), [#allocation3], 16  }
 0x1de   : > { %308 = vsyncadd (%p275_p5), [#allocation3], 4294967280 }
 0x1df   : > { %223 = sfence }
 0x1e0 PF: > { %s13_s9 = sadd.s32 1, %s311_s9  }
 0x1e1   : > { %p10_p11 = scmp.ge.s32.totalorder %s13_s9, 8  }
 0x1e3   :  { %12 = sbr.rel (!%p10_p11) target bundleno = 1 (0x1), region = 61 }
 0x1ea   :  { %229 = vsyncpa [#allocation3], 1 }
 0x1eb   :  { %231 = vsyncpa [#allocation3 + $0x1], 1 }

// kernel: inpaint_loss.65
= control target key start
LH: loop header
LB: loop body
LE: loop exit
PB: predicated region body
PF: predicated region fallthrough
CT: control target
= control target key end

     0   :  { %s109_s0 = inlined_call_operand.vmem [shape: f32[16,128], index: 0, kind: input, shape index: {}]   ;;  %s110_s1 = inlined_call_operand.vmem [shape: f32[16,128], index: 1, kind: input, shape index: {}]   ;;  %s111_s2 = inlined_call_operand.hbm [shape: f32[1,1], index: 2, kind: output, shape index: {}]  }
   0x1   :  { %v18_v0 = vld [vmem:[%s109_s0] sm:$0xff]  ;;  %v19_v1 = vld [vmem:[%s109_s0 + $0x8] sm:$0xff] }
   0x2   :  { %v20_v2 = vld [vmem:[%s110_s1] sm:$0xff]  ;;  %v21_v3 = vld [vmem:[%s110_s1 + $0x8] sm:$0xff] }
   0x3   :  { %v22_v4 = vsub.f32 %v18_v0, %v20_v2 }
   0x4   :  { %7 = vsyncpa [#allocation3], 0  ;;  %v23_v5 = vsub.f32 %v19_v1, %v21_v3  ;;  %s57_s1 = scalar_lea.hbm %s111_s2, 16 }
   0x5   :  { %v25_v6 = vand.u32 2147483647, %v22_v4  ;;  %p58_p0 = scmp.ne.s32.totalorder %s111_s2, %s57_s1  ;;  %p61_p1 = scmp.lt.u32.totalorder %s57_s1, %s111_s2 }
   0x6   :  { %v26_v7 = vand.u32 2147483647, %v23_v5 }
   0x7   :  { %p63_p2 = pnand %p61_p1, %p58_p0 }
   0x8   :  { %v27_v8 = vadd.f32 %v26_v7, %v25_v6 }
   0xa   :  { %28 = vadd.xlane.f32.xlu0 %v27_v8 }
  0x97   :  { %v29_v9 = vpop.xlane.xlu0 %28 }
  0x98   :  { %v30_v10 = vrot.slane %v29_v9, 4 }
  0x9a   :  { %v31_v11 = vadd.f32 %v30_v10, %v29_v9 }
  0x9c   :  { %v32_v12 = vrot.slane %v31_v11, 2 }
  0x9e   :  { %v33_v13 = vadd.f32 %v32_v12, %v31_v11 }
  0xa0   :  { %v34_v14 = vrot.slane %v33_v13, 1 }
  0xa2   :  { %v35_v15 = vadd.f32 %v34_v14, %v33_v13 }
  0xa4   :  { %53 = vpush %v35_v15 }
  0xd5   :  { %s54_s0 = spop %53 }
  0xd6   :  { %39 = sst [smem:[#allocation2]] %s54_s0 }
  0xd7   :  { %66 = shalt.err (!%p63_p2)
}
  0xd8   :  { %s69_s23 = smov [#allocation2]  }
  0xd9   :  { %47 = dma.smem_to_hbm %s69_s23, 16, %s111_s2, [#allocation3]  }
  0xda   :  { %67 = dma.done.wait [#allocation3], 16  }
  0xdb   :  { %68 = vsyncadd [#allocation3], 4294967280 }
  0xdc   :  { %51 = sfence }
  0xdd   :  { %52 = vsyncpa [#allocation3], 1 }

// kernel: inpaint_loss.80
= control target key start
LH: loop header
LB: loop body
LE: loop exit
PB: predicated region body
PF: predicated region fallthrough
CT: control target
= control target key end

     0   :  { %s1100_s12 = smov 0   ;;  %s1102_s13 = smov 0   ;;  %s1283_s0 = inlined_call_operand.vmem [shape: bf16[2,256,27], index: 0, kind: input, shape index: {}]   ;;  %s1284_s1 = inlined_call_operand.vmem [shape: bf16[27,64], index: 1, kind: input, shape index: {}]   ;;  %s1285_s2 = inlined_call_operand.vmem [shape: f32[1,64], index: 2, kind: input, shape index: {}]   ;;  %s1286_s3 = inlined_call_operand.vmem [shape: bf16[2,256,64], index: 3, kind: output, shape index: {}]  }
   0x1   :  { %s1104_s14 = smov 0  }
   0x2 LB: > { %s25_s15 = sadd.s32 1, %s1073_s13  ;;  %p846_p0 = scmp.ge.s32.totalorder %s1077_s14, 1  ;;  %s1077_s14 = sphi %s1104_s14, %s13_s14   ;;  %s1073_s13 = sphi %s1102_s13, %s1288_s13   ;;  %s1069_s12 = sphi %s1100_s12, %s1287_s12  }
   0x3   : > { %p27_p1 = scmp.ge.s32.totalorder %s25_s15, 2  ;;  %p158_p2 = scmp.lt.s32.totalorder %s1077_s14, 3 }
   0x5   : > { %s1290_s15 = smov (%p27_p1, %s25_s15), 0  ;;  %p159_p3 = pnand %p846_p0, %p158_p2 }
   0x6   : > { %v1037_v0 = vld [vmem:[%s1284_s1] sm:$0xff] (!%p159_p3)   ;;  %vm394_vm0 = vcmask (!%p159_p3), 1044480   ;;  %v1038_v1 = vld [vmem:[%s1284_s1 + $0x8] sm:$0x3f] (!%p159_p3)   ;;  %vm395_vm1 = vcmask (!%p159_p3), 1045504   ;;  %p191_p4 = scmp.lt.s32.totalorder (!%p159_p3), %s1069_s12, 1 }
   0x7   : > { %162 = sbr.rel (%p159_p3) target bundleno = 266 (0x10a), region = 32  ;;  %972 = vmatprep.subr.bf16.mxu0 (!%p159_p3), %v1037_v0  ;;  %1008 = vmatprep.subr.bf16.mxu1 (!%p159_p3), %v1037_v0  ;;  %v1079_v2 = vmov (!%p159_p3), 65535   ;;  %vm345_vm2 = vcmask (!%p159_p3), 220160   ;;  %v1169_v22 = vld [vmem:[%s1285_s2] ss:$0 sm:$0xff] (!%p159_p3)  ;;  %vm722_vm3 = vcmask (!%p159_p3), 519168  }
   0x8   : > { %973 = vmatpush3.bf16.msra.mxu0 (!%p159_p3), %v1037_v0  ;;  %1010 = vmatpush3.bf16.msra.mxu1 (!%p159_p3), %v1037_v0  ;;  %v396_v3 = vsel (!%p159_p3), %vm394_vm0, 4294967295, %v1079_v2 }
   0x9   : > { %v397_v4 = vsel (!%p159_p3), %vm395_vm1, %v396_v3, 0 }
   0xa   : > { %v399_v5 = vand.u32 (!%p159_p3), %v1038_v1, %v397_v4 }
   0xc   : > { %974 = vmatprep.subr.bf16.mxu0 (!%p159_p3), %v399_v5  ;;  %1009 = vmatprep.subr.bf16.mxu1 (!%p159_p3), %v399_v5 }
   0xd   : > { %975 = vmatpush3.bf16.msra.mxu0 (!%p159_p3), %v399_v5  ;;  %1011 = vmatpush3.bf16.msra.mxu1 (!%p159_p3), %v399_v5 }
   0xe   : > { %s1292_s12 = smov (!%p191_p4, %s1069_s12), 1 }
   0xf   : > { %s920_s20 = sshll.u32 %s1292_s12, 7 }
  0x10   : > { %s1132_s23 = scalar_lea.vmem %s1283_s0, %s920_s20  ;;  %s1181_s28 = scalar_lea.vmem %s1286_s3, %s920_s20 }
  0x11   : > { %v1039_v6 = vld [vmem:[%s1132_s23] sm:$0xff]   ;;  %v1041_v8 = vld [vmem:[%s1132_s23 + $0x8] sm:$0xff]   ;;  %v1043_v10 = vld [vmem:[%s1132_s23 + $0x10] sm:$0xff]  }
  0x12   : > { %v1040_v7 = vld [vmem:[%s1132_s23 + $0x40] sm:$0xff]   ;;  %976 = vmatprep.mubr.msk.bf16.mxu0 %vm345_vm2, %v1039_v6  ;;  %v1042_v9 = vld [vmem:[%s1132_s23 + $0x48] sm:$0xff]   ;;  %v1044_v11 = vld [vmem:[%s1132_s23 + $0x50] sm:$0xff]  }
  0x13   : > { %992 = vmatprep.mubr.msk.bf16.mxu1 %vm345_vm2, %v1040_v7  ;;  %977 = vmatmul.mubr.msk.bf16.vlgmr.msra.gmra.mrb[0].mxu0 %vm345_vm2, %v1041_v8  ;;  %v1045_v12 = vld [vmem:[%s1132_s23 + $0x18] sm:$0xff]   ;;  %v1047_v14 = vld [vmem:[%s1132_s23 + $0x20] sm:$0xff]   ;;  %v1049_v16 = vld [vmem:[%s1132_s23 + $0x28] sm:$0xff]  }
  0x14   : > { %993 = vmatmul.mubr.msk.bf16.vlgmr.msra.gmra.mrb[0].mxu1 %vm345_vm2, %v1042_v9  ;;  %980 = vmatprep.mubr.msk.bf16.mxu0 %vm345_vm2, %v1043_v10  ;;  %v1046_v13 = vld [vmem:[%s1132_s23 + $0x58] sm:$0xff]   ;;  %v1048_v15 = vld [vmem:[%s1132_s23 + $0x60] sm:$0xff]   ;;  %v1050_v17 = vld [vmem:[%s1132_s23 + $0x68] sm:$0xff]  }
  0x15   : > { %996 = vmatprep.mubr.msk.bf16.mxu1 %vm345_vm2, %v1044_v11  ;;  %v1051_v18 = vld [vmem:[%s1132_s23 + $0x30] sm:$0xff]   ;;  %v1053_v20 = vld [vmem:[%s1132_s23 + $0x38] sm:$0xff]  }
  0x16   : > { %v1052_v19 = vld [vmem:[%s1132_s23 + $0x70] sm:$0xff]   ;;  %v1054_v21 = vld [vmem:[%s1132_s23 + $0x78] sm:$0xff]  }
  0x1b   : > { %981 = vmatmul.mubr.msk.bf16.gmra.mrb[4].mxu0 %vm345_vm2, %v1045_v12 }
  0x1c   : > { %997 = vmatmul.mubr.msk.bf16.gmra.mrb[4].mxu1 %vm345_vm2, %v1046_v13  ;;  %984 = vmatprep.mubr.msk.bf16.mxu0 %vm345_vm2, %v1047_v14 }
  0x1d   : > { %1000 = vmatprep.mubr.msk.bf16.mxu1 %vm345_vm2, %v1048_v15 }
  0x23   : > { %985 = vmatmul.mubr.msk.bf16.gmra.mrb[8].mxu0 %vm345_vm2, %v1049_v16 }
  0x24   : > { %1001 = vmatmul.mubr.msk.bf16.gmra.mrb[8].mxu1 %vm345_vm2, %v1050_v17  ;;  %988 = vmatprep.mubr.msk.bf16.mxu0 %vm345_vm2, %v1051_v18 }
  0x25   : > { %1004 = vmatprep.mubr.msk.bf16.mxu1 %vm345_vm2, %v1052_v19 }
  0x2b   : > { %989 = vmatmul.mubr.msk.bf16.gmra.mrb[12].mxu0 %vm345_vm2, %v1053_v20 }
  0x2c   : > { %1005 = vmatmul.mubr.msk.bf16.gmra.mrb[12].mxu1 %vm345_vm2, %v1054_v21 }
  0xe6   : > { %v978_v23 = vpop.f32.mrb[0].mxu0 }
  0xe7   : > { %v444_v24 = vadd.f32 %v978_v23, %v1169_v22  ;;  %v994_v25 = vpop.f32.mrb[0].mxu1  ;;  %v435_v26 = vpop.f32.mrb[1].mxu0 }
  0xe8   : > { %v508_v27 = vadd.f32 %v994_v25, %v1169_v22  ;;  %v436_v28 = vadd.f32 %v1169_v22, %v435_v26  ;;  %v499_v29 = vpop.f32.mrb[1].mxu1  ;;  %v979_v30 = vpop.f32.mrb[2].mxu0 }
  0xe9   : > { %v564_v31 = vmax.f32 %v444_v24, 0.0  ;;  %v500_v32 = vadd.f32 %v1169_v22, %v499_v29  ;;  %v447_v33 = vadd.f32 %v979_v30, %v1169_v22  ;;  %v995_v34 = vpop.f32.mrb[2].mxu1  ;;  %v438_v35 = vpop.f32.mrb[3].mxu0 }
  0xea   : > { %v580_v36 = vmax.f32 %v508_v27, 0.0  ;;  %v562_v37 = vmax.f32 %v436_v28, 0.0  ;;  %v511_v38 = vadd.f32 %v995_v34, %v1169_v22  ;;  %v439_v39 = vadd.f32 %v1169_v22, %v438_v35  ;;  %v502_v40 = vpop.f32.mrb[3].mxu1 }
  0xeb   : > { %v924_v41 = vpack.c.bf16 %v564_v31, %v564_v31  ;;  %v578_v42 = vmax.f32 %v500_v32, 0.0  ;;  %v565_v43 = vmax.f32 %v447_v33, 0.0  ;;  %v503_v44 = vadd.f32 %v1169_v22, %v502_v40 }
  0xec   : > { %v940_v45 = vpack.c.bf16 %v580_v36, %v580_v36  ;;  %v922_v46 = vpack.c.bf16 %v562_v37, %v562_v37  ;;  %v581_v47 = vmax.f32 %v511_v38, 0.0  ;;  %v563_v48 = vmax.f32 %v439_v39, 0.0 }
  0xed   : > { %725 = vst.msk [vmem:[%s1181_s28 + $0x8] sm:$0xf] %vm722_vm3, %v924_v41  ;;  %v938_v49 = vpack.c.bf16 %v578_v42, %v578_v42  ;;  %v925_v50 = vpack.c.bf16 %v565_v43, %v565_v43  ;;  %v579_v51 = vmax.f32 %v503_v44, 0.0 }
  0xee   : > { %741 = vst.msk [vmem:[%s1181_s28 + $0x48] sm:$0xf] %vm722_vm3, %v940_v45  ;;  %723 = vst.msk [vmem:[%s1181_s28] sm:$0xf] %vm722_vm3, %v922_v46  ;;  %v941_v52 = vpack.c.bf16 %v581_v47, %v581_v47  ;;  %v923_v53 = vpack.c.bf16 %v563_v48, %v563_v48  ;;  %v982_v54 = vpop.f32.mrb[4].mxu0 }
  0xef   : > { %739 = vst.msk [vmem:[%s1181_s28 + $0x40] sm:$0xf] %vm722_vm3, %v938_v49  ;;  %726 = vst.msk [vmem:[%s1181_s28 + $0xc] sm:$0xf] %vm722_vm3, %v925_v50  ;;  %v939_v55 = vpack.c.bf16 %v579_v51, %v579_v51  ;;  %v460_v56 = vadd.f32 %v982_v54, %v1169_v22  ;;  %v998_v57 = vpop.f32.mrb[4].mxu1  ;;  %v451_v58 = vpop.f32.mrb[5].mxu0 }
  0xf0   : > { %742 = vst.msk [vmem:[%s1181_s28 + $0x4c] sm:$0xf] %vm722_vm3, %v941_v52  ;;  %724 = vst.msk [vmem:[%s1181_s28 + $0x4] sm:$0xf] %vm722_vm3, %v923_v53  ;;  %v524_v59 = vadd.f32 %v998_v57, %v1169_v22  ;;  %v452_v60 = vadd.f32 %v1169_v22, %v451_v58  ;;  %v515_v61 = vpop.f32.mrb[5].mxu1  ;;  %v983_v62 = vpop.f32.mrb[6].mxu0 }
  0xf1   : > { %740 = vst.msk [vmem:[%s1181_s28 + $0x44] sm:$0xf] %vm722_vm3, %v939_v55  ;;  %v568_v63 = vmax.f32 %v460_v56, 0.0  ;;  %v516_v0 = vadd.f32 %v1169_v22, %v515_v61  ;;  %v463_v1 = vadd.f32 %v983_v62, %v1169_v22  ;;  %v999_v2 = vpop.f32.mrb[6].mxu1  ;;  %v454_v3 = vpop.f32.mrb[7].mxu0 }
  0xf2   : > { %v584_v4 = vmax.f32 %v524_v59, 0.0  ;;  %v566_v5 = vmax.f32 %v452_v60, 0.0  ;;  %v527_v6 = vadd.f32 %v999_v2, %v1169_v22  ;;  %v455_v7 = vadd.f32 %v1169_v22, %v454_v3  ;;  %v518_v8 = vpop.f32.mrb[7].mxu1 }
  0xf3   : > { %v928_v9 = vpack.c.bf16 %v568_v63, %v568_v63  ;;  %v582_v10 = vmax.f32 %v516_v0, 0.0  ;;  %v569_v11 = vmax.f32 %v463_v1, 0.0  ;;  %v519_v12 = vadd.f32 %v1169_v22, %v518_v8 }
  0xf4   : > { %v944_v13 = vpack.c.bf16 %v584_v4, %v584_v4  ;;  %v926_v14 = vpack.c.bf16 %v566_v5, %v566_v5  ;;  %v585_v15 = vmax.f32 %v527_v6, 0.0  ;;  %v567_v16 = vmax.f32 %v455_v7, 0.0 }
  0xf5   : > { %729 = vst.msk [vmem:[%s1181_s28 + $0x18] sm:$0xf] %vm722_vm3, %v928_v9  ;;  %v942_v17 = vpack.c.bf16 %v582_v10, %v582_v10  ;;  %v929_v18 = vpack.c.bf16 %v569_v11, %v569_v11  ;;  %v583_v19 = vmax.f32 %v519_v12, 0.0 }
  0xf6   : > { %745 = vst.msk [vmem:[%s1181_s28 + $0x58] sm:$0xf] %vm722_vm3, %v944_v13  ;;  %727 = vst.msk [vmem:[%s1181_s28 + $0x10] sm:$0xf] %vm722_vm3, %v926_v14  ;;  %v945_v20 = vpack.c.bf16 %v585_v15, %v585_v15  ;;  %v927_v21 = vpack.c.bf16 %v567_v16, %v567_v16  ;;  %v986_v23 = vpop.f32.mrb[8].mxu0 }
  0xf7   : > { %743 = vst.msk [vmem:[%s1181_s28 + $0x50] sm:$0xf] %vm722_vm3, %v942_v17  ;;  %730 = vst.msk [vmem:[%s1181_s28 + $0x1c] sm:$0xf] %vm722_vm3, %v929_v18  ;;  %v943_v24 = vpack.c.bf16 %v583_v19, %v583_v19  ;;  %v476_v25 = vadd.f32 %v986_v23, %v1169_v22  ;;  %v1002_v26 = vpop.f32.mrb[8].mxu1  ;;  %v467_v27 = vpop.f32.mrb[9].mxu0 }
  0xf8   : > { %746 = vst.msk [vmem:[%s1181_s28 + $0x5c] sm:$0xf] %vm722_vm3, %v945_v20  ;;  %728 = vst.msk [vmem:[%s1181_s28 + $0x14] sm:$0xf] %vm722_vm3, %v927_v21  ;;  %v540_v28 = vadd.f32 %v1002_v26, %v1169_v22  ;;  %v468_v29 = vadd.f32 %v1169_v22, %v467_v27  ;;  %v531_v30 = vpop.f32.mrb[9].mxu1  ;;  %v987_v31 = vpop.f32.mrb[10].mxu0 }
  0xf9   : > { %744 = vst.msk [vmem:[%s1181_s28 + $0x54] sm:$0xf] %vm722_vm3, %v943_v24  ;;  %v572_v32 = vmax.f32 %v476_v25, 0.0  ;;  %v532_v33 = vadd.f32 %v1169_v22, %v531_v30  ;;  %v479_v34 = vadd.f32 %v987_v31, %v1169_v22  ;;  %v1003_v35 = vpop.f32.mrb[10].mxu1  ;;  %v470_v36 = vpop.f32.mrb[11].mxu0 }
  0xfa   : > { %v588_v37 = vmax.f32 %v540_v28, 0.0  ;;  %v570_v38 = vmax.f32 %v468_v29, 0.0  ;;  %v543_v39 = vadd.f32 %v1003_v35, %v1169_v22  ;;  %v471_v40 = vadd.f32 %v1169_v22, %v470_v36  ;;  %v534_v41 = vpop.f32.mrb[11].mxu1 }
  0xfb   : > { %v932_v42 = vpack.c.bf16 %v572_v32, %v572_v32  ;;  %v586_v43 = vmax.f32 %v532_v33, 0.0  ;;  %v573_v44 = vmax.f32 %v479_v34, 0.0  ;;  %v535_v45 = vadd.f32 %v1169_v22, %v534_v41 }
  0xfc   : > { %v948_v46 = vpack.c.bf16 %v588_v37, %v588_v37  ;;  %v930_v47 = vpack.c.bf16 %v570_v38, %v570_v38  ;;  %v589_v48 = vmax.f32 %v543_v39, 0.0  ;;  %v571_v49 = vmax.f32 %v471_v40, 0.0 }
  0xfd   : > { %733 = vst.msk [vmem:[%s1181_s28 + $0x28] sm:$0xf] %vm722_vm3, %v932_v42  ;;  %v946_v50 = vpack.c.bf16 %v586_v43, %v586_v43  ;;  %v933_v51 = vpack.c.bf16 %v573_v44, %v573_v44  ;;  %v587_v52 = vmax.f32 %v535_v45, 0.0 }
  0xfe   : > { %749 = vst.msk [vmem:[%s1181_s28 + $0x68] sm:$0xf] %vm722_vm3, %v948_v46  ;;  %731 = vst.msk [vmem:[%s1181_s28 + $0x20] sm:$0xf] %vm722_vm3, %v930_v47  ;;  %v949_v53 = vpack.c.bf16 %v589_v48, %v589_v48  ;;  %v931_v54 = vpack.c.bf16 %v571_v49, %v571_v49  ;;  %v990_v55 = vpop.f32.mrb[12].mxu0 }
  0xff   : > { %747 = vst.msk [vmem:[%s1181_s28 + $0x60] sm:$0xf] %vm722_vm3, %v946_v50  ;;  %734 = vst.msk [vmem:[%s1181_s28 + $0x2c] sm:$0xf] %vm722_vm3, %v933_v51  ;;  %v947_v56 = vpack.c.bf16 %v587_v52, %v587_v52  ;;  %v492_v57 = vadd.f32 %v990_v55, %v1169_v22  ;;  %v1006_v58 = vpop.f32.mrb[12].mxu1  ;;  %v483_v59 = vpop.f32.mrb[13].mxu0 }
 0x100   : > { %750 = vst.msk [vmem:[%s1181_s28 + $0x6c] sm:$0xf] %vm722_vm3, %v949_v53  ;;  %732 = vst.msk [vmem:[%s1181_s28 + $0x24] sm:$0xf] %vm722_vm3, %v931_v54  ;;  %v556_v60 = vadd.f32 %v1006_v58, %v1169_v22  ;;  %v484_v61 = vadd.f32 %v1169_v22, %v483_v59  ;;  %v547_v62 = vpop.f32.mrb[13].mxu1  ;;  %v991_v63 = vpop.f32.mrb[14].mxu0 }
 0x101   : > { %748 = vst.msk [vmem:[%s1181_s28 + $0x64] sm:$0xf] %vm722_vm3, %v947_v56  ;;  %v576_v0 = vmax.f32 %v492_v57, 0.0  ;;  %v548_v1 = vadd.f32 %v1169_v22, %v547_v62  ;;  %v495_v2 = vadd.f32 %v991_v63, %v1169_v22  ;;  %v1007_v3 = vpop.f32.mrb[14].mxu1  ;;  %v486_v4 = vpop.f32.mrb[15].mxu0 }
 0x102   : > { %v592_v5 = vmax.f32 %v556_v60, 0.0  ;;  %v574_v6 = vmax.f32 %v484_v61, 0.0  ;;  %v559_v7 = vadd.f32 %v1007_v3, %v1169_v22  ;;  %v487_v8 = vadd.f32 %v1169_v22, %v486_v4  ;;  %v550_v9 = vpop.f32.mrb[15].mxu1 }
 0x103   : > { %v936_v10 = vpack.c.bf16 %v576_v0, %v576_v0  ;;  %v590_v11 = vmax.f32 %v548_v1, 0.0  ;;  %v577_v12 = vmax.f32 %v495_v2, 0.0  ;;  %v551_v13 = vadd.f32 %v1169_v22, %v550_v9 }
 0x104   : > { %v952_v14 = vpack.c.bf16 %v592_v5, %v592_v5  ;;  %v934_v15 = vpack.c.bf16 %v574_v6, %v574_v6  ;;  %v593_v16 = vmax.f32 %v559_v7, 0.0  ;;  %v575_v17 = vmax.f32 %v487_v8, 0.0 }
 0x105   : > { %737 = vst.msk [vmem:[%s1181_s28 + $0x38] sm:$0xf] %vm722_vm3, %v936_v10  ;;  %v950_v18 = vpack.c.bf16 %v590_v11, %v590_v11  ;;  %v937_v19 = vpack.c.bf16 %v577_v12, %v577_v12  ;;  %v591_v20 = vmax.f32 %v551_v13, 0.0 }
 0x106   : > { %753 = vst.msk [vmem:[%s1181_s28 + $0x78] sm:$0xf] %vm722_vm3, %v952_v14  ;;  %735 = vst.msk [vmem:[%s1181_s28 + $0x30] sm:$0xf] %vm722_vm3, %v934_v15  ;;  %v953_v21 = vpack.c.bf16 %v593_v16, %v593_v16  ;;  %v935_v23 = vpack.c.bf16 %v575_v17, %v575_v17 }
 0x107   : > { %751 = vst.msk [vmem:[%s1181_s28 + $0x70] sm:$0xf] %vm722_vm3, %v950_v18  ;;  %738 = vst.msk [vmem:[%s1181_s28 + $0x3c] sm:$0xf] %vm722_vm3, %v937_v19  ;;  %v951_v22 = vpack.c.bf16 %v591_v20, %v591_v20 }
 0x108   : > { %754 = vst.msk [vmem:[%s1181_s28 + $0x7c] sm:$0xf] %vm722_vm3, %v953_v21  ;;  %736 = vst.msk [vmem:[%s1181_s28 + $0x34] sm:$0xf] %vm722_vm3, %v935_v23 }
 0x109   : > { %752 = vst.msk [vmem:[%s1181_s28 + $0x74] sm:$0xf] %vm722_vm3, %v951_v22 }
 0x10a PF: > { %s13_s14 = sadd.s32 1, %s1077_s14   ;;  %s1287_s12 = smov %s1073_s13 }
 0x10b   : > { %p10_p5 = scmp.ge.s32.totalorder %s13_s14, 4   ;;  %s1288_s13 = smov %s1290_s15 }
 0x10d   :  { %12 = sbr.rel (!%p10_p5) target bundleno = 2 (0x2), region = 62 }

// kernel: inpaint_loss.88
= control target key start
LH: loop header
LB: loop body
LE: loop exit
PB: predicated region body
PF: predicated region fallthrough
CT: control target
= control target key end

     0   :  { %s2545_s12 = smov 0   ;;  %s2547_s13 = smov 0   ;;  %s3002_s0 = inlined_call_operand.vmem [shape: bf16[2,256,576], index: 0, kind: input, shape index: {}]   ;;  %s3003_s1 = inlined_call_operand.vmem [shape: bf16[576,64], index: 1, kind: input, shape index: {}]   ;;  %s3004_s2 = inlined_call_operand.vmem [shape: f32[1,64], index: 2, kind: input, shape index: {}]   ;;  %s3005_s3 = inlined_call_operand.vmem [shape: bf16[2,256,64], index: 3, kind: output, shape index: {}]  }
   0x1   :  { %s2549_s14 = smov 0  }
   0x2 LB: > { %s25_s15 = sadd.s32 1, %s2519_s13  ;;  %p1824_p0 = scmp.ge.s32.totalorder %s2523_s14, 1  ;;  %s2523_s14 = sphi %s2549_s14, %s13_s14   ;;  %s2519_s13 = sphi %s2547_s13, %s3007_s13   ;;  %s2515_s12 = sphi %s2545_s12, %s3006_s12  }
   0x3   : > { %p27_p1 = scmp.ge.s32.totalorder %s25_s15, 2  ;;  %p159_p2 = scmp.lt.s32.totalorder %s2523_s14, 3 }
   0x5   : > { %s3009_s15 = smov (%p27_p1, %s25_s15), 0  ;;  %p160_p3 = pnand %p1824_p0, %p159_p2 }
   0x6   : > { %v2353_v0 = vld [vmem:[%s3003_s1 + $0x40] sm:$0xff] (!%p160_p3)   ;;  %v2355_v2 = vld [vmem:[%s3003_s1 + $0x48] sm:$0xff] (!%p160_p3)   ;;  %p193_p4 = scmp.lt.s32.totalorder (!%p160_p3), %s2515_s12, 1  ;;  %v2357_v4 = vld [vmem:[%s3003_s1 + $0x50] sm:$0xff] (!%p160_p3)   ;;  %vm1005_vm0 = vcmask (!%p160_p3), 523264   ;;  %vm1697_vm1 = vcmask (!%p160_p3), 519168  }
   0x7   : > { %163 = sbr.rel (%p160_p3) target bundleno = 417 (0x1a1), region = 32  ;;  %v2354_v1 = vld [vmem:[%s3003_s1] sm:$0xff] (!%p160_p3)   ;;  %2028 = vmatprep.subr.bf16.mxu0 (!%p160_p3), %v2353_v0  ;;  %2312 = vmatprep.subr.bf16.mxu1 (!%p160_p3), %v2353_v0  ;;  %v2356_v3 = vld [vmem:[%s3003_s1 + $0x8] sm:$0xff] (!%p160_p3)   ;;  %v2358_v5 = vld [vmem:[%s3003_s1 + $0x10] sm:$0xff] (!%p160_p3)  }
   0x8   : > { %2029 = vmatpush3.bf16.msra.mxu0 (!%p160_p3), %v2354_v1  ;;  %2320 = vmatpush3.bf16.msra.mxu1 (!%p160_p3), %v2354_v1  ;;  %v2359_v6 = vld [vmem:[%s3003_s1 + $0x58] sm:$0xff] (!%p160_p3)   ;;  %v2361_v8 = vld [vmem:[%s3003_s1 + $0x60] sm:$0xff] (!%p160_p3)   ;;  %v2363_v10 = vld [vmem:[%s3003_s1 + $0x68] sm:$0xff] (!%p160_p3)  }
   0x9   : > { %2030 = vmatprep.subr.bf16.mxu0 (!%p160_p3), %v2355_v2  ;;  %2313 = vmatprep.subr.bf16.mxu1 (!%p160_p3), %v2355_v2  ;;  %v2360_v7 = vld [vmem:[%s3003_s1 + $0x18] sm:$0xff] (!%p160_p3)   ;;  %v2362_v9 = vld [vmem:[%s3003_s1 + $0x20] sm:$0xff] (!%p160_p3)   ;;  %v2364_v13 = vld [vmem:[%s3003_s1 + $0x28] sm:$0xff] (!%p160_p3)  }
   0xa   : > { %v2365_v14 = vld [vmem:[%s3003_s1 + $0x70] sm:$0xff] (!%p160_p3)   ;;  %v2367_v16 = vld [vmem:[%s3003_s1 + $0x78] sm:$0xff] (!%p160_p3)   ;;  %v2375_v18 = vld [vmem:[%s3003_s1 + $0xc0] sm:$0xff] (!%p160_p3)  }
   0xb   : > { %v2366_v15 = vld [vmem:[%s3003_s1 + $0x30] sm:$0xff] (!%p160_p3)   ;;  %v2368_v17 = vld [vmem:[%s3003_s1 + $0x38] sm:$0xff] (!%p160_p3)   ;;  %v2378_v19 = vld [vmem:[%s3003_s1 + $0x100] sm:$0xff] (!%p160_p3)  }
   0xc   : > { %2031 = vmatpush3.bf16.msra.mxu0 (!%p160_p3), %v2356_v3  ;;  %2321 = vmatpush3.bf16.msra.mxu1 (!%p160_p3), %v2356_v3  ;;  %v2376_v22 = vld [vmem:[%s3003_s1 + $0x80] sm:$0xff] (!%p160_p3)   ;;  %v2377_v23 = vld [vmem:[%s3003_s1 + $0xc8] sm:$0xff] (!%p160_p3)   ;;  %v2386_v28 = vld [vmem:[%s3003_s1 + $0xd0] sm:$0xff] (!%p160_p3)  }
   0xd   : > { %2032 = vmatprep.subr.bf16.mxu0 (!%p160_p3), %v2357_v4  ;;  %2314 = vmatprep.subr.bf16.mxu1 (!%p160_p3), %v2357_v4  ;;  %v2379_v26 = vld [vmem:[%s3003_s1 + $0x88] sm:$0xff] (!%p160_p3)   ;;  %v2387_v30 = vld [vmem:[%s3003_s1 + $0x90] sm:$0xff] (!%p160_p3)   ;;  %v2388_v31 = vld [vmem:[%s3003_s1 + $0xd8] sm:$0xff] (!%p160_p3)  }
   0xe   : > { %s3011_s12 = smov (!%p193_p4, %s2515_s12), 1  ;;  %v2389_v34 = vld [vmem:[%s3003_s1 + $0x98] sm:$0xff]   ;;  %v2409_v35 = vld [vmem:[%s3003_s1 + $0x108] sm:$0xff]   ;;  %v2396_v37 = vld [vmem:[%s3003_s1 + $0xe0] sm:$0xff]  }
   0xf   : > { %s2328_s30 = smul.u32 640, %s3011_s12  ;;  %v2397_v39 = vld [vmem:[%s3003_s1 + $0xa0] sm:$0xff]   ;;  %v2398_v40 = vld [vmem:[%s3003_s1 + $0xe8] sm:$0xff]   ;;  %v2406_v46 = vld [vmem:[%s3003_s1 + $0xf0] sm:$0xff]   ;;  %s1995_s26 = sshll.u32 %s3011_s12, 7 }
  0x10   : > { %2033 = vmatpush3.bf16.msra.mxu0 %v2358_v5  ;;  %2322 = vmatpush3.bf16.msra.mxu1 %v2358_v5  ;;  %v2399_v43 = vld [vmem:[%s3003_s1 + $0xa8] sm:$0xff]   ;;  %v2429_v47 = vld [vmem:[%s3003_s1 + $0x110] sm:$0xff]   ;;  %v2408_v49 = vld [vmem:[%s3003_s1 + $0xf8] sm:$0xff]   ;;  %s2868_s28 = scalar_lea.vmem %s3005_s3, %s1995_s26 }
  0x11   : > { %2034 = vmatprep.subr.bf16.mxu0 %v2359_v6  ;;  %2315 = vmatprep.subr.bf16.mxu1 %v2359_v6  ;;  %s2596_s10 = scalar_lea.vmem %s3002_s0, %s2328_s30  ;;  %v2407_v48 = vld [vmem:[%s3003_s1 + $0xb0] sm:$0xff]   ;;  %v2410_v52 = vld [vmem:[%s3003_s1 + $0xb8] sm:$0xff]  }
  0x12   : > { %v2371_v11 = vld [vmem:[%s2596_s10 + $0x4] ss:$20 sps:$4 sm:$0xff]   ;;  %v2369_v20 = vld [vmem:[%s2596_s10] ss:$20 sps:$4 sm:$0xff]   ;;  %v2384_v27 = vld [vmem:[%s2596_s10 + $0x28] ss:$20 sps:$4 sm:$0xff]  }
  0x13   : > { %v2374_v12 = vld [vmem:[%s2596_s10 + $0x1e4] ss:$20 sps:$4 sm:$0xff]   ;;  %1086 = vmatprep.mubr.bf16.mxu0 %v2371_v11  ;;  %v2372_v21 = vld [vmem:[%s2596_s10 + $0x1e0] ss:$20 sps:$4 sm:$0xff]   ;;  %v2385_v29 = vld [vmem:[%s2596_s10 + $0x208] ss:$20 sps:$4 sm:$0xff]  }
  0x14   : > { %2035 = vmatpush3.bf16.msra.mxu0 %v2360_v7  ;;  %2323 = vmatpush3.bf16.msra.mxu1 %v2360_v7  ;;  %v2380_v24 = vld [vmem:[%s2596_s10 + $0x2c] ss:$20 sps:$4 sm:$0xff]   ;;  %v2390_v32 = vld [vmem:[%s2596_s10 + $0x54] ss:$20 sps:$4 sm:$0xff]   ;;  %v2394_v36 = vld [vmem:[%s2596_s10 + $0x50] ss:$20 sps:$4 sm:$0xff]  }
  0x15   : > { %2036 = vmatprep.subr.bf16.mxu0 %v2361_v8  ;;  %2316 = vmatprep.subr.bf16.mxu1 %v2361_v8  ;;  %v2382_v25 = vld [vmem:[%s2596_s10 + $0x20c] ss:$20 sps:$4 sm:$0xff]   ;;  %v2392_v33 = vld [vmem:[%s2596_s10 + $0x234] ss:$20 sps:$4 sm:$0xff]   ;;  %v2395_v38 = vld [vmem:[%s2596_s10 + $0x230] ss:$20 sps:$4 sm:$0xff]  }
  0x16   : > { %1182 = vmatprep.mubr.bf16.mxu1 %v2374_v12  ;;  %v2400_v41 = vld [vmem:[%s2596_s10 + $0x7c] ss:$20 sps:$4 sm:$0xff]   ;;  %v2404_v44 = vld [vmem:[%s2596_s10 + $0x78] ss:$20 sps:$4 sm:$0xff]   ;;  %v2416_v54 = vld [vmem:[%s2596_s10 + $0xa0] ss:$20 sps:$4 sm:$0xff]  }
  0x17   : > { %v2402_v42 = vld [vmem:[%s2596_s10 + $0x25c] ss:$20 sps:$4 sm:$0xff]   ;;  %v2405_v45 = vld [vmem:[%s2596_s10 + $0x258] ss:$20 sps:$4 sm:$0xff]   ;;  %v2419_v57 = vld [vmem:[%s2596_s10 + $0x34] ss:$20 sps:$4 sm:$0xff]  }
  0x18   : > { %2037 = vmatpush3.bf16.msra.mxu0 %v2362_v9  ;;  %2324 = vmatpush3.bf16.msra.mxu1 %v2362_v9  ;;  %v2411_v50 = vld [vmem:[%s2596_s10 + $0xa4] ss:$20 sps:$4 sm:$0xff]   ;;  %v2415_v51 = vld [vmem:[%s2596_s10 + $0xc] ss:$20 sps:$4 sm:$0xff]   ;;  %v2413_v53 = vld [vmem:[%s2596_s10 + $0x8] ss:$20 sps:$4 sm:$0xff]  }
  0x19   : > { %2038 = vmatprep.subr.bf16.mxu0 %v2363_v10  ;;  %2317 = vmatprep.subr.bf16.mxu1 %v2363_v10  ;;  %v2417_v55 = vld [vmem:[%s2596_s10 + $0xcc] ss:$20 sps:$4 sm:$0xff]   ;;  %v2448_v56 = vld [vmem:[%s3003_s1 + $0x118] sm:$0xff]   ;;  %v2422_v59 = vld [vmem:[%s2596_s10 + $0x30] ss:$20 sps:$4 sm:$0xff]  }
  0x1a   : > { %v2421_v58 = vld [vmem:[%s2596_s10 + $0xc8] ss:$20 sps:$4 sm:$0xff]   ;;  %v2427_v62 = vld [vmem:[%s2596_s10 + $0xf0] ss:$20 sps:$4 sm:$0xff]   ;;  %v2428_v63 = vld [vmem:[%s2596_s10 + $0x58] ss:$20 sps:$4 sm:$0xff]  }
  0x1b   : > { %v2423_v60 = vld [vmem:[%s2596_s10 + $0xf4] ss:$20 sps:$4 sm:$0xff]   ;;  %v2425_v61 = vld [vmem:[%s2596_s10 + $0x5c] ss:$20 sps:$4 sm:$0xff]   ;;  %v2432_v1 = vld [vmem:[%s2596_s10 + $0x84] ss:$20 sps:$4 sm:$0xff]  }
  0x1c   : > { %2039 = vmatpush3.bf16.msra.mxu0 %v2364_v13  ;;  %2325 = vmatpush3.bf16.msra.mxu1 %v2364_v13  ;;  %v2430_v0 = vld [vmem:[%s2596_s10 + $0x11c] ss:$20 sps:$4 sm:$0xff]   ;;  %v2434_v2 = vld [vmem:[%s2596_s10 + $0x118] ss:$20 sps:$4 sm:$0xff]   ;;  %v2435_v3 = vld [vmem:[%s2596_s10 + $0x80] ss:$20 sps:$4 sm:$0xff]  }
  0x1d   : > { %2040 = vmatprep.subr.bf16.mxu0 %v2365_v14  ;;  %2318 = vmatprep.subr.bf16.mxu1 %v2365_v14  ;;  %v2436_v4 = vld [vmem:[%s2596_s10 + $0x144] ss:$20 sps:$4 sm:$0xff]   ;;  %v2438_v5 = vld [vmem:[%s2596_s10 + $0xac] ss:$20 sps:$4 sm:$0xff]   ;;  %v2441_v7 = vld [vmem:[%s2596_s10 + $0xa8] ss:$20 sps:$4 sm:$0xff]  }
  0x1e   : > { %v2440_v6 = vld [vmem:[%s2596_s10 + $0x140] ss:$20 sps:$4 sm:$0xff]   ;;  %v2446_v10 = vld [vmem:[%s2596_s10 + $0x168] ss:$20 sps:$4 sm:$0xff]   ;;  %v2447_v11 = vld [vmem:[%s2596_s10 + $0xd0] ss:$20 sps:$4 sm:$0xff]  }
  0x1f   : > { %v2442_v8 = vld [vmem:[%s2596_s10 + $0x16c] ss:$20 sps:$4 sm:$0xff]   ;;  %v2444_v9 = vld [vmem:[%s2596_s10 + $0xd4] ss:$20 sps:$4 sm:$0xff]   ;;  %v2451_v13 = vld [vmem:[%s2596_s10 + $0xfc] ss:$20 sps:$4 sm:$0xff]  }
  0x20   : > { %2041 = vmatpush3.bf16.msra.mxu0 %v2366_v15  ;;  %2326 = vmatpush3.bf16.msra.mxu1 %v2366_v15  ;;  %v2449_v12 = vld [vmem:[%s2596_s10 + $0x194] ss:$20 sps:$4 sm:$0xff]   ;;  %v2453_v14 = vld [vmem:[%s2596_s10 + $0x190] ss:$20 sps:$4 sm:$0xff]   ;;  %v2454_v15 = vld [vmem:[%s2596_s10 + $0xf8] ss:$20 sps:$4 sm:$0xff]  }
  0x21   : > { %2042 = vmatprep.subr.bf16.mxu0 %v2367_v16  ;;  %2319 = vmatprep.subr.bf16.mxu1 %v2367_v16  ;;  %v2455_v16 = vld [vmem:[%s2596_s10 + $0x1bc] ss:$20 sps:$4 sm:$0xff]  }
  0x24   : > { %2043 = vmatpush3.bf16.msra.mxu0 %v2368_v17  ;;  %2327 = vmatpush3.bf16.msra.mxu1 %v2368_v17  ;;  %v2457_v17 = vld [vmem:[%s2596_s10 + $0x124] ss:$20 sps:$4 sm:$0xff]  }
  0x25   : > { %2140 = vmatprep.subr.bf16.mxu1 %v2375_v18  ;;  %2272 = vmatprep.subr.bf16.mxu0 %v2378_v19  ;;  %v2459_v18 = vld [vmem:[%s2596_s10 + $0x1b8] ss:$20 sps:$4 sm:$0xff]  }
  0x27   : > { %1087 = vmatmul.mubr.bf16.vlgmr.msra.gmra.mrb[0].mxu0 %v2369_v20  ;;  %1183 = vmatmul.mubr.bf16.vlgmr.msra.gmra.mrb[0].mxu1 %v2372_v21  ;;  %v2461_v20 = vld [vmem:[%s2596_s10 + $0x14c] ss:$20 sps:$4 sm:$0xff]   ;;  %v2463_v21 = vld [vmem:[%s2596_s10 + $0x10] ss:$20 sps:$4 sm:$0xff]  }
  0x28   : > { %2141 = vmatpush3.bf16.msra.mxu1 %v2376_v22  ;;  %2273 = vmatpush3.bf16.msra.mxu0 %v2378_v19  ;;  %v2460_v19 = vld [vmem:[%s2596_s10 + $0x120] ss:$20 sps:$4 sm:$0xff]   ;;  %v2464_v22 = vld [vmem:[%s2596_s10 + $0x148] ss:$20 sps:$4 sm:$0xff]  }
  0x29   : > { %2142 = vmatprep.subr.bf16.mxu1 %v2377_v23  ;;  %1094 = vmatprep.mubr.bf16.mxu0 %v2380_v24  ;;  %v2465_v23 = vld [vmem:[%s2596_s10 + $0x38] ss:$20 sps:$4 sm:$0xff]   ;;  %v2466_v24 = vld [vmem:[%s2596_s10 + $0x174] ss:$20 sps:$4 sm:$0xff]  }
  0x2a   : > { %1190 = vmatprep.mubr.bf16.mxu1 %v2382_v25  ;;  %2274 = vmatprep.subr.bf16.mxu0 %v2409_v35  ;;  %v2468_v25 = vld [vmem:[%s2596_s10 + $0x60] ss:$20 sps:$4 sm:$0xff]  }
  0x2c   : > { %2143 = vmatpush3.bf16.msra.mxu1 %v2379_v26  ;;  %2275 = vmatpush3.bf16.msra.mxu0 %v2409_v35  ;;  %v2469_v26 = vld [vmem:[%s2596_s10 + $0x170] ss:$20 sps:$4 sm:$0xff]   ;;  %v2480_v35 = vld [vmem:[%s2596_s10 + $0x128] ss:$20 sps:$4 sm:$0xff]  }
  0x2d   : > { %2144 = vmatprep.subr.bf16.mxu1 %v2386_v28  ;;  %2276 = vmatprep.subr.bf16.mxu0 %v2429_v47  ;;  %v2471_v28 = vld [vmem:[%s2596_s10 + $0x19c] ss:$20 sps:$4 sm:$0xff]  }
  0x2f   : > { %1095 = vmatmul.mubr.bf16.gmra.mrb[4].mxu0 %v2384_v27  ;;  %1191 = vmatmul.mubr.bf16.gmra.mrb[4].mxu1 %v2385_v29  ;;  %v2470_v27 = vld [vmem:[%s2596_s10 + $0x88] ss:$20 sps:$4 sm:$0xff]   ;;  %v2473_v29 = vld [vmem:[%s2596_s10 + $0xb0] ss:$20 sps:$4 sm:$0xff]  }
  0x30   : > { %2145 = vmatpush3.bf16.msra.mxu1 %v2387_v30  ;;  %1102 = vmatprep.mubr.bf16.mxu0 %v2390_v32  ;;  %v2474_v30 = vld [vmem:[%s2596_s10 + $0x198] ss:$20 sps:$4 sm:$0xff]  }
  0x31   : > { %2146 = vmatprep.subr.bf16.mxu1 %v2388_v31  ;;  %1198 = vmatprep.mubr.bf16.mxu1 %v2392_v33  ;;  %v2475_v31 = vld [vmem:[%s2596_s10 + $0xd8] ss:$20 sps:$4 sm:$0xff]   ;;  %v2478_v33 = vld [vmem:[%s2596_s10 + $0x100] ss:$20 sps:$4 sm:$0xff]  }
  0x32   : > { %2277 = vmatpush3.bf16.msra.mxu0 %v2429_v47  ;;  %v2476_v32 = vld [vmem:[%s2596_s10 + $0x1c4] ss:$20 sps:$4 sm:$0xff]  }
  0x33   : > { %2278 = vmatprep.subr.bf16.mxu0 %v2448_v56  ;;  %v2495_v47 = vld [vmem:[%s2596_s10 + $0x218] ss:$20 sps:$4 sm:$0xff]  }
  0x34   : > { %2147 = vmatpush3.bf16.msra.mxu1 %v2389_v34  ;;  %v2479_v34 = vld [vmem:[%s2596_s10 + $0x1c0] ss:$20 sps:$4 sm:$0xff]  }
  0x35   : > { %2148 = vmatprep.subr.bf16.mxu1 %v2396_v37  ;;  %v2483_v37 = vld [vmem:[%s2596_s10 + $0x150] ss:$20 sps:$4 sm:$0xff]  }
  0x36   : > { %2279 = vmatpush3.bf16.msra.mxu0 %v2448_v56 }
  0x37   : > { %1103 = vmatmul.mubr.bf16.gmra.mrb[8].mxu0 %v2394_v36  ;;  %1199 = vmatmul.mubr.bf16.gmra.mrb[8].mxu1 %v2395_v38  ;;  %v2481_v36 = vld [vmem:[%s2596_s10 + $0x1ec] ss:$20 sps:$4 sm:$0xff]   ;;  %v2484_v38 = vld [vmem:[%s2596_s10 + $0x1e8] ss:$20 sps:$4 sm:$0xff]  }
  0x38   : > { %2149 = vmatpush3.bf16.msra.mxu1 %v2397_v39  ;;  %1110 = vmatprep.mubr.bf16.mxu0 %v2400_v41  ;;  %v2485_v39 = vld [vmem:[%s2596_s10 + $0x178] ss:$20 sps:$4 sm:$0xff]   ;;  %v2488_v41 = vld [vmem:[%s2596_s10 + $0x1a0] ss:$20 sps:$4 sm:$0xff]  }
  0x39   : > { %2150 = vmatprep.subr.bf16.mxu1 %v2398_v40  ;;  %1206 = vmatprep.mubr.bf16.mxu1 %v2402_v42  ;;  %v2486_v40 = vld [vmem:[%s2596_s10 + $0x214] ss:$20 sps:$4 sm:$0xff]   ;;  %v2489_v42 = vld [vmem:[%s2596_s10 + $0x210] ss:$20 sps:$4 sm:$0xff]  }
  0x3c   : > { %2151 = vmatpush3.bf16.msra.mxu1 %v2399_v43  ;;  %v2490_v43 = vld [vmem:[%s2596_s10 + $0x1c8] ss:$20 sps:$4 sm:$0xff]  }
  0x3d   : > { %2152 = vmatprep.subr.bf16.mxu1 %v2406_v46  ;;  %v2494_v46 = vld [vmem:[%s2596_s10 + $0x238] ss:$20 sps:$4 sm:$0xff]  }
  0x3f   : > { %1111 = vmatmul.mubr.bf16.gmra.mrb[12].mxu0 %v2404_v44  ;;  %1207 = vmatmul.mubr.bf16.gmra.mrb[12].mxu1 %v2405_v45  ;;  %v2491_v44 = vld [vmem:[%s2596_s10 + $0x23c] ss:$20 sps:$4 sm:$0xff]  }
  0x40   : > { %2153 = vmatpush3.bf16.msra.mxu1 %v2407_v48  ;;  %1118 = vmatprep.mubr.bf16.mxu0 %v2411_v50  ;;  %v2493_v45 = vld [vmem:[%s2596_s10 + $0x1f0] ss:$20 sps:$4 sm:$0xff]   ;;  %v2499_v50 = vld [vmem:[%s2596_s10 + $0x260] ss:$20 sps:$4 sm:$0xff]  }
  0x41   : > { %2154 = vmatprep.subr.bf16.mxu1 %v2408_v49  ;;  %1247 = vmatprep.mubr.bf16.mxu1 %v2415_v51  ;;  %v2496_v48 = vld [vmem:[%s2596_s10 + $0x264] ss:$20 sps:$4 sm:$0xff]   ;;  %v2498_v49 = vld [vmem:[%s2596_s10 + $0x240] ss:$20 sps:$4 sm:$0xff]   ;;  %v2500_v51 = vld [vmem:[%s2596_s10 + $0x268] ss:$20 sps:$4 sm:$0xff]  }
  0x44   : > { %2155 = vmatpush3.bf16.msra.mxu1 %v2410_v52 }
  0x47   : > { %1119 = vmatmul.mubr.bf16.gmra.mrb[16].mxu0 %v2416_v54  ;;  %1248 = vmatmul.mubr.bf16.vlgmr.msra.gmra.mrb[16].mxu1 %v2413_v53 }
  0x48   : > { %1126 = vmatprep.mubr.bf16.mxu0 %v2417_v55  ;;  %1255 = vmatprep.mubr.bf16.mxu1 %v2419_v57 }
  0x4f   : > { %1127 = vmatmul.mubr.bf16.gmra.mrb[20].mxu0 %v2421_v58  ;;  %1256 = vmatmul.mubr.bf16.gmra.mrb[20].mxu1 %v2422_v59 }
  0x50   : > { %1134 = vmatprep.mubr.bf16.mxu0 %v2423_v60  ;;  %1263 = vmatprep.mubr.bf16.mxu1 %v2425_v61 }
  0x57   : > { %1135 = vmatmul.mubr.bf16.gmra.mrb[24].mxu0 %v2427_v62  ;;  %1264 = vmatmul.mubr.bf16.gmra.mrb[24].mxu1 %v2428_v63 }
  0x58   : > { %1142 = vmatprep.mubr.bf16.mxu0 %v2430_v0  ;;  %1271 = vmatprep.mubr.bf16.mxu1 %v2432_v1 }
  0x5f   : > { %1143 = vmatmul.mubr.bf16.gmra.mrb[28].mxu0 %v2434_v2  ;;  %1272 = vmatmul.mubr.bf16.gmra.mrb[28].mxu1 %v2435_v3 }
  0x60   : > { %1150 = vmatprep.mubr.bf16.mxu0 %v2436_v4  ;;  %1279 = vmatprep.mubr.bf16.mxu1 %v2438_v5 }
  0x67   : > { %1151 = vmatmul.mubr.bf16.gmra.mrb[32].mxu0 %v2440_v6  ;;  %1280 = vmatmul.mubr.bf16.gmra.mrb[32].mxu1 %v2441_v7 }
  0x68   : > { %1158 = vmatprep.mubr.bf16.mxu0 %v2442_v8  ;;  %1287 = vmatprep.mubr.bf16.mxu1 %v2444_v9 }
  0x6f   : > { %1159 = vmatmul.mubr.bf16.gmra.mrb[36].mxu0 %v2446_v10  ;;  %1288 = vmatmul.mubr.bf16.gmra.mrb[36].mxu1 %v2447_v11 }
  0x70   : > { %1166 = vmatprep.mubr.bf16.mxu0 %v2449_v12  ;;  %1295 = vmatprep.mubr.bf16.mxu1 %v2451_v13 }
  0x77   : > { %1167 = vmatmul.mubr.bf16.gmra.mrb[40].mxu0 %v2453_v14  ;;  %1296 = vmatmul.mubr.bf16.gmra.mrb[40].mxu1 %v2454_v15 }
  0x78   : > { %1174 = vmatprep.mubr.bf16.mxu0 %v2455_v16  ;;  %1303 = vmatprep.mubr.bf16.mxu1 %v2457_v17 }
  0x7f   : > { %1175 = vmatmul.mubr.bf16.gmra.mrb[44].mxu0 %v2459_v18  ;;  %1304 = vmatmul.mubr.bf16.gmra.mrb[44].mxu1 %v2460_v19 }
  0x80   : > { %1311 = vmatprep.mubr.bf16.mxu1 %v2461_v20  ;;  %2280 = vmatprep.mubr.msk.bf16.mxu0 %vm1005_vm0, %v2463_v21 }
  0x87   : > { %1312 = vmatmul.mubr.bf16.gmra.mrb[48].mxu1 %v2464_v22  ;;  %2281 = vmatmul.mubr.msk.bf16.vlgmr.msra.gmra.mrb[48].mxu0 %vm1005_vm0, %v2465_v23 }
  0x88   : > { %1319 = vmatprep.mubr.bf16.mxu1 %v2466_v24  ;;  %2284 = vmatprep.mubr.msk.bf16.mxu0 %vm1005_vm0, %v2468_v25 }
  0x8f   : > { %1320 = vmatmul.mubr.bf16.gmra.mrb[52].mxu1 %v2469_v26  ;;  %2285 = vmatmul.mubr.msk.bf16.gmra.mrb[52].mxu0 %vm1005_vm0, %v2470_v27 }
  0x90   : > { %1327 = vmatprep.mubr.bf16.mxu1 %v2471_v28  ;;  %2288 = vmatprep.mubr.msk.bf16.mxu0 %vm1005_vm0, %v2473_v29 }
  0x97   : > { %1328 = vmatmul.mubr.bf16.gmra.mrb[56].mxu1 %v2474_v30  ;;  %2289 = vmatmul.mubr.msk.bf16.gmra.mrb[56].mxu0 %vm1005_vm0, %v2475_v31 }
  0x98   : > { %1335 = vmatprep.mubr.bf16.mxu1 %v2476_v32  ;;  %2292 = vmatprep.mubr.msk.bf16.mxu0 %vm1005_vm0, %v2478_v33 }
  0x9f   : > { %1336 = vmatmul.mubr.bf16.gmra.mrb[60].mxu1 %v2479_v34  ;;  %2293 = vmatmul.mubr.msk.bf16.gmra.mrb[60].mxu0 %vm1005_vm0, %v2480_v35 }
  0xa0   : > { %1343 = vmatprep.mubr.bf16.mxu1 %v2481_v36  ;;  %2296 = vmatprep.mubr.msk.bf16.mxu0 %vm1005_vm0, %v2483_v37 }
  0xa7   : > { %1344 = vmatmul.mubr.bf16.gmra.mrb[64].mxu1 %v2484_v38  ;;  %2297 = vmatmul.mubr.msk.bf16.gmra.mrb[64].mxu0 %vm1005_vm0, %v2485_v39  ;;  %v2794_v38 = vld [vmem:[%s3004_s2] ss:$0 sm:$0xff] }
  0xa8   : > { %1351 = vmatprep.mubr.bf16.mxu1 %v2486_v40  ;;  %2300 = vmatprep.mubr.msk.bf16.mxu0 %vm1005_vm0, %v2488_v41 }
  0xaf   : > { %1352 = vmatmul.mubr.bf16.gmra.mrb[68].mxu1 %v2489_v42  ;;  %2301 = vmatmul.mubr.msk.bf16.gmra.mrb[68].mxu0 %vm1005_vm0, %v2490_v43 }
  0xb0   : > { %1359 = vmatprep.mubr.bf16.mxu1 %v2491_v44  ;;  %2304 = vmatprep.mubr.msk.bf16.mxu0 %vm1005_vm0, %v2493_v45 }
  0xb7   : > { %1360 = vmatmul.mubr.bf16.gmra.mrb[72].mxu1 %v2494_v46  ;;  %2305 = vmatmul.mubr.msk.bf16.gmra.mrb[72].mxu0 %vm1005_vm0, %v2495_v47 }
  0xb8   : > { %1367 = vmatprep.mubr.bf16.mxu1 %v2496_v48  ;;  %2308 = vmatprep.mubr.msk.bf16.mxu0 %vm1005_vm0, %v2498_v49 }
  0xbf   : > { %1368 = vmatmul.mubr.bf16.gmra.mrb[76].mxu1 %v2499_v50  ;;  %2309 = vmatmul.mubr.msk.bf16.gmra.mrb[76].mxu0 %vm1005_vm0, %v2500_v51 }
  0xfa   : > { %v2116_v52 = vpop.f32.mrb[0].mxu1  ;;  %v2044_v53 = vpop.f32.mrb[0].mxu0 }
  0xfb   : > { %v2117_v54 = vpop.f32.mrb[1].mxu1  ;;  %v2045_v55 = vpop.f32.mrb[1].mxu0 }
  0xfc   : > { %v2775_v56 = vadd.f32 %v2117_v54, %v2116_v52  ;;  %v2119_v57 = vpop.f32.mrb[2].mxu1  ;;  %v2046_v58 = vadd.f32 %v2045_v55, %v2044_v53  ;;  %v2047_v59 = vpop.f32.mrb[2].mxu0 }
  0xfd   : > { %v2120_v60 = vpop.f32.mrb[3].mxu1  ;;  %v2048_v61 = vpop.f32.mrb[3].mxu0 }
  0xfe   : > { %v2777_v62 = vadd.f32 %v2120_v60, %v2119_v57  ;;  %v2049_v63 = vadd.f32 %v2048_v61, %v2047_v59  ;;  %v1089_v41 = vadd.f32 %v2046_v58, %v2794_v38 }
 0x100   : > { %v1092_v48 = vadd.f32 %v2049_v63, %v2794_v38 }
 0x102   : > { %v2122_v0 = vpop.f32.mrb[4].mxu1  ;;  %v2050_v1 = vpop.f32.mrb[4].mxu0 }
 0x103   : > { %v2123_v2 = vpop.f32.mrb[5].mxu1  ;;  %v2051_v3 = vpop.f32.mrb[5].mxu0 }
 0x104   : > { %v2779_v4 = vadd.f32 %v2123_v2, %v2122_v0  ;;  %v2125_v5 = vpop.f32.mrb[6].mxu1  ;;  %v2052_v6 = vadd.f32 %v2051_v3, %v2050_v1  ;;  %v2053_v7 = vpop.f32.mrb[6].mxu0 }
 0x105   : > { %v2126_v8 = vpop.f32.mrb[7].mxu1  ;;  %v2054_v9 = vpop.f32.mrb[7].mxu0 }
 0x106   : > { %v2781_v10 = vadd.f32 %v2126_v8, %v2125_v5  ;;  %v2055_v11 = vadd.f32 %v2054_v9, %v2053_v7  ;;  %v1097_v58 = vadd.f32 %v2052_v6, %v2794_v38 }
 0x108   : > { %v1100_v63 = vadd.f32 %v2055_v11, %v2794_v38 }
 0x10a   : > { %v2128_v12 = vpop.f32.mrb[8].mxu1  ;;  %v2056_v13 = vpop.f32.mrb[8].mxu0 }
 0x10b   : > { %v2129_v14 = vpop.f32.mrb[9].mxu1  ;;  %v2057_v15 = vpop.f32.mrb[9].mxu0 }
 0x10c   : > { %v2783_v16 = vadd.f32 %v2129_v14, %v2128_v12  ;;  %v2131_v17 = vpop.f32.mrb[10].mxu1  ;;  %v2058_v18 = vadd.f32 %v2057_v15, %v2056_v13  ;;  %v2059_v19 = vpop.f32.mrb[10].mxu0 }
 0x10d   : > { %v2132_v20 = vpop.f32.mrb[11].mxu1  ;;  %v2060_v21 = vpop.f32.mrb[11].mxu0 }
 0x10e   : > { %v2785_v22 = vadd.f32 %v2132_v20, %v2131_v17  ;;  %v2061_v23 = vadd.f32 %v2060_v21, %v2059_v19  ;;  %v1105_v6 = vadd.f32 %v2058_v18, %v2794_v38 }
 0x110   : > { %v1108_v11 = vadd.f32 %v2061_v23, %v2794_v38 }
 0x112   : > { %v2134_v24 = vpop.f32.mrb[12].mxu1  ;;  %v2062_v25 = vpop.f32.mrb[12].mxu0 }
 0x113   : > { %v2135_v26 = vpop.f32.mrb[13].mxu1  ;;  %v2063_v27 = vpop.f32.mrb[13].mxu0 }
 0x114   : > { %v2787_v28 = vadd.f32 %v2135_v26, %v2134_v24  ;;  %v2137_v29 = vpop.f32.mrb[14].mxu1  ;;  %v2064_v30 = vadd.f32 %v2063_v27, %v2062_v25  ;;  %v2065_v31 = vpop.f32.mrb[14].mxu0 }
 0x115   : > { %v2138_v32 = vpop.f32.mrb[15].mxu1  ;;  %v2066_v33 = vpop.f32.mrb[15].mxu0 }
 0x116   : > { %v2789_v34 = vadd.f32 %v2138_v32, %v2137_v29  ;;  %v2067_v35 = vadd.f32 %v2066_v33, %v2065_v31  ;;  %v1113_v18 = vadd.f32 %v2064_v30, %v2794_v38 }
 0x118   : > { %v1116_v23 = vadd.f32 %v2067_v35, %v2794_v38 }
 0x11a   : > { %v2156_v36 = vpop.f32.mrb[16].mxu1  ;;  %v2068_v37 = vpop.f32.mrb[16].mxu0 }
 0x11b   : > { %v2157_v39 = vpop.f32.mrb[17].mxu1  ;;  %v2069_v40 = vpop.f32.mrb[17].mxu0 }
 0x11c   : > { %v2158_v42 = vadd.f32 %v2157_v39, %v2156_v36  ;;  %v2159_v43 = vpop.f32.mrb[18].mxu1  ;;  %v2070_v44 = vadd.f32 %v2069_v40, %v2068_v37  ;;  %v2071_v45 = vpop.f32.mrb[18].mxu0 }
 0x11d   : > { %v2160_v46 = vpop.f32.mrb[19].mxu1  ;;  %v2072_v47 = vpop.f32.mrb[19].mxu0 }
 0x11e   : > { %v2161_v49 = vadd.f32 %v2160_v46, %v2159_v43  ;;  %v2073_v50 = vadd.f32 %v2072_v47, %v2071_v45  ;;  %v2798_v51 = vadd.f32 %v2158_v42, %v1089_v41  ;;  %v1121_v30 = vadd.f32 %v2070_v44, %v2794_v38 }
 0x120   : > { %v2800_v52 = vadd.f32 %v2161_v49, %v1092_v48  ;;  %v1124_v35 = vadd.f32 %v2073_v50, %v2794_v38 }
 0x122   : > { %v2162_v53 = vpop.f32.mrb[20].mxu1  ;;  %v2074_v54 = vpop.f32.mrb[20].mxu0 }
 0x123   : > { %v2163_v55 = vpop.f32.mrb[21].mxu1  ;;  %v2075_v57 = vpop.f32.mrb[21].mxu0 }
 0x124   : > { %v2164_v59 = vadd.f32 %v2163_v55, %v2162_v53  ;;  %v2165_v60 = vpop.f32.mrb[22].mxu1  ;;  %v2076_v61 = vadd.f32 %v2075_v57, %v2074_v54  ;;  %v2077_v0 = vpop.f32.mrb[22].mxu0 }
 0x125   : > { %v2166_v1 = vpop.f32.mrb[23].mxu1  ;;  %v2078_v2 = vpop.f32.mrb[23].mxu0 }
 0x126   : > { %v2167_v3 = vadd.f32 %v2166_v1, %v2165_v60  ;;  %v2079_v5 = vadd.f32 %v2078_v2, %v2077_v0  ;;  %v2804_v7 = vadd.f32 %v2164_v59, %v1097_v58  ;;  %v1129_v44 = vadd.f32 %v2076_v61, %v2794_v38 }
 0x128   : > { %v2806_v8 = vadd.f32 %v2167_v3, %v1100_v63  ;;  %v1132_v50 = vadd.f32 %v2079_v5, %v2794_v38 }
 0x12a   : > { %v2168_v9 = vpop.f32.mrb[24].mxu1  ;;  %v2080_v12 = vpop.f32.mrb[24].mxu0 }
 0x12b   : > { %v2169_v13 = vpop.f32.mrb[25].mxu1  ;;  %v2081_v14 = vpop.f32.mrb[25].mxu0 }
 0x12c   : > { %v2170_v15 = vadd.f32 %v2169_v13, %v2168_v9  ;;  %v2171_v17 = vpop.f32.mrb[26].mxu1  ;;  %v2082_v19 = vadd.f32 %v2081_v14, %v2080_v12  ;;  %v2083_v20 = vpop.f32.mrb[26].mxu0 }
 0x12d   : > { %v2172_v21 = vpop.f32.mrb[27].mxu1  ;;  %v2084_v24 = vpop.f32.mrb[27].mxu0 }
 0x12e   : > { %v2173_v25 = vadd.f32 %v2172_v21, %v2171_v17  ;;  %v2085_v26 = vadd.f32 %v2084_v24, %v2083_v20  ;;  %v2810_v27 = vadd.f32 %v2170_v15, %v1105_v6 }
 0x130   : > { %v2812_v29 = vadd.f32 %v2173_v25, %v1108_v11 }
 0x132   : > { %v2174_v31 = vpop.f32.mrb[28].mxu1  ;;  %v2086_v32 = vpop.f32.mrb[28].mxu0 }
 0x133   : > { %v2175_v33 = vpop.f32.mrb[29].mxu1  ;;  %v2087_v36 = vpop.f32.mrb[29].mxu0 }
 0x134   : > { %v2176_v37 = vadd.f32 %v2175_v33, %v2174_v31  ;;  %v2177_v39 = vpop.f32.mrb[30].mxu1  ;;  %v2088_v40 = vadd.f32 %v2087_v36, %v2086_v32  ;;  %v2089_v41 = vpop.f32.mrb[30].mxu0 }
 0x135   : > { %v2178_v42 = vpop.f32.mrb[31].mxu1  ;;  %v2090_v43 = vpop.f32.mrb[31].mxu0 }
 0x136   : > { %v2179_v45 = vadd.f32 %v2178_v42, %v2177_v39  ;;  %v2091_v46 = vadd.f32 %v2090_v43, %v2089_v41  ;;  %v2816_v47 = vadd.f32 %v2176_v37, %v1113_v18  ;;  %v1137_v39 = vadd.f32 %v2082_v19, %v2794_v38 }
 0x138   : > { %v2818_v48 = vadd.f32 %v2179_v45, %v1116_v23 }
 0x13a   : > { %v2180_v49 = vpop.f32.mrb[32].mxu1  ;;  %v2092_v53 = vpop.f32.mrb[32].mxu0 }
 0x13b   : > { %v2181_v54 = vpop.f32.mrb[33].mxu1  ;;  %v2093_v55 = vpop.f32.mrb[33].mxu0 }
 0x13c   : > { %v2182_v57 = vadd.f32 %v2181_v54, %v2180_v49  ;;  %v2183_v58 = vpop.f32.mrb[34].mxu1  ;;  %v2821_v59 = vadd.f32 %v2093_v55, %v2092_v53  ;;  %v2095_v60 = vpop.f32.mrb[34].mxu0  ;;  %v1140_v49 = vadd.f32 %v2085_v26, %v2794_v38 }
 0x13d   : > { %v2184_v0 = vpop.f32.mrb[35].mxu1  ;;  %v2096_v1 = vpop.f32.mrb[35].mxu0 }
 0x13e   : > { %v2185_v2 = vadd.f32 %v2184_v0, %v2183_v58  ;;  %v2097_v63 = vadd.f32 %v2096_v1, %v2095_v60  ;;  %v2824_v3 = vadd.f32 %v2182_v57, %v1121_v30  ;;  %v1145_v0 = vadd.f32 %v2088_v40, %v2794_v38 }
 0x140   : > { %v2826_v9 = vadd.f32 %v2185_v2, %v1124_v35 }
 0x142   : > { %v2186_v12 = vpop.f32.mrb[36].mxu1  ;;  %v2098_v13 = vpop.f32.mrb[36].mxu0 }
 0x143   : > { %v2187_v14 = vpop.f32.mrb[37].mxu1  ;;  %v2099_v6 = vpop.f32.mrb[37].mxu0 }
 0x144   : > { %v2188_v15 = vadd.f32 %v2187_v14, %v2186_v12  ;;  %v2189_v17 = vpop.f32.mrb[38].mxu1  ;;  %v2829_v20 = vadd.f32 %v2099_v6, %v2098_v13  ;;  %v2101_v21 = vpop.f32.mrb[38].mxu0  ;;  %v1148_v14 = vadd.f32 %v2091_v46, %v2794_v38 }
 0x145   : > { %v2190_v24 = vpop.f32.mrb[39].mxu1  ;;  %v2102_v11 = vpop.f32.mrb[39].mxu0 }
 0x146   : > { %v2191_v25 = vadd.f32 %v2190_v24, %v2189_v17  ;;  %v2832_v31 = vadd.f32 %v2102_v11, %v2101_v21  ;;  %v2834_v32 = vadd.f32 %v2188_v15, %v1129_v44 }
 0x148   : > { %v2836_v33 = vadd.f32 %v2191_v25, %v1132_v50  ;;  %v1153_v25 = vadd.f32 %v2821_v59, %v2794_v38 }
 0x14a   : > { %v2192_v36 = vpop.f32.mrb[40].mxu1  ;;  %v2104_v18 = vpop.f32.mrb[40].mxu0 }
 0x14b   : > { %v2193_v37 = vpop.f32.mrb[41].mxu1  ;;  %v2105_v61 = vpop.f32.mrb[41].mxu0 }
 0x14c   : > { %v2194_v41 = vadd.f32 %v2193_v37, %v2192_v36  ;;  %v2195_v42 = vpop.f32.mrb[42].mxu1  ;;  %v2839_v43 = vadd.f32 %v2105_v61, %v2104_v18  ;;  %v2107_v23 = vpop.f32.mrb[42].mxu0  ;;  %v1156_v61 = vadd.f32 %v2097_v63, %v2794_v38 }
 0x14d   : > { %v2196_v45 = vpop.f32.mrb[43].mxu1  ;;  %v2108_v5 = vpop.f32.mrb[43].mxu0 }
 0x14e   : > { %v2197_v53 = vadd.f32 %v2196_v45, %v2195_v42  ;;  %v2842_v54 = vadd.f32 %v2108_v5, %v2107_v23  ;;  %v2844_v55 = vadd.f32 %v2194_v41, %v1137_v39 }
 0x150   : > { %v2846_v30 = vadd.f32 %v2197_v53, %v1140_v49 }
 0x152   : > { %v2198_v57 = vpop.f32.mrb[44].mxu1  ;;  %v2110_v58 = vpop.f32.mrb[44].mxu0 }
 0x153   : > { %v2199_v60 = vpop.f32.mrb[45].mxu1  ;;  %v2111_v19 = vpop.f32.mrb[45].mxu0 }
 0x154   : > { %v2200_v1 = vadd.f32 %v2199_v60, %v2198_v57  ;;  %v2201_v35 = vpop.f32.mrb[46].mxu1  ;;  %v2849_v2 = vadd.f32 %v2111_v19, %v2110_v58  ;;  %v2113_v12 = vpop.f32.mrb[46].mxu0 }
 0x155   : > { %v2202_v26 = vpop.f32.mrb[47].mxu1  ;;  %v2114_v13 = vpop.f32.mrb[47].mxu0 }
 0x156   : > { %v2203_v6 = vadd.f32 %v2202_v26, %v2201_v35  ;;  %v2852_v44 = vadd.f32 %v2114_v13, %v2113_v12  ;;  %v2854_v15 = vadd.f32 %v2200_v1, %v1145_v0  ;;  %v1161_v35 = vadd.f32 %v2829_v20, %v2794_v38 }
 0x158   : > { %v2856_v17 = vadd.f32 %v2203_v6, %v1148_v14  ;;  %v1164_v6 = vadd.f32 %v2832_v31, %v2794_v38 }
 0x15a   : > { %v2204_v21 = vpop.f32.mrb[48].mxu1  ;;  %v2282_v24 = vpop.f32.mrb[48].mxu0 }
 0x15b   : > { %v1419_v40 = vadd.f32 %v2282_v24, %v2804_v7  ;;  %v2205_v11 = vpop.f32.mrb[49].mxu1  ;;  %v1410_v50 = vpop.f32.mrb[49].mxu0 }
 0x15c   : > { %v2206_v36 = vadd.f32 %v2205_v11, %v2204_v21  ;;  %v1411_v46 = vadd.f32 %v1410_v50, %v2798_v51  ;;  %v2207_v18 = vpop.f32.mrb[50].mxu1  ;;  %v2283_v37 = vpop.f32.mrb[50].mxu0 }
 0x15d   : > { %v1539_v39 = vmax.f32 %v1419_v40, 0.0  ;;  %v1422_v41 = vadd.f32 %v2283_v37, %v2806_v8  ;;  %v2208_v42 = vpop.f32.mrb[51].mxu1  ;;  %v1413_v23 = vpop.f32.mrb[51].mxu0 }
 0x15e   : > { %v1537_v7 = vmax.f32 %v1411_v46, 0.0  ;;  %v2209_v51 = vadd.f32 %v2208_v42, %v2207_v18  ;;  %v1414_v59 = vadd.f32 %v1413_v23, %v2800_v52  ;;  %v2871_v45 = vadd.f32 %v2206_v36, %v1153_v25 }
 0x15f   : > { %v1998_v63 = vpack.c.bf16 %v1539_v39, %v1539_v39  ;;  %v1540_v5 = vmax.f32 %v1422_v41, 0.0  ;;  %v1169_v23 = vadd.f32 %v2839_v43, %v2794_v38 }
 0x160   : > { %v1996_v8 = vpack.c.bf16 %v1537_v7, %v1537_v7  ;;  %v1538_v49 = vmax.f32 %v1414_v59, 0.0  ;;  %v2873_v53 = vadd.f32 %v2209_v51, %v1156_v61 }
 0x161   : > { %1700 = vst.msk [vmem:[%s2868_s28 + $0x8] sm:$0xf] %vm1697_vm1, %v1998_v63  ;;  %v1999_v57 = vpack.c.bf16 %v1540_v5, %v1540_v5  ;;  %v1172_v5 = vadd.f32 %v2842_v54, %v2794_v38 }
 0x162   : > { %1698 = vst.msk [vmem:[%s2868_s28] sm:$0xf] %vm1697_vm1, %v1996_v8  ;;  %v1997_v58 = vpack.c.bf16 %v1538_v49, %v1538_v49  ;;  %v2210_v60 = vpop.f32.mrb[52].mxu1  ;;  %v2286_v19 = vpop.f32.mrb[52].mxu0 }
 0x163   : > { %1701 = vst.msk [vmem:[%s2868_s28 + $0xc] sm:$0xf] %vm1697_vm1, %v1999_v57  ;;  %v1435_v52 = vadd.f32 %v2286_v19, %v2816_v47  ;;  %v2211_v0 = vpop.f32.mrb[53].mxu1  ;;  %v1426_v1 = vpop.f32.mrb[53].mxu0 }
 0x164   : > { %1699 = vst.msk [vmem:[%s2868_s28 + $0x4] sm:$0xf] %vm1697_vm1, %v1997_v58  ;;  %v2212_v12 = vadd.f32 %v2211_v0, %v2210_v60  ;;  %v1427_v26 = vadd.f32 %v1426_v1, %v2810_v27  ;;  %v2213_v13 = vpop.f32.mrb[54].mxu1  ;;  %v2287_v14 = vpop.f32.mrb[54].mxu0 }
 0x165   : > { %v1543_v21 = vmax.f32 %v1435_v52, 0.0  ;;  %v1438_v47 = vadd.f32 %v2287_v14, %v2818_v48  ;;  %v2214_v24 = vpop.f32.mrb[55].mxu1  ;;  %v1429_v40 = vpop.f32.mrb[55].mxu0 }
 0x166   : > { %v1541_v11 = vmax.f32 %v1427_v26, 0.0  ;;  %v2215_v20 = vadd.f32 %v2214_v24, %v2213_v13  ;;  %v1430_v50 = vadd.f32 %v1429_v40, %v2812_v29  ;;  %v2891_v25 = vadd.f32 %v2212_v12, %v1161_v35 }
 0x167   : > { %v2002_v27 = vpack.c.bf16 %v1543_v21, %v1543_v21  ;;  %v1544_v36 = vmax.f32 %v1438_v47, 0.0 }
 0x168   : > { %v2000_v46 = vpack.c.bf16 %v1541_v11, %v1541_v11  ;;  %v1542_v18 = vmax.f32 %v1430_v50, 0.0  ;;  %v2893_v37 = vadd.f32 %v2215_v20, %v1164_v6  ;;  %v1177_v6 = vadd.f32 %v2849_v2, %v2794_v38 }
 0x169   : > { %1704 = vst.msk [vmem:[%s2868_s28 + $0x18] sm:$0xf] %vm1697_vm1, %v2002_v27  ;;  %v2003_v31 = vpack.c.bf16 %v1544_v36, %v1544_v36  ;;  %v1180_v11 = vadd.f32 %v2852_v44, %v2794_v38 }
 0x16a   : > { %1702 = vst.msk [vmem:[%s2868_s28 + $0x10] sm:$0xf] %vm1697_vm1, %v2000_v46  ;;  %v2001_v48 = vpack.c.bf16 %v1542_v18, %v1542_v18  ;;  %v2216_v61 = vpop.f32.mrb[56].mxu1  ;;  %v2290_v39 = vpop.f32.mrb[56].mxu0 }
 0x16b   : > { %1705 = vst.msk [vmem:[%s2868_s28 + $0x1c] sm:$0xf] %vm1697_vm1, %v2003_v31  ;;  %v1451_v29 = vadd.f32 %v2290_v39, %v2834_v32  ;;  %v2217_v41 = vpop.f32.mrb[57].mxu1  ;;  %v1442_v42 = vpop.f32.mrb[57].mxu0 }
 0x16c   : > { %1703 = vst.msk [vmem:[%s2868_s28 + $0x14] sm:$0xf] %vm1697_vm1, %v2001_v48  ;;  %v2218_v7 = vadd.f32 %v2217_v41, %v2216_v61  ;;  %v1443_v51 = vadd.f32 %v1442_v42, %v2824_v3  ;;  %v2219_v59 = vpop.f32.mrb[58].mxu1  ;;  %v2291_v63 = vpop.f32.mrb[58].mxu0 }
 0x16d   : > { %v1547_v8 = vmax.f32 %v1451_v29, 0.0  ;;  %v1454_v32 = vadd.f32 %v2291_v63, %v2836_v33  ;;  %v2220_v49 = vpop.f32.mrb[59].mxu1  ;;  %v1445_v57 = vpop.f32.mrb[59].mxu0 }
 0x16e   : > { %v1545_v58 = vmax.f32 %v1443_v51, 0.0  ;;  %v2221_v43 = vadd.f32 %v2220_v49, %v2219_v59  ;;  %v1446_v60 = vadd.f32 %v1445_v57, %v2826_v9  ;;  %v2911_v19 = vadd.f32 %v2218_v7, %v1169_v23 }
 0x16f   : > { %v2006_v3 = vpack.c.bf16 %v1547_v8, %v1547_v8  ;;  %v1548_v52 = vmax.f32 %v1454_v32, 0.0  ;;  %v1185_v7 = vadd.f32 %v2775_v56, %v2794_v38  ;;  %v1188_v8 = vadd.f32 %v2777_v62, %v2794_v38 }
 0x170   : > { %v2004_v0 = vpack.c.bf16 %v1545_v58, %v1545_v58  ;;  %v1546_v1 = vmax.f32 %v1446_v60, 0.0  ;;  %v2913_v35 = vadd.f32 %v2221_v43, %v1172_v5 }
 0x171   : > { %1708 = vst.msk [vmem:[%s2868_s28 + $0x28] sm:$0xf] %vm1697_vm1, %v2006_v3  ;;  %v2007_v54 = vpack.c.bf16 %v1548_v52, %v1548_v52 }
 0x172   : > { %1706 = vst.msk [vmem:[%s2868_s28 + $0x20] sm:$0xf] %vm1697_vm1, %v2004_v0  ;;  %v2005_v33 = vpack.c.bf16 %v1546_v1, %v1546_v1  ;;  %v2222_v12 = vpop.f32.mrb[60].mxu1  ;;  %v2294_v26 = vpop.f32.mrb[60].mxu0 }
 0x173   : > { %1709 = vst.msk [vmem:[%s2868_s28 + $0x2c] sm:$0xf] %vm1697_vm1, %v2007_v54  ;;  %v1467_v9 = vadd.f32 %v2294_v26, %v2854_v15  ;;  %v2223_v13 = vpop.f32.mrb[61].mxu1  ;;  %v1458_v14 = vpop.f32.mrb[61].mxu0 }
 0x174   : > { %1707 = vst.msk [vmem:[%s2868_s28 + $0x24] sm:$0xf] %vm1697_vm1, %v2005_v33  ;;  %v2224_v21 = vadd.f32 %v2223_v13, %v2222_v12  ;;  %v1459_v47 = vadd.f32 %v1458_v14, %v2844_v55  ;;  %v2225_v24 = vpop.f32.mrb[62].mxu1  ;;  %v2295_v40 = vpop.f32.mrb[62].mxu0 }
 0x175   : > { %v1551_v20 = vmax.f32 %v1467_v9, 0.0  ;;  %v1470_v15 = vadd.f32 %v2295_v40, %v2856_v17  ;;  %v2226_v50 = vpop.f32.mrb[63].mxu1  ;;  %v1461_v27 = vpop.f32.mrb[63].mxu0  ;;  %v1193_v9 = vadd.f32 %v2779_v4, %v2794_v38 }
 0x176   : > { %v1549_v36 = vmax.f32 %v1459_v47, 0.0  ;;  %v2227_v2 = vadd.f32 %v2226_v50, %v2225_v24  ;;  %v1462_v46 = vadd.f32 %v1461_v27, %v2846_v30  ;;  %v1338_v18 = vadd.f32 %v2224_v21, %v1177_v6 }
 0x177   : > { %v2010_v31 = vpack.c.bf16 %v1551_v20, %v1551_v20  ;;  %v1552_v55 = vmax.f32 %v1470_v15, 0.0  ;;  %v1196_v47 = vadd.f32 %v2781_v10, %v2794_v38 }
 0x178   : > { %v2008_v48 = vpack.c.bf16 %v1549_v36, %v1549_v36  ;;  %v1550_v61 = vmax.f32 %v1462_v46, 0.0  ;;  %v1341_v39 = vadd.f32 %v2227_v2, %v1180_v11 }
 0x179   : > { %1712 = vst.msk [vmem:[%s2868_s28 + $0x38] sm:$0xf] %vm1697_vm1, %v2010_v31  ;;  %v2011_v44 = vpack.c.bf16 %v1552_v55, %v1552_v55 }
 0x17a   : > { %1710 = vst.msk [vmem:[%s2868_s28 + $0x30] sm:$0xf] %vm1697_vm1, %v2008_v48  ;;  %v2009_v17 = vpack.c.bf16 %v1550_v61, %v1550_v61  ;;  %v2228_v29 = vpop.f32.mrb[64].mxu1  ;;  %v2298_v41 = vpop.f32.mrb[64].mxu0 }
 0x17b   : > { %1713 = vst.msk [vmem:[%s2868_s28 + $0x3c] sm:$0xf] %vm1697_vm1, %v2011_v44  ;;  %v1483_v42 = vadd.f32 %v2298_v41, %v2891_v25  ;;  %v2229_v30 = vpop.f32.mrb[65].mxu1  ;;  %v1474_v23 = vpop.f32.mrb[65].mxu0  ;;  %v1201_v44 = vadd.f32 %v2783_v16, %v2794_v38 }
 0x17c   : > { %1711 = vst.msk [vmem:[%s2868_s28 + $0x34] sm:$0xf] %vm1697_vm1, %v2009_v17  ;;  %v2230_v51 = vadd.f32 %v2229_v30, %v2228_v29  ;;  %v1475_v59 = vadd.f32 %v1474_v23, %v2871_v45  ;;  %v2231_v63 = vpop.f32.mrb[66].mxu1  ;;  %v2299_v5 = vpop.f32.mrb[66].mxu0  ;;  %v1204_v30 = vadd.f32 %v2785_v22, %v2794_v38 }
 0x17d   : > { %v1555_v32 = vmax.f32 %v1483_v42, 0.0  ;;  %v1486_v25 = vadd.f32 %v2299_v5, %v2893_v37  ;;  %v2232_v49 = vpop.f32.mrb[67].mxu1  ;;  %v1477_v57 = vpop.f32.mrb[67].mxu0 }
 0x17e   : > { %v1553_v58 = vmax.f32 %v1475_v59, 0.0  ;;  %v2233_v56 = vadd.f32 %v2232_v49, %v2231_v63  ;;  %v1478_v43 = vadd.f32 %v1477_v57, %v2873_v53  ;;  %v1346_v60 = vadd.f32 %v2230_v51, %v1185_v7 }
 0x17f   : > { %v2014_v3 = vpack.c.bf16 %v1555_v32, %v1555_v32  ;;  %v1556_v45 = vmax.f32 %v1486_v25, 0.0 }
 0x180   : > { %v2012_v52 = vpack.c.bf16 %v1553_v58, %v1553_v58  ;;  %v1554_v0 = vmax.f32 %v1478_v43, 0.0  ;;  %v1349_v1 = vadd.f32 %v2233_v56, %v1188_v8 }
 0x181   : > { %1716 = vst.msk [vmem:[%s2868_s28 + $0x48] sm:$0xf] %vm1697_vm1, %v2014_v3  ;;  %v2015_v62 = vpack.c.bf16 %v1556_v45, %v1556_v45 }
 0x182   : > { %1714 = vst.msk [vmem:[%s2868_s28 + $0x40] sm:$0xf] %vm1697_vm1, %v2012_v52  ;;  %v2013_v37 = vpack.c.bf16 %v1554_v0, %v1554_v0  ;;  %v2234_v54 = vpop.f32.mrb[68].mxu1  ;;  %v2302_v33 = vpop.f32.mrb[68].mxu0  ;;  %v1209_v52 = vadd.f32 %v2787_v28, %v2794_v38 }
 0x183   : > { %1717 = vst.msk [vmem:[%s2868_s28 + $0x4c] sm:$0xf] %vm1697_vm1, %v2015_v62  ;;  %v1499_v12 = vadd.f32 %v2302_v33, %v1338_v18  ;;  %v2235_v26 = vpop.f32.mrb[69].mxu1  ;;  %v1490_v53 = vpop.f32.mrb[69].mxu0 }
 0x184   : > { %1715 = vst.msk [vmem:[%s2868_s28 + $0x44] sm:$0xf] %vm1697_vm1, %v2013_v37  ;;  %v2236_v13 = vadd.f32 %v2235_v26, %v2234_v54  ;;  %v1491_v14 = vadd.f32 %v1490_v53, %v2911_v19  ;;  %v2237_v6 = vpop.f32.mrb[70].mxu1  ;;  %v2303_v21 = vpop.f32.mrb[70].mxu0  ;;  %v1212_v54 = vadd.f32 %v2789_v34, %v2794_v38 }
 0x185   : > { %v1559_v24 = vmax.f32 %v1499_v12, 0.0  ;;  %v1502_v40 = vadd.f32 %v2303_v21, %v1341_v39  ;;  %v2238_v11 = vpop.f32.mrb[71].mxu1  ;;  %v1493_v20 = vpop.f32.mrb[71].mxu0 }
 0x186   : > { %v1557_v15 = vmax.f32 %v1491_v14, 0.0  ;;  %v2239_v50 = vadd.f32 %v2238_v11, %v2237_v6  ;;  %v1494_v4 = vadd.f32 %v1493_v20, %v2913_v35  ;;  %v1354_v27 = vadd.f32 %v2236_v13, %v1193_v9 }
 0x187   : > { %v2018_v36 = vpack.c.bf16 %v1559_v24, %v1559_v24  ;;  %v1560_v19 = vmax.f32 %v1502_v40, 0.0 }
 0x188   : > { %v2016_v2 = vpack.c.bf16 %v1557_v15, %v1557_v15  ;;  %v1558_v46 = vmax.f32 %v1494_v4, 0.0  ;;  %v1357_v18 = vadd.f32 %v2239_v50, %v1196_v47 }
 0x189   : > { %1720 = vst.msk [vmem:[%s2868_s28 + $0x58] sm:$0xf] %vm1697_vm1, %v2018_v36  ;;  %v2019_v10 = vpack.c.bf16 %v1560_v19, %v1560_v19 }
 0x18a   : > { %1718 = vst.msk [vmem:[%s2868_s28 + $0x50] sm:$0xf] %vm1697_vm1, %v2016_v2  ;;  %v2017_v31 = vpack.c.bf16 %v1558_v46, %v1558_v46  ;;  %v2240_v55 = vpop.f32.mrb[72].mxu1  ;;  %v2306_v48 = vpop.f32.mrb[72].mxu0 }
 0x18b   : > { %1721 = vst.msk [vmem:[%s2868_s28 + $0x5c] sm:$0xf] %vm1697_vm1, %v2019_v10  ;;  %v1515_v61 = vadd.f32 %v2306_v48, %v1354_v27  ;;  %v2241_v39 = vpop.f32.mrb[73].mxu1  ;;  %v1506_v35 = vpop.f32.mrb[73].mxu0 }
 0x18c   : > { %1719 = vst.msk [vmem:[%s2868_s28 + $0x54] sm:$0xf] %vm1697_vm1, %v2017_v31  ;;  %v2242_v17 = vadd.f32 %v2241_v39, %v2240_v55  ;;  %v1507_v29 = vadd.f32 %v1506_v35, %v1346_v60  ;;  %v2243_v41 = vpop.f32.mrb[74].mxu1  ;;  %v2307_v42 = vpop.f32.mrb[74].mxu0 }
 0x18d   : > { %v1563_v23 = vmax.f32 %v1515_v61, 0.0  ;;  %v1518_v7 = vadd.f32 %v2307_v42, %v1357_v18  ;;  %v2244_v51 = vpop.f32.mrb[75].mxu1  ;;  %v1509_v59 = vpop.f32.mrb[75].mxu0 }
 0x18e   : > { %v1561_v63 = vmax.f32 %v1507_v29, 0.0  ;;  %v2245_v5 = vadd.f32 %v2244_v51, %v2243_v41  ;;  %v1510_v8 = vadd.f32 %v1509_v59, %v1349_v1  ;;  %v1362_v16 = vadd.f32 %v2242_v17, %v1201_v44 }
 0x18f   : > { %v2022_v32 = vpack.c.bf16 %v1563_v23, %v1563_v23  ;;  %v1564_v25 = vmax.f32 %v1518_v7, 0.0 }
 0x190   : > { %v2020_v49 = vpack.c.bf16 %v1561_v63, %v1561_v63  ;;  %v1562_v57 = vmax.f32 %v1510_v8, 0.0  ;;  %v1365_v58 = vadd.f32 %v2245_v5, %v1204_v30 }
 0x191   : > { %1724 = vst.msk [vmem:[%s2868_s28 + $0x68] sm:$0xf] %vm1697_vm1, %v2022_v32  ;;  %v2023_v56 = vpack.c.bf16 %v1564_v25, %v1564_v25 }
 0x192   : > { %1722 = vst.msk [vmem:[%s2868_s28 + $0x60] sm:$0xf] %vm1697_vm1, %v2020_v49  ;;  %v2021_v22 = vpack.c.bf16 %v1562_v57, %v1562_v57  ;;  %v2246_v43 = vpop.f32.mrb[76].mxu1  ;;  %v2310_v60 = vpop.f32.mrb[76].mxu0 }
 0x193   : > { %1725 = vst.msk [vmem:[%s2868_s28 + $0x6c] sm:$0xf] %vm1697_vm1, %v2023_v56  ;;  %v2247_v3 = vpop.f32.mrb[77].mxu1  ;;  %v1522_v45 = vpop.f32.mrb[77].mxu0 }
 0x194   : > { %1723 = vst.msk [vmem:[%s2868_s28 + $0x64] sm:$0xf] %vm1697_vm1, %v2021_v22  ;;  %v2248_v0 = vadd.f32 %v2247_v3, %v2246_v43  ;;  %v1523_v1 = vadd.f32 %v1522_v45, %v1362_v16  ;;  %v2249_v62 = vpop.f32.mrb[78].mxu1  ;;  %v2311_v37 = vpop.f32.mrb[78].mxu0 }
 0x195   : > { %v2250_v33 = vpop.f32.mrb[79].mxu1  ;;  %v1525_v12 = vpop.f32.mrb[79].mxu0 }
 0x196   : > { %v1370_v26 = vadd.f32 %v2248_v0, %v1209_v52  ;;  %v1565_v53 = vmax.f32 %v1523_v1, 0.0  ;;  %v2251_v9 = vadd.f32 %v2250_v33, %v2249_v62  ;;  %v1526_v13 = vadd.f32 %v1525_v12, %v1365_v58 }
 0x198   : > { %v1531_v28 = vadd.f32 %v2310_v60, %v1370_v26  ;;  %v2024_v14 = vpack.c.bf16 %v1565_v53, %v1565_v53  ;;  %v1373_v6 = vadd.f32 %v2251_v9, %v1212_v54  ;;  %v1566_v21 = vmax.f32 %v1526_v13, 0.0 }
 0x19a   : > { %v1567_v47 = vmax.f32 %v1531_v28, 0.0  ;;  %1726 = vst.msk [vmem:[%s2868_s28 + $0x70] sm:$0xf] %vm1697_vm1, %v2024_v14  ;;  %v1534_v24 = vadd.f32 %v2311_v37, %v1373_v6  ;;  %v2025_v40 = vpack.c.bf16 %v1566_v21, %v1566_v21 }
 0x19c   : > { %v2026_v11 = vpack.c.bf16 %v1567_v47, %v1567_v47  ;;  %v1568_v34 = vmax.f32 %v1534_v24, 0.0  ;;  %1727 = vst.msk [vmem:[%s2868_s28 + $0x74] sm:$0xf] %vm1697_vm1, %v2025_v40 }
 0x19e   : > { %1728 = vst.msk [vmem:[%s2868_s28 + $0x78] sm:$0xf] %vm1697_vm1, %v2026_v11  ;;  %v2027_v38 = vpack.c.bf16 %v1568_v34, %v1568_v34 }
 0x1a0   : > { %1729 = vst.msk [vmem:[%s2868_s28 + $0x7c] sm:$0xf] %vm1697_vm1, %v2027_v38 }
 0x1a1 PF: > { %s13_s14 = sadd.s32 1, %s2523_s14   ;;  %s3006_s12 = smov %s2519_s13 }
 0x1a2   : > { %p10_p5 = scmp.ge.s32.totalorder %s13_s14, 4   ;;  %s3007_s13 = smov %s3009_s15 }
 0x1a4   :  { %12 = sbr.rel (!%p10_p5) target bundleno = 2 (0x2), region = 62 }

// kernel: inpaint_loss.89
= control target key start
LH: loop header
LB: loop body
LE: loop exit
PB: predicated region body
PF: predicated region fallthrough
CT: control target
= control target key end

     0   :  { %s1335_s12 = smov 0   ;;  %s1337_s13 = smov 0   ;;  %s1509_s0 = inlined_call_operand.vmem [shape: bf16[2,64,576], index: 0, kind: input, shape index: {}]   ;;  %s1510_s1 = inlined_call_operand.vmem [shape: bf16[576,128], index: 1, kind: input, shape index: {}]   ;;  %s1511_s2 = inlined_call_operand.vmem [shape: f32[1,128], index: 2, kind: input, shape index: {}]   ;;  %s1512_s3 = inlined_call_operand.vmem [shape: bf16[2,64,128], index: 3, kind: output, shape index: {}]  }
   0x1   :  { %s1339_s14 = smov 0  }
   0x2 LB: > { %s25_s15 = sadd.s32 1, %s1309_s13  ;;  %p983_p0 = scmp.ge.s32.totalorder %s1313_s14, 1  ;;  %s1313_s14 = sphi %s1339_s14, %s13_s14   ;;  %s1309_s13 = sphi %s1337_s13, %s1514_s13   ;;  %s1305_s12 = sphi %s1335_s12, %s1513_s12  }
   0x3   : > { %p27_p1 = scmp.ge.s32.totalorder %s25_s15, 2  ;;  %p159_p2 = scmp.lt.s32.totalorder %s1313_s14, 3 }
   0x5   : > { %s1516_s15 = smov (%p27_p1, %s25_s15), 0  ;;  %p160_p3 = pnand %p983_p0, %p159_p2 }
   0x6   : > { %v1227_v0 = vld [vmem:[%s1510_s1 + $0x40] sm:$0xff] (!%p160_p3)   ;;  %v1231_v4 = vld [vmem:[%s1510_s1 + $0x48] sm:$0xff] (!%p160_p3)   ;;  %v1235_v8 = vld [vmem:[%s1510_s1 + $0x50] sm:$0xff] (!%p160_p3)   ;;  %p193_p4 = scmp.lt.s32.totalorder (!%p160_p3), %s1305_s12, 1  ;;  %vm633_vm0 = vcmask (!%p160_p3), 523264  }
   0x7   : > { %163 = sbr.rel (%p160_p3) target bundleno = 295 (0x127), region = 32  ;;  %v1228_v1 = vld [vmem:[%s1510_s1 + $0xc0] sm:$0xff] (!%p160_p3)   ;;  %1090 = vmatprep.subr.bf16.mxu0 (!%p160_p3), %v1227_v0  ;;  %v1232_v5 = vld [vmem:[%s1510_s1 + $0xc8] sm:$0xff] (!%p160_p3)   ;;  %v1236_v9 = vld [vmem:[%s1510_s1 + $0xd0] sm:$0xff] (!%p160_p3)  }
   0x8   : > { %v1229_v2 = vld [vmem:[%s1510_s1] sm:$0xff] (!%p160_p3)   ;;  %1130 = vmatprep.subr.bf16.mxu1 (!%p160_p3), %v1228_v1  ;;  %v1233_v6 = vld [vmem:[%s1510_s1 + $0x8] sm:$0xff] (!%p160_p3)   ;;  %v1237_v10 = vld [vmem:[%s1510_s1 + $0x10] sm:$0xff] (!%p160_p3)  }
   0x9   : > { %v1230_v3 = vld [vmem:[%s1510_s1 + $0x80] sm:$0xff] (!%p160_p3)   ;;  %1091 = vmatpush3.bf16.msra.mxu0 (!%p160_p3), %v1229_v2  ;;  %v1234_v7 = vld [vmem:[%s1510_s1 + $0x88] sm:$0xff] (!%p160_p3)   ;;  %v1238_v11 = vld [vmem:[%s1510_s1 + $0x90] sm:$0xff] (!%p160_p3)  }
   0xa   : > { %1131 = vmatpush3.bf16.msra.mxu1 (!%p160_p3), %v1230_v3  ;;  %1092 = vmatprep.subr.bf16.mxu0 (!%p160_p3), %v1231_v4  ;;  %v1239_v12 = vld [vmem:[%s1510_s1 + $0x58] sm:$0xff] (!%p160_p3)   ;;  %v1243_v16 = vld [vmem:[%s1510_s1 + $0x60] sm:$0xff] (!%p160_p3)   ;;  %v1247_v20 = vld [vmem:[%s1510_s1 + $0x68] sm:$0xff] (!%p160_p3)  }
   0xb   : > { %1132 = vmatprep.subr.bf16.mxu1 (!%p160_p3), %v1232_v5  ;;  %v1240_v13 = vld [vmem:[%s1510_s1 + $0xd8] sm:$0xff] (!%p160_p3)   ;;  %v1244_v17 = vld [vmem:[%s1510_s1 + $0xe0] sm:$0xff] (!%p160_p3)   ;;  %v1248_v21 = vld [vmem:[%s1510_s1 + $0xe8] sm:$0xff] (!%p160_p3)  }
   0xc   : > { %v1241_v14 = vld [vmem:[%s1510_s1 + $0x18] sm:$0xff] (!%p160_p3)   ;;  %v1245_v18 = vld [vmem:[%s1510_s1 + $0x20] sm:$0xff] (!%p160_p3)   ;;  %v1249_v22 = vld [vmem:[%s1510_s1 + $0x28] sm:$0xff] (!%p160_p3)  }
   0xd   : > { %1093 = vmatpush3.bf16.msra.mxu0 (!%p160_p3), %v1233_v6  ;;  %v1242_v15 = vld [vmem:[%s1510_s1 + $0x98] sm:$0xff] (!%p160_p3)   ;;  %v1246_v19 = vld [vmem:[%s1510_s1 + $0xa0] sm:$0xff] (!%p160_p3)   ;;  %v1250_v23 = vld [vmem:[%s1510_s1 + $0xa8] sm:$0xff] (!%p160_p3)  }
   0xe   : > { %1133 = vmatpush3.bf16.msra.mxu1 %v1234_v7  ;;  %1094 = vmatprep.subr.bf16.mxu0 %v1235_v8  ;;  %s1518_s12 = smov (!%p193_p4, %s1305_s12), 1  ;;  %v1251_v24 = vld [vmem:[%s1510_s1 + $0x70] sm:$0xff]   ;;  %v1255_v28 = vld [vmem:[%s1510_s1 + $0x78] sm:$0xff]   ;;  %v1265_v36 = vld [vmem:[%s1510_s1 + $0x100] sm:$0xff]  }
   0xf   : > { %1134 = vmatprep.subr.bf16.mxu1 %v1236_v9  ;;  %v1252_v25 = vld [vmem:[%s1510_s1 + $0xf0] sm:$0xff]   ;;  %s1202_s22 = smul.u32 160, %s1518_s12  ;;  %v1256_v29 = vld [vmem:[%s1510_s1 + $0xf8] sm:$0xff]   ;;  %v1272_v39 = vld [vmem:[%s1510_s1 + $0x108] sm:$0xff]   ;;  %s1058_s25 = sshll.u32 %s1518_s12, 5 }
  0x10   : > { %v1253_v26 = vld [vmem:[%s1510_s1 + $0x30] sm:$0xff]   ;;  %v1257_v30 = vld [vmem:[%s1510_s1 + $0x38] sm:$0xff]   ;;  %v987_v58 = vld [vmem:[%s1511_s2] ss:$0 sm:$0xff]  ;;  %s211_s28 = scalar_lea.vmem %s1512_s3, %s1058_s25 }
  0x11   : > { %1095 = vmatpush3.bf16.msra.mxu0 %v1237_v10  ;;  %v1254_v27 = vld [vmem:[%s1510_s1 + $0xb0] sm:$0xff]   ;;  %s1453_s6 = scalar_lea.vmem %s1509_s0, %s1202_s22  ;;  %v1258_v31 = vld [vmem:[%s1510_s1 + $0xb8] sm:$0xff]  }
  0x12   : > { %1135 = vmatpush3.bf16.msra.mxu1 %v1238_v11  ;;  %1096 = vmatprep.subr.bf16.mxu0 %v1239_v12  ;;  %v1259_v32 = vld [vmem:[%s1453_s6] ss:$20 sps:$4 sm:$0xff]   ;;  %v1261_v33 = vld [vmem:[%s1453_s6 + $0x4] ss:$20 sps:$4 sm:$0xff]   ;;  %v1262_v34 = vld [vmem:[%s1453_s6 + $0x8] ss:$20 sps:$4 sm:$0xff]  }
  0x13   : > { %1136 = vmatprep.subr.bf16.mxu1 %v1240_v13  ;;  %v1264_v35 = vld [vmem:[%s1453_s6 + $0xc] ss:$20 sps:$4 sm:$0xff]   ;;  %678 = vmatprep.mubr.bf16.mxu0 %v1261_v33  ;;  %v1268_v38 = vld [vmem:[%s1453_s6 + $0x34] ss:$20 sps:$4 sm:$0xff]   ;;  %v1271_v41 = vld [vmem:[%s1453_s6 + $0x30] ss:$20 sps:$4 sm:$0xff]  }
  0x14   : > { %743 = vmatprep.mubr.bf16.mxu1 %v1264_v35  ;;  %v1266_v37 = vld [vmem:[%s1453_s6 + $0x2c] ss:$20 sps:$4 sm:$0xff]   ;;  %v1270_v40 = vld [vmem:[%s1453_s6 + $0x28] ss:$20 sps:$4 sm:$0xff]   ;;  %v1279_v44 = vld [vmem:[%s1510_s1 + $0x110] sm:$0xff]  }
  0x15   : > { %1097 = vmatpush3.bf16.msra.mxu0 %v1241_v14  ;;  %v1273_v42 = vld [vmem:[%s1453_s6 + $0x54] ss:$20 sps:$4 sm:$0xff]   ;;  %v1275_v43 = vld [vmem:[%s1453_s6 + $0x5c] ss:$20 sps:$4 sm:$0xff]   ;;  %v1278_v47 = vld [vmem:[%s1453_s6 + $0x58] ss:$20 sps:$4 sm:$0xff]  }
  0x16   : > { %1137 = vmatpush3.bf16.msra.mxu1 %v1242_v15  ;;  %1098 = vmatprep.subr.bf16.mxu0 %v1243_v16  ;;  %v1286_v45 = vld [vmem:[%s1510_s1 + $0x118] sm:$0xff]   ;;  %v1277_v46 = vld [vmem:[%s1453_s6 + $0x50] ss:$20 sps:$4 sm:$0xff]   ;;  %v1285_v51 = vld [vmem:[%s1453_s6 + $0x80] ss:$20 sps:$4 sm:$0xff]  }
  0x17   : > { %1138 = vmatprep.subr.bf16.mxu1 %v1244_v17  ;;  %v1280_v48 = vld [vmem:[%s1453_s6 + $0x7c] ss:$20 sps:$4 sm:$0xff]   ;;  %v1282_v49 = vld [vmem:[%s1453_s6 + $0x84] ss:$20 sps:$4 sm:$0xff]   ;;  %v1288_v53 = vld [vmem:[%s1453_s6 + $0x60] ss:$20 sps:$4 sm:$0xff]  }
  0x18   : > { %v1284_v50 = vld [vmem:[%s1453_s6 + $0x78] ss:$20 sps:$4 sm:$0xff]   ;;  %v1287_v52 = vld [vmem:[%s1453_s6 + $0x10] ss:$20 sps:$4 sm:$0xff]   ;;  %v1290_v55 = vld [vmem:[%s1453_s6 + $0x88] ss:$20 sps:$4 sm:$0xff]  }
  0x19   : > { %1099 = vmatpush3.bf16.msra.mxu0 %v1245_v18  ;;  %v1289_v54 = vld [vmem:[%s1453_s6 + $0x38] ss:$20 sps:$4 sm:$0xff]  }
  0x1a   : > { %1139 = vmatpush3.bf16.msra.mxu1 %v1246_v19  ;;  %1100 = vmatprep.subr.bf16.mxu0 %v1247_v20 }
  0x1b   : > { %1140 = vmatprep.subr.bf16.mxu1 %v1248_v21 }
  0x1d   : > { %1101 = vmatpush3.bf16.msra.mxu0 %v1249_v22 }
  0x1e   : > { %1141 = vmatpush3.bf16.msra.mxu1 %v1250_v23  ;;  %1102 = vmatprep.subr.bf16.mxu0 %v1251_v24 }
  0x1f   : > { %1142 = vmatprep.subr.bf16.mxu1 %v1252_v25 }
  0x21   : > { %1103 = vmatpush3.bf16.msra.mxu0 %v1253_v26 }
  0x22   : > { %1143 = vmatpush3.bf16.msra.mxu1 %v1254_v27  ;;  %1104 = vmatprep.subr.bf16.mxu0 %v1255_v28 }
  0x23   : > { %1144 = vmatprep.subr.bf16.mxu1 %v1256_v29 }
  0x25   : > { %1105 = vmatpush3.bf16.msra.mxu0 %v1257_v30 }
  0x26   : > { %1145 = vmatpush3.bf16.msra.mxu1 %v1258_v31  ;;  %1178 = vmatprep.subr.bf16.mxu0 %v1265_v36 }
  0x27   : > { %1194 = vmatprep.subr.bf16.mxu1 %v1265_v36 }
  0x28   : > { %679 = vmatmul.mubr.bf16.vlgmr.msra.gmra.mrb[0].mxu0 %v1259_v32 }
  0x29   : > { %744 = vmatmul.mubr.bf16.vlgmr.msra.gmra.mrb[0].mxu1 %v1262_v34  ;;  %1179 = vmatpush3.bf16.msra.mxu0 %v1265_v36 }
  0x2a   : > { %1198 = vmatpush3.bf16.msra.mxu1 %v1265_v36  ;;  %686 = vmatprep.mubr.bf16.mxu0 %v1266_v37 }
  0x2b   : > { %751 = vmatprep.mubr.bf16.mxu1 %v1268_v38  ;;  %1180 = vmatprep.subr.bf16.mxu0 %v1272_v39 }
  0x2c   : > { %1195 = vmatprep.subr.bf16.mxu1 %v1272_v39 }
  0x2d   : > { %1181 = vmatpush3.bf16.msra.mxu0 %v1272_v39 }
  0x2e   : > { %1199 = vmatpush3.bf16.msra.mxu1 %v1272_v39  ;;  %1182 = vmatprep.subr.bf16.mxu0 %v1279_v44 }
  0x2f   : > { %1196 = vmatprep.subr.bf16.mxu1 %v1279_v44 }
  0x30   : > { %687 = vmatmul.mubr.bf16.gmra.mrb[4].mxu0 %v1270_v40 }
  0x31   : > { %752 = vmatmul.mubr.bf16.gmra.mrb[4].mxu1 %v1271_v41  ;;  %694 = vmatprep.mubr.bf16.mxu0 %v1273_v42 }
  0x32   : > { %759 = vmatprep.mubr.bf16.mxu1 %v1275_v43  ;;  %1183 = vmatpush3.bf16.msra.mxu0 %v1279_v44 }
  0x33   : > { %1200 = vmatpush3.bf16.msra.mxu1 %v1279_v44  ;;  %1184 = vmatprep.subr.bf16.mxu0 %v1286_v45 }
  0x34   : > { %1197 = vmatprep.subr.bf16.mxu1 %v1286_v45 }
  0x36   : > { %1185 = vmatpush3.bf16.msra.mxu0 %v1286_v45 }
  0x37   : > { %1201 = vmatpush3.bf16.msra.mxu1 %v1286_v45 }
  0x38   : > { %695 = vmatmul.mubr.bf16.gmra.mrb[8].mxu0 %v1277_v46 }
  0x39   : > { %760 = vmatmul.mubr.bf16.gmra.mrb[8].mxu1 %v1278_v47  ;;  %702 = vmatprep.mubr.bf16.mxu0 %v1280_v48 }
  0x3a   : > { %767 = vmatprep.mubr.bf16.mxu1 %v1282_v49 }
  0x40   : > { %703 = vmatmul.mubr.bf16.gmra.mrb[12].mxu0 %v1284_v50 }
  0x41   : > { %768 = vmatmul.mubr.bf16.gmra.mrb[12].mxu1 %v1285_v51  ;;  %1186 = vmatprep.mubr.msk.bf16.mxu0 %vm633_vm0, %v1287_v52 }
  0x42   : > { %1190 = vmatprep.mubr.msk.bf16.mxu1 %vm633_vm0, %v1288_v53 }
  0x48   : > { %1187 = vmatmul.mubr.msk.bf16.vlgmr.msra.gmra.mrb[16].mxu0 %vm633_vm0, %v1289_v54 }
  0x49   : > { %1191 = vmatmul.mubr.msk.bf16.vlgmr.msra.gmra.mrb[16].mxu1 %vm633_vm0, %v1290_v55 }
  0xfb   : > { %v1106_v56 = vpop.f32.mrb[0].mxu0 }
  0xfc   : > { %v1146_v57 = vpop.f32.mrb[0].mxu1  ;;  %v1107_v59 = vpop.f32.mrb[1].mxu0 }
  0xfd   : > { %v1108_v60 = vadd.f32 %v1107_v59, %v1106_v56  ;;  %v1147_v61 = vpop.f32.mrb[1].mxu1  ;;  %v1109_v62 = vpop.f32.mrb[2].mxu0 }
  0xfe   : > { %v1148_v63 = vadd.f32 %v1147_v61, %v1146_v57  ;;  %v1149_v0 = vpop.f32.mrb[2].mxu1  ;;  %v1110_v1 = vpop.f32.mrb[3].mxu0 }
  0xff   : > { %v681_v2 = vadd.f32 %v1108_v60, %v987_v58  ;;  %v1111_v3 = vadd.f32 %v1110_v1, %v1109_v62  ;;  %v1150_v4 = vpop.f32.mrb[3].mxu1 }
 0x100   : > { %v1151_v5 = vadd.f32 %v1150_v4, %v1149_v0 }
 0x101   : > { %v684_v6 = vadd.f32 %v1111_v3, %v987_v58  ;;  %v746_v7 = vadd.f32 %v1148_v63, %v681_v2 }
 0x103   : > { %v1112_v8 = vpop.f32.mrb[4].mxu0  ;;  %v749_v9 = vadd.f32 %v1151_v5, %v684_v6 }
 0x104   : > { %v1152_v10 = vpop.f32.mrb[4].mxu1  ;;  %v1113_v11 = vpop.f32.mrb[5].mxu0 }
 0x105   : > { %v1114_v12 = vadd.f32 %v1113_v11, %v1112_v8  ;;  %v1153_v13 = vpop.f32.mrb[5].mxu1  ;;  %v1115_v14 = vpop.f32.mrb[6].mxu0 }
 0x106   : > { %v1154_v15 = vadd.f32 %v1153_v13, %v1152_v10  ;;  %v1155_v16 = vpop.f32.mrb[6].mxu1  ;;  %v1116_v17 = vpop.f32.mrb[7].mxu0 }
 0x107   : > { %v689_v18 = vadd.f32 %v1114_v12, %v987_v58  ;;  %v1117_v19 = vadd.f32 %v1116_v17, %v1115_v14  ;;  %v1156_v20 = vpop.f32.mrb[7].mxu1 }
 0x108   : > { %v1157_v21 = vadd.f32 %v1156_v20, %v1155_v16 }
 0x109   : > { %v692_v22 = vadd.f32 %v1117_v19, %v987_v58  ;;  %v754_v23 = vadd.f32 %v1154_v15, %v689_v18 }
 0x10b   : > { %v1118_v24 = vpop.f32.mrb[8].mxu0  ;;  %v757_v25 = vadd.f32 %v1157_v21, %v692_v22 }
 0x10c   : > { %v1158_v26 = vpop.f32.mrb[8].mxu1  ;;  %v1119_v27 = vpop.f32.mrb[9].mxu0 }
 0x10d   : > { %v1120_v28 = vadd.f32 %v1119_v27, %v1118_v24  ;;  %v1159_v29 = vpop.f32.mrb[9].mxu1  ;;  %v1121_v30 = vpop.f32.mrb[10].mxu0 }
 0x10e   : > { %v1160_v31 = vadd.f32 %v1159_v29, %v1158_v26  ;;  %v1161_v32 = vpop.f32.mrb[10].mxu1  ;;  %v1122_v33 = vpop.f32.mrb[11].mxu0 }
 0x10f   : > { %v697_v34 = vadd.f32 %v1120_v28, %v987_v58  ;;  %v1123_v35 = vadd.f32 %v1122_v33, %v1121_v30  ;;  %v1162_v36 = vpop.f32.mrb[11].mxu1 }
 0x110   : > { %v1163_v37 = vadd.f32 %v1162_v36, %v1161_v32 }
 0x111   : > { %v700_v38 = vadd.f32 %v1123_v35, %v987_v58  ;;  %v762_v39 = vadd.f32 %v1160_v31, %v697_v34 }
 0x113   : > { %v1124_v40 = vpop.f32.mrb[12].mxu0  ;;  %v765_v41 = vadd.f32 %v1163_v37, %v700_v38 }
 0x114   : > { %v1164_v42 = vpop.f32.mrb[12].mxu1  ;;  %v1125_v43 = vpop.f32.mrb[13].mxu0 }
 0x115   : > { %v1126_v44 = vadd.f32 %v1125_v43, %v1124_v40  ;;  %v1165_v45 = vpop.f32.mrb[13].mxu1  ;;  %v1127_v46 = vpop.f32.mrb[14].mxu0 }
 0x116   : > { %v1166_v47 = vadd.f32 %v1165_v45, %v1164_v42  ;;  %v1167_v48 = vpop.f32.mrb[14].mxu1  ;;  %v1128_v49 = vpop.f32.mrb[15].mxu0 }
 0x117   : > { %v705_v50 = vadd.f32 %v1126_v44, %v987_v58  ;;  %v1129_v51 = vadd.f32 %v1128_v49, %v1127_v46  ;;  %v1168_v52 = vpop.f32.mrb[15].mxu1 }
 0x118   : > { %v1169_v53 = vadd.f32 %v1168_v52, %v1167_v48 }
 0x119   : > { %v708_v54 = vadd.f32 %v1129_v51, %v987_v58  ;;  %v770_v55 = vadd.f32 %v1166_v47, %v705_v50 }
 0x11b   : > { %v1188_v56 = vpop.f32.mrb[16].mxu0  ;;  %v773_v57 = vadd.f32 %v1169_v53, %v708_v54 }
 0x11c   : > { %v819_v59 = vadd.f32 %v1188_v56, %v754_v23  ;;  %v1192_v60 = vpop.f32.mrb[16].mxu1  ;;  %v810_v61 = vpop.f32.mrb[17].mxu0 }
 0x11d   : > { %v835_v62 = vadd.f32 %v1192_v60, %v770_v55  ;;  %v811_v63 = vadd.f32 %v810_v61, %v746_v7  ;;  %v826_v0 = vpop.f32.mrb[17].mxu1  ;;  %v1189_v1 = vpop.f32.mrb[18].mxu0 }
 0x11e   : > { %v827_v2 = vadd.f32 %v826_v0, %v762_v39  ;;  %v822_v3 = vadd.f32 %v1189_v1, %v757_v25  ;;  %v1193_v4 = vpop.f32.mrb[18].mxu1  ;;  %v813_v5 = vpop.f32.mrb[19].mxu0  ;;  %v843_v11 = vmax.f32 %v819_v59, 0.0 }
 0x11f   : > { %v838_v6 = vadd.f32 %v1193_v4, %v773_v57  ;;  %v814_v8 = vadd.f32 %v813_v5, %v749_v9  ;;  %v829_v10 = vpop.f32.mrb[19].mxu1  ;;  %v847_v13 = vmax.f32 %v835_v62, 0.0  ;;  %v841_v14 = vmax.f32 %v811_v63, 0.0 }
 0x120   : > { %v844_v58 = vmax.f32 %v822_v3, 0.0  ;;  %v830_v12 = vadd.f32 %v829_v10, %v765_v41  ;;  %v845_v16 = vmax.f32 %v827_v2, 0.0 }
 0x121   : > { %v848_v7 = vmax.f32 %v838_v6, 0.0  ;;  %v842_v15 = vmax.f32 %v814_v8, 0.0 }
 0x122   : > { %v1075_v17 = vpack.c.bf16 %v844_v58, %v843_v11  ;;  %v846_v18 = vmax.f32 %v830_v12, 0.0 }
 0x123   : > { %v1085_v19 = vpack.c.bf16 %v848_v7, %v847_v13  ;;  %v1070_v20 = vpack.c.bf16 %v842_v15, %v841_v14 }
 0x124   : > { %1087 = vst [vmem:[%s211_s28 + $0x8] sm:$0xff] %v1075_v17   ;;  %v1080_v21 = vpack.c.bf16 %v846_v18, %v845_v16 }
 0x125   : > { %1089 = vst [vmem:[%s211_s28 + $0x18] sm:$0xff] %v1085_v19   ;;  %1071 = vst [vmem:[%s211_s28] sm:$0xff] %v1070_v20  }
 0x126   : > { %1088 = vst [vmem:[%s211_s28 + $0x10] sm:$0xff] %v1080_v21  }
 0x127 PF: > { %s13_s14 = sadd.s32 1, %s1313_s14   ;;  %s1513_s12 = smov %s1309_s13 }
 0x128   : > { %p10_p5 = scmp.ge.s32.totalorder %s13_s14, 4   ;;  %s1514_s13 = smov %s1516_s15 }
 0x12a   :  { %12 = sbr.rel (!%p10_p5) target bundleno = 2 (0x2), region = 62 }

// kernel: inpaint_loss.90
= control target key start
LH: loop header
LB: loop body
LE: loop exit
PB: predicated region body
PF: predicated region fallthrough
CT: control target
= control target key end

     0   :  { %s2048_s12 = smov 0   ;;  %s2050_s13 = smov 0   ;;  %s2346_s0 = inlined_call_operand.vmem [shape: bf16[2,64,1152], index: 0, kind: input, shape index: {}]   ;;  %s2347_s1 = inlined_call_operand.vmem [shape: bf16[1152,128], index: 1, kind: input, shape index: {}]   ;;  %s2348_s2 = inlined_call_operand.vmem [shape: f32[1,128], index: 2, kind: input, shape index: {}]   ;;  %s2349_s3 = inlined_call_operand.vmem [shape: bf16[2,64,128], index: 3, kind: output, shape index: {}]  }
   0x1   :  { %s2052_s14 = smov 0  }
   0x2 LB: > { %s25_s15 = sadd.s32 1, %s2022_s13  ;;  %p1488_p0 = scmp.ge.s32.totalorder %s2026_s14, 1  ;;  %s2026_s14 = sphi %s2052_s14, %s13_s14   ;;  %s2022_s13 = sphi %s2050_s13, %s2351_s13   ;;  %s2018_s12 = sphi %s2048_s12, %s2350_s12  }
   0x3   : > { %p27_p1 = scmp.ge.s32.totalorder %s25_s15, 2  ;;  %p159_p2 = scmp.lt.s32.totalorder %s2026_s14, 3 }
   0x5   : > { %s2353_s15 = smov (%p27_p1, %s25_s15), 0  ;;  %p160_p3 = pnand %p1488_p0, %p159_p2 }
   0x6   : > { %v1880_v0 = vld [vmem:[%s2347_s1 + $0x40] sm:$0xff] (!%p160_p3)   ;;  %v1884_v4 = vld [vmem:[%s2347_s1 + $0x48] sm:$0xff] (!%p160_p3)   ;;  %v1888_v8 = vld [vmem:[%s2347_s1 + $0x50] sm:$0xff] (!%p160_p3)   ;;  %p193_p4 = scmp.lt.s32.totalorder (!%p160_p3), %s2018_s12, 1 }
   0x7   : > { %163 = sbr.rel (%p160_p3) target bundleno = 328 (0x148), region = 32  ;;  %v1881_v1 = vld [vmem:[%s2347_s1 + $0xc0] sm:$0xff] (!%p160_p3)   ;;  %1643 = vmatprep.subr.bf16.mxu0 (!%p160_p3), %v1880_v0  ;;  %v1885_v5 = vld [vmem:[%s2347_s1 + $0xc8] sm:$0xff] (!%p160_p3)   ;;  %v1889_v9 = vld [vmem:[%s2347_s1 + $0xd0] sm:$0xff] (!%p160_p3)  }
   0x8   : > { %v1882_v2 = vld [vmem:[%s2347_s1] sm:$0xff] (!%p160_p3)   ;;  %1683 = vmatprep.subr.bf16.mxu1 (!%p160_p3), %v1881_v1  ;;  %v1886_v6 = vld [vmem:[%s2347_s1 + $0x8] sm:$0xff] (!%p160_p3)   ;;  %v1890_v10 = vld [vmem:[%s2347_s1 + $0x10] sm:$0xff] (!%p160_p3)  }
   0x9   : > { %v1883_v3 = vld [vmem:[%s2347_s1 + $0x80] sm:$0xff] (!%p160_p3)   ;;  %1644 = vmatpush3.bf16.msra.mxu0 (!%p160_p3), %v1882_v2  ;;  %v1887_v7 = vld [vmem:[%s2347_s1 + $0x88] sm:$0xff] (!%p160_p3)   ;;  %v1891_v11 = vld [vmem:[%s2347_s1 + $0x90] sm:$0xff] (!%p160_p3)  }
   0xa   : > { %1684 = vmatpush3.bf16.msra.mxu1 (!%p160_p3), %v1883_v3  ;;  %1645 = vmatprep.subr.bf16.mxu0 (!%p160_p3), %v1884_v4  ;;  %v1892_v12 = vld [vmem:[%s2347_s1 + $0x58] sm:$0xff] (!%p160_p3)   ;;  %v1896_v16 = vld [vmem:[%s2347_s1 + $0x60] sm:$0xff] (!%p160_p3)   ;;  %v1900_v20 = vld [vmem:[%s2347_s1 + $0x68] sm:$0xff] (!%p160_p3)  }
   0xb   : > { %1685 = vmatprep.subr.bf16.mxu1 (!%p160_p3), %v1885_v5  ;;  %v1893_v13 = vld [vmem:[%s2347_s1 + $0xd8] sm:$0xff] (!%p160_p3)   ;;  %v1897_v17 = vld [vmem:[%s2347_s1 + $0xe0] sm:$0xff] (!%p160_p3)   ;;  %v1901_v21 = vld [vmem:[%s2347_s1 + $0xe8] sm:$0xff] (!%p160_p3)  }
   0xc   : > { %v1894_v14 = vld [vmem:[%s2347_s1 + $0x18] sm:$0xff] (!%p160_p3)   ;;  %v1898_v18 = vld [vmem:[%s2347_s1 + $0x20] sm:$0xff] (!%p160_p3)   ;;  %v1902_v22 = vld [vmem:[%s2347_s1 + $0x28] sm:$0xff] (!%p160_p3)  }
   0xd   : > { %1646 = vmatpush3.bf16.msra.mxu0 (!%p160_p3), %v1886_v6  ;;  %v1895_v15 = vld [vmem:[%s2347_s1 + $0x98] sm:$0xff] (!%p160_p3)   ;;  %v1899_v19 = vld [vmem:[%s2347_s1 + $0xa0] sm:$0xff] (!%p160_p3)   ;;  %v1903_v23 = vld [vmem:[%s2347_s1 + $0xa8] sm:$0xff] (!%p160_p3)  }
   0xe   : > { %1686 = vmatpush3.bf16.msra.mxu1 %v1887_v7  ;;  %1647 = vmatprep.subr.bf16.mxu0 %v1888_v8  ;;  %s2355_s12 = smov (!%p193_p4, %s2018_s12), 1  ;;  %v1904_v24 = vld [vmem:[%s2347_s1 + $0x70] sm:$0xff]   ;;  %v1908_v28 = vld [vmem:[%s2347_s1 + $0x78] sm:$0xff]   ;;  %v1918_v36 = vld [vmem:[%s2347_s1 + $0x140] sm:$0xff]  }
   0xf   : > { %1687 = vmatprep.subr.bf16.mxu1 %v1889_v9  ;;  %v1905_v25 = vld [vmem:[%s2347_s1 + $0xf0] sm:$0xff]   ;;  %s1855_s22 = smul.u32 288, %s2355_s12  ;;  %v1909_v29 = vld [vmem:[%s2347_s1 + $0xf8] sm:$0xff]   ;;  %v1919_v37 = vld [vmem:[%s2347_s1 + $0x1c0] sm:$0xff]  }
  0x10   : > { %v1906_v26 = vld [vmem:[%s2347_s1 + $0x30] sm:$0xff]   ;;  %v1910_v30 = vld [vmem:[%s2347_s1 + $0x38] sm:$0xff]   ;;  %v1920_v38 = vld [vmem:[%s2347_s1 + $0x100] sm:$0xff]  }
  0x11   : > { %1648 = vmatpush3.bf16.msra.mxu0 %v1890_v10  ;;  %v1907_v27 = vld [vmem:[%s2347_s1 + $0xb0] sm:$0xff]   ;;  %s2166_s6 = scalar_lea.vmem %s2346_s0, %s1855_s22  ;;  %v1911_v31 = vld [vmem:[%s2347_s1 + $0xb8] sm:$0xff]   ;;  %v1921_v39 = vld [vmem:[%s2347_s1 + $0x180] sm:$0xff]  }
  0x12   : > { %1688 = vmatpush3.bf16.msra.mxu1 %v1891_v11  ;;  %1649 = vmatprep.subr.bf16.mxu0 %v1892_v12  ;;  %v1912_v32 = vld [vmem:[%s2166_s6] ss:$36 sps:$4 sm:$0xff]   ;;  %v1915_v34 = vld [vmem:[%s2166_s6 + $0x8] ss:$36 sps:$4 sm:$0xff]   ;;  %v1928_v45 = vld [vmem:[%s2166_s6 + $0x54] ss:$36 sps:$4 sm:$0xff]  }
  0x13   : > { %1689 = vmatprep.subr.bf16.mxu1 %v1893_v13  ;;  %v1914_v33 = vld [vmem:[%s2166_s6 + $0x4] ss:$36 sps:$4 sm:$0xff]   ;;  %v1917_v35 = vld [vmem:[%s2166_s6 + $0xc] ss:$36 sps:$4 sm:$0xff]   ;;  %v1936_v52 = vld [vmem:[%s2347_s1 + $0x158] sm:$0xff]  }
  0x14   : > { %1053 = vmatprep.mubr.bf16.mxu0 %v1914_v33  ;;  %1118 = vmatprep.mubr.bf16.mxu1 %v1917_v35  ;;  %v1922_v40 = vld [vmem:[%s2347_s1 + $0x148] sm:$0xff]   ;;  %v1931_v47 = vld [vmem:[%s2166_s6 + $0x50] ss:$36 sps:$4 sm:$0xff]   ;;  %v1937_v53 = vld [vmem:[%s2347_s1 + $0x1d8] sm:$0xff]  }
  0x15   : > { %1650 = vmatpush3.bf16.msra.mxu0 %v1894_v14  ;;  %v1923_v41 = vld [vmem:[%s2347_s1 + $0x1c8] sm:$0xff]   ;;  %v1932_v48 = vld [vmem:[%s2347_s1 + $0x150] sm:$0xff]   ;;  %v1938_v54 = vld [vmem:[%s2347_s1 + $0x118] sm:$0xff]  }
  0x16   : > { %1690 = vmatpush3.bf16.msra.mxu1 %v1895_v15  ;;  %1651 = vmatprep.subr.bf16.mxu0 %v1896_v16  ;;  %v1924_v42 = vld [vmem:[%s2347_s1 + $0x108] sm:$0xff]   ;;  %v1933_v49 = vld [vmem:[%s2347_s1 + $0x1d0] sm:$0xff]   ;;  %v1939_v55 = vld [vmem:[%s2347_s1 + $0x198] sm:$0xff]  }
  0x17   : > { %1691 = vmatprep.subr.bf16.mxu1 %v1897_v17  ;;  %v1925_v43 = vld [vmem:[%s2347_s1 + $0x188] sm:$0xff]   ;;  %v1934_v50 = vld [vmem:[%s2347_s1 + $0x110] sm:$0xff]   ;;  %v1942_v57 = vld [vmem:[%s2166_s6 + $0x9c] ss:$36 sps:$4 sm:$0xff]  }
  0x18   : > { %v1926_v44 = vld [vmem:[%s2166_s6 + $0x4c] ss:$36 sps:$4 sm:$0xff]   ;;  %v1940_v56 = vld [vmem:[%s2166_s6 + $0x94] ss:$36 sps:$4 sm:$0xff]   ;;  %v1946_v60 = vld [vmem:[%s2347_s1 + $0x160] sm:$0xff]  }
  0x19   : > { %1652 = vmatpush3.bf16.msra.mxu0 %v1898_v18  ;;  %v1930_v46 = vld [vmem:[%s2166_s6 + $0x48] ss:$36 sps:$4 sm:$0xff]   ;;  %v1935_v51 = vld [vmem:[%s2347_s1 + $0x190] sm:$0xff]   ;;  %v1945_v59 = vld [vmem:[%s2166_s6 + $0x98] ss:$36 sps:$4 sm:$0xff]  }
  0x1a   : > { %1692 = vmatpush3.bf16.msra.mxu1 %v1899_v19  ;;  %1653 = vmatprep.subr.bf16.mxu0 %v1900_v20  ;;  %v1944_v58 = vld [vmem:[%s2166_s6 + $0x90] ss:$36 sps:$4 sm:$0xff]   ;;  %v1947_v61 = vld [vmem:[%s2347_s1 + $0x1e0] sm:$0xff]   ;;  %v1950_v0 = vld [vmem:[%s2347_s1 + $0x168] sm:$0xff]  }
  0x1b   : > { %1693 = vmatprep.subr.bf16.mxu1 %v1901_v21  ;;  %v1948_v62 = vld [vmem:[%s2347_s1 + $0x120] sm:$0xff]   ;;  %v1951_v1 = vld [vmem:[%s2347_s1 + $0x1e8] sm:$0xff]   ;;  %v1958_v6 = vld [vmem:[%s2166_s6 + $0xd8] ss:$36 sps:$4 sm:$0xff]  }
  0x1c   : > { %v1949_v63 = vld [vmem:[%s2347_s1 + $0x1a0] sm:$0xff]   ;;  %v1952_v2 = vld [vmem:[%s2347_s1 + $0x128] sm:$0xff]   ;;  %v1960_v8 = vld [vmem:[%s2347_s1 + $0x170] sm:$0xff]  }
  0x1d   : > { %1654 = vmatpush3.bf16.msra.mxu0 %v1902_v22  ;;  %v1953_v3 = vld [vmem:[%s2347_s1 + $0x1a8] sm:$0xff]   ;;  %v1954_v4 = vld [vmem:[%s2166_s6 + $0xdc] ss:$36 sps:$4 sm:$0xff]   ;;  %v1961_v9 = vld [vmem:[%s2347_s1 + $0x1f0] sm:$0xff]  }
  0x1e   : > { %1694 = vmatpush3.bf16.msra.mxu1 %v1903_v23  ;;  %1655 = vmatprep.subr.bf16.mxu0 %v1904_v24  ;;  %v1956_v5 = vld [vmem:[%s2166_s6 + $0xe4] ss:$36 sps:$4 sm:$0xff]   ;;  %v1962_v10 = vld [vmem:[%s2347_s1 + $0x130] sm:$0xff]   ;;  %v1964_v12 = vld [vmem:[%s2347_s1 + $0x178] sm:$0xff]  }
  0x1f   : > { %1695 = vmatprep.subr.bf16.mxu1 %v1905_v25  ;;  %v1959_v7 = vld [vmem:[%s2166_s6 + $0xe0] ss:$36 sps:$4 sm:$0xff]   ;;  %v1963_v11 = vld [vmem:[%s2347_s1 + $0x1b0] sm:$0xff]   ;;  %v1965_v13 = vld [vmem:[%s2347_s1 + $0x1f8] sm:$0xff]  }
  0x20   : > { %v1966_v14 = vld [vmem:[%s2347_s1 + $0x138] sm:$0xff]   ;;  %v1968_v16 = vld [vmem:[%s2166_s6 + $0x10] ss:$36 sps:$4 sm:$0xff]   ;;  %v1974_v20 = vld [vmem:[%s2347_s1 + $0x200] sm:$0xff]  }
  0x21   : > { %1656 = vmatpush3.bf16.msra.mxu0 %v1906_v26  ;;  %v1967_v15 = vld [vmem:[%s2347_s1 + $0x1b8] sm:$0xff]   ;;  %v1975_v21 = vld [vmem:[%s2347_s1 + $0x208] sm:$0xff]   ;;  %v1981_v25 = vld [vmem:[%s2166_s6 + $0x60] ss:$36 sps:$4 sm:$0xff]  }
  0x22   : > { %1696 = vmatpush3.bf16.msra.mxu1 %v1907_v27  ;;  %1657 = vmatprep.subr.bf16.mxu0 %v1908_v28  ;;  %v1970_v17 = vld [vmem:[%s2166_s6 + $0x14] ss:$36 sps:$4 sm:$0xff]   ;;  %v1973_v19 = vld [vmem:[%s2166_s6 + $0x1c] ss:$36 sps:$4 sm:$0xff]   ;;  %v1978_v23 = vld [vmem:[%s2166_s6 + $0x64] ss:$36 sps:$4 sm:$0xff]  }
  0x23   : > { %1697 = vmatprep.subr.bf16.mxu1 %v1909_v29  ;;  %v1971_v18 = vld [vmem:[%s2166_s6 + $0x18] ss:$36 sps:$4 sm:$0xff]   ;;  %v1982_v26 = vld [vmem:[%s2347_s1 + $0x210] sm:$0xff]   ;;  %v1984_v27 = vld [vmem:[%s2166_s6 + $0xa4] ss:$36 sps:$4 sm:$0xff]  }
  0x24   : > { %v1976_v22 = vld [vmem:[%s2166_s6 + $0x5c] ss:$36 sps:$4 sm:$0xff]   ;;  %v1986_v28 = vld [vmem:[%s2166_s6 + $0xac] ss:$36 sps:$4 sm:$0xff]  }
  0x25   : > { %1658 = vmatpush3.bf16.msra.mxu0 %v1910_v30  ;;  %v1980_v24 = vld [vmem:[%s2166_s6 + $0x58] ss:$36 sps:$4 sm:$0xff]   ;;  %v1988_v30 = vld [vmem:[%s2166_s6 + $0xa0] ss:$36 sps:$4 sm:$0xff]   ;;  %v1992_v33 = vld [vmem:[%s2166_s6 + $0xec] ss:$36 sps:$4 sm:$0xff]  }
  0x26   : > { %1698 = vmatpush3.bf16.msra.mxu1 %v1911_v31  ;;  %1723 = vmatprep.subr.bf16.mxu0 %v1918_v36  ;;  %v1983_v29 = vld [vmem:[%s2347_s1 + $0x218] sm:$0xff]   ;;  %v1989_v31 = vld [vmem:[%s2166_s6 + $0xa8] ss:$36 sps:$4 sm:$0xff]  }
  0x27   : > { %1763 = vmatprep.subr.bf16.mxu1 %v1919_v37  ;;  %v1991_v35 = vld [vmem:[%s2347_s1 + $0x228] sm:$0xff]   ;;  %v1998_v37 = vld [vmem:[%s2347_s1 + $0x230] sm:$0xff]  }
  0x28   : > { %1054 = vmatmul.mubr.bf16.vlgmr.msra.gmra.mrb[0].mxu0 %v1912_v32  ;;  %v1990_v32 = vld [vmem:[%s2347_s1 + $0x220] sm:$0xff]   ;;  %v1996_v36 = vld [vmem:[%s2166_s6 + $0xe8] ss:$36 sps:$4 sm:$0xff]  }
  0x29   : > { %1119 = vmatmul.mubr.bf16.vlgmr.msra.gmra.mrb[0].mxu1 %v1915_v34  ;;  %1724 = vmatpush3.bf16.msra.mxu0 %v1920_v38  ;;  %v1994_v34 = vld [vmem:[%s2166_s6 + $0xf4] ss:$36 sps:$4 sm:$0xff]  }
  0x2a   : > { %1764 = vmatpush3.bf16.msra.mxu1 %v1921_v39  ;;  %1725 = vmatprep.subr.bf16.mxu0 %v1922_v40  ;;  %v1997_v38 = vld [vmem:[%s2166_s6 + $0xf0] ss:$36 sps:$4 sm:$0xff]   ;;  %v2000_v39 = vld [vmem:[%s2166_s6 + $0x20] ss:$36 sps:$4 sm:$0xff]  }
  0x2b   : > { %1765 = vmatprep.subr.bf16.mxu1 %v1923_v41  ;;  %1061 = vmatprep.mubr.bf16.mxu0 %v1926_v44  ;;  %v2001_v40 = vld [vmem:[%s2166_s6 + $0xb0] ss:$36 sps:$4 sm:$0xff]   ;;  %v1999_v41 = vld [vmem:[%s2347_s1 + $0x238] sm:$0xff]  }
  0x2c   : > { %1126 = vmatprep.mubr.bf16.mxu1 %v1928_v45 }
  0x2d   : > { %1726 = vmatpush3.bf16.msra.mxu0 %v1924_v42  ;;  %v2002_v42 = vld [vmem:[%s2166_s6 + $0x68] ss:$36 sps:$4 sm:$0xff]  }
  0x2e   : > { %1766 = vmatpush3.bf16.msra.mxu1 %v1925_v43  ;;  %1727 = vmatprep.subr.bf16.mxu0 %v1932_v48  ;;  %v2003_v43 = vld [vmem:[%s2166_s6 + $0xf8] ss:$36 sps:$4 sm:$0xff]   ;;  %s1611_s6 = sshll.u32 %s2355_s12, 5 }
  0x2f   : > { %1767 = vmatprep.subr.bf16.mxu1 %v1933_v49  ;;  %s211_s7 = scalar_lea.vmem %s2349_s3, %s1611_s6 }
  0x30   : > { %1062 = vmatmul.mubr.bf16.gmra.mrb[4].mxu0 %v1930_v46  ;;  %v1492_v46 = vld [vmem:[%s2348_s2] ss:$0 sm:$0xff] }
  0x31   : > { %1127 = vmatmul.mubr.bf16.gmra.mrb[4].mxu1 %v1931_v47  ;;  %1728 = vmatpush3.bf16.msra.mxu0 %v1934_v50 }
  0x32   : > { %1768 = vmatpush3.bf16.msra.mxu1 %v1935_v51  ;;  %1729 = vmatprep.subr.bf16.mxu0 %v1936_v52 }
  0x33   : > { %1769 = vmatprep.subr.bf16.mxu1 %v1937_v53  ;;  %1069 = vmatprep.mubr.bf16.mxu0 %v1940_v56 }
  0x34   : > { %1134 = vmatprep.mubr.bf16.mxu1 %v1942_v57 }
  0x35   : > { %1730 = vmatpush3.bf16.msra.mxu0 %v1938_v54 }
  0x36   : > { %1770 = vmatpush3.bf16.msra.mxu1 %v1939_v55  ;;  %1731 = vmatprep.subr.bf16.mxu0 %v1946_v60 }
  0x37   : > { %1771 = vmatprep.subr.bf16.mxu1 %v1947_v61 }
  0x38   : > { %1070 = vmatmul.mubr.bf16.gmra.mrb[8].mxu0 %v1944_v58 }
  0x39   : > { %1135 = vmatmul.mubr.bf16.gmra.mrb[8].mxu1 %v1945_v59  ;;  %1732 = vmatpush3.bf16.msra.mxu0 %v1948_v62 }
  0x3a   : > { %1772 = vmatpush3.bf16.msra.mxu1 %v1949_v63  ;;  %1733 = vmatprep.subr.bf16.mxu0 %v1950_v0 }
  0x3b   : > { %1773 = vmatprep.subr.bf16.mxu1 %v1951_v1  ;;  %1077 = vmatprep.mubr.bf16.mxu0 %v1954_v4 }
  0x3c   : > { %1142 = vmatprep.mubr.bf16.mxu1 %v1956_v5 }
  0x3d   : > { %1734 = vmatpush3.bf16.msra.mxu0 %v1952_v2 }
  0x3e   : > { %1774 = vmatpush3.bf16.msra.mxu1 %v1953_v3  ;;  %1735 = vmatprep.subr.bf16.mxu0 %v1960_v8 }
  0x3f   : > { %1775 = vmatprep.subr.bf16.mxu1 %v1961_v9 }
  0x40   : > { %1078 = vmatmul.mubr.bf16.gmra.mrb[12].mxu0 %v1958_v6 }
  0x41   : > { %1143 = vmatmul.mubr.bf16.gmra.mrb[12].mxu1 %v1959_v7  ;;  %1736 = vmatpush3.bf16.msra.mxu0 %v1962_v10 }
  0x42   : > { %1776 = vmatpush3.bf16.msra.mxu1 %v1963_v11  ;;  %1737 = vmatprep.subr.bf16.mxu0 %v1964_v12 }
  0x43   : > { %1777 = vmatprep.subr.bf16.mxu1 %v1965_v13  ;;  %1183 = vmatprep.mubr.bf16.mxu0 %v1970_v17 }
  0x44   : > { %1248 = vmatprep.mubr.bf16.mxu1 %v1973_v19 }
  0x45   : > { %1738 = vmatpush3.bf16.msra.mxu0 %v1966_v14 }
  0x46   : > { %1778 = vmatpush3.bf16.msra.mxu1 %v1967_v15  ;;  %1815 = vmatprep.subr.bf16.mxu0 %v1974_v20 }
  0x47   : > { %1839 = vmatprep.subr.bf16.mxu1 %v1974_v20 }
  0x48   : > { %1184 = vmatmul.mubr.bf16.vlgmr.msra.gmra.mrb[16].mxu0 %v1968_v16 }
  0x49   : > { %1249 = vmatmul.mubr.bf16.vlgmr.msra.gmra.mrb[16].mxu1 %v1971_v18  ;;  %1816 = vmatpush3.bf16.msra.mxu0 %v1974_v20 }
  0x4a   : > { %1847 = vmatpush3.bf16.msra.mxu1 %v1974_v20  ;;  %1817 = vmatprep.subr.bf16.mxu0 %v1975_v21 }
  0x4b   : > { %1840 = vmatprep.subr.bf16.mxu1 %v1975_v21  ;;  %1191 = vmatprep.mubr.bf16.mxu0 %v1976_v22 }
  0x4c   : > { %1256 = vmatprep.mubr.bf16.mxu1 %v1978_v23 }
  0x4d   : > { %1818 = vmatpush3.bf16.msra.mxu0 %v1975_v21 }
  0x4e   : > { %1848 = vmatpush3.bf16.msra.mxu1 %v1975_v21  ;;  %1819 = vmatprep.subr.bf16.mxu0 %v1982_v26 }
  0x4f   : > { %1841 = vmatprep.subr.bf16.mxu1 %v1982_v26 }
  0x50   : > { %1192 = vmatmul.mubr.bf16.gmra.mrb[20].mxu0 %v1980_v24 }
  0x51   : > { %1257 = vmatmul.mubr.bf16.gmra.mrb[20].mxu1 %v1981_v25  ;;  %1199 = vmatprep.mubr.bf16.mxu0 %v1984_v27 }
  0x52   : > { %1820 = vmatpush3.bf16.msra.mxu0 %v1982_v26  ;;  %1264 = vmatprep.mubr.bf16.mxu1 %v1986_v28 }
  0x53   : > { %1849 = vmatpush3.bf16.msra.mxu1 %v1982_v26  ;;  %1821 = vmatprep.subr.bf16.mxu0 %v1983_v29 }
  0x54   : > { %1842 = vmatprep.subr.bf16.mxu1 %v1983_v29 }
  0x56   : > { %1822 = vmatpush3.bf16.msra.mxu0 %v1983_v29 }
  0x57   : > { %1850 = vmatpush3.bf16.msra.mxu1 %v1983_v29  ;;  %1823 = vmatprep.subr.bf16.mxu0 %v1990_v32 }
  0x58   : > { %1200 = vmatmul.mubr.bf16.gmra.mrb[24].mxu0 %v1988_v30  ;;  %1843 = vmatprep.subr.bf16.mxu1 %v1990_v32 }
  0x59   : > { %1265 = vmatmul.mubr.bf16.gmra.mrb[24].mxu1 %v1989_v31  ;;  %1207 = vmatprep.mubr.bf16.mxu0 %v1992_v33 }
  0x5a   : > { %1824 = vmatpush3.bf16.msra.mxu0 %v1990_v32  ;;  %1272 = vmatprep.mubr.bf16.mxu1 %v1994_v34 }
  0x5b   : > { %1851 = vmatpush3.bf16.msra.mxu1 %v1990_v32  ;;  %1825 = vmatprep.subr.bf16.mxu0 %v1991_v35 }
  0x5c   : > { %1844 = vmatprep.subr.bf16.mxu1 %v1991_v35 }
  0x5e   : > { %1826 = vmatpush3.bf16.msra.mxu0 %v1991_v35 }
  0x5f   : > { %1852 = vmatpush3.bf16.msra.mxu1 %v1991_v35  ;;  %1827 = vmatprep.subr.bf16.mxu0 %v1998_v37 }
  0x60   : > { %1208 = vmatmul.mubr.bf16.gmra.mrb[28].mxu0 %v1996_v36  ;;  %1845 = vmatprep.subr.bf16.mxu1 %v1998_v37 }
  0x61   : > { %1273 = vmatmul.mubr.bf16.gmra.mrb[28].mxu1 %v1997_v38  ;;  %1831 = vmatprep.mubr.bf16.mxu0 %v2000_v39 }
  0x62   : > { %1828 = vmatpush3.bf16.msra.mxu0 %v1998_v37  ;;  %1835 = vmatprep.mubr.bf16.mxu1 %v2001_v40 }
  0x63   : > { %1853 = vmatpush3.bf16.msra.mxu1 %v1998_v37  ;;  %1829 = vmatprep.subr.bf16.mxu0 %v1999_v41 }
  0x64   : > { %1846 = vmatprep.subr.bf16.mxu1 %v1999_v41 }
  0x66   : > { %1830 = vmatpush3.bf16.msra.mxu0 %v1999_v41 }
  0x67   : > { %1854 = vmatpush3.bf16.msra.mxu1 %v1999_v41 }
  0x69   : > { %1832 = vmatmul.mubr.bf16.vlgmr.msra.gmra.mrb[32].mxu0 %v2002_v42 }
  0x6a   : > { %1836 = vmatmul.mubr.bf16.vlgmr.msra.gmra.mrb[32].mxu1 %v2003_v43 }
  0xfb   : > { %v1659_v44 = vpop.f32.mrb[0].mxu0 }
  0xfc   : > { %v1699_v45 = vpop.f32.mrb[0].mxu1  ;;  %v1660_v47 = vpop.f32.mrb[1].mxu0 }
  0xfd   : > { %v1661_v48 = vadd.f32 %v1660_v47, %v1659_v44  ;;  %v1700_v49 = vpop.f32.mrb[1].mxu1  ;;  %v1662_v50 = vpop.f32.mrb[2].mxu0 }
  0xfe   : > { %v1701_v51 = vadd.f32 %v1700_v49, %v1699_v45  ;;  %v1702_v52 = vpop.f32.mrb[2].mxu1  ;;  %v1663_v53 = vpop.f32.mrb[3].mxu0 }
  0xff   : > { %v1056_v54 = vadd.f32 %v1661_v48, %v1492_v46  ;;  %v1664_v55 = vadd.f32 %v1663_v53, %v1662_v50  ;;  %v1703_v56 = vpop.f32.mrb[3].mxu1 }
 0x100   : > { %v1704_v57 = vadd.f32 %v1703_v56, %v1702_v52 }
 0x101   : > { %v1121_v58 = vadd.f32 %v1701_v51, %v1056_v54  ;;  %v1059_v59 = vadd.f32 %v1664_v55, %v1492_v46 }
 0x103   : > { %v1124_v60 = vadd.f32 %v1704_v57, %v1059_v59  ;;  %v1665_v61 = vpop.f32.mrb[4].mxu0 }
 0x104   : > { %v1705_v62 = vpop.f32.mrb[4].mxu1  ;;  %v1666_v63 = vpop.f32.mrb[5].mxu0 }
 0x105   : > { %v1667_v0 = vadd.f32 %v1666_v63, %v1665_v61  ;;  %v1706_v1 = vpop.f32.mrb[5].mxu1  ;;  %v1668_v2 = vpop.f32.mrb[6].mxu0 }
 0x106   : > { %v1707_v3 = vadd.f32 %v1706_v1, %v1705_v62  ;;  %v1708_v4 = vpop.f32.mrb[6].mxu1  ;;  %v1669_v5 = vpop.f32.mrb[7].mxu0 }
 0x107   : > { %v1064_v6 = vadd.f32 %v1667_v0, %v1492_v46  ;;  %v1670_v7 = vadd.f32 %v1669_v5, %v1668_v2  ;;  %v1709_v8 = vpop.f32.mrb[7].mxu1 }
 0x108   : > { %v1710_v9 = vadd.f32 %v1709_v8, %v1708_v4 }
 0x109   : > { %v1129_v10 = vadd.f32 %v1707_v3, %v1064_v6  ;;  %v1067_v11 = vadd.f32 %v1670_v7, %v1492_v46 }
 0x10b   : > { %v1132_v12 = vadd.f32 %v1710_v9, %v1067_v11  ;;  %v1671_v13 = vpop.f32.mrb[8].mxu0 }
 0x10c   : > { %v1711_v14 = vpop.f32.mrb[8].mxu1  ;;  %v1672_v15 = vpop.f32.mrb[9].mxu0 }
 0x10d   : > { %v1673_v16 = vadd.f32 %v1672_v15, %v1671_v13  ;;  %v1712_v17 = vpop.f32.mrb[9].mxu1  ;;  %v1674_v18 = vpop.f32.mrb[10].mxu0 }
 0x10e   : > { %v1713_v19 = vadd.f32 %v1712_v17, %v1711_v14  ;;  %v1714_v20 = vpop.f32.mrb[10].mxu1  ;;  %v1675_v21 = vpop.f32.mrb[11].mxu0 }
 0x10f   : > { %v1072_v22 = vadd.f32 %v1673_v16, %v1492_v46  ;;  %v1676_v23 = vadd.f32 %v1675_v21, %v1674_v18  ;;  %v1715_v24 = vpop.f32.mrb[11].mxu1 }
 0x110   : > { %v1716_v25 = vadd.f32 %v1715_v24, %v1714_v20 }
 0x111   : > { %v1137_v26 = vadd.f32 %v1713_v19, %v1072_v22  ;;  %v1075_v27 = vadd.f32 %v1676_v23, %v1492_v46 }
 0x113   : > { %v1140_v28 = vadd.f32 %v1716_v25, %v1075_v27  ;;  %v1677_v29 = vpop.f32.mrb[12].mxu0 }
 0x114   : > { %v1717_v30 = vpop.f32.mrb[12].mxu1  ;;  %v1678_v31 = vpop.f32.mrb[13].mxu0 }
 0x115   : > { %v1718_v32 = vpop.f32.mrb[13].mxu1  ;;  %v1679_v33 = vadd.f32 %v1678_v31, %v1677_v29  ;;  %v1680_v35 = vpop.f32.mrb[14].mxu0 }
 0x116   : > { %v1719_v34 = vadd.f32 %v1718_v32, %v1717_v30  ;;  %v1720_v36 = vpop.f32.mrb[14].mxu1  ;;  %v1681_v37 = vpop.f32.mrb[15].mxu0 }
 0x117   : > { %v1721_v38 = vpop.f32.mrb[15].mxu1  ;;  %v1080_v39 = vadd.f32 %v1679_v33, %v1492_v46  ;;  %v1682_v40 = vadd.f32 %v1681_v37, %v1680_v35 }
 0x118   : > { %v1722_v41 = vadd.f32 %v1721_v38, %v1720_v36 }
 0x119   : > { %v1145_v42 = vadd.f32 %v1719_v34, %v1080_v39  ;;  %v1083_v43 = vadd.f32 %v1682_v40, %v1492_v46 }
 0x11b   : > { %v1148_v44 = vadd.f32 %v1722_v41, %v1083_v43  ;;  %v1739_v45 = vpop.f32.mrb[16].mxu0 }
 0x11c   : > { %v1740_v47 = vpop.f32.mrb[17].mxu0  ;;  %v1779_v48 = vpop.f32.mrb[16].mxu1 }
 0x11d   : > { %v1741_v49 = vadd.f32 %v1740_v47, %v1739_v45  ;;  %v1742_v50 = vpop.f32.mrb[18].mxu0  ;;  %v1780_v51 = vpop.f32.mrb[17].mxu1 }
 0x11e   : > { %v1743_v52 = vpop.f32.mrb[19].mxu0  ;;  %v1781_v54 = vadd.f32 %v1780_v51, %v1779_v48  ;;  %v1782_v55 = vpop.f32.mrb[18].mxu1 }
 0x11f   : > { %v1186_v53 = vadd.f32 %v1741_v49, %v1121_v58  ;;  %v1744_v56 = vadd.f32 %v1743_v52, %v1742_v50  ;;  %v1783_v57 = vpop.f32.mrb[19].mxu1 }
 0x120   : > { %v1784_v61 = vadd.f32 %v1783_v57, %v1782_v55 }
 0x121   : > { %v1189_v59 = vadd.f32 %v1744_v56, %v1124_v60  ;;  %v1251_v62 = vadd.f32 %v1781_v54, %v1186_v53 }
 0x123   : > { %v1745_v63 = vpop.f32.mrb[20].mxu0  ;;  %v1254_v0 = vadd.f32 %v1784_v61, %v1189_v59 }
 0x124   : > { %v1746_v1 = vpop.f32.mrb[21].mxu0  ;;  %v1785_v46 = vpop.f32.mrb[20].mxu1 }
 0x125   : > { %v1747_v2 = vadd.f32 %v1746_v1, %v1745_v63  ;;  %v1748_v3 = vpop.f32.mrb[22].mxu0  ;;  %v1786_v4 = vpop.f32.mrb[21].mxu1 }
 0x126   : > { %v1749_v5 = vpop.f32.mrb[23].mxu0  ;;  %v1787_v7 = vadd.f32 %v1786_v4, %v1785_v46  ;;  %v1788_v8 = vpop.f32.mrb[22].mxu1 }
 0x127   : > { %v1194_v6 = vadd.f32 %v1747_v2, %v1129_v10  ;;  %v1750_v9 = vadd.f32 %v1749_v5, %v1748_v3  ;;  %v1789_v58 = vpop.f32.mrb[23].mxu1 }
 0x128   : > { %v1790_v13 = vadd.f32 %v1789_v58, %v1788_v8 }
 0x129   : > { %v1197_v11 = vadd.f32 %v1750_v9, %v1132_v12  ;;  %v1259_v14 = vadd.f32 %v1787_v7, %v1194_v6 }
 0x12b   : > { %v1751_v15 = vpop.f32.mrb[24].mxu0  ;;  %v1262_v60 = vadd.f32 %v1790_v13, %v1197_v11 }
 0x12c   : > { %v1752_v16 = vpop.f32.mrb[25].mxu0  ;;  %v1791_v17 = vpop.f32.mrb[24].mxu1 }
 0x12d   : > { %v1753_v18 = vadd.f32 %v1752_v16, %v1751_v15  ;;  %v1754_v19 = vpop.f32.mrb[26].mxu0  ;;  %v1792_v20 = vpop.f32.mrb[25].mxu1 }
 0x12e   : > { %v1755_v21 = vpop.f32.mrb[27].mxu0  ;;  %v1793_v23 = vadd.f32 %v1792_v20, %v1791_v17  ;;  %v1794_v24 = vpop.f32.mrb[26].mxu1 }
 0x12f   : > { %v1202_v22 = vadd.f32 %v1753_v18, %v1137_v26  ;;  %v1756_v25 = vadd.f32 %v1755_v21, %v1754_v19  ;;  %v1795_v10 = vpop.f32.mrb[27].mxu1 }
 0x130   : > { %v1796_v29 = vadd.f32 %v1795_v10, %v1794_v24 }
 0x131   : > { %v1205_v27 = vadd.f32 %v1756_v25, %v1140_v28  ;;  %v1267_v30 = vadd.f32 %v1793_v23, %v1202_v22 }
 0x133   : > { %v1757_v31 = vpop.f32.mrb[28].mxu0  ;;  %v1270_v12 = vadd.f32 %v1796_v29, %v1205_v27 }
 0x134   : > { %v1758_v32 = vpop.f32.mrb[29].mxu0  ;;  %v1797_v33 = vpop.f32.mrb[28].mxu1 }
 0x135   : > { %v1759_v34 = vadd.f32 %v1758_v32, %v1757_v31  ;;  %v1760_v35 = vpop.f32.mrb[30].mxu0  ;;  %v1798_v36 = vpop.f32.mrb[29].mxu1 }
 0x136   : > { %v1761_v37 = vpop.f32.mrb[31].mxu0  ;;  %v1799_v39 = vadd.f32 %v1798_v36, %v1797_v33  ;;  %v1800_v40 = vpop.f32.mrb[30].mxu1 }
 0x137   : > { %v1210_v38 = vadd.f32 %v1759_v34, %v1145_v42  ;;  %v1762_v26 = vadd.f32 %v1761_v37, %v1760_v35  ;;  %v1801_v41 = vpop.f32.mrb[31].mxu1 }
 0x138   : > { %v1802_v45 = vadd.f32 %v1801_v41, %v1800_v40 }
 0x139   : > { %v1213_v43 = vadd.f32 %v1762_v26, %v1148_v44  ;;  %v1275_v47 = vadd.f32 %v1799_v39, %v1210_v38 }
 0x13b   : > { %v1278_v28 = vadd.f32 %v1802_v45, %v1213_v43 }
 0x13c   : > { %v1833_v48 = vpop.f32.mrb[32].mxu0 }
 0x13d   : > { %v1324_v49 = vadd.f32 %v1833_v48, %v1259_v14  ;;  %v1837_v50 = vpop.f32.mrb[32].mxu1  ;;  %v1315_v51 = vpop.f32.mrb[33].mxu0 }
 0x13e   : > { %v1340_v52 = vadd.f32 %v1837_v50, %v1275_v47  ;;  %v1316_v53 = vadd.f32 %v1315_v51, %v1251_v62  ;;  %v1331_v54 = vpop.f32.mrb[33].mxu1  ;;  %v1834_v55 = vpop.f32.mrb[34].mxu0 }
 0x13f   : > { %v1332_v56 = vadd.f32 %v1331_v54, %v1267_v30  ;;  %v1327_v42 = vadd.f32 %v1834_v55, %v1262_v60  ;;  %v1838_v57 = vpop.f32.mrb[34].mxu1  ;;  %v1318_v59 = vpop.f32.mrb[35].mxu0  ;;  %v1348_v44 = vmax.f32 %v1324_v49, 0.0 }
 0x140   : > { %v1343_v61 = vadd.f32 %v1838_v57, %v1278_v28  ;;  %v1319_v63 = vadd.f32 %v1318_v59, %v1254_v0  ;;  %v1334_v1 = vpop.f32.mrb[35].mxu1  ;;  %v1352_v3 = vmax.f32 %v1340_v52, 0.0  ;;  %v1346_v4 = vmax.f32 %v1316_v53, 0.0 }
 0x141   : > { %v1349_v46 = vmax.f32 %v1327_v42, 0.0  ;;  %v1335_v2 = vadd.f32 %v1334_v1, %v1270_v12  ;;  %v1350_v6 = vmax.f32 %v1332_v56, 0.0 }
 0x142   : > { %v1353_v62 = vmax.f32 %v1343_v61, 0.0  ;;  %v1347_v5 = vmax.f32 %v1319_v63, 0.0 }
 0x143   : > { %v1628_v7 = vpack.c.bf16 %v1349_v46, %v1348_v44  ;;  %v1351_v8 = vmax.f32 %v1335_v2, 0.0 }
 0x144   : > { %v1638_v9 = vpack.c.bf16 %v1353_v62, %v1352_v3  ;;  %v1623_v58 = vpack.c.bf16 %v1347_v5, %v1346_v4 }
 0x145   : > { %1640 = vst [vmem:[%s211_s7 + $0x8] sm:$0xff] %v1628_v7   ;;  %v1633_v11 = vpack.c.bf16 %v1351_v8, %v1350_v6 }
 0x146   : > { %1642 = vst [vmem:[%s211_s7 + $0x18] sm:$0xff] %v1638_v9   ;;  %1624 = vst [vmem:[%s211_s7] sm:$0xff] %v1623_v58  }
 0x147   : > { %1641 = vst [vmem:[%s211_s7 + $0x10] sm:$0xff] %v1633_v11  }
 0x148 PF: > { %s13_s14 = sadd.s32 1, %s2026_s14   ;;  %s2350_s12 = smov %s2022_s13 }
 0x149   : > { %p10_p5 = scmp.ge.s32.totalorder %s13_s14, 4   ;;  %s2351_s13 = smov %s2353_s15 }
 0x14b   :  { %12 = sbr.rel (!%p10_p5) target bundleno = 2 (0x2), region = 62 }

// kernel: inpaint_loss.91
= control target key start
LH: loop header
LB: loop body
LE: loop exit
PB: predicated region body
PF: predicated region fallthrough
CT: control target
= control target key end

     0   :  { %s1965_s12 = smov 0   ;;  %s1967_s13 = smov 0   ;;  %s2452_s0 = inlined_call_operand.vmem [shape: bf16[2,16,1152], index: 0, kind: input, shape index: {}]   ;;  %s2453_s1 = inlined_call_operand.vmem [shape: bf16[1152,256], index: 1, kind: input, shape index: {}]   ;;  %s2454_s2 = inlined_call_operand.vmem [shape: f32[1,256], index: 2, kind: input, shape index: {}]   ;;  %s2455_s3 = inlined_call_operand.vmem [shape: bf16[2,16,256], index: 3, kind: output, shape index: {}]  }
   0x1   :  { %s1969_s14 = smov 0  }
   0x2 LB: > { %s25_s15 = sadd.s32 1, %s1938_s13  ;;  %p1481_p0 = scmp.ge.s32.totalorder %s1942_s14, 1  ;;  %s1942_s14 = sphi %s1969_s14, %s13_s14   ;;  %s1938_s13 = sphi %s1967_s13, %s2457_s13   ;;  %s1934_s12 = sphi %s1965_s12, %s2456_s12  }
   0x3   : > { %p27_p1 = scmp.ge.s32.totalorder %s25_s15, 2  ;;  %p159_p2 = scmp.lt.s32.totalorder %s1942_s14, 3 }
   0x5   : > { %s2459_s15 = smov (%p27_p1, %s25_s15), 0  ;;  %p160_p3 = pnand %p1481_p0, %p159_p2 }
   0x6   : > { %v1691_v0 = vld [vmem:[%s2453_s1 + $0x4] ss:$8 sps:$4 sm:$0xff] (!%p160_p3)   ;;  %v1695_v2 = vld [vmem:[%s2453_s1] ss:$8 sps:$4 sm:$0xff] (!%p160_p3)   ;;  %v1697_v4 = vld [vmem:[%s2453_s1 + $0x14] ss:$8 sps:$4 sm:$0xff] (!%p160_p3)  }
   0x7   : > { %163 = sbr.rel (%p160_p3) target bundleno = 390 (0x186), region = 32  ;;  %v1693_v1 = vld [vmem:[%s2453_s1 + $0x204] ss:$8 sps:$4 sm:$0xff] (!%p160_p3)   ;;  %1148 = vmatprep.subr.bf16.mxu1 (!%p160_p3), %v1691_v0  ;;  %v1696_v3 = vld [vmem:[%s2453_s1 + $0x200] ss:$8 sps:$4 sm:$0xff] (!%p160_p3)   ;;  %p194_p4 = scmp.lt.s32.totalorder (!%p160_p3), %s1934_s12, 1 }
   0x8   : > { %1234 = vmatprep.subr.bf16.mxu0 (!%p160_p3), %v1693_v1  ;;  %1149 = vmatpush1.bf16.msra.mxu1 (!%p160_p3), %v1695_v2  ;;  %v1699_v5 = vld [vmem:[%s2453_s1 + $0x214] ss:$8 sps:$4 sm:$0xff] (!%p160_p3)   ;;  %v1701_v6 = vld [vmem:[%s2453_s1 + $0x10] ss:$8 sps:$4 sm:$0xff] (!%p160_p3)   ;;  %v1703_v8 = vld [vmem:[%s2453_s1 + $0x24] ss:$8 sps:$4 sm:$0xff] (!%p160_p3)  }
   0x9   : > { %1235 = vmatpush1.bf16.msra.mxu0 (!%p160_p3), %v1696_v3  ;;  %1150 = vmatprep.subr.bf16.mxu1 (!%p160_p3), %v1697_v4  ;;  %v1702_v7 = vld [vmem:[%s2453_s1 + $0x210] ss:$8 sps:$4 sm:$0xff] (!%p160_p3)   ;;  %v1705_v9 = vld [vmem:[%s2453_s1 + $0x224] ss:$8 sps:$4 sm:$0xff] (!%p160_p3)   ;;  %v1707_v10 = vld [vmem:[%s2453_s1 + $0x20] ss:$8 sps:$4 sm:$0xff] (!%p160_p3)  }
   0xa   : > { %1236 = vmatprep.subr.bf16.mxu0 (!%p160_p3), %v1699_v5  ;;  %v1708_v11 = vld [vmem:[%s2453_s1 + $0x220] ss:$8 sps:$4 sm:$0xff] (!%p160_p3)   ;;  %v1709_v12 = vld [vmem:[%s2453_s1 + $0x34] ss:$8 sps:$4 sm:$0xff] (!%p160_p3)   ;;  %v1713_v14 = vld [vmem:[%s2453_s1 + $0x30] ss:$8 sps:$4 sm:$0xff] (!%p160_p3)  }
   0xb   : > { %v1711_v13 = vld [vmem:[%s2453_s1 + $0x234] ss:$8 sps:$4 sm:$0xff] (!%p160_p3)   ;;  %v1714_v15 = vld [vmem:[%s2453_s1 + $0x230] ss:$8 sps:$4 sm:$0xff] (!%p160_p3)   ;;  %v1715_v16 = vld [vmem:[%s2453_s1 + $0x44] ss:$8 sps:$4 sm:$0xff] (!%p160_p3)  }
   0xc   : > { %1151 = vmatpush1.bf16.msra.mxu1 (!%p160_p3), %v1701_v6  ;;  %v1717_v17 = vld [vmem:[%s2453_s1 + $0x244] ss:$8 sps:$4 sm:$0xff] (!%p160_p3)   ;;  %v1719_v18 = vld [vmem:[%s2453_s1 + $0x40] ss:$8 sps:$4 sm:$0xff] (!%p160_p3)   ;;  %v1721_v20 = vld [vmem:[%s2453_s1 + $0x54] ss:$8 sps:$4 sm:$0xff] (!%p160_p3)  }
   0xd   : > { %1237 = vmatpush1.bf16.msra.mxu0 (!%p160_p3), %v1702_v7  ;;  %1152 = vmatprep.subr.bf16.mxu1 (!%p160_p3), %v1703_v8  ;;  %v1720_v19 = vld [vmem:[%s2453_s1 + $0x240] ss:$8 sps:$4 sm:$0xff] (!%p160_p3)   ;;  %v1723_v21 = vld [vmem:[%s2453_s1 + $0x254] ss:$8 sps:$4 sm:$0xff] (!%p160_p3)   ;;  %v1725_v22 = vld [vmem:[%s2453_s1 + $0x50] ss:$8 sps:$4 sm:$0xff] (!%p160_p3)  }
   0xe   : > { %1238 = vmatprep.subr.bf16.mxu0 %v1705_v9  ;;  %v1726_v23 = vld [vmem:[%s2453_s1 + $0x250] ss:$8 sps:$4 sm:$0xff]   ;;  %v1727_v24 = vld [vmem:[%s2453_s1 + $0x64] ss:$8 sps:$4 sm:$0xff]   ;;  %v1731_v26 = vld [vmem:[%s2453_s1 + $0x60] ss:$8 sps:$4 sm:$0xff]  }
   0xf   : > { %v1729_v25 = vld [vmem:[%s2453_s1 + $0x264] ss:$8 sps:$4 sm:$0xff]   ;;  %v1732_v27 = vld [vmem:[%s2453_s1 + $0x260] ss:$8 sps:$4 sm:$0xff]   ;;  %v1733_v28 = vld [vmem:[%s2453_s1 + $0x74] ss:$8 sps:$4 sm:$0xff]  }
  0x10   : > { %1153 = vmatpush1.bf16.msra.mxu1 %v1707_v10  ;;  %v1735_v29 = vld [vmem:[%s2453_s1 + $0x274] ss:$8 sps:$4 sm:$0xff]   ;;  %v1737_v30 = vld [vmem:[%s2453_s1 + $0x70] ss:$8 sps:$4 sm:$0xff]   ;;  %v1739_v32 = vld [vmem:[%s2453_s1 + $0x84] ss:$8 sps:$4 sm:$0xff]  }
  0x11   : > { %1239 = vmatpush1.bf16.msra.mxu0 %v1708_v11  ;;  %1154 = vmatprep.subr.bf16.mxu1 %v1709_v12  ;;  %v1738_v31 = vld [vmem:[%s2453_s1 + $0x270] ss:$8 sps:$4 sm:$0xff]   ;;  %v1741_v33 = vld [vmem:[%s2453_s1 + $0x284] ss:$8 sps:$4 sm:$0xff]   ;;  %v1743_v34 = vld [vmem:[%s2453_s1 + $0x80] ss:$8 sps:$4 sm:$0xff]  }
  0x12   : > { %1240 = vmatprep.subr.bf16.mxu0 %v1711_v13  ;;  %v1744_v35 = vld [vmem:[%s2453_s1 + $0x280] ss:$8 sps:$4 sm:$0xff]   ;;  %v1745_v36 = vld [vmem:[%s2453_s1 + $0x94] ss:$8 sps:$4 sm:$0xff]   ;;  %s2461_s12 = smov (!%p194_p4, %s1934_s12), 1 }
  0x13   : > { %v1747_v37 = vld [vmem:[%s2453_s1 + $0x294] ss:$8 sps:$4 sm:$0xff]   ;;  %v1749_v38 = vld [vmem:[%s2453_s1 + $0x90] ss:$8 sps:$4 sm:$0xff]   ;;  %v1751_v40 = vld [vmem:[%s2453_s1 + $0xa4] ss:$8 sps:$4 sm:$0xff]  }
  0x14   : > { %1155 = vmatpush1.bf16.msra.mxu1 %v1713_v14  ;;  %v1750_v39 = vld [vmem:[%s2453_s1 + $0x290] ss:$8 sps:$4 sm:$0xff]   ;;  %s1665_s29 = smul.u32 72, %s2461_s12  ;;  %v1753_v41 = vld [vmem:[%s2453_s1 + $0x2a4] ss:$8 sps:$4 sm:$0xff]  }
  0x15   : > { %1241 = vmatpush1.bf16.msra.mxu0 %v1714_v15  ;;  %1156 = vmatprep.subr.bf16.mxu1 %v1715_v16  ;;  %v1755_v42 = vld [vmem:[%s2453_s1 + $0xa0] ss:$8 sps:$4 sm:$0xff]   ;;  %v1757_v44 = vld [vmem:[%s2453_s1 + $0xb4] ss:$8 sps:$4 sm:$0xff]   ;;  %v1761_v46 = vld [vmem:[%s2453_s1 + $0xb0] ss:$8 sps:$4 sm:$0xff]  }
  0x16   : > { %1242 = vmatprep.subr.bf16.mxu0 %v1717_v17  ;;  %v1756_v43 = vld [vmem:[%s2453_s1 + $0x2a0] ss:$8 sps:$4 sm:$0xff]   ;;  %s2128_s17 = scalar_lea.vmem %s2452_s0, %s1665_s29  ;;  %v1759_v45 = vld [vmem:[%s2453_s1 + $0x2b4] ss:$8 sps:$4 sm:$0xff]   ;;  %v1762_v47 = vld [vmem:[%s2453_s1 + $0x2b0] ss:$8 sps:$4 sm:$0xff]  }
  0x17   : > { %v1789_v48 = vld [vmem:[%s2128_s17 + $0x4] ss:$36 sps:$4 sm:$0xff]   ;;  %v1795_v51 = vld [vmem:[%s2128_s17 + $0x14] ss:$36 sps:$4 sm:$0xff]  }
  0x18   : > { %1157 = vmatpush1.bf16.msra.mxu1 %v1719_v18  ;;  %v1763_v49 = vld [vmem:[%s2453_s1 + $0xc4] ss:$8 sps:$4 sm:$0xff]   ;;  %1180 = vmatprep.mubr.bf16.mxu1 %v1789_v48  ;;  %v1767_v52 = vld [vmem:[%s2453_s1 + $0xc0] ss:$8 sps:$4 sm:$0xff]   ;;  %v1769_v54 = vld [vmem:[%s2453_s1 + $0xd4] ss:$8 sps:$4 sm:$0xff]  }
  0x19   : > { %1243 = vmatpush1.bf16.msra.mxu0 %v1720_v19  ;;  %1158 = vmatprep.subr.bf16.mxu1 %v1721_v20  ;;  %v1765_v50 = vld [vmem:[%s2453_s1 + $0x2c4] ss:$8 sps:$4 sm:$0xff]   ;;  %v1768_v53 = vld [vmem:[%s2453_s1 + $0x2c0] ss:$8 sps:$4 sm:$0xff]   ;;  %v1771_v55 = vld [vmem:[%s2453_s1 + $0x2d4] ss:$8 sps:$4 sm:$0xff]  }
  0x1a   : > { %1244 = vmatprep.subr.bf16.mxu0 %v1723_v21  ;;  %1266 = vmatprep.mubr.bf16.mxu0 %v1795_v51  ;;  %v1773_v56 = vld [vmem:[%s2453_s1 + $0xd0] ss:$8 sps:$4 sm:$0xff]   ;;  %v1775_v58 = vld [vmem:[%s2453_s1 + $0xe4] ss:$8 sps:$4 sm:$0xff]   ;;  %v1779_v60 = vld [vmem:[%s2453_s1 + $0xe0] ss:$8 sps:$4 sm:$0xff]  }
  0x1b   : > { %v1774_v57 = vld [vmem:[%s2453_s1 + $0x2d0] ss:$8 sps:$4 sm:$0xff]   ;;  %v1777_v59 = vld [vmem:[%s2453_s1 + $0x2e4] ss:$8 sps:$4 sm:$0xff]   ;;  %v1780_v61 = vld [vmem:[%s2453_s1 + $0x2e0] ss:$8 sps:$4 sm:$0xff]  }
  0x1c   : > { %1159 = vmatpush1.bf16.msra.mxu1 %v1725_v22  ;;  %v1781_v62 = vld [vmem:[%s2453_s1 + $0xf4] ss:$8 sps:$4 sm:$0xff]   ;;  %v1785_v0 = vld [vmem:[%s2453_s1 + $0xf0] ss:$8 sps:$4 sm:$0xff]   ;;  %v1792_v2 = vld [vmem:[%s2453_s1 + $0x104] ss:$8 sps:$4 sm:$0xff]  }
  0x1d   : > { %1245 = vmatpush1.bf16.msra.mxu0 %v1726_v23  ;;  %1160 = vmatprep.subr.bf16.mxu1 %v1727_v24  ;;  %v1783_v63 = vld [vmem:[%s2453_s1 + $0x2f4] ss:$8 sps:$4 sm:$0xff]   ;;  %v1786_v1 = vld [vmem:[%s2453_s1 + $0x2f0] ss:$8 sps:$4 sm:$0xff]   ;;  %v1798_v3 = vld [vmem:[%s2453_s1 + $0x304] ss:$8 sps:$4 sm:$0xff]  }
  0x1e   : > { %1246 = vmatprep.subr.bf16.mxu0 %v1729_v25  ;;  %v1787_v4 = vld [vmem:[%s2128_s17] ss:$36 sps:$4 sm:$0xff]   ;;  %v1793_v6 = vld [vmem:[%s2128_s17 + $0x10] ss:$36 sps:$4 sm:$0xff]  }
  0x1f   : > { %v1790_v5 = vld [vmem:[%s2453_s1 + $0x100] ss:$8 sps:$4 sm:$0xff]   ;;  %v1801_v8 = vld [vmem:[%s2453_s1 + $0x114] ss:$8 sps:$4 sm:$0xff]   ;;  %v1799_v10 = vld [vmem:[%s2453_s1 + $0x110] ss:$8 sps:$4 sm:$0xff]  }
  0x20   : > { %1161 = vmatpush1.bf16.msra.mxu1 %v1731_v26  ;;  %v1796_v7 = vld [vmem:[%s2453_s1 + $0x300] ss:$8 sps:$4 sm:$0xff]   ;;  %v1804_v9 = vld [vmem:[%s2453_s1 + $0x314] ss:$8 sps:$4 sm:$0xff]   ;;  %v1802_v11 = vld [vmem:[%s2453_s1 + $0x310] ss:$8 sps:$4 sm:$0xff]  }
  0x21   : > { %1247 = vmatpush1.bf16.msra.mxu0 %v1732_v27  ;;  %1162 = vmatprep.subr.bf16.mxu1 %v1733_v28  ;;  %v1807_v12 = vld [vmem:[%s2453_s1 + $0x124] ss:$8 sps:$4 sm:$0xff]   ;;  %v1805_v14 = vld [vmem:[%s2453_s1 + $0x120] ss:$8 sps:$4 sm:$0xff]   ;;  %v1813_v16 = vld [vmem:[%s2453_s1 + $0x134] ss:$8 sps:$4 sm:$0xff]  }
  0x22   : > { %1248 = vmatprep.subr.bf16.mxu0 %v1735_v29  ;;  %v1810_v13 = vld [vmem:[%s2453_s1 + $0x324] ss:$8 sps:$4 sm:$0xff]   ;;  %v1808_v15 = vld [vmem:[%s2453_s1 + $0x320] ss:$8 sps:$4 sm:$0xff]   ;;  %v1816_v17 = vld [vmem:[%s2453_s1 + $0x334] ss:$8 sps:$4 sm:$0xff]  }
  0x23   : > { %v1811_v18 = vld [vmem:[%s2453_s1 + $0x130] ss:$8 sps:$4 sm:$0xff]   ;;  %v1819_v20 = vld [vmem:[%s2453_s1 + $0x144] ss:$8 sps:$4 sm:$0xff]   ;;  %v1817_v22 = vld [vmem:[%s2453_s1 + $0x140] ss:$8 sps:$4 sm:$0xff]  }
  0x24   : > { %1163 = vmatpush1.bf16.msra.mxu1 %v1737_v30  ;;  %v1814_v19 = vld [vmem:[%s2453_s1 + $0x330] ss:$8 sps:$4 sm:$0xff]   ;;  %v1822_v21 = vld [vmem:[%s2453_s1 + $0x344] ss:$8 sps:$4 sm:$0xff]   ;;  %v1820_v23 = vld [vmem:[%s2453_s1 + $0x340] ss:$8 sps:$4 sm:$0xff]  }
  0x25   : > { %1249 = vmatpush1.bf16.msra.mxu0 %v1738_v31  ;;  %1164 = vmatprep.subr.bf16.mxu1 %v1739_v32  ;;  %v1825_v24 = vld [vmem:[%s2453_s1 + $0x154] ss:$8 sps:$4 sm:$0xff]   ;;  %v1823_v26 = vld [vmem:[%s2453_s1 + $0x150] ss:$8 sps:$4 sm:$0xff]   ;;  %v1831_v28 = vld [vmem:[%s2453_s1 + $0x164] ss:$8 sps:$4 sm:$0xff]  }
  0x26   : > { %1250 = vmatprep.subr.bf16.mxu0 %v1741_v33  ;;  %v1828_v25 = vld [vmem:[%s2453_s1 + $0x354] ss:$8 sps:$4 sm:$0xff]   ;;  %v1826_v27 = vld [vmem:[%s2453_s1 + $0x350] ss:$8 sps:$4 sm:$0xff]   ;;  %v1834_v29 = vld [vmem:[%s2453_s1 + $0x364] ss:$8 sps:$4 sm:$0xff]  }
  0x27   : > { %v1829_v30 = vld [vmem:[%s2453_s1 + $0x160] ss:$8 sps:$4 sm:$0xff]   ;;  %v1837_v32 = vld [vmem:[%s2453_s1 + $0x174] ss:$8 sps:$4 sm:$0xff]  }
  0x28   : > { %1165 = vmatpush1.bf16.msra.mxu1 %v1743_v34  ;;  %v1832_v31 = vld [vmem:[%s2453_s1 + $0x360] ss:$8 sps:$4 sm:$0xff]   ;;  %v1840_v33 = vld [vmem:[%s2453_s1 + $0x374] ss:$8 sps:$4 sm:$0xff]   ;;  %v1891_v34 = vld [vmem:[%s2128_s17 + $0xc] ss:$36 sps:$4 sm:$0xff]  }
  0x29   : > { %1251 = vmatpush1.bf16.msra.mxu0 %v1744_v35  ;;  %1166 = vmatprep.subr.bf16.mxu1 %v1745_v36  ;;  %v1894_v35 = vld [vmem:[%s2128_s17 + $0x1c] ss:$36 sps:$4 sm:$0xff]   ;;  %v1835_v36 = vld [vmem:[%s2453_s1 + $0x170] ss:$8 sps:$4 sm:$0xff]  }
  0x2a   : > { %1252 = vmatprep.subr.bf16.mxu0 %v1747_v37  ;;  %v1838_v37 = vld [vmem:[%s2453_s1 + $0x370] ss:$8 sps:$4 sm:$0xff]   ;;  %v1853_v48 = vld [vmem:[%s2453_s1 + $0x1a0] ss:$8 sps:$4 sm:$0xff]   ;;  %v1864_v51 = vld [vmem:[%s2453_s1 + $0x3b4] ss:$8 sps:$4 sm:$0xff]  }
  0x2c   : > { %1167 = vmatpush1.bf16.msra.mxu1 %v1749_v38  ;;  %v1843_v38 = vld [vmem:[%s2453_s1 + $0x184] ss:$8 sps:$4 sm:$0xff]  }
  0x2d   : > { %1253 = vmatpush1.bf16.msra.mxu0 %v1750_v39  ;;  %1168 = vmatprep.subr.bf16.mxu1 %v1751_v40  ;;  %v1846_v39 = vld [vmem:[%s2453_s1 + $0x384] ss:$8 sps:$4 sm:$0xff]   ;;  %v1841_v40 = vld [vmem:[%s2453_s1 + $0x180] ss:$8 sps:$4 sm:$0xff]  }
  0x2e   : > { %1254 = vmatprep.subr.bf16.mxu0 %v1753_v41  ;;  %v1844_v41 = vld [vmem:[%s2453_s1 + $0x380] ss:$8 sps:$4 sm:$0xff]  }
  0x30   : > { %1169 = vmatpush1.bf16.msra.mxu1 %v1755_v42  ;;  %v1849_v42 = vld [vmem:[%s2453_s1 + $0x194] ss:$8 sps:$4 sm:$0xff]  }
  0x31   : > { %1255 = vmatpush1.bf16.msra.mxu0 %v1756_v43  ;;  %1170 = vmatprep.subr.bf16.mxu1 %v1757_v44  ;;  %v1852_v43 = vld [vmem:[%s2453_s1 + $0x394] ss:$8 sps:$4 sm:$0xff]   ;;  %v1847_v44 = vld [vmem:[%s2453_s1 + $0x190] ss:$8 sps:$4 sm:$0xff]  }
  0x32   : > { %1256 = vmatprep.subr.bf16.mxu0 %v1759_v45  ;;  %v1850_v45 = vld [vmem:[%s2453_s1 + $0x390] ss:$8 sps:$4 sm:$0xff]  }
  0x34   : > { %1171 = vmatpush1.bf16.msra.mxu1 %v1761_v46  ;;  %v1855_v46 = vld [vmem:[%s2453_s1 + $0x1a4] ss:$8 sps:$4 sm:$0xff]  }
  0x35   : > { %1257 = vmatpush1.bf16.msra.mxu0 %v1762_v47  ;;  %1172 = vmatprep.subr.bf16.mxu1 %v1763_v49  ;;  %v1858_v47 = vld [vmem:[%s2453_s1 + $0x3a4] ss:$8 sps:$4 sm:$0xff]   ;;  %v1856_v49 = vld [vmem:[%s2453_s1 + $0x3a0] ss:$8 sps:$4 sm:$0xff]  }
  0x36   : > { %1258 = vmatprep.subr.bf16.mxu0 %v1765_v50  ;;  %v1861_v50 = vld [vmem:[%s2453_s1 + $0x1b4] ss:$8 sps:$4 sm:$0xff]  }
  0x38   : > { %1173 = vmatpush1.bf16.msra.mxu1 %v1767_v52  ;;  %v1859_v52 = vld [vmem:[%s2453_s1 + $0x1b0] ss:$8 sps:$4 sm:$0xff]  }
  0x39   : > { %1259 = vmatpush1.bf16.msra.mxu0 %v1768_v53  ;;  %1174 = vmatprep.subr.bf16.mxu1 %v1769_v54  ;;  %v1862_v53 = vld [vmem:[%s2453_s1 + $0x3b0] ss:$8 sps:$4 sm:$0xff]   ;;  %v1867_v54 = vld [vmem:[%s2453_s1 + $0x1c4] ss:$8 sps:$4 sm:$0xff]  }
  0x3a   : > { %1260 = vmatprep.subr.bf16.mxu0 %v1771_v55  ;;  %v1870_v55 = vld [vmem:[%s2453_s1 + $0x3c4] ss:$8 sps:$4 sm:$0xff]  }
  0x3c   : > { %1175 = vmatpush1.bf16.msra.mxu1 %v1773_v56  ;;  %v1865_v56 = vld [vmem:[%s2453_s1 + $0x1c0] ss:$8 sps:$4 sm:$0xff]  }
  0x3d   : > { %1261 = vmatpush1.bf16.msra.mxu0 %v1774_v57  ;;  %1176 = vmatprep.subr.bf16.mxu1 %v1775_v58  ;;  %v1868_v57 = vld [vmem:[%s2453_s1 + $0x3c0] ss:$8 sps:$4 sm:$0xff]   ;;  %v1873_v58 = vld [vmem:[%s2453_s1 + $0x1d4] ss:$8 sps:$4 sm:$0xff]  }
  0x3e   : > { %1262 = vmatprep.subr.bf16.mxu0 %v1777_v59  ;;  %v1876_v59 = vld [vmem:[%s2453_s1 + $0x3d4] ss:$8 sps:$4 sm:$0xff]  }
  0x40   : > { %1177 = vmatpush1.bf16.msra.mxu1 %v1779_v60  ;;  %v1871_v60 = vld [vmem:[%s2453_s1 + $0x1d0] ss:$8 sps:$4 sm:$0xff]  }
  0x41   : > { %1263 = vmatpush1.bf16.msra.mxu0 %v1780_v61  ;;  %1178 = vmatprep.subr.bf16.mxu1 %v1781_v62  ;;  %v1874_v61 = vld [vmem:[%s2453_s1 + $0x3d0] ss:$8 sps:$4 sm:$0xff]   ;;  %v1879_v62 = vld [vmem:[%s2453_s1 + $0x1e4] ss:$8 sps:$4 sm:$0xff]  }
  0x42   : > { %1264 = vmatprep.subr.bf16.mxu0 %v1783_v63  ;;  %v1882_v63 = vld [vmem:[%s2453_s1 + $0x3e4] ss:$8 sps:$4 sm:$0xff]  }
  0x44   : > { %1179 = vmatpush1.bf16.msra.mxu1 %v1785_v0  ;;  %v1877_v0 = vld [vmem:[%s2453_s1 + $0x1e0] ss:$8 sps:$4 sm:$0xff]  }
  0x45   : > { %1265 = vmatpush1.bf16.msra.mxu0 %v1786_v1  ;;  %1191 = vmatprep.subr.bf16.mxu1 %v1792_v2  ;;  %v1880_v1 = vld [vmem:[%s2453_s1 + $0x3e0] ss:$8 sps:$4 sm:$0xff]   ;;  %v1885_v2 = vld [vmem:[%s2453_s1 + $0x1f4] ss:$8 sps:$4 sm:$0xff]  }
  0x46   : > { %1277 = vmatprep.subr.bf16.mxu0 %v1798_v3  ;;  %v1888_v3 = vld [vmem:[%s2453_s1 + $0x3f4] ss:$8 sps:$4 sm:$0xff]  }
  0x47   : > { %1181 = vmatmul.mubr.bf16.vlgmr.msra.gmra.mrb[0].mxu1 %v1787_v4  ;;  %v1883_v4 = vld [vmem:[%s2453_s1 + $0x1f0] ss:$8 sps:$4 sm:$0xff]  }
  0x48   : > { %1267 = vmatmul.mubr.bf16.vlgmr.msra.gmra.mrb[0].mxu0 %v1793_v6  ;;  %1192 = vmatpush1.bf16.msra.mxu1 %v1790_v5  ;;  %v1886_v5 = vld [vmem:[%s2453_s1 + $0x3f0] ss:$8 sps:$4 sm:$0xff]   ;;  %v1897_v6 = vld [vmem:[%s2453_s1 + $0x404] ss:$8 sps:$4 sm:$0xff]  }
  0x49   : > { %1278 = vmatpush1.bf16.msra.mxu0 %v1796_v7  ;;  %1193 = vmatprep.subr.bf16.mxu1 %v1801_v8  ;;  %v1889_v7 = vld [vmem:[%s2128_s17 + $0x8] ss:$36 sps:$4 sm:$0xff]   ;;  %v1892_v8 = vld [vmem:[%s2128_s17 + $0x18] ss:$36 sps:$4 sm:$0xff]  }
  0x4a   : > { %1279 = vmatprep.subr.bf16.mxu0 %v1804_v9  ;;  %1223 = vmatprep.mubr.bf16.mxu1 %v1891_v34  ;;  %v1895_v9 = vld [vmem:[%s2453_s1 + $0x400] ss:$8 sps:$4 sm:$0xff]  }
  0x4b   : > { %1309 = vmatprep.mubr.bf16.mxu0 %v1894_v35 }
  0x4c   : > { %1194 = vmatpush1.bf16.msra.mxu1 %v1799_v10  ;;  %v1900_v10 = vld [vmem:[%s2453_s1 + $0x414] ss:$8 sps:$4 sm:$0xff]  }
  0x4d   : > { %1280 = vmatpush1.bf16.msra.mxu0 %v1802_v11  ;;  %1195 = vmatprep.subr.bf16.mxu1 %v1807_v12  ;;  %v1898_v11 = vld [vmem:[%s2453_s1 + $0x410] ss:$8 sps:$4 sm:$0xff]   ;;  %v1944_v12 = vmov 0  }
  0x4e   : > { %1281 = vmatprep.subr.bf16.mxu0 %v1810_v13  ;;  %v1903_v13 = vld [vmem:[%s2453_s1 + $0x424] ss:$8 sps:$4 sm:$0xff]  }
  0x50   : > { %1196 = vmatpush1.bf16.msra.mxu1 %v1805_v14  ;;  %v1901_v14 = vld [vmem:[%s2453_s1 + $0x420] ss:$8 sps:$4 sm:$0xff]  }
  0x51   : > { %1282 = vmatpush1.bf16.msra.mxu0 %v1808_v15  ;;  %1197 = vmatprep.subr.bf16.mxu1 %v1813_v16  ;;  %v1906_v15 = vld [vmem:[%s2453_s1 + $0x434] ss:$8 sps:$4 sm:$0xff]   ;;  %v1904_v16 = vld [vmem:[%s2453_s1 + $0x430] ss:$8 sps:$4 sm:$0xff]  }
  0x52   : > { %1283 = vmatprep.subr.bf16.mxu0 %v1816_v17  ;;  %v1909_v17 = vld [vmem:[%s2453_s1 + $0x444] ss:$8 sps:$4 sm:$0xff]  }
  0x54   : > { %1198 = vmatpush1.bf16.msra.mxu1 %v1811_v18  ;;  %v1907_v18 = vld [vmem:[%s2453_s1 + $0x440] ss:$8 sps:$4 sm:$0xff]  }
  0x55   : > { %1284 = vmatpush1.bf16.msra.mxu0 %v1814_v19  ;;  %1199 = vmatprep.subr.bf16.mxu1 %v1819_v20  ;;  %v1912_v19 = vld [vmem:[%s2453_s1 + $0x454] ss:$8 sps:$4 sm:$0xff]   ;;  %v1910_v20 = vld [vmem:[%s2453_s1 + $0x450] ss:$8 sps:$4 sm:$0xff]  }
  0x56   : > { %1285 = vmatprep.subr.bf16.mxu0 %v1822_v21  ;;  %v1915_v21 = vld [vmem:[%s2453_s1 + $0x464] ss:$8 sps:$4 sm:$0xff]  }
  0x58   : > { %1200 = vmatpush1.bf16.msra.mxu1 %v1817_v22  ;;  %v1913_v22 = vld [vmem:[%s2453_s1 + $0x460] ss:$8 sps:$4 sm:$0xff]  }
  0x59   : > { %1286 = vmatpush1.bf16.msra.mxu0 %v1820_v23  ;;  %1201 = vmatprep.subr.bf16.mxu1 %v1825_v24  ;;  %v1918_v23 = vld [vmem:[%s2453_s1 + $0x474] ss:$8 sps:$4 sm:$0xff]   ;;  %v1916_v24 = vld [vmem:[%s2453_s1 + $0x470] ss:$8 sps:$4 sm:$0xff]  }
  0x5a   : > { %1287 = vmatprep.subr.bf16.mxu0 %v1828_v25  ;;  %v1919_v25 = vld [vmem:[%s2128_s17 + $0x20] ss:$36 sps:$4 sm:$0xff]   ;;  %s1642_s17 = sshll.u32 %s2461_s12, 4 }
  0x5b   : > { %s213_s22 = scalar_lea.vmem %s2455_s3, %s1642_s17 }
  0x5c   : > { %1202 = vmatpush1.bf16.msra.mxu1 %v1823_v26 }
  0x5d   : > { %1288 = vmatpush1.bf16.msra.mxu0 %v1826_v27  ;;  %1203 = vmatprep.subr.bf16.mxu1 %v1831_v28 }
  0x5e   : > { %1289 = vmatprep.subr.bf16.mxu0 %v1834_v29 }
  0x60   : > { %1204 = vmatpush1.bf16.msra.mxu1 %v1829_v30  ;;  %v372_v30 = vlaneseq }
  0x61   : > { %1290 = vmatpush1.bf16.msra.mxu0 %v1832_v31  ;;  %1205 = vmatprep.subr.bf16.mxu1 %v1837_v32 }
  0x62   : > { %1291 = vmatprep.subr.bf16.mxu0 %v1840_v33  ;;  %v373_v31 = vshrl.u32 %v372_v30, 7  ;;  %v370_v33 = vld [vmem:[%s2454_s2] sm:$0x3] }
  0x64   : > { %1206 = vmatpush1.bf16.msra.mxu1 %v1835_v36  ;;  %v374_v32 = vsub.s32 0, %v373_v31  ;;  %v378_v34 = vsub.s32 1, %v373_v31 }
  0x65   : > { %1292 = vmatpush1.bf16.msra.mxu0 %v1838_v37  ;;  %1207 = vmatprep.subr.bf16.mxu1 %v1843_v38 }
  0x66   : > { %1293 = vmatprep.subr.bf16.mxu0 %v1846_v39  ;;  %v375_v35 = vrot.slane %v370_v33, %v374_v32  ;;  %v379_v36 = vrot.slane %v370_v33, %v378_v34 }
  0x68   : > { %1208 = vmatpush1.bf16.msra.mxu1 %v1841_v40 }
  0x69   : > { %1294 = vmatpush1.bf16.msra.mxu0 %v1844_v41  ;;  %1209 = vmatprep.subr.bf16.mxu1 %v1849_v42 }
  0x6a   : > { %1295 = vmatprep.subr.bf16.mxu0 %v1852_v43 }
  0x6c   : > { %1210 = vmatpush1.bf16.msra.mxu1 %v1847_v44 }
  0x6d   : > { %1296 = vmatpush1.bf16.msra.mxu0 %v1850_v45  ;;  %1211 = vmatprep.subr.bf16.mxu1 %v1855_v46 }
  0x6e   : > { %1297 = vmatprep.subr.bf16.mxu0 %v1858_v47 }
  0x70   : > { %1212 = vmatpush1.bf16.msra.mxu1 %v1853_v48 }
  0x71   : > { %1298 = vmatpush1.bf16.msra.mxu0 %v1856_v49  ;;  %1213 = vmatprep.subr.bf16.mxu1 %v1861_v50 }
  0x72   : > { %1299 = vmatprep.subr.bf16.mxu0 %v1864_v51 }
  0x74   : > { %1214 = vmatpush1.bf16.msra.mxu1 %v1859_v52 }
  0x75   : > { %1300 = vmatpush1.bf16.msra.mxu0 %v1862_v53  ;;  %1215 = vmatprep.subr.bf16.mxu1 %v1867_v54 }
  0x76   : > { %1301 = vmatprep.subr.bf16.mxu0 %v1870_v55 }
  0x78   : > { %1216 = vmatpush1.bf16.msra.mxu1 %v1865_v56 }
  0x79   : > { %1302 = vmatpush1.bf16.msra.mxu0 %v1868_v57  ;;  %1217 = vmatprep.subr.bf16.mxu1 %v1873_v58 }
  0x7a   : > { %1303 = vmatprep.subr.bf16.mxu0 %v1876_v59 }
  0x7c   : > { %1218 = vmatpush1.bf16.msra.mxu1 %v1871_v60 }
  0x7d   : > { %1304 = vmatpush1.bf16.msra.mxu0 %v1874_v61  ;;  %1219 = vmatprep.subr.bf16.mxu1 %v1879_v62 }
  0x7e   : > { %1305 = vmatprep.subr.bf16.mxu0 %v1882_v63 }
  0x80   : > { %1220 = vmatpush1.bf16.msra.mxu1 %v1877_v0 }
  0x81   : > { %1306 = vmatpush1.bf16.msra.mxu0 %v1880_v1  ;;  %1221 = vmatprep.subr.bf16.mxu1 %v1885_v2 }
  0x82   : > { %1307 = vmatprep.subr.bf16.mxu0 %v1888_v3 }
  0x84   : > { %1222 = vmatpush1.bf16.msra.mxu1 %v1883_v4 }
  0x85   : > { %1308 = vmatpush1.bf16.msra.mxu0 %v1886_v5 }
  0x86   : > { %1320 = vmatprep.subr.bf16.mxu0 %v1897_v6 }
  0x87   : > { %1224 = vmatmul.mubr.bf16.vlgmr.msra.gmra.mrb[0].mxu1 %v1889_v7 }
  0x88   : > { %1310 = vmatmul.mubr.bf16.vlgmr.msra.gmra.mrb[0].mxu0 %v1892_v8 }
  0x89   : > { %1321 = vmatpush1.bf16.msra.mxu0 %v1895_v9  ;;  %1352 = vmatprep.mubr.bf16.mxu0 %v1944_v12 }
  0x8a   : > { %1322 = vmatprep.subr.bf16.mxu0 %v1900_v10 }
  0x8d   : > { %1323 = vmatpush1.bf16.msra.mxu0 %v1898_v11 }
  0x8e   : > { %1324 = vmatprep.subr.bf16.mxu0 %v1903_v13 }
  0x91   : > { %1325 = vmatpush1.bf16.msra.mxu0 %v1901_v14 }
  0x92   : > { %1326 = vmatprep.subr.bf16.mxu0 %v1906_v15 }
  0x95   : > { %1327 = vmatpush1.bf16.msra.mxu0 %v1904_v16 }
  0x96   : > { %1328 = vmatprep.subr.bf16.mxu0 %v1909_v17 }
  0x99   : > { %1329 = vmatpush1.bf16.msra.mxu0 %v1907_v18 }
  0x9a   : > { %1330 = vmatprep.subr.bf16.mxu0 %v1912_v19 }
  0x9d   : > { %1331 = vmatpush1.bf16.msra.mxu0 %v1910_v20 }
  0x9e   : > { %1332 = vmatprep.subr.bf16.mxu0 %v1915_v21 }
  0xa1   : > { %1333 = vmatpush1.bf16.msra.mxu0 %v1913_v22 }
  0xa2   : > { %1334 = vmatprep.subr.bf16.mxu0 %v1918_v23 }
  0xa5   : > { %1335 = vmatpush1.bf16.msra.mxu0 %v1916_v24 }
  0xa8   : > { %1353 = vmatmul.mubr.bf16.vlgmr.msra.gmra.mrb[0].mxu0 %v1919_v25 }
 0x15a   : > { %v1225_v26 = vpop.f32.mrb[0].mxu1 }
 0x15b   : > { %v1227_v27 = vpop.f32.mrb[1].mxu1  ;;  %v1645_v37 = vadd.f32 %v1225_v26, %v375_v35 }
 0x15c   : > { %v1229_v28 = vpop.f32.mrb[2].mxu1  ;;  %v1647_v38 = vadd.f32 %v1227_v27, %v379_v36 }
 0x15d   : > { %v1231_v29 = vpop.f32.mrb[3].mxu1  ;;  %v1649_v40 = vadd.f32 %v1229_v28, %v375_v35 }
 0x15e   : > { %v1651_v43 = vadd.f32 %v1231_v29, %v379_v36 }
 0x17b   : > { %v1354_v39 = vpop.f32.mrb[0].mxu0 }
 0x17c   : > { %v1646_v41 = vadd.f32 %v1645_v37, %v1354_v39  ;;  %v1356_v42 = vpop.f32.mrb[1].mxu0 }
 0x17d   : > { %v1648_v44 = vadd.f32 %v1647_v38, %v1356_v42  ;;  %v1358_v45 = vpop.f32.mrb[2].mxu0 }
 0x17e   : > { %v1363_v46 = vmax.f32 %v1646_v41, 0.0  ;;  %v1650_v47 = vadd.f32 %v1649_v40, %v1358_v45  ;;  %v1360_v48 = vpop.f32.mrb[3].mxu0 }
 0x17f   : > { %v1364_v49 = vmax.f32 %v1648_v44, 0.0  ;;  %v1652_v50 = vadd.f32 %v1651_v43, %v1360_v48 }
 0x180   : > { %v1365_v51 = vmax.f32 %v1650_v47, 0.0 }
 0x181   : > { %v1643_v52 = vpack.c.bf16 %v1364_v49, %v1363_v46  ;;  %v1366_v53 = vmax.f32 %v1652_v50, 0.0 }
 0x183   : > { %1379 = vst [vmem:[%s213_s22] sm:$0xff] %v1643_v52  ;;  %v1644_v54 = vpack.c.bf16 %v1366_v53, %v1365_v51 }
 0x185   : > { %1380 = vst [vmem:[%s213_s22 + $0x8] sm:$0xff] %v1644_v54 }
 0x186 PF: > { %s13_s14 = sadd.s32 1, %s1942_s14   ;;  %s2456_s12 = smov %s1938_s13 }
 0x187   : > { %p10_p5 = scmp.ge.s32.totalorder %s13_s14, 4   ;;  %s2457_s13 = smov %s2459_s15 }
 0x189   :  { %12 = sbr.rel (!%p10_p5) target bundleno = 2 (0x2), region = 62 }

// kernel: inpaint_loss.95
= control target key start
LH: loop header
LB: loop body
LE: loop exit
PB: predicated region body
PF: predicated region fallthrough
CT: control target
= control target key end

     0   :  { %9 = vsyncpa [#allocation5], 0  ;;  %s1189_s0 = inlined_call_operand.vmem [shape: bf16[2,16,128], index: 0, kind: input, shape index: {}]   ;;  %s1190_s1 = inlined_call_operand.vmem [shape: bf16[2,16,128], index: 1, kind: input, shape index: {}]   ;;  %s1191_s2 = inlined_call_operand.hbm [shape: f32[1,1], index: 2, kind: output, shape index: {0}]   ;;  %s1192_s3 = inlined_call_operand.hbm [shape: f32[1,1], index: 3, kind: output, shape index: {1}]  }
   0x1   :  { %10 = vsyncpa [#allocation7], 0  ;;  %s1088_s12 = smov 0   ;;  %s1090_s13 = smov 0  }
   0x2   :  { %s1092_s14 = smov 0  }
   0x3 LB: > { %s869_s15 = sadd.s32 4294967295, %s1063_s14   ;;  %s28_s16 = sadd.s32 1, %s1059_s13  ;;  %s1063_s14 = sphi %s1092_s14, %s16_s14   ;;  %s1059_s13 = sphi %s1090_s13, %s1195_s13   ;;  %s1055_s12 = sphi %s1088_s12, %s1194_s12  }
   0x4   : > { %p30_p0 = scmp.ge.s32.totalorder %s28_s16, 2  ;;  %p872_p1 = scmp.ge.s32.totalorder %s1063_s14, 1 }
   0x5   : > { %p168_p2 = scmp.lt.s32.totalorder %s1063_s14, 3 }
   0x6   : > { %s1197_s16 = smov (%p30_p0, %s28_s16), 0 }
   0x7   : > { %p169_p3 = pnand %p872_p1, %p168_p2 }
   0x8   : > { %p201_p4 = scmp.lt.s32.totalorder (!%p169_p3), %s1055_s12, 1  ;;  %vm330_vm0 = vcmask (!%p169_p3), 130048   ;;  %p221_p5 = scmp.eq.s32.totalorder (!%p169_p3), %s1055_s12, 0 }
   0x9   : > { %172 = sbr.rel (%p169_p3) target bundleno = 626 (0x272), region = 28  ;;  %s1065_s25 = smov (!%p169_p3), 0.0  }
   0xa   : > { %p1136_p6 = scmp.eq.s32.totalorder (!%p169_p3), %s869_s15, 1  ;;  %s1009_s5 = scalar_lea.hbm (!%p169_p3), %s1192_s3, 16 }
   0xb   : > { %p1010_p7 = scmp.ne.s32.totalorder (!%p169_p3), %s1192_s3, %s1009_s5  ;;  %p1015_p10 = scmp.lt.u32.totalorder (!%p169_p3), %s1009_s5, %s1192_s3 }
   0xd   : > { %p1011_p8 = pnand (!%p169_p3), %p1010_p7, %p1136_p6 }
   0xf   : > { %p1012_p9 = pneg (!%p169_p3), %p1011_p8 }
  0x10   : > { %s202_s17 = scalar_select %p201_p4, %s1055_s12, 1 }
  0x11   : > { %964 = sst [smem:[#allocation6]] (%p221_p5), %s1065_s25  ;;  %p1017_p11 = pnand %p1015_p10, %p1012_p9 }
  0x12   : > { %s902_s18 = sshll.u32 %s202_s17, 3  ;;  %963 = sst [smem:[#allocation4]] (%p221_p5), %s1065_s25 }
  0x13   : > { %s208_s21 = scalar_lea.vmem %s1189_s0, %s902_s18  ;;  %s218_s24 = scalar_lea.vmem %s1190_s1, %s902_s18 }
  0x14   : > { %v266_v0 = vld [vmem:[%s208_s21] sm:$0xff]   ;;  %s270_s26 = sld [smem:[#allocation6]] }
  0x15   : > { %v268_v1 = vld [vmem:[%s218_s24] sm:$0xff]   ;;  %314 = vxpose.xlu0.c.b16.start.end [1/1] (short) %v266_v0, 128  ;;  %923 = vmatprep.subr.bf16.mxu0 %v266_v0  ;;  %v271_v18 = vunpack.c.l.bf16 %v266_v0  ;;  %v272_v19 = vunpack.c.h.bf16 %v266_v0 }
  0x16   : > { %924 = vmatpush3.bf16.msra.mxu0 %v266_v0  ;;  %941 = vmatprep.subr.bf16.mxu1 %v268_v1  ;;  %v273_v20 = vunpack.c.l.bf16 %v268_v1  ;;  %v274_v21 = vunpack.c.h.bf16 %v268_v1 }
  0x17   : > { %942 = vmatpush3.bf16.msra.mxu1 %v268_v1 }
  0x18   : > { %v275_v22 = vsub.f32 %v271_v18, %v273_v20  ;;  %v276_v23 = vsub.f32 %v272_v19, %v274_v21 }
  0x1a   : > { %v277_v24 = vand.u32 2147483647, %v275_v22  ;;  %v278_v25 = vand.u32 2147483647, %v276_v23 }
  0x1c   : > { %v279_v26 = vadd.f32 %v278_v25, %v277_v24 }
  0x1e   : > { %280 = vadd.xlane.f32.xlu1 %v279_v26 }
  0x32   : > { %506 = vxpose.xlu0.c.b16.start.end [1/1] (short) %v268_v1, 128 }
  0x7b   : > { %v322_v2 = vpop.trf.xlu0 }
  0x7c   : > { %925 = vmatprep.mubr.msk.bf16.mxu0 %vm330_vm0, %v322_v2 }
  0x7f   : > { %v323_v3 = vpop.trf.xlu0 }
  0x80   : > { %926 = vmatmul.mubr.msk.bf16.vlgmr.msra.gmra.mrb[0].mxu0 %vm330_vm0, %v323_v3 }
  0x83   : > { %v324_v4 = vpop.trf.xlu0 }
  0x84   : > { %929 = vmatprep.mubr.msk.bf16.mxu0 %vm330_vm0, %v324_v4 }
  0x87   : > { %v325_v5 = vpop.trf.xlu0 }
  0x88   : > { %930 = vmatmul.mubr.msk.bf16.gmra.mrb[4].mxu0 %vm330_vm0, %v325_v5 }
  0x8b   : > { %v326_v6 = vpop.trf.xlu0 }
  0x8c   : > { %933 = vmatprep.mubr.msk.bf16.mxu0 %vm330_vm0, %v326_v6 }
  0x8f   : > { %v327_v7 = vpop.trf.xlu0 }
  0x90   : > { %934 = vmatmul.mubr.msk.bf16.gmra.mrb[8].mxu0 %vm330_vm0, %v327_v7 }
  0x93   : > { %v328_v8 = vpop.trf.xlu0 }
  0x94   : > { %937 = vmatprep.mubr.msk.bf16.mxu0 %vm330_vm0, %v328_v8 }
  0x97   : > { %v329_v9 = vpop.trf.xlu0 }
  0x98   : > { %938 = vmatmul.mubr.msk.bf16.gmra.mrb[12].mxu0 %vm330_vm0, %v329_v9 }
  0x9b   : > { %v514_v10 = vpop.trf.xlu0 }
  0x9c   : > { %943 = vmatprep.mubr.msk.bf16.mxu1 %vm330_vm0, %v514_v10 }
  0x9f   : > { %v515_v11 = vpop.trf.xlu0 }
  0xa0   : > { %944 = vmatmul.mubr.msk.bf16.vlgmr.msra.gmra.mrb[0].mxu1 %vm330_vm0, %v515_v11 }
  0xa3   : > { %v516_v12 = vpop.trf.xlu0 }
  0xa4   : > { %947 = vmatprep.mubr.msk.bf16.mxu1 %vm330_vm0, %v516_v12 }
  0xa7   : > { %v517_v13 = vpop.trf.xlu0 }
  0xa8   : > { %948 = vmatmul.mubr.msk.bf16.gmra.mrb[4].mxu1 %vm330_vm0, %v517_v13 }
  0xab   : > { %v518_v14 = vpop.trf.xlu0 }
  0xac   : > { %951 = vmatprep.mubr.msk.bf16.mxu1 %vm330_vm0, %v518_v14 }
  0xaf   : > { %v519_v15 = vpop.trf.xlu0 }
  0xb0   : > { %952 = vmatmul.mubr.msk.bf16.gmra.mrb[8].mxu1 %vm330_vm0, %v519_v15 }
  0xb3   : > { %v520_v16 = vpop.trf.xlu0 }
  0xb4   : > { %955 = vmatprep.mubr.msk.bf16.mxu1 %vm330_vm0, %v520_v16 }
  0xb7   : > { %v521_v17 = vpop.trf.xlu0 }
  0xb8   : > { %956 = vmatmul.mubr.msk.bf16.gmra.mrb[12].mxu1 %vm330_vm0, %v521_v17 }
 0x153   : > { %v927_v27 = vpop.f32.mrb[0].mxu0 }
 0x154   : > { %v389_v28 = vpop.f32.mrb[1].mxu0 }
 0x155   : > { %v928_v29 = vpop.f32.mrb[2].mxu0 }
 0x156   : > { %v392_v30 = vpop.f32.mrb[3].mxu0 }
 0x15b   : > { %v931_v31 = vpop.f32.mrb[4].mxu0 }
 0x15c   : > { %v405_v32 = vpop.f32.mrb[5].mxu0 }
 0x15d   : > { %v932_v33 = vpop.f32.mrb[6].mxu0 }
 0x15e   : > { %v408_v34 = vpop.f32.mrb[7].mxu0 }
 0x163   : > { %v935_v35 = vpop.f32.mrb[8].mxu0 }
 0x164   : > { %v421_v36 = vpop.f32.mrb[9].mxu0 }
 0x165   : > { %v936_v37 = vpop.f32.mrb[10].mxu0 }
 0x166   : > { %v424_v38 = vpop.f32.mrb[11].mxu0 }
 0x16b   : > { %v939_v39 = vpop.f32.mrb[12].mxu0 }
 0x16c   : > { %v437_v40 = vpop.f32.mrb[13].mxu0 }
 0x16d   : > { %v940_v41 = vpop.f32.mrb[14].mxu0 }
 0x16e   : > { %v440_v42 = vpop.f32.mrb[15].mxu0 }
 0x173   : > { %v945_v43 = vpop.f32.mrb[0].mxu1 }
 0x174   : > { %v713_v44 = vsub.f32 %v927_v27, %v945_v43  ;;  %v580_v45 = vpop.f32.mrb[1].mxu1 }
 0x175   : > { %v711_v46 = vsub.f32 %v389_v28, %v580_v45  ;;  %v946_v47 = vpop.f32.mrb[2].mxu1 }
 0x176   : > { %v714_v48 = vsub.f32 %v928_v29, %v946_v47  ;;  %v583_v49 = vpop.f32.mrb[3].mxu1  ;;  %v729_v53 = vand.u32 2147483647, %v713_v44 }
 0x177   : > { %v712_v50 = vsub.f32 %v392_v30, %v583_v49  ;;  %v727_v51 = vand.u32 2147483647, %v711_v46 }
 0x178   : > { %v730_v58 = vand.u32 2147483647, %v714_v48 }
 0x179   : > { %v728_v52 = vand.u32 2147483647, %v712_v50 }
 0x17b   : > { %v743_v54 = vadd.f32 %v728_v52, %v727_v51  ;;  %v949_v55 = vpop.f32.mrb[4].mxu1 }
 0x17c   : > { %v717_v56 = vsub.f32 %v931_v31, %v949_v55  ;;  %v596_v57 = vpop.f32.mrb[5].mxu1 }
 0x17d   : > { %v744_v59 = vadd.f32 %v743_v54, %v729_v53  ;;  %v715_v60 = vsub.f32 %v405_v32, %v596_v57  ;;  %v950_v61 = vpop.f32.mrb[6].mxu1 }
 0x17e   : > { %v718_v62 = vsub.f32 %v932_v33, %v950_v61  ;;  %v599_v63 = vpop.f32.mrb[7].mxu1  ;;  %v733_v5 = vand.u32 2147483647, %v717_v56 }
 0x17f   : > { %v731_v0 = vand.u32 2147483647, %v715_v60  ;;  %v745_v1 = vadd.f32 %v744_v59, %v730_v58  ;;  %v716_v2 = vsub.f32 %v408_v34, %v599_v63 }
 0x180   : > { %v734_v10 = vand.u32 2147483647, %v718_v62 }
 0x181   : > { %v746_v3 = vadd.f32 %v745_v1, %v731_v0  ;;  %v732_v4 = vand.u32 2147483647, %v716_v2 }
 0x183   : > { %v747_v6 = vadd.f32 %v746_v3, %v732_v4  ;;  %v953_v7 = vpop.f32.mrb[8].mxu1 }
 0x184   : > { %v721_v8 = vsub.f32 %v935_v35, %v953_v7  ;;  %v612_v9 = vpop.f32.mrb[9].mxu1 }
 0x185   : > { %v748_v11 = vadd.f32 %v747_v6, %v733_v5  ;;  %v719_v12 = vsub.f32 %v421_v36, %v612_v9  ;;  %v954_v13 = vpop.f32.mrb[10].mxu1 }
 0x186   : > { %v722_v14 = vsub.f32 %v936_v37, %v954_v13  ;;  %v615_v15 = vpop.f32.mrb[11].mxu1  ;;  %v737_v21 = vand.u32 2147483647, %v721_v8 }
 0x187   : > { %v735_v16 = vand.u32 2147483647, %v719_v12  ;;  %v749_v17 = vadd.f32 %v748_v11, %v734_v10  ;;  %v720_v18 = vsub.f32 %v424_v38, %v615_v15 }
 0x188   : > { %v738_v26 = vand.u32 2147483647, %v722_v14 }
 0x189   : > { %v750_v19 = vadd.f32 %v749_v17, %v735_v16  ;;  %v736_v20 = vand.u32 2147483647, %v720_v18 }
 0x18b   : > { %v751_v22 = vadd.f32 %v750_v19, %v736_v20  ;;  %v957_v23 = vpop.f32.mrb[12].mxu1 }
 0x18c   : > { %v725_v24 = vsub.f32 %v939_v39, %v957_v23  ;;  %v628_v25 = vpop.f32.mrb[13].mxu1  ;;  %v281_v39 = vpop.xlane.xlu1 %280 }
 0x18d   : > { %v752_v27 = vadd.f32 %v751_v22, %v737_v21  ;;  %v723_v28 = vsub.f32 %v437_v40, %v628_v25  ;;  %v958_v29 = vpop.f32.mrb[14].mxu1  ;;  %v282_v46 = vrot.slane %v281_v39, 4 }
 0x18e   : > { %v726_v30 = vsub.f32 %v940_v41, %v958_v29  ;;  %v631_v31 = vpop.f32.mrb[15].mxu1  ;;  %v741_v37 = vand.u32 2147483647, %v725_v24 }
 0x18f   : > { %v739_v32 = vand.u32 2147483647, %v723_v28  ;;  %v753_v33 = vadd.f32 %v752_v27, %v738_v26  ;;  %v724_v34 = vsub.f32 %v440_v42, %v631_v31  ;;  %v283_v47 = vadd.f32 %v282_v46, %v281_v39 }
 0x190   : > { %v742_v43 = vand.u32 2147483647, %v726_v30 }
 0x191   : > { %v754_v35 = vadd.f32 %v753_v33, %v739_v32  ;;  %v740_v36 = vand.u32 2147483647, %v724_v34  ;;  %v284_v40 = vrot.slane %v283_v47, 2 }
 0x193   : > { %v755_v38 = vadd.f32 %v754_v35, %v740_v36  ;;  %v285_v48 = vadd.f32 %v284_v40, %v283_v47 }
 0x195   : > { %v756_v44 = vadd.f32 %v755_v38, %v741_v37  ;;  %v286_v41 = vrot.slane %v285_v48, 1 }
 0x197   : > { %v757_v45 = vadd.f32 %v756_v44, %v742_v43  ;;  %v287_v49 = vadd.f32 %v286_v41, %v285_v48 }
 0x199   : > { %758 = vadd.xlane.f32.xlu1 %v757_v45  ;;  %959 = vpush %v287_v49 }
 0x1ca   : > { %s960_s27 = spop %959 }
 0x1cb   : > { %s289_s28 = sadd.f32 %s960_s27, %s270_s26 }
 0x1cd   : > { %291 = sst [smem:[#allocation6]] %s289_s28 }
 0x1ce   : > { %1020 = shalt.err (!%p1017_p11)
}
 0x1cf   : > { %s1066_s10 = smov [#allocation6]   ;;  %s678_s15 = sld [smem:[#allocation4]] }
 0x1d0   : > { %968 = dma.smem_to_hbm (%p1136_p6), %s1066_s10, 16, %s1192_s3, [#allocation7]  }
 0x1d1   : > { %s1021_s22 = scalar_lea.hbm %s1191_s2, 16 }
 0x1d2   : > { %p1022_p12 = scmp.ne.s32.totalorder %s1191_s2, %s1021_s22  ;;  %p1027_p1 = scmp.lt.u32.totalorder %s1021_s22, %s1191_s2 }
 0x1d4   : > { %p1023_p13 = pnand %p1022_p12, %p1136_p6 }
 0x1d6   : > { %p1024_p0 = pneg %p1023_p13 }
 0x1d8   : > { %p1029_p2 = pnand %p1027_p1, %p1024_p0 }
 0x226   : > { %v759_v42 = vpop.xlane.xlu1 %758 }
 0x227   : > { %v760_v50 = vrot.slane %v759_v42, 4 }
 0x229   : > { %v761_v51 = vadd.f32 %v760_v50, %v759_v42 }
 0x22b   : > { %v762_v52 = vrot.slane %v761_v51, 2 }
 0x22d   : > { %v763_v53 = vadd.f32 %v762_v52, %v761_v51 }
 0x22f   : > { %v764_v54 = vrot.slane %v763_v53, 1 }
 0x231   : > { %v765_v55 = vadd.f32 %v764_v54, %v763_v53 }
 0x233   : > { %961 = vpush %v765_v55 }
 0x264   : > { %s962_s17 = spop %961 }
 0x265   : > { %s767_s18 = smul.f32 0.00048828125, %s962_s17 }
 0x267   : > { %s768_s19 = sadd.f32 %s767_s18, %s678_s15 }
 0x269   : > { %770 = sst [smem:[#allocation4]] %s768_s19 }
 0x26a   : > { %1032 = shalt.err (!%p1029_p2)
}
 0x26b   : > { %s1067_s27 = smov [#allocation4]  }
 0x26c   : > { %966 = dma.smem_to_hbm (%p1136_p6), %s1067_s27, 16, %s1191_s2, [#allocation5]  }
 0x26d   : > { %1046 = dma.done.wait (%p1136_p6), [#allocation5], 16  }
 0x26e   : > { %1048 = vsyncadd (%p1136_p6), [#allocation5], 4294967280 }
 0x26f   : > { %1050 = dma.done.wait (%p1136_p6), [#allocation7], 16  }
 0x270   : > { %1052 = vsyncadd (%p1136_p6), [#allocation7], 4294967280 }
 0x271   : > { %797 = sfence }
 0x272 PF: > { %s16_s14 = sadd.s32 1, %s1063_s14   ;;  %s1194_s12 = smov %s1059_s13 }
 0x273   : > { %p13_p3 = scmp.ge.s32.totalorder %s16_s14, 4   ;;  %s1195_s13 = smov %s1197_s16 }
 0x275   :  { %15 = sbr.rel (!%p13_p3) target bundleno = 3 (0x3), region = 82 }
 0x27c   :  { %803 = vsyncpa [#allocation5], 1 }
 0x27d   :  { %805 = vsyncpa [#allocation5 + $0x1], 1 }
 0x27e   :  { %806 = vsyncpa [#allocation7], 1 }

// kernel: inpaint_loss.94
= control target key start
LH: loop header
LB: loop body
LE: loop exit
PB: predicated region body
PF: predicated region fallthrough
CT: control target
= control target key end

     0   :  { %9 = vsyncpa [#allocation5], 0  ;;  %s1152_s0 = inlined_call_operand.vmem [shape: bf16[2,64,64], index: 0, kind: input, shape index: {}]   ;;  %s1153_s1 = inlined_call_operand.vmem [shape: bf16[2,64,64], index: 1, kind: input, shape index: {}]   ;;  %s1154_s2 = inlined_call_operand.hbm [shape: f32[1,1], index: 2, kind: output, shape index: {0}]   ;;  %s1155_s3 = inlined_call_operand.hbm [shape: f32[1,1], index: 3, kind: output, shape index: {1}]  }
   0x1   :  { %10 = vsyncpa [#allocation7], 0  ;;  %s997_s12 = smov 0   ;;  %s999_s13 = smov 0  }
   0x2   :  { %s1001_s14 = smov 0  }
   0x3 LB: > { %s772_s15 = sadd.s32 4294967295, %s971_s14   ;;  %s28_s16 = sadd.s32 1, %s967_s13  ;;  %s971_s14 = sphi %s1001_s14, %s16_s14   ;;  %s967_s13 = sphi %s999_s13, %s1158_s13   ;;  %s963_s12 = sphi %s997_s12, %s1157_s12  }
   0x4   : > { %p30_p0 = scmp.ge.s32.totalorder %s28_s16, 2  ;;  %p775_p1 = scmp.ge.s32.totalorder %s971_s14, 1 }
   0x5   : > { %p168_p2 = scmp.lt.s32.totalorder %s971_s14, 3 }
   0x6   : > { %s1160_s16 = smov (%p30_p0, %s28_s16), 0 }
   0x7   : > { %p169_p3 = pnand %p775_p1, %p168_p2 }
   0x8   : > { %p201_p4 = scmp.lt.s32.totalorder (!%p169_p3), %s963_s12, 1  ;;  %vm234_vm0 = vcmask (!%p169_p3), 523264   ;;  %v973_v0 = vmov (!%p169_p3), 0.0   ;;  %p221_p5 = scmp.eq.s32.totalorder (!%p169_p3), %s963_s12, 0 }
   0x9   : > { %172 = sbr.rel (%p169_p3) target bundleno = 590 (0x24e), region = 28  ;;  %237 = vst.msk [vmem:[#allocation2 + $0x10] sm:$0xff] (!%p169_p3), %vm234_vm0, %v973_v0  ;;  %235 = vst.msk [vmem:[#allocation2] sm:$0xff] (!%p169_p3), %vm234_vm0, %v973_v0  ;;  %s974_s25 = smov (!%p169_p3), 0.0  }
   0xa   : > { %236 = vst.msk [vmem:[#allocation2 + $0x8] sm:$0xff] (!%p169_p3), %vm234_vm0, %v973_v0  ;;  %238 = vst.msk [vmem:[#allocation2 + $0x18] sm:$0xff] (!%p169_p3), %vm234_vm0, %v973_v0  ;;  %p1099_p6 = scmp.eq.s32.totalorder (!%p169_p3), %s772_s15, 1  ;;  %s917_s5 = scalar_lea.hbm (!%p169_p3), %s1155_s3, 16 }
   0xb   : > { %239 = vst.msk [vmem:[#allocation2 + $0x20] sm:$0xff] (!%p169_p3), %vm234_vm0, %v973_v0  ;;  %240 = vst.msk [vmem:[#allocation2 + $0x28] sm:$0xff] (!%p169_p3), %vm234_vm0, %v973_v0  ;;  %p918_p7 = scmp.ne.s32.totalorder (!%p169_p3), %s1155_s3, %s917_s5  ;;  %p923_p10 = scmp.lt.u32.totalorder (!%p169_p3), %s917_s5, %s1155_s3 }
   0xc   : > { %241 = vst.msk [vmem:[#allocation2 + $0x30] sm:$0xff] (!%p169_p3), %vm234_vm0, %v973_v0  ;;  %242 = vst.msk [vmem:[#allocation2 + $0x38] sm:$0xff] (!%p169_p3), %vm234_vm0, %v973_v0 }
   0xd   : > { %243 = vst.msk [vmem:[#allocation3] sm:$0xff] (!%p169_p3), %vm234_vm0, %v973_v0  ;;  %244 = vst.msk [vmem:[#allocation3 + $0x8] sm:$0xff] (!%p169_p3), %vm234_vm0, %v973_v0  ;;  %p919_p8 = pnand (!%p169_p3), %p918_p7, %p1099_p6 }
   0xe   : > { %245 = vst.msk [vmem:[#allocation3 + $0x10] sm:$0xff] (!%p169_p3), %vm234_vm0, %v973_v0  ;;  %246 = vst.msk [vmem:[#allocation3 + $0x18] sm:$0xff] (!%p169_p3), %vm234_vm0, %v973_v0 }
   0xf   : > { %247 = vst.msk [vmem:[#allocation3 + $0x20] sm:$0xff] (!%p169_p3), %vm234_vm0, %v973_v0  ;;  %248 = vst.msk [vmem:[#allocation3 + $0x28] sm:$0xff] (!%p169_p3), %vm234_vm0, %v973_v0  ;;  %p920_p9 = pneg (!%p169_p3), %p919_p8 }
  0x10   : > { %249 = vst.msk [vmem:[#allocation3 + $0x30] sm:$0xff] %vm234_vm0, %v973_v0  ;;  %250 = vst.msk [vmem:[#allocation3 + $0x38] sm:$0xff] %vm234_vm0, %v973_v0  ;;  %s202_s17 = scalar_select %p201_p4, %s963_s12, 1 }
  0x11   : > { %859 = sst [smem:[#allocation6]] (%p221_p5), %s974_s25  ;;  %p925_p11 = pnand %p923_p10, %p920_p9 }
  0x12   : > { %s803_s18 = sshll.u32 %s202_s17, 5  ;;  %858 = sst [smem:[#allocation4]] (%p221_p5), %s974_s25 }
  0x13   : > { %s1041_s21 = scalar_lea.vmem %s1153_s1, %s803_s18  ;;  %s1046_s24 = scalar_lea.vmem %s1152_s0, %s803_s18 }
  0x14   : > { %v259_v1 = vld [vmem:[%s1041_s21] sm:$0xff]   ;;  %v261_v3 = vld [vmem:[%s1041_s21 + $0x8] sm:$0xff]   ;;  %v263_v14 = vld [vmem:[%s1041_s21 + $0x10] sm:$0xff]   ;;  %s267_s26 = sld [smem:[#allocation6]] }
  0x15   : > { %v251_v2 = vld [vmem:[%s1046_s24] sm:$0xff]   ;;  %v277_v4 = vunpack.c.h.bf16 %v259_v1  ;;  %v276_v5 = vunpack.c.l.bf16 %v259_v1  ;;  %v253_v7 = vld [vmem:[%s1046_s24 + $0x8] sm:$0xff]   ;;  %v278_v9 = vunpack.c.l.bf16 %v261_v3  ;;  %v279_v10 = vunpack.c.h.bf16 %v261_v3  ;;  %501 = vxpose.xlu1.c.b16.start [1/4] (short) (narrow) %v259_v1, 64  ;;  %838 = vmatprep.subr.bf16.mxu1 %v259_v1  ;;  %v255_v21 = vld [vmem:[%s1046_s24 + $0x10] sm:$0xff]  }
  0x16   : > { %v269_v6 = vunpack.c.h.bf16 %v251_v2  ;;  %v268_v8 = vunpack.c.l.bf16 %v251_v2  ;;  %v270_v12 = vunpack.c.l.bf16 %v253_v7  ;;  %v271_v13 = vunpack.c.h.bf16 %v253_v7  ;;  %360 = vxpose.xlu0.c.b16.start [1/4] (short) (narrow) %v251_v2, 64  ;;  %822 = vmatprep.subr.bf16.mxu0 %v251_v2  ;;  %v265_v29 = vld [vmem:[%s1041_s21 + $0x18] sm:$0xff]   ;;  %v471_v0 = vld [vmem:[#allocation3 + $0x10] sm:$0xff] }
  0x17   : > { %v280_v16 = vunpack.c.l.bf16 %v263_v14  ;;  %v281_v17 = vunpack.c.h.bf16 %v263_v14  ;;  %823 = vmatpush3.bf16.msra.mxu0 %v251_v2  ;;  %839 = vmatpush3.bf16.msra.mxu1 %v259_v1  ;;  %v272_v23 = vunpack.c.l.bf16 %v255_v21  ;;  %v273_v24 = vunpack.c.h.bf16 %v255_v21  ;;  %v257_v31 = vld [vmem:[%s1046_s24 + $0x18] sm:$0xff]   ;;  %v330_v1 = vld [vmem:[#allocation2 + $0x10] sm:$0xff]  ;;  %v469_v2 = vld [vmem:[#allocation3] sm:$0xff] }
  0x18   : > { %v285_v11 = vsub.f32 %v269_v6, %v277_v4  ;;  %v284_v15 = vsub.f32 %v268_v8, %v276_v5  ;;  %v286_v19 = vsub.f32 %v270_v12, %v278_v9  ;;  %v287_v20 = vsub.f32 %v271_v13, %v279_v10  ;;  %824 = vmatprep.subr.bf16.mxu0 %v253_v7  ;;  %v328_v4 = vld [vmem:[#allocation2] sm:$0xff]  ;;  %v472_v5 = vld [vmem:[#allocation3 + $0x18] sm:$0xff]  ;;  %v470_v10 = vld [vmem:[#allocation3 + $0x8] sm:$0xff] }
  0x19   : > { %840 = vmatprep.subr.bf16.mxu1 %v261_v3  ;;  %502 = vxpose.xlu1.c.b16.cont [2/4] (short) (narrow) %v261_v3, 64  ;;  %v288_v27 = vsub.f32 %v272_v23, %v280_v16  ;;  %v289_v28 = vsub.f32 %v273_v24, %v281_v17  ;;  %v282_v41 = vunpack.c.l.bf16 %v265_v29  ;;  %v283_v42 = vunpack.c.h.bf16 %v265_v29  ;;  %v331_v9 = vld [vmem:[#allocation2 + $0x18] sm:$0xff]  ;;  %v475_v24 = vld [vmem:[#allocation3 + $0x30] sm:$0xff] }
  0x1a   : > { %v293_v18 = vand.u32 2147483647, %v285_v11  ;;  %v292_v22 = vand.u32 2147483647, %v284_v15  ;;  %361 = vxpose.xlu0.c.b16.cont [2/4] (short) (narrow) %v253_v7, 64  ;;  %v274_v43 = vunpack.c.l.bf16 %v257_v31  ;;  %v275_v44 = vunpack.c.h.bf16 %v257_v31  ;;  %v329_v15 = vld [vmem:[#allocation2 + $0x8] sm:$0xff] }
  0x1b   : > { %825 = vmatpush3.bf16.msra.mxu0 %v253_v7  ;;  %841 = vmatpush3.bf16.msra.mxu1 %v261_v3  ;;  %v294_v40 = vand.u32 2147483647, %v286_v19  ;;  %v295_v45 = vand.u32 2147483647, %v287_v20  ;;  %v296_v47 = vand.u32 2147483647, %v288_v27 }
  0x1c   : > { %v302_v25 = vsel %vm234_vm0, %v293_v18, 0.0  ;;  %v301_v26 = vsel %vm234_vm0, %v292_v22, 0.0  ;;  %826 = vmatprep.subr.bf16.mxu0 %v255_v21  ;;  %842 = vmatprep.subr.bf16.mxu1 %v263_v14  ;;  %v290_v48 = vsub.f32 %v274_v43, %v282_v41  ;;  %v291_v49 = vsub.f32 %v275_v44, %v283_v42 }
  0x1d   : > { %v303_v30 = vadd.f32 %v302_v25, %v301_v26  ;;  %503 = vxpose.xlu1.c.b16.cont [3/4] (short) (narrow) %v263_v14, 64  ;;  %v304_v46 = vsel %vm234_vm0, %v294_v40, 0.0  ;;  %v297_v50 = vand.u32 2147483647, %v289_v28  ;;  %v306_v52 = vsel %vm234_vm0, %v295_v45, 0.0  ;;  %v334_v25 = vld [vmem:[#allocation2 + $0x30] sm:$0xff] }
  0x1e   : > { %362 = vxpose.xlu0.c.b16.cont [3/4] (short) (narrow) %v255_v21, 64  ;;  %v308_v53 = vsel %vm234_vm0, %v296_v47, 0.0  ;;  %v298_v54 = vand.u32 2147483647, %v290_v48  ;;  %v299_v56 = vand.u32 2147483647, %v291_v49 }
  0x1f   : > { %827 = vmatpush3.bf16.msra.mxu0 %v255_v21  ;;  %843 = vmatpush3.bf16.msra.mxu1 %v263_v14  ;;  %v305_v51 = vadd.f32 %v304_v46, %v303_v30  ;;  %v310_v57 = vsel %vm234_vm0, %v297_v50, 0.0  ;;  %v473_v26 = vld [vmem:[#allocation3 + $0x20] sm:$0xff] }
  0x20   : > { %828 = vmatprep.subr.bf16.mxu0 %v257_v31  ;;  %844 = vmatprep.subr.bf16.mxu1 %v265_v29  ;;  %v312_v59 = vsel %vm234_vm0, %v298_v54, 0.0  ;;  %v314_v61 = vsel %vm234_vm0, %v299_v56, 0.0  ;;  %v332_v28 = vld [vmem:[#allocation2 + $0x20] sm:$0xff] }
  0x21   : > { %504 = vxpose.xlu1.c.b16.end [4/4] (short) (narrow) %v265_v29, 64  ;;  %v307_v55 = vadd.f32 %v306_v52, %v305_v51 }
  0x22   : > { %363 = vxpose.xlu0.c.b16.end [4/4] (short) (narrow) %v257_v31, 64 }
  0x23   : > { %829 = vmatpush3.bf16.msra.mxu0 %v257_v31  ;;  %845 = vmatpush3.bf16.msra.mxu1 %v265_v29  ;;  %v309_v58 = vadd.f32 %v308_v53, %v307_v55  ;;  %v476_v29 = vld [vmem:[#allocation3 + $0x38] sm:$0xff] }
  0x25   : > { %v311_v60 = vadd.f32 %v310_v57, %v309_v58 }
  0x27   : > { %v313_v62 = vadd.f32 %v312_v59, %v311_v60 }
  0x29   : > { %v315_v63 = vadd.f32 %v314_v61, %v313_v62 }
  0x2f   : > { %316 = vadd.xlane.f32.xlu0 %v315_v63 }
  0x7b   : > { %v509_v32 = vpop.trf.xlu1 }
  0x7c   : > { %v368_v33 = vpop.trf.xlu0  ;;  %846 = vmatprep.mubr.msk.bf16.mxu1 %vm234_vm0, %v509_v32 }
  0x7d   : > { %830 = vmatprep.mubr.msk.bf16.mxu0 %vm234_vm0, %v368_v33  ;;  %v335_v33 = vld [vmem:[#allocation2 + $0x38] sm:$0xff] }
  0x7f   : > { %v510_v34 = vpop.trf.xlu1 }
  0x80   : > { %v369_v35 = vpop.trf.xlu0  ;;  %847 = vmatmul.mubr.msk.bf16.vlgmr.msra.gmra.mrb[0].mxu1 %vm234_vm0, %v510_v34  ;;  %v474_v34 = vld [vmem:[#allocation3 + $0x28] sm:$0xff] }
  0x81   : > { %831 = vmatmul.mubr.msk.bf16.vlgmr.msra.gmra.mrb[0].mxu0 %vm234_vm0, %v369_v35 }
  0x83   : > { %v511_v36 = vpop.trf.xlu1 }
  0x84   : > { %v370_v37 = vpop.trf.xlu0  ;;  %850 = vmatprep.mubr.msk.bf16.mxu1 %vm234_vm0, %v511_v36 }
  0x85   : > { %834 = vmatprep.mubr.msk.bf16.mxu0 %vm234_vm0, %v370_v37 }
  0x87   : > { %v512_v38 = vpop.trf.xlu1 }
  0x88   : > { %v371_v39 = vpop.trf.xlu0  ;;  %851 = vmatmul.mubr.msk.bf16.gmra.mrb[4].mxu1 %vm234_vm0, %v512_v38 }
  0x89   : > { %835 = vmatmul.mubr.msk.bf16.gmra.mrb[4].mxu0 %vm234_vm0, %v371_v39  ;;  %v333_v39 = vld [vmem:[#allocation2 + $0x28] sm:$0xff] }
 0x153   : > { %v848_v3 = vpop.f32.mrb[0].mxu1 }
 0x154   : > { %v832_v6 = vpop.f32.mrb[0].mxu0  ;;  %v596_v7 = vadd.f32 %v848_v3, %v471_v0  ;;  %v563_v8 = vpop.f32.mrb[1].mxu1 }
 0x155   : > { %v455_v11 = vadd.f32 %v832_v6, %v330_v1  ;;  %v422_v12 = vpop.f32.mrb[1].mxu0  ;;  %v594_v13 = vadd.f32 %v563_v8, %v469_v2  ;;  %v849_v14 = vpop.f32.mrb[2].mxu1 }
 0x156   : > { %604 = vst.msk [vmem:[#allocation3 + $0x10] sm:$0xff] %vm234_vm0, %v596_v7  ;;  %v453_v16 = vadd.f32 %v422_v12, %v328_v4  ;;  %v833_v17 = vpop.f32.mrb[2].mxu0  ;;  %v597_v18 = vadd.f32 %v849_v14, %v472_v5  ;;  %v566_v19 = vpop.f32.mrb[3].mxu1 }
 0x157   : > { %463 = vst.msk [vmem:[#allocation2 + $0x10] sm:$0xff] %vm234_vm0, %v455_v11  ;;  %602 = vst.msk [vmem:[#allocation3] sm:$0xff] %vm234_vm0, %v594_v13  ;;  %v456_v20 = vadd.f32 %v833_v17, %v331_v9  ;;  %v425_v21 = vpop.f32.mrb[3].mxu0  ;;  %v595_v22 = vadd.f32 %v566_v19, %v470_v10 }
 0x158   : > { %461 = vst.msk [vmem:[#allocation2] sm:$0xff] %vm234_vm0, %v453_v16  ;;  %605 = vst.msk [vmem:[#allocation3 + $0x18] sm:$0xff] %vm234_vm0, %v597_v18  ;;  %v454_v23 = vadd.f32 %v425_v21, %v329_v15 }
 0x159   : > { %464 = vst.msk [vmem:[#allocation2 + $0x18] sm:$0xff] %vm234_vm0, %v456_v20  ;;  %603 = vst.msk [vmem:[#allocation3 + $0x8] sm:$0xff] %vm234_vm0, %v595_v22 }
 0x15a   : > { %462 = vst.msk [vmem:[#allocation2 + $0x8] sm:$0xff] %vm234_vm0, %v454_v23 }
 0x15b   : > { %v852_v27 = vpop.f32.mrb[4].mxu1 }
 0x15c   : > { %v836_v30 = vpop.f32.mrb[4].mxu0  ;;  %v600_v31 = vadd.f32 %v852_v27, %v475_v24  ;;  %v579_v32 = vpop.f32.mrb[5].mxu1 }
 0x15d   : > { %v459_v35 = vadd.f32 %v836_v30, %v334_v25  ;;  %v438_v36 = vpop.f32.mrb[5].mxu0  ;;  %v598_v37 = vadd.f32 %v579_v32, %v473_v26  ;;  %v853_v38 = vpop.f32.mrb[6].mxu1  ;;  %v624_v40 = vld [vmem:[#allocation3 + $0x10] sm:$0xff] }
 0x15e   : > { %608 = vst.msk [vmem:[#allocation3 + $0x30] sm:$0xff] %vm234_vm0, %v600_v31  ;;  %v457_v41 = vadd.f32 %v438_v36, %v332_v28  ;;  %v837_v42 = vpop.f32.mrb[6].mxu0  ;;  %v601_v43 = vadd.f32 %v853_v38, %v476_v29  ;;  %v582_v44 = vpop.f32.mrb[7].mxu1  ;;  %v616_v45 = vld [vmem:[#allocation2 + $0x10] sm:$0xff]  ;;  %v622_v46 = vld [vmem:[#allocation3] sm:$0xff] }
 0x15f   : > { %467 = vst.msk [vmem:[#allocation2 + $0x30] sm:$0xff] %vm234_vm0, %v459_v35  ;;  %606 = vst.msk [vmem:[#allocation3 + $0x20] sm:$0xff] %vm234_vm0, %v598_v37  ;;  %v460_v47 = vadd.f32 %v837_v42, %v335_v33  ;;  %v441_v48 = vpop.f32.mrb[7].mxu0  ;;  %v599_v49 = vadd.f32 %v582_v44, %v474_v34  ;;  %v614_v50 = vld [vmem:[#allocation2] sm:$0xff]  ;;  %v625_v51 = vld [vmem:[#allocation3 + $0x18] sm:$0xff]  ;;  %v632_v56 = vsub.f32 %v616_v45, %v624_v40  ;;  %v317_v31 = vpop.xlane.xlu0 %316 }
 0x160   : > { %465 = vst.msk [vmem:[#allocation2 + $0x20] sm:$0xff] %vm234_vm0, %v457_v41  ;;  %609 = vst.msk [vmem:[#allocation3 + $0x38] sm:$0xff] %vm234_vm0, %v601_v43  ;;  %v458_v52 = vadd.f32 %v441_v48, %v333_v39  ;;  %v617_v53 = vld [vmem:[#allocation2 + $0x18] sm:$0xff]  ;;  %v623_v54 = vld [vmem:[#allocation3 + $0x8] sm:$0xff]  ;;  %v630_v55 = vsub.f32 %v614_v50, %v622_v46  ;;  %v318_v32 = vrot.slane %v317_v31, 4 }
 0x161   : > { %468 = vst.msk [vmem:[#allocation2 + $0x38] sm:$0xff] %vm234_vm0, %v460_v47  ;;  %607 = vst.msk [vmem:[#allocation3 + $0x28] sm:$0xff] %vm234_vm0, %v599_v49  ;;  %v615_v57 = vld [vmem:[#allocation2 + $0x8] sm:$0xff]  ;;  %v633_v59 = vsub.f32 %v617_v53, %v625_v51  ;;  %v640_v62 = vand.u32 2147483647, %v632_v56 }
 0x162   : > { %466 = vst.msk [vmem:[#allocation2 + $0x28] sm:$0xff] %vm234_vm0, %v458_v52  ;;  %v631_v58 = vsub.f32 %v615_v57, %v623_v54  ;;  %v638_v60 = vand.u32 2147483647, %v630_v55  ;;  %v319_v33 = vadd.f32 %v318_v32, %v317_v31 }
 0x163   : > { %v641_v2 = vand.u32 2147483647, %v633_v59  ;;  %v649_v12 = vsel %vm234_vm0, %v640_v62, 0.0 }
 0x164   : > { %v639_v61 = vand.u32 2147483647, %v631_v58  ;;  %v646_v3 = vsel %vm234_vm0, %v638_v60, 0.0  ;;  %v320_v34 = vrot.slane %v319_v33, 2 }
 0x165   : > { %v628_v63 = vld [vmem:[#allocation3 + $0x30] sm:$0xff]  ;;  %v651_v18 = vsel %vm234_vm0, %v641_v2, 0.0 }
 0x166   : > { %v620_v0 = vld [vmem:[#allocation2 + $0x30] sm:$0xff]  ;;  %v626_v1 = vld [vmem:[#allocation3 + $0x20] sm:$0xff]  ;;  %v647_v4 = vsel %vm234_vm0, %v639_v61, 0.0  ;;  %v321_v35 = vadd.f32 %v320_v34, %v319_v33 }
 0x167   : > { %v618_v5 = vld [vmem:[#allocation2 + $0x20] sm:$0xff]  ;;  %v629_v6 = vld [vmem:[#allocation3 + $0x38] sm:$0xff]  ;;  %v648_v7 = vadd.f32 %v647_v4, %v646_v3  ;;  %v636_v11 = vsub.f32 %v620_v0, %v628_v63 }
 0x168   : > { %v621_v8 = vld [vmem:[#allocation2 + $0x38] sm:$0xff]  ;;  %v627_v9 = vld [vmem:[#allocation3 + $0x28] sm:$0xff]  ;;  %v634_v10 = vsub.f32 %v618_v5, %v626_v1  ;;  %v322_v36 = vrot.slane %v321_v35, 1 }
 0x169   : > { %v619_v13 = vld [vmem:[#allocation2 + $0x28] sm:$0xff]  ;;  %v650_v14 = vadd.f32 %v649_v12, %v648_v7  ;;  %v637_v16 = vsub.f32 %v621_v8, %v629_v6  ;;  %v644_v21 = vand.u32 2147483647, %v636_v11 }
 0x16a   : > { %v635_v15 = vsub.f32 %v619_v13, %v627_v9  ;;  %v642_v17 = vand.u32 2147483647, %v634_v10  ;;  %v323_v37 = vadd.f32 %v322_v36, %v321_v35 }
 0x16b   : > { %v652_v19 = vadd.f32 %v651_v18, %v650_v14  ;;  %v645_v24 = vand.u32 2147483647, %v637_v16  ;;  %v657_v27 = vsel %vm234_vm0, %v644_v21, 0.0 }
 0x16c   : > { %v643_v20 = vand.u32 2147483647, %v635_v15  ;;  %v653_v22 = vsel %vm234_vm0, %v642_v17, 0.0  ;;  %854 = vpush %v323_v37 }
 0x16d   : > { %v654_v23 = vadd.f32 %v653_v22, %v652_v19  ;;  %v659_v29 = vsel %vm234_vm0, %v645_v24, 0.0 }
 0x16e   : > { %v655_v25 = vsel %vm234_vm0, %v643_v20, 0.0 }
 0x16f   : > { %v656_v26 = vadd.f32 %v655_v25, %v654_v23 }
 0x171   : > { %v658_v28 = vadd.f32 %v657_v27, %v656_v26 }
 0x173   : > { %v660_v30 = vadd.f32 %v659_v29, %v658_v28 }
 0x175   : > { %661 = vadd.xlane.f32.xlu1 %v660_v30 }
 0x19d   : > { %s855_s27 = spop %854 }
 0x19e   : > { %s325_s28 = sadd.f32 %s855_s27, %s267_s26 }
 0x1a0   : > { %327 = sst [smem:[#allocation6]] %s325_s28 }
 0x1a1   : > { %928 = shalt.err (!%p925_p11)
}
 0x1a2   : > { %s975_s10 = smov [#allocation6]   ;;  %s613_s15 = sld [smem:[#allocation4]] }
 0x1a3   : > { %863 = dma.smem_to_hbm (%p1099_p6), %s975_s10, 16, %s1155_s3, [#allocation7]  }
 0x1a4   : > { %s929_s22 = scalar_lea.hbm %s1154_s2, 16 }
 0x1a5   : > { %p930_p12 = scmp.ne.s32.totalorder %s1154_s2, %s929_s22  ;;  %p935_p1 = scmp.lt.u32.totalorder %s929_s22, %s1154_s2 }
 0x1a7   : > { %p931_p13 = pnand %p930_p12, %p1099_p6 }
 0x1a9   : > { %p932_p0 = pneg %p931_p13 }
 0x1ab   : > { %p937_p2 = pnand %p935_p1, %p932_p0 }
 0x202   : > { %v662_v38 = vpop.xlane.xlu1 %661 }
 0x203   : > { %v663_v39 = vrot.slane %v662_v38, 4 }
 0x205   : > { %v664_v40 = vadd.f32 %v663_v39, %v662_v38 }
 0x207   : > { %v665_v41 = vrot.slane %v664_v40, 2 }
 0x209   : > { %v666_v42 = vadd.f32 %v665_v41, %v664_v40 }
 0x20b   : > { %v667_v43 = vrot.slane %v666_v42, 1 }
 0x20d   : > { %v668_v44 = vadd.f32 %v667_v43, %v666_v42 }
 0x20f   : > { %856 = vpush %v668_v44 }
 0x240   : > { %s857_s17 = spop %856 }
 0x241   : > { %s670_s18 = smul.f32 0.00024414063, %s857_s17 }
 0x243   : > { %s671_s19 = sadd.f32 %s670_s18, %s613_s15 }
 0x245   : > { %673 = sst [smem:[#allocation4]] %s671_s19 }
 0x246   : > { %940 = shalt.err (!%p937_p2)
}
 0x247   : > { %s976_s27 = smov [#allocation4]  }
 0x248   : > { %861 = dma.smem_to_hbm (%p1099_p6), %s976_s27, 16, %s1154_s2, [#allocation5]  }
 0x249   : > { %954 = dma.done.wait (%p1099_p6), [#allocation5], 16  }
 0x24a   : > { %956 = vsyncadd (%p1099_p6), [#allocation5], 4294967280 }
 0x24b   : > { %958 = dma.done.wait (%p1099_p6), [#allocation7], 16  }
 0x24c   : > { %960 = vsyncadd (%p1099_p6), [#allocation7], 4294967280 }
 0x24d   : > { %700 = sfence }
 0x24e PF: > { %s16_s14 = sadd.s32 1, %s971_s14   ;;  %s1157_s12 = smov %s967_s13 }
 0x24f   : > { %p13_p3 = scmp.ge.s32.totalorder %s16_s14, 4   ;;  %s1158_s13 = smov %s1160_s16 }
 0x251   :  { %15 = sbr.rel (!%p13_p3) target bundleno = 3 (0x3), region = 82 }
 0x258   :  { %706 = vsyncpa [#allocation5], 1 }
 0x259   :  { %708 = vsyncpa [#allocation5 + $0x1], 1 }
 0x25a   :  { %709 = vsyncpa [#allocation7], 1 }

// kernel: inpaint_loss.96
= control target key start
LH: loop header
LB: loop body
LE: loop exit
PB: predicated region body
PF: predicated region fallthrough
CT: control target
= control target key end

     0   :  { %9 = vsyncpa [#allocation5], 0  ;;  %s2295_s0 = inlined_call_operand.vmem [shape: bf16[2,4,256], index: 0, kind: input, shape index: {}]   ;;  %s2296_s1 = inlined_call_operand.vmem [shape: bf16[2,4,256], index: 1, kind: input, shape index: {}]   ;;  %s2297_s2 = inlined_call_operand.hbm [shape: f32[1,1], index: 2, kind: output, shape index: {0}]   ;;  %s2298_s3 = inlined_call_operand.hbm [shape: f32[1,1], index: 3, kind: output, shape index: {1}]  }
   0x1   :  { %10 = vsyncpa [#allocation7], 0  ;;  %s1970_s12 = smov 0   ;;  %s1972_s13 = smov 0  }
   0x2   :  { %s1974_s14 = smov 0  }
   0x3 LB: > { %s1790_s15 = sadd.s32 4294967295, %s1943_s14   ;;  %s28_s16 = sadd.s32 1, %s1939_s13  ;;  %s1943_s14 = sphi %s1974_s14, %s16_s14   ;;  %s1939_s13 = sphi %s1972_s13, %s2301_s13   ;;  %s1935_s12 = sphi %s1970_s12, %s2300_s12  }
   0x4   : > { %p30_p0 = scmp.ge.s32.totalorder %s28_s16, 2  ;;  %p1793_p1 = scmp.ge.s32.totalorder %s1943_s14, 1 }
   0x5   : > { %p166_p2 = scmp.lt.s32.totalorder %s1943_s14, 3 }
   0x6   : > { %s2303_s16 = smov (%p30_p0, %s28_s16), 0 }
   0x7   : > { %p167_p3 = pnand %p1793_p1, %p166_p2 }
   0x8   : > { %p198_p4 = scmp.lt.s32.totalorder (!%p167_p3), %s1935_s12, 1  ;;  %v452_v0 = vlaneseq (!%p167_p3)  ;;  %v1945_v1 = vmov (!%p167_p3), 1983009808   ;;  %v1946_v3 = vmov (!%p167_p3), 0   ;;  %vm540_vm0 = vcmask (!%p167_p3), 1041408   ;;  %p217_p5 = scmp.eq.s32.totalorder (!%p167_p3), %s1935_s12, 0 }
   0x9   : > { %170 = sbr.rel (%p167_p3) target bundleno = 719 (0x2cf), region = 28  ;;  %v450_v2 = vunpack.c.l.s4 (!%p167_p3), %v1945_v1  ;;  %579 = vmatprep.mubr.bf16.mxu0 (!%p167_p3), %v1946_v3  ;;  %1061 = vmatprep.mubr.bf16.mxu1 (!%p167_p3), %v1946_v3  ;;  %vm491_vm1 = vcmask (!%p167_p3), 31744   ;;  %vm368_vm2 = vcmask (!%p167_p3), 1043456   ;;  %s1947_s25 = smov (!%p167_p3), 0.0  }
   0xa   : > { %v453_v4 = vshrl.u32 (!%p167_p3), %v452_v0, 7  ;;  %p2242_p6 = scmp.eq.s32.totalorder (!%p167_p3), %s1790_s15, 1  ;;  %s1889_s5 = scalar_lea.hbm (!%p167_p3), %s2298_s3, 16 }
   0xb   : > { %v451_v5 = vunpack.c.0.s8 (!%p167_p3), %v450_v2  ;;  %p1890_p7 = scmp.ne.s32.totalorder (!%p167_p3), %s2298_s3, %s1889_s5  ;;  %p1895_p10 = scmp.lt.u32.totalorder (!%p167_p3), %s1889_s5, %s2298_s3 }
   0xd   : > { %v454_v6 = vsub.s32 (!%p167_p3), %v451_v5, %v453_v4  ;;  %p1891_p8 = pnand (!%p167_p3), %p1890_p7, %p2242_p6 }
   0xf   : > { %p1892_p9 = pneg (!%p167_p3), %p1891_p8 }
  0x10   : > { %s199_s17 = scalar_select %p198_p4, %s1935_s12, 1 }
  0x11   : > { %1847 = sst [smem:[#allocation6]] (%p217_p5), %s1947_s25  ;;  %p1897_p11 = pnand %p1895_p10, %p1892_p9 }
  0x12   : > { %s1839_s18 = sshll.u32 %s199_s17, 2  ;;  %1846 = sst [smem:[#allocation4]] (%p217_p5), %s1947_s25 }
  0x13   : > { %s206_s21 = scalar_lea.vmem %s2295_s0, %s1839_s18  ;;  %s215_s24 = scalar_lea.vmem %s2296_s1, %s1839_s18 }
  0x14   : > { %v2001_v7 = vld [vmem:[%s206_s21] sm:$0xf]  ;;  %s360_s26 = sld [smem:[#allocation6]] }
  0x15   : > { %v2003_v8 = vld [vmem:[%s215_s24] sm:$0xf]  ;;  %v455_v9 = vrot.slane %v2001_v7, %v454_v6  ;;  %v361_v57 = vunpack.c.l.bf16 %v2001_v7 }
  0x16   : > { %v939_v10 = vrot.slane %v2003_v8, %v454_v6  ;;  %v362_v58 = vunpack.c.l.bf16 %v2003_v8 }
  0x17   : > { %459 = vxpose.xlu0.c.b16.start.end [1/1] (short) %v455_v9, 128  ;;  %v456_v11 = vcombine.high %v455_v9, %v455_v9  ;;  %v542_v12 = vsel %vm540_vm0, %v455_v9, 0 }
  0x18   : > { %v940_v13 = vcombine.high %v939_v10, %v939_v10  ;;  %v1024_v14 = vsel %vm540_vm0, %v939_v10, 0  ;;  %v363_v61 = vsub.f32 %v361_v57, %v362_v58 }
  0x19   : > { %475 = vxpose.xlu1.c.b16.start.end [1/1] (short) %v456_v11, 128  ;;  %1799 = vmatprep.subr.msk.bf16.mxu0 %vm540_vm0, %v456_v11 }
  0x1a   : > { %548 = vmatpush1.bf16.msra.mxu0 %v542_v12  ;;  %1816 = vmatprep.subr.msk.bf16.mxu1 %vm540_vm0, %v940_v13  ;;  %v364_v63 = vand.u32 2147483647, %v363_v61 }
  0x1b   : > { %1030 = vmatpush1.bf16.msra.mxu1 %v1024_v14 }
  0x1c   : > { %v366_v2 = vcombine.high %v364_v63, %v364_v63  ;;  %v369_v4 = vsel %vm368_vm2, %v364_v63, 0.0 }
  0x1e   : > { %v370_v5 = vsel %vm368_vm2, %v366_v2, 0.0 }
  0x1f   : > { %v371_v6 = vadd.f32 %v370_v5, %v369_v4 }
  0x34   : > { %943 = vxpose.xlu0.c.b16.start.end [1/1] (short) %v939_v10, 128 }
  0x36   : > { %959 = vxpose.xlu1.c.b16.start.end [1/1] (short) %v940_v13, 128 }
  0x5d   : > { %372 = vadd.xlane.f32.xlu0 %v371_v6 }
  0x7d   : > { %v467_v15 = vpop.trf.xlu0 }
  0x7e   : > { %1800 = vmatmul.mubr.msk.bf16.vlgmr.msra.gmra.mrb[0].mxu0 %vm491_vm1, %v467_v15 }
  0x7f   : > { %589 = vmatprep.mubr.bf16.mxu0 %v1946_v3  ;;  %v483_v26 = vpop.trf.xlu1 }
  0x81   : > { %v468_v16 = vpop.trf.xlu0 }
  0x83   : > { %v484_v27 = vpop.trf.xlu1 }
  0x85   : > { %v469_v17 = vpop.trf.xlu0 }
  0x86   : > { %1801 = vmatmul.mubr.msk.bf16.gmra.mrb[4].mxu0 %vm491_vm1, %v468_v16 }
  0x87   : > { %599 = vmatprep.mubr.bf16.mxu0 %v1946_v3  ;;  %v485_v29 = vpop.trf.xlu1 }
  0x89   : > { %v470_v18 = vpop.trf.xlu0 }
  0x8b   : > { %v486_v31 = vpop.trf.xlu1 }
  0x8d   : > { %v471_v19 = vpop.trf.xlu0 }
  0x8e   : > { %1802 = vmatmul.mubr.msk.bf16.gmra.mrb[8].mxu0 %vm491_vm1, %v469_v17 }
  0x8f   : > { %609 = vmatprep.mubr.bf16.mxu0 %v1946_v3  ;;  %v487_v33 = vpop.trf.xlu1 }
  0x91   : > { %v472_v20 = vpop.trf.xlu0 }
  0x93   : > { %v488_v34 = vpop.trf.xlu1 }
  0x95   : > { %v473_v21 = vpop.trf.xlu0 }
  0x96   : > { %1803 = vmatmul.mubr.msk.bf16.gmra.mrb[12].mxu0 %vm491_vm1, %v470_v18 }
  0x97   : > { %619 = vmatprep.mubr.bf16.mxu0 %v1946_v3  ;;  %v489_v36 = vpop.trf.xlu1 }
  0x99   : > { %v474_v22 = vpop.trf.xlu0 }
  0x9b   : > { %v490_v38 = vpop.trf.xlu1 }
  0x9d   : > { %v951_v23 = vpop.trf.xlu0 }
  0x9e   : > { %1804 = vmatmul.mubr.msk.bf16.gmra.mrb[16].mxu0 %vm491_vm1, %v471_v19  ;;  %1817 = vmatmul.mubr.msk.bf16.vlgmr.msra.gmra.mrb[0].mxu1 %vm491_vm1, %v951_v23 }
  0x9f   : > { %1071 = vmatprep.mubr.bf16.mxu1 %v1946_v3  ;;  %629 = vmatprep.mubr.bf16.mxu0 %v1946_v3  ;;  %v967_v39 = vpop.trf.xlu1 }
  0xa1   : > { %v952_v24 = vpop.trf.xlu0 }
  0xa3   : > { %v968_v40 = vpop.trf.xlu1 }
  0xa5   : > { %v953_v25 = vpop.trf.xlu0 }
  0xa6   : > { %1805 = vmatmul.mubr.msk.bf16.gmra.mrb[20].mxu0 %vm491_vm1, %v472_v20  ;;  %1818 = vmatmul.mubr.msk.bf16.gmra.mrb[4].mxu1 %vm491_vm1, %v952_v24 }
  0xa7   : > { %1081 = vmatprep.mubr.bf16.mxu1 %v1946_v3  ;;  %639 = vmatprep.mubr.bf16.mxu0 %v1946_v3  ;;  %v969_v41 = vpop.trf.xlu1 }
  0xa9   : > { %v954_v28 = vpop.trf.xlu0 }
  0xab   : > { %v970_v42 = vpop.trf.xlu1 }
  0xad   : > { %v955_v30 = vpop.trf.xlu0 }
  0xae   : > { %1806 = vmatmul.mubr.msk.bf16.gmra.mrb[24].mxu0 %vm491_vm1, %v473_v21  ;;  %1819 = vmatmul.mubr.msk.bf16.gmra.mrb[8].mxu1 %vm491_vm1, %v953_v25 }
  0xaf   : > { %1091 = vmatprep.mubr.bf16.mxu1 %v1946_v3  ;;  %649 = vmatprep.mubr.bf16.mxu0 %v1946_v3  ;;  %v971_v43 = vpop.trf.xlu1 }
  0xb1   : > { %v956_v32 = vpop.trf.xlu0 }
  0xb3   : > { %v972_v44 = vpop.trf.xlu1 }
  0xb5   : > { %v957_v35 = vpop.trf.xlu0 }
  0xb6   : > { %1807 = vmatmul.mubr.msk.bf16.gmra.mrb[28].mxu0 %vm491_vm1, %v474_v22  ;;  %1820 = vmatmul.mubr.msk.bf16.gmra.mrb[12].mxu1 %vm491_vm1, %v954_v28 }
  0xb7   : > { %1101 = vmatprep.mubr.bf16.mxu1 %v1946_v3  ;;  %659 = vmatprep.mubr.bf16.mxu0 %v1946_v3  ;;  %v973_v45 = vpop.trf.xlu1 }
  0xb9   : > { %v958_v37 = vpop.trf.xlu0 }
  0xbb   : > { %v974_v46 = vpop.trf.xlu1 }
  0xbe   : > { %1808 = vmatmul.mubr.msk.bf16.gmra.mrb[32].mxu0 %vm491_vm1, %v483_v26  ;;  %1821 = vmatmul.mubr.msk.bf16.gmra.mrb[16].mxu1 %vm491_vm1, %v955_v30 }
  0xbf   : > { %1111 = vmatprep.mubr.bf16.mxu1 %v1946_v3  ;;  %669 = vmatprep.mubr.bf16.mxu0 %v1946_v3 }
  0xc6   : > { %1809 = vmatmul.mubr.msk.bf16.gmra.mrb[36].mxu0 %vm491_vm1, %v484_v27  ;;  %1822 = vmatmul.mubr.msk.bf16.gmra.mrb[20].mxu1 %vm491_vm1, %v956_v32 }
  0xc7   : > { %1121 = vmatprep.mubr.bf16.mxu1 %v1946_v3  ;;  %679 = vmatprep.mubr.bf16.mxu0 %v1946_v3 }
  0xce   : > { %1810 = vmatmul.mubr.msk.bf16.gmra.mrb[40].mxu0 %vm491_vm1, %v485_v29  ;;  %1823 = vmatmul.mubr.msk.bf16.gmra.mrb[24].mxu1 %vm491_vm1, %v957_v35 }
  0xcf   : > { %1131 = vmatprep.mubr.bf16.mxu1 %v1946_v3  ;;  %689 = vmatprep.mubr.bf16.mxu0 %v1946_v3 }
  0xd6   : > { %1811 = vmatmul.mubr.msk.bf16.gmra.mrb[44].mxu0 %vm491_vm1, %v486_v31  ;;  %1824 = vmatmul.mubr.msk.bf16.gmra.mrb[28].mxu1 %vm491_vm1, %v958_v37 }
  0xd7   : > { %1141 = vmatprep.mubr.bf16.mxu1 %v1946_v3  ;;  %699 = vmatprep.mubr.bf16.mxu0 %v1946_v3 }
  0xde   : > { %1812 = vmatmul.mubr.msk.bf16.gmra.mrb[48].mxu0 %vm491_vm1, %v487_v33  ;;  %1825 = vmatmul.mubr.msk.bf16.gmra.mrb[32].mxu1 %vm491_vm1, %v967_v39 }
  0xdf   : > { %1151 = vmatprep.mubr.bf16.mxu1 %v1946_v3  ;;  %709 = vmatprep.mubr.bf16.mxu0 %v1946_v3 }
  0xe6   : > { %1813 = vmatmul.mubr.msk.bf16.gmra.mrb[52].mxu0 %vm491_vm1, %v488_v34  ;;  %1826 = vmatmul.mubr.msk.bf16.gmra.mrb[36].mxu1 %vm491_vm1, %v968_v40 }
  0xe7   : > { %1161 = vmatprep.mubr.bf16.mxu1 %v1946_v3  ;;  %719 = vmatprep.mubr.bf16.mxu0 %v1946_v3 }
  0xee   : > { %1814 = vmatmul.mubr.msk.bf16.gmra.mrb[56].mxu0 %vm491_vm1, %v489_v36  ;;  %1827 = vmatmul.mubr.msk.bf16.gmra.mrb[40].mxu1 %vm491_vm1, %v969_v41 }
  0xef   : > { %1171 = vmatprep.mubr.bf16.mxu1 %v1946_v3  ;;  %729 = vmatprep.mubr.bf16.mxu0 %v1946_v3 }
  0xf6   : > { %1815 = vmatmul.mubr.msk.bf16.gmra.mrb[60].mxu0 %vm491_vm1, %v490_v38  ;;  %1828 = vmatmul.mubr.msk.bf16.gmra.mrb[44].mxu1 %vm491_vm1, %v970_v42 }
  0xf7   : > { %1181 = vmatprep.mubr.bf16.mxu1 %v1946_v3 }
  0xfe   : > { %1829 = vmatmul.mubr.msk.bf16.gmra.mrb[48].mxu1 %vm491_vm1, %v971_v43 }
  0xff   : > { %1191 = vmatprep.mubr.bf16.mxu1 %v1946_v3 }
 0x106   : > { %1830 = vmatmul.mubr.msk.bf16.gmra.mrb[52].mxu1 %vm491_vm1, %v972_v44 }
 0x107   : > { %1201 = vmatprep.mubr.bf16.mxu1 %v1946_v3 }
 0x10e   : > { %1831 = vmatmul.mubr.msk.bf16.gmra.mrb[56].mxu1 %vm491_vm1, %v973_v45 }
 0x10f   : > { %1211 = vmatprep.mubr.bf16.mxu1 %v1946_v3 }
 0x116   : > { %1832 = vmatmul.mubr.msk.bf16.gmra.mrb[60].mxu1 %vm491_vm1, %v974_v46 }
 0x151   : > { %v581_v47 = vpop.f32.mrb[0].mxu0 }
 0x152   : > { %v583_v48 = vpop.f32.mrb[1].mxu0 }
 0x153   : > { %v585_v49 = vpop.f32.mrb[2].mxu0 }
 0x154   : > { %v587_v50 = vpop.f32.mrb[3].mxu0 }
 0x159   : > { %v591_v51 = vpop.f32.mrb[4].mxu0 }
 0x15a   : > { %v593_v52 = vpop.f32.mrb[5].mxu0 }
 0x15b   : > { %v595_v53 = vpop.f32.mrb[6].mxu0 }
 0x15c   : > { %v597_v54 = vpop.f32.mrb[7].mxu0 }
 0x161   : > { %v2069_v55 = vpop.f32.mrb[8].mxu0 }
 0x162   : > { %v2071_v56 = vpop.f32.mrb[9].mxu0 }
 0x163   : > { %v2075_v59 = vpop.f32.mrb[10].mxu0 }
 0x164   : > { %v2077_v60 = vpop.f32.mrb[11].mxu0 }
 0x169   : > { %v2079_v62 = vpop.f32.mrb[12].mxu0 }
 0x16a   : > { %v2081_v0 = vpop.f32.mrb[13].mxu0 }
 0x16b   : > { %v2083_v1 = vpop.f32.mrb[14].mxu0 }
 0x16c   : > { %v2085_v3 = vpop.f32.mrb[15].mxu0 }
 0x171   : > { %v2087_v7 = vpop.f32.mrb[16].mxu0  ;;  %v1063_v8 = vpop.f32.mrb[0].mxu1 }
 0x172   : > { %v1482_v9 = vsub.f32 %v581_v47, %v1063_v8  ;;  %v2089_v10 = vpop.f32.mrb[17].mxu0  ;;  %v1065_v11 = vpop.f32.mrb[1].mxu1 }
 0x173   : > { %v1483_v12 = vsub.f32 %v583_v48, %v1065_v11  ;;  %v2091_v13 = vpop.f32.mrb[18].mxu0  ;;  %v1067_v14 = vpop.f32.mrb[2].mxu1 }
 0x174   : > { %v1546_v15 = vand.u32 2147483647, %v1482_v9  ;;  %v1484_v16 = vsub.f32 %v585_v49, %v1067_v14  ;;  %v2093_v17 = vpop.f32.mrb[19].mxu0  ;;  %v1069_v18 = vpop.f32.mrb[3].mxu1 }
 0x175   : > { %v1547_v19 = vand.u32 2147483647, %v1483_v12  ;;  %v1485_v20 = vsub.f32 %v587_v50, %v1069_v18 }
 0x176   : > { %v1548_v21 = vand.u32 2147483647, %v1484_v16 }
 0x177   : > { %v1610_v22 = vadd.f32 %v1547_v19, %v1546_v15  ;;  %v1549_v24 = vand.u32 2147483647, %v1485_v20 }
 0x179   : > { %v1611_v23 = vadd.f32 %v1610_v22, %v1548_v21  ;;  %v2095_v25 = vpop.f32.mrb[20].mxu0  ;;  %v1073_v26 = vpop.f32.mrb[4].mxu1 }
 0x17a   : > { %v1486_v27 = vsub.f32 %v591_v51, %v1073_v26  ;;  %v2097_v28 = vpop.f32.mrb[21].mxu0  ;;  %v1075_v29 = vpop.f32.mrb[5].mxu1 }
 0x17b   : > { %v1612_v30 = vadd.f32 %v1611_v23, %v1549_v24  ;;  %v1487_v31 = vsub.f32 %v593_v52, %v1075_v29  ;;  %v2099_v32 = vpop.f32.mrb[22].mxu0  ;;  %v1077_v33 = vpop.f32.mrb[6].mxu1 }
 0x17c   : > { %v1550_v34 = vand.u32 2147483647, %v1486_v27  ;;  %v1488_v35 = vsub.f32 %v595_v53, %v1077_v33  ;;  %v2101_v36 = vpop.f32.mrb[23].mxu0  ;;  %v1079_v37 = vpop.f32.mrb[7].mxu1 }
 0x17d   : > { %v1551_v38 = vand.u32 2147483647, %v1487_v31  ;;  %v1489_v39 = vsub.f32 %v597_v54, %v1079_v37 }
 0x17e   : > { %v1613_v40 = vadd.f32 %v1612_v30, %v1550_v34  ;;  %v1552_v42 = vand.u32 2147483647, %v1488_v35 }
 0x17f   : > { %v1553_v46 = vand.u32 2147483647, %v1489_v39 }
 0x180   : > { %v1614_v41 = vadd.f32 %v1613_v40, %v1551_v38 }
 0x181   : > { %v2103_v43 = vpop.f32.mrb[24].mxu0  ;;  %v1083_v44 = vpop.f32.mrb[8].mxu1 }
 0x182   : > { %v1615_v45 = vadd.f32 %v1614_v41, %v1552_v42  ;;  %v1490_v47 = vsub.f32 %v2069_v55, %v1083_v44  ;;  %v2106_v48 = vpop.f32.mrb[25].mxu0  ;;  %v1085_v49 = vpop.f32.mrb[9].mxu1 }
 0x183   : > { %v1491_v50 = vsub.f32 %v2071_v56, %v1085_v49  ;;  %v2109_v51 = vpop.f32.mrb[26].mxu0  ;;  %v1087_v52 = vpop.f32.mrb[10].mxu1 }
 0x184   : > { %v1616_v53 = vadd.f32 %v1615_v45, %v1553_v46  ;;  %v1554_v54 = vand.u32 2147483647, %v1490_v47  ;;  %v1492_v57 = vsub.f32 %v2075_v59, %v1087_v52  ;;  %v2112_v58 = vpop.f32.mrb[27].mxu0  ;;  %v1089_v61 = vpop.f32.mrb[11].mxu1 }
 0x185   : > { %v1555_v63 = vand.u32 2147483647, %v1491_v50  ;;  %v1493_v2 = vsub.f32 %v2077_v60, %v1089_v61 }
 0x186   : > { %v1617_v4 = vadd.f32 %v1616_v53, %v1554_v54  ;;  %v1556_v5 = vand.u32 2147483647, %v1492_v57 }
 0x187   : > { %v1557_v9 = vand.u32 2147483647, %v1493_v2 }
 0x188   : > { %v1618_v55 = vadd.f32 %v1617_v4, %v1555_v63 }
 0x189   : > { %v2115_v6 = vpop.f32.mrb[28].mxu0  ;;  %v1093_v8 = vpop.f32.mrb[12].mxu1 }
 0x18a   : > { %v1619_v56 = vadd.f32 %v1618_v55, %v1556_v5  ;;  %v1494_v11 = vsub.f32 %v2079_v62, %v1093_v8  ;;  %v2118_v12 = vpop.f32.mrb[29].mxu0  ;;  %v1095_v14 = vpop.f32.mrb[13].mxu1 }
 0x18b   : > { %v1495_v59 = vsub.f32 %v2081_v0, %v1095_v14  ;;  %v2121_v15 = vpop.f32.mrb[30].mxu0  ;;  %v1097_v16 = vpop.f32.mrb[14].mxu1 }
 0x18c   : > { %v1620_v18 = vadd.f32 %v1619_v56, %v1557_v9  ;;  %v1558_v60 = vand.u32 2147483647, %v1494_v11  ;;  %v1496_v19 = vsub.f32 %v2083_v1, %v1097_v16  ;;  %v2124_v20 = vpop.f32.mrb[31].mxu0  ;;  %v1099_v21 = vpop.f32.mrb[15].mxu1 }
 0x18d   : > { %v1559_v22 = vand.u32 2147483647, %v1495_v59  ;;  %v1497_v23 = vsub.f32 %v2085_v3, %v1099_v21 }
 0x18e   : > { %v1621_v24 = vadd.f32 %v1620_v18, %v1558_v60  ;;  %v1560_v26 = vand.u32 2147483647, %v1496_v19 }
 0x18f   : > { %v1561_v30 = vand.u32 2147483647, %v1497_v23 }
 0x190   : > { %v1622_v62 = vadd.f32 %v1621_v24, %v1559_v22 }
 0x191   : > { %v2127_v27 = vpop.f32.mrb[32].mxu0  ;;  %v1103_v29 = vpop.f32.mrb[16].mxu1 }
 0x192   : > { %v1623_v0 = vadd.f32 %v1622_v62, %v1560_v26  ;;  %v1498_v31 = vsub.f32 %v2087_v7, %v1103_v29  ;;  %v2130_v33 = vpop.f32.mrb[33].mxu0  ;;  %v1105_v34 = vpop.f32.mrb[17].mxu1 }
 0x193   : > { %v1499_v1 = vsub.f32 %v2089_v10, %v1105_v34  ;;  %v2133_v35 = vpop.f32.mrb[34].mxu0  ;;  %v1107_v37 = vpop.f32.mrb[18].mxu1 }
 0x194   : > { %v1624_v38 = vadd.f32 %v1623_v0, %v1561_v30  ;;  %v1562_v3 = vand.u32 2147483647, %v1498_v31  ;;  %v1500_v39 = vsub.f32 %v2091_v13, %v1107_v37  ;;  %v2136_v40 = vpop.f32.mrb[35].mxu0  ;;  %v1109_v41 = vpop.f32.mrb[19].mxu1 }
 0x195   : > { %v1563_v42 = vand.u32 2147483647, %v1499_v1  ;;  %v1501_v44 = vsub.f32 %v2093_v17, %v1109_v41 }
 0x196   : > { %v1625_v45 = vadd.f32 %v1624_v38, %v1562_v3  ;;  %v1564_v46 = vand.u32 2147483647, %v1500_v39 }
 0x197   : > { %v1565_v50 = vand.u32 2147483647, %v1501_v44 }
 0x198   : > { %v1626_v7 = vadd.f32 %v1625_v45, %v1563_v42 }
 0x199   : > { %v2139_v47 = vpop.f32.mrb[36].mxu0  ;;  %v1113_v49 = vpop.f32.mrb[20].mxu1 }
 0x19a   : > { %v1627_v10 = vadd.f32 %v1626_v7, %v1564_v46  ;;  %v1502_v52 = vsub.f32 %v2095_v25, %v1113_v49  ;;  %v2142_v53 = vpop.f32.mrb[37].mxu0  ;;  %v1115_v54 = vpop.f32.mrb[21].mxu1 }
 0x19b   : > { %v1503_v13 = vsub.f32 %v2097_v28, %v1115_v54  ;;  %v2145_v57 = vpop.f32.mrb[38].mxu0  ;;  %v1117_v61 = vpop.f32.mrb[22].mxu1 }
 0x19c   : > { %v1628_v63 = vadd.f32 %v1627_v10, %v1565_v50  ;;  %v1566_v17 = vand.u32 2147483647, %v1502_v52  ;;  %v1504_v2 = vsub.f32 %v2099_v32, %v1117_v61  ;;  %v2148_v4 = vpop.f32.mrb[39].mxu0  ;;  %v1119_v55 = vpop.f32.mrb[23].mxu1 }
 0x19d   : > { %v1567_v5 = vand.u32 2147483647, %v1503_v13  ;;  %v1505_v8 = vsub.f32 %v2101_v36, %v1119_v55 }
 0x19e   : > { %v1629_v56 = vadd.f32 %v1628_v63, %v1566_v17  ;;  %v1568_v9 = vand.u32 2147483647, %v1504_v2 }
 0x19f   : > { %v1569_v59 = vand.u32 2147483647, %v1505_v8 }
 0x1a0   : > { %v1630_v25 = vadd.f32 %v1629_v56, %v1567_v5 }
 0x1a1   : > { %v2151_v11 = vpop.f32.mrb[40].mxu0  ;;  %v1123_v14 = vpop.f32.mrb[24].mxu1 }
 0x1a2   : > { %v1631_v28 = vadd.f32 %v1630_v25, %v1568_v9  ;;  %v1506_v16 = vsub.f32 %v2103_v43, %v1123_v14  ;;  %v2154_v18 = vpop.f32.mrb[41].mxu0  ;;  %v1125_v60 = vpop.f32.mrb[25].mxu1 }
 0x1a3   : > { %v1507_v32 = vsub.f32 %v2106_v48, %v1125_v60  ;;  %v2157_v19 = vpop.f32.mrb[42].mxu0  ;;  %v1127_v21 = vpop.f32.mrb[26].mxu1 }
 0x1a4   : > { %v1632_v22 = vadd.f32 %v1631_v28, %v1569_v59  ;;  %v1570_v36 = vand.u32 2147483647, %v1506_v16  ;;  %v1508_v23 = vsub.f32 %v2109_v51, %v1127_v21  ;;  %v2160_v24 = vpop.f32.mrb[43].mxu0  ;;  %v1129_v62 = vpop.f32.mrb[27].mxu1 }
 0x1a5   : > { %v1571_v26 = vand.u32 2147483647, %v1507_v32  ;;  %v1509_v29 = vsub.f32 %v2112_v58, %v1129_v62 }
 0x1a6   : > { %v1633_v0 = vadd.f32 %v1632_v22, %v1570_v36  ;;  %v1572_v30 = vand.u32 2147483647, %v1508_v23 }
 0x1a7   : > { %v1573_v1 = vand.u32 2147483647, %v1509_v29 }
 0x1a8   : > { %v1634_v43 = vadd.f32 %v1633_v0, %v1571_v26 }
 0x1a9   : > { %v2163_v31 = vpop.f32.mrb[44].mxu0  ;;  %v1133_v34 = vpop.f32.mrb[28].mxu1 }
 0x1aa   : > { %v1635_v48 = vadd.f32 %v1634_v43, %v1572_v30  ;;  %v1510_v37 = vsub.f32 %v2115_v6, %v1133_v34  ;;  %v2166_v38 = vpop.f32.mrb[45].mxu0  ;;  %v1135_v3 = vpop.f32.mrb[29].mxu1 }
 0x1ab   : > { %v1511_v51 = vsub.f32 %v2118_v12, %v1135_v3  ;;  %v2169_v39 = vpop.f32.mrb[46].mxu0  ;;  %v1137_v41 = vpop.f32.mrb[30].mxu1 }
 0x1ac   : > { %v1636_v42 = vadd.f32 %v1635_v48, %v1573_v1  ;;  %v1574_v58 = vand.u32 2147483647, %v1510_v37  ;;  %v1512_v44 = vsub.f32 %v2121_v15, %v1137_v41  ;;  %v2172_v45 = vpop.f32.mrb[47].mxu0  ;;  %v1139_v7 = vpop.f32.mrb[31].mxu1 }
 0x1ad   : > { %v1575_v46 = vand.u32 2147483647, %v1511_v51  ;;  %v1513_v49 = vsub.f32 %v2124_v20, %v1139_v7 }
 0x1ae   : > { %v1637_v10 = vadd.f32 %v1636_v42, %v1574_v58  ;;  %v1576_v50 = vand.u32 2147483647, %v1512_v44 }
 0x1af   : > { %v1577_v13 = vand.u32 2147483647, %v1513_v49 }
 0x1b0   : > { %v1638_v6 = vadd.f32 %v1637_v10, %v1575_v46 }
 0x1b1   : > { %v2175_v52 = vpop.f32.mrb[48].mxu0  ;;  %v1143_v54 = vpop.f32.mrb[32].mxu1 }
 0x1b2   : > { %v1639_v12 = vadd.f32 %v1638_v6, %v1576_v50  ;;  %v1514_v61 = vsub.f32 %v2127_v27, %v1143_v54  ;;  %v2178_v63 = vpop.f32.mrb[49].mxu0  ;;  %v1145_v17 = vpop.f32.mrb[33].mxu1 }
 0x1b3   : > { %v1515_v15 = vsub.f32 %v2130_v33, %v1145_v17  ;;  %v2181_v2 = vpop.f32.mrb[50].mxu0  ;;  %v1147_v55 = vpop.f32.mrb[34].mxu1 }
 0x1b4   : > { %v1640_v5 = vadd.f32 %v1639_v12, %v1577_v13  ;;  %v1578_v20 = vand.u32 2147483647, %v1514_v61  ;;  %v1516_v8 = vsub.f32 %v2133_v35, %v1147_v55  ;;  %v2184_v56 = vpop.f32.mrb[51].mxu0  ;;  %v1149_v25 = vpop.f32.mrb[35].mxu1 }
 0x1b5   : > { %v1579_v9 = vand.u32 2147483647, %v1515_v15  ;;  %v1517_v14 = vsub.f32 %v2136_v40, %v1149_v25 }
 0x1b6   : > { %v1641_v28 = vadd.f32 %v1640_v5, %v1578_v20  ;;  %v1580_v59 = vand.u32 2147483647, %v1516_v8 }
 0x1b7   : > { %v1581_v32 = vand.u32 2147483647, %v1517_v14 }
 0x1b8   : > { %v1642_v27 = vadd.f32 %v1641_v28, %v1579_v9 }
 0x1b9   : > { %v2187_v16 = vpop.f32.mrb[52].mxu0  ;;  %v1153_v60 = vpop.f32.mrb[36].mxu1 }
 0x1ba   : > { %v1643_v33 = vadd.f32 %v1642_v27, %v1580_v59  ;;  %v1518_v21 = vsub.f32 %v2139_v47, %v1153_v60  ;;  %v2190_v22 = vpop.f32.mrb[53].mxu0  ;;  %v1155_v36 = vpop.f32.mrb[37].mxu1 }
 0x1bb   : > { %v1519_v35 = vsub.f32 %v2142_v53, %v1155_v36  ;;  %v2193_v23 = vpop.f32.mrb[54].mxu0  ;;  %v1157_v62 = vpop.f32.mrb[38].mxu1 }
 0x1bc   : > { %v1644_v26 = vadd.f32 %v1643_v33, %v1581_v32  ;;  %v1582_v40 = vand.u32 2147483647, %v1518_v21  ;;  %v1520_v29 = vsub.f32 %v2145_v57, %v1157_v62  ;;  %v2196_v0 = vpop.f32.mrb[55].mxu0  ;;  %v1159_v43 = vpop.f32.mrb[39].mxu1 }
 0x1bd   : > { %v1583_v30 = vand.u32 2147483647, %v1519_v35  ;;  %v1521_v34 = vsub.f32 %v2148_v4, %v1159_v43 }
 0x1be   : > { %v1645_v48 = vadd.f32 %v1644_v26, %v1582_v40  ;;  %v1584_v1 = vand.u32 2147483647, %v1520_v29 }
 0x1bf   : > { %v1585_v51 = vand.u32 2147483647, %v1521_v34 }
 0x1c0   : > { %v1646_v47 = vadd.f32 %v1645_v48, %v1583_v30 }
 0x1c1   : > { %v2199_v37 = vpop.f32.mrb[56].mxu0  ;;  %v1163_v3 = vpop.f32.mrb[40].mxu1 }
 0x1c2   : > { %v1647_v53 = vadd.f32 %v1646_v47, %v1584_v1  ;;  %v1522_v41 = vsub.f32 %v2151_v11, %v1163_v3  ;;  %v2202_v42 = vpop.f32.mrb[57].mxu0  ;;  %v1165_v58 = vpop.f32.mrb[41].mxu1 }
 0x1c3   : > { %v1523_v57 = vsub.f32 %v2154_v18, %v1165_v58  ;;  %v2205_v44 = vpop.f32.mrb[58].mxu0  ;;  %v1167_v7 = vpop.f32.mrb[42].mxu1 }
 0x1c4   : > { %v1648_v46 = vadd.f32 %v1647_v53, %v1585_v51  ;;  %v1586_v4 = vand.u32 2147483647, %v1522_v41  ;;  %v1524_v49 = vsub.f32 %v2157_v19, %v1167_v7  ;;  %v2208_v10 = vpop.f32.mrb[59].mxu0  ;;  %v1169_v6 = vpop.f32.mrb[43].mxu1 }
 0x1c5   : > { %v1587_v50 = vand.u32 2147483647, %v1523_v57  ;;  %v1525_v54 = vsub.f32 %v2160_v24, %v1169_v6 }
 0x1c6   : > { %v1649_v12 = vadd.f32 %v1648_v46, %v1586_v4  ;;  %v1588_v13 = vand.u32 2147483647, %v1524_v49 }
 0x1c7   : > { %v1589_v15 = vand.u32 2147483647, %v1525_v54 }
 0x1c8   : > { %v1650_v11 = vadd.f32 %v1649_v12, %v1587_v50 }
 0x1c9   : > { %v2211_v61 = vpop.f32.mrb[60].mxu0  ;;  %v1173_v17 = vpop.f32.mrb[44].mxu1 }
 0x1ca   : > { %v1651_v18 = vadd.f32 %v1650_v11, %v1588_v13  ;;  %v1526_v55 = vsub.f32 %v2163_v31, %v1173_v17  ;;  %v2214_v5 = vpop.f32.mrb[61].mxu0  ;;  %v1175_v20 = vpop.f32.mrb[45].mxu1 }
 0x1cb   : > { %v1527_v19 = vsub.f32 %v2166_v38, %v1175_v20  ;;  %v2217_v8 = vpop.f32.mrb[62].mxu0  ;;  %v1177_v25 = vpop.f32.mrb[46].mxu1 }
 0x1cc   : > { %v1652_v9 = vadd.f32 %v1651_v18, %v1589_v15  ;;  %v1590_v24 = vand.u32 2147483647, %v1526_v55  ;;  %v1528_v14 = vsub.f32 %v2169_v39, %v1177_v25  ;;  %v2220_v28 = vpop.f32.mrb[63].mxu0  ;;  %v1179_v27 = vpop.f32.mrb[47].mxu1 }
 0x1cd   : > { %v1591_v59 = vand.u32 2147483647, %v1527_v19  ;;  %v1529_v60 = vsub.f32 %v2172_v45, %v1179_v27 }
 0x1ce   : > { %v1653_v33 = vadd.f32 %v1652_v9, %v1590_v24  ;;  %v1592_v32 = vand.u32 2147483647, %v1528_v14 }
 0x1cf   : > { %v1593_v35 = vand.u32 2147483647, %v1529_v60 }
 0x1d0   : > { %v1654_v31 = vadd.f32 %v1653_v33, %v1591_v59 }
 0x1d1   : > { %v1183_v21 = vpop.f32.mrb[48].mxu1 }
 0x1d2   : > { %v1655_v36 = vadd.f32 %v1654_v31, %v1592_v32  ;;  %v1530_v38 = vsub.f32 %v2175_v52, %v1183_v21  ;;  %v1185_v62 = vpop.f32.mrb[49].mxu1 }
 0x1d3   : > { %v1531_v26 = vsub.f32 %v2178_v63, %v1185_v62  ;;  %v1187_v40 = vpop.f32.mrb[50].mxu1 }
 0x1d4   : > { %v1656_v29 = vadd.f32 %v1655_v36, %v1593_v35  ;;  %v1594_v39 = vand.u32 2147483647, %v1530_v38  ;;  %v1532_v43 = vsub.f32 %v2181_v2, %v1187_v40  ;;  %v1189_v30 = vpop.f32.mrb[51].mxu1 }
 0x1d5   : > { %v1595_v34 = vand.u32 2147483647, %v1531_v26  ;;  %v1533_v45 = vsub.f32 %v2184_v56, %v1189_v30 }
 0x1d6   : > { %v1657_v48 = vadd.f32 %v1656_v29, %v1594_v39  ;;  %v1596_v1 = vand.u32 2147483647, %v1532_v43 }
 0x1d7   : > { %v1597_v51 = vand.u32 2147483647, %v1533_v45 }
 0x1d8   : > { %v1658_v47 = vadd.f32 %v1657_v48, %v1595_v34 }
 0x1d9   : > { %v1193_v3 = vpop.f32.mrb[52].mxu1 }
 0x1da   : > { %v1659_v53 = vadd.f32 %v1658_v47, %v1596_v1  ;;  %v1534_v52 = vsub.f32 %v2187_v16, %v1193_v3  ;;  %v1195_v41 = vpop.f32.mrb[53].mxu1 }
 0x1db   : > { %v1535_v63 = vsub.f32 %v2190_v22, %v1195_v41  ;;  %v1197_v58 = vpop.f32.mrb[54].mxu1 }
 0x1dc   : > { %v1660_v57 = vadd.f32 %v1659_v53, %v1597_v51  ;;  %v1598_v7 = vand.u32 2147483647, %v1534_v52  ;;  %v1536_v2 = vsub.f32 %v2193_v23, %v1197_v58  ;;  %v1199_v46 = vpop.f32.mrb[55].mxu1 }
 0x1dd   : > { %v1599_v4 = vand.u32 2147483647, %v1535_v63  ;;  %v1537_v56 = vsub.f32 %v2196_v0, %v1199_v46 }
 0x1de   : > { %v1661_v49 = vadd.f32 %v1660_v57, %v1598_v7  ;;  %v1600_v50 = vand.u32 2147483647, %v1536_v2 }
 0x1df   : > { %v1601_v11 = vand.u32 2147483647, %v1537_v56 }
 0x1e0   : > { %v1662_v6 = vadd.f32 %v1661_v49, %v1599_v4 }
 0x1e1   : > { %v1203_v54 = vpop.f32.mrb[56].mxu1 }
 0x1e2   : > { %v1663_v12 = vadd.f32 %v1662_v6, %v1600_v50  ;;  %v1538_v16 = vsub.f32 %v2199_v37, %v1203_v54  ;;  %v1205_v13 = vpop.f32.mrb[57].mxu1 }
 0x1e3   : > { %v1539_v22 = vsub.f32 %v2202_v42, %v1205_v13  ;;  %v1207_v17 = vpop.f32.mrb[58].mxu1 }
 0x1e4   : > { %v1664_v18 = vadd.f32 %v1663_v12, %v1601_v11  ;;  %v1602_v15 = vand.u32 2147483647, %v1538_v16  ;;  %v1540_v23 = vsub.f32 %v2205_v44, %v1207_v17  ;;  %v1209_v55 = vpop.f32.mrb[59].mxu1 }
 0x1e5   : > { %v1603_v20 = vand.u32 2147483647, %v1539_v22  ;;  %v1541_v0 = vsub.f32 %v2208_v10, %v1209_v55 }
 0x1e6   : > { %v1665_v19 = vadd.f32 %v1664_v18, %v1602_v15  ;;  %v1604_v9 = vand.u32 2147483647, %v1540_v23 }
 0x1e7   : > { %v1605_v27 = vand.u32 2147483647, %v1541_v0 }
 0x1e8   : > { %v1666_v25 = vadd.f32 %v1665_v19, %v1603_v20 }
 0x1e9   : > { %v1213_v24 = vpop.f32.mrb[60].mxu1 }
 0x1ea   : > { %v1667_v14 = vadd.f32 %v1666_v25, %v1604_v9  ;;  %v1542_v37 = vsub.f32 %v2211_v61, %v1213_v24  ;;  %v1215_v59 = vpop.f32.mrb[61].mxu1  ;;  %v373_v61 = vpop.xlane.xlu0 %372 }
 0x1eb   : > { %v1543_v42 = vsub.f32 %v2214_v5, %v1215_v59  ;;  %v1217_v60 = vpop.f32.mrb[62].mxu1  ;;  %v374_v5 = vrot.slane %v373_v61, 4 }
 0x1ec   : > { %v1668_v33 = vadd.f32 %v1667_v14, %v1605_v27  ;;  %v1606_v31 = vand.u32 2147483647, %v1542_v37  ;;  %v1544_v44 = vsub.f32 %v2217_v8, %v1217_v60  ;;  %v1219_v32 = vpop.f32.mrb[63].mxu1 }
 0x1ed   : > { %v1607_v21 = vand.u32 2147483647, %v1543_v42  ;;  %v1545_v10 = vsub.f32 %v2220_v28, %v1219_v32  ;;  %v375_v29 = vadd.f32 %v374_v5, %v373_v61 }
 0x1ee   : > { %v1669_v36 = vadd.f32 %v1668_v33, %v1606_v31  ;;  %v1608_v38 = vand.u32 2147483647, %v1544_v44 }
 0x1ef   : > { %v1609_v26 = vand.u32 2147483647, %v1545_v10  ;;  %v376_v39 = vrot.slane %v375_v29, 2 }
 0x1f0   : > { %v1670_v35 = vadd.f32 %v1669_v36, %v1607_v21 }
 0x1f1   : > { %v377_v43 = vadd.f32 %v376_v39, %v375_v29 }
 0x1f2   : > { %v1671_v62 = vadd.f32 %v1670_v35, %v1608_v38 }
 0x1f3   : > { %v378_v30 = vrot.slane %v377_v43, 1 }
 0x1f4   : > { %v1672_v40 = vadd.f32 %v1671_v62, %v1609_v26 }
 0x1f5   : > { %v379_v8 = vadd.f32 %v378_v30, %v377_v43 }
 0x1f6   : > { %1673 = vadd.xlane.f32.xlu1 %v1672_v40 }
 0x1f7   : > { %1842 = vpush %v379_v8 }
 0x228   : > { %s1843_s27 = spop %1842 }
 0x229   : > { %s381_s28 = sadd.f32 %s1843_s27, %s360_s26 }
 0x22b   : > { %383 = sst [smem:[#allocation6]] %s381_s28 }
 0x22c   : > { %1900 = shalt.err (!%p1897_p11)
}
 0x22d   : > { %s1948_s10 = smov [#allocation6]   ;;  %s1353_s15 = sld [smem:[#allocation4]] }
 0x22e   : > { %1851 = dma.smem_to_hbm (%p2242_p6), %s1948_s10, 16, %s2298_s3, [#allocation7]  }
 0x22f   : > { %s1901_s22 = scalar_lea.hbm %s2297_s2, 16 }
 0x230   : > { %p1902_p12 = scmp.ne.s32.totalorder %s2297_s2, %s1901_s22  ;;  %p1907_p1 = scmp.lt.u32.totalorder %s1901_s22, %s2297_s2 }
 0x232   : > { %p1903_p13 = pnand %p1902_p12, %p2242_p6 }
 0x234   : > { %p1904_p0 = pneg %p1903_p13 }
 0x236   : > { %p1909_p2 = pnand %p1907_p1, %p1904_p0 }
 0x283   : > { %v1674_v28 = vpop.xlane.xlu1 %1673 }
 0x284   : > { %v1675_v34 = vrot.slane %v1674_v28, 4 }
 0x286   : > { %v1676_v45 = vadd.f32 %v1675_v34, %v1674_v28 }
 0x288   : > { %v1677_v48 = vrot.slane %v1676_v45, 2 }
 0x28a   : > { %v1678_v47 = vadd.f32 %v1677_v48, %v1676_v45 }
 0x28c   : > { %v1679_v1 = vrot.slane %v1678_v47, 1 }
 0x28e   : > { %v1680_v3 = vadd.f32 %v1679_v1, %v1678_v47 }
 0x290   : > { %1844 = vpush %v1680_v3 }
 0x2c1   : > { %s1845_s17 = spop %1844 }
 0x2c2   : > { %s1682_s18 = smul.f32 0.0009765625, %s1845_s17 }
 0x2c4   : > { %s1683_s19 = sadd.f32 %s1682_s18, %s1353_s15 }
 0x2c6   : > { %1685 = sst [smem:[#allocation4]] %s1683_s19 }
 0x2c7   : > { %1912 = shalt.err (!%p1909_p2)
}
 0x2c8   : > { %s1949_s27 = smov [#allocation4]  }
 0x2c9   : > { %1849 = dma.smem_to_hbm (%p2242_p6), %s1949_s27, 16, %s2297_s2, [#allocation5]  }
 0x2ca   : > { %1926 = dma.done.wait (%p2242_p6), [#allocation5], 16  }
 0x2cb   : > { %1928 = vsyncadd (%p2242_p6), [#allocation5], 4294967280 }
 0x2cc   : > { %1930 = dma.done.wait (%p2242_p6), [#allocation7], 16  }
 0x2cd   : > { %1932 = vsyncadd (%p2242_p6), [#allocation7], 4294967280 }
 0x2ce   : > { %1712 = sfence }
 0x2cf PF: > { %s16_s14 = sadd.s32 1, %s1943_s14   ;;  %s2300_s12 = smov %s1939_s13 }
 0x2d0   : > { %p13_p3 = scmp.ge.s32.totalorder %s16_s14, 4   ;;  %s2301_s13 = smov %s2303_s16 }
 0x2d2   :  { %15 = sbr.rel (!%p13_p3) target bundleno = 3 (0x3), region = 82 }
 0x2d9   :  { %1718 = vsyncpa [#allocation5], 1 }
 0x2da   :  { %1720 = vsyncpa [#allocation5 + $0x1], 1 }
 0x2db   :  { %1721 = vsyncpa [#allocation7], 1 }

// kernel: inpaint_loss.85
= control target key start
LH: loop header
LB: loop body
LE: loop exit
PB: predicated region body
PF: predicated region fallthrough
CT: control target
= control target key end

     0   :  { %s3449_s12 = smov 0   ;;  %s3451_s13 = smov 0   ;;  %s4377_s0 = inlined_call_operand.vmem [shape: bf16[2,16,2304], index: 0, kind: input, shape index: {}]   ;;  %s4378_s1 = inlined_call_operand.vmem [shape: bf16[2304,256], index: 1, kind: input, shape index: {}]   ;;  %s4379_s2 = inlined_call_operand.vmem [shape: f32[1,256], index: 2, kind: input, shape index: {}]   ;;  %s4380_s3 = inlined_call_operand.vmem [shape: bf16[2,16,256], index: 3, kind: output, shape index: {}]  }
   0x1   :  { %s3453_s14 = smov 0  }
   0x2 LB: > { %s25_s15 = sadd.s32 1, %s3423_s13  ;;  %p2568_p0 = scmp.ge.s32.totalorder %s3427_s14, 1  ;;  %s3427_s14 = sphi %s3453_s14, %s13_s14   ;;  %s3423_s13 = sphi %s3451_s13, %s4382_s13   ;;  %s3419_s12 = sphi %s3449_s12, %s4381_s12  }
   0x3   : > { %p27_p1 = scmp.ge.s32.totalorder %s25_s15, 2  ;;  %p159_p2 = scmp.lt.s32.totalorder %s3427_s14, 3 }
   0x5   : > { %s4384_s15 = smov (%p27_p1, %s25_s15), 0  ;;  %p160_p3 = pnand %p2568_p0, %p159_p2 }
   0x6   : > { %v2946_v0 = vld [vmem:[%s4378_s1 + $0x4] ss:$8 sps:$4 sm:$0xff] (!%p160_p3)   ;;  %v2950_v2 = vld [vmem:[%s4378_s1] ss:$8 sps:$4 sm:$0xff] (!%p160_p3)   ;;  %v2952_v4 = vld [vmem:[%s4378_s1 + $0x14] ss:$8 sps:$4 sm:$0xff] (!%p160_p3)  }
   0x7   : > { %163 = sbr.rel (%p160_p3) target bundleno = 550 (0x226), region = 32  ;;  %v2948_v1 = vld [vmem:[%s4378_s1 + $0x404] ss:$8 sps:$4 sm:$0xff] (!%p160_p3)   ;;  %2063 = vmatprep.subr.bf16.mxu1 (!%p160_p3), %v2946_v0  ;;  %v2951_v3 = vld [vmem:[%s4378_s1 + $0x400] ss:$8 sps:$4 sm:$0xff] (!%p160_p3)   ;;  %p194_p4 = scmp.lt.s32.totalorder (!%p160_p3), %s3419_s12, 1 }
   0x8   : > { %2235 = vmatprep.subr.bf16.mxu0 (!%p160_p3), %v2948_v1  ;;  %2064 = vmatpush1.bf16.msra.mxu1 (!%p160_p3), %v2950_v2  ;;  %v2954_v5 = vld [vmem:[%s4378_s1 + $0x414] ss:$8 sps:$4 sm:$0xff] (!%p160_p3)   ;;  %v2956_v6 = vld [vmem:[%s4378_s1 + $0x10] ss:$8 sps:$4 sm:$0xff] (!%p160_p3)   ;;  %v2958_v8 = vld [vmem:[%s4378_s1 + $0x24] ss:$8 sps:$4 sm:$0xff] (!%p160_p3)  }
   0x9   : > { %2236 = vmatpush1.bf16.msra.mxu0 (!%p160_p3), %v2951_v3  ;;  %2065 = vmatprep.subr.bf16.mxu1 (!%p160_p3), %v2952_v4  ;;  %v2957_v7 = vld [vmem:[%s4378_s1 + $0x410] ss:$8 sps:$4 sm:$0xff] (!%p160_p3)   ;;  %v2960_v9 = vld [vmem:[%s4378_s1 + $0x424] ss:$8 sps:$4 sm:$0xff] (!%p160_p3)   ;;  %v2962_v10 = vld [vmem:[%s4378_s1 + $0x20] ss:$8 sps:$4 sm:$0xff] (!%p160_p3)  }
   0xa   : > { %2237 = vmatprep.subr.bf16.mxu0 (!%p160_p3), %v2954_v5  ;;  %v2963_v11 = vld [vmem:[%s4378_s1 + $0x420] ss:$8 sps:$4 sm:$0xff] (!%p160_p3)   ;;  %v2964_v12 = vld [vmem:[%s4378_s1 + $0x34] ss:$8 sps:$4 sm:$0xff] (!%p160_p3)   ;;  %v2968_v14 = vld [vmem:[%s4378_s1 + $0x30] ss:$8 sps:$4 sm:$0xff] (!%p160_p3)  }
   0xb   : > { %v2966_v13 = vld [vmem:[%s4378_s1 + $0x434] ss:$8 sps:$4 sm:$0xff] (!%p160_p3)   ;;  %v2969_v15 = vld [vmem:[%s4378_s1 + $0x430] ss:$8 sps:$4 sm:$0xff] (!%p160_p3)   ;;  %v2970_v16 = vld [vmem:[%s4378_s1 + $0x44] ss:$8 sps:$4 sm:$0xff] (!%p160_p3)  }
   0xc   : > { %2066 = vmatpush1.bf16.msra.mxu1 (!%p160_p3), %v2956_v6  ;;  %v2972_v17 = vld [vmem:[%s4378_s1 + $0x444] ss:$8 sps:$4 sm:$0xff] (!%p160_p3)   ;;  %v2974_v18 = vld [vmem:[%s4378_s1 + $0x40] ss:$8 sps:$4 sm:$0xff] (!%p160_p3)   ;;  %v2976_v20 = vld [vmem:[%s4378_s1 + $0x54] ss:$8 sps:$4 sm:$0xff] (!%p160_p3)  }
   0xd   : > { %2238 = vmatpush1.bf16.msra.mxu0 (!%p160_p3), %v2957_v7  ;;  %2067 = vmatprep.subr.bf16.mxu1 (!%p160_p3), %v2958_v8  ;;  %v2975_v19 = vld [vmem:[%s4378_s1 + $0x440] ss:$8 sps:$4 sm:$0xff] (!%p160_p3)   ;;  %v2978_v21 = vld [vmem:[%s4378_s1 + $0x454] ss:$8 sps:$4 sm:$0xff] (!%p160_p3)   ;;  %v2980_v22 = vld [vmem:[%s4378_s1 + $0x50] ss:$8 sps:$4 sm:$0xff] (!%p160_p3)  }
   0xe   : > { %2239 = vmatprep.subr.bf16.mxu0 %v2960_v9  ;;  %v2981_v23 = vld [vmem:[%s4378_s1 + $0x450] ss:$8 sps:$4 sm:$0xff]   ;;  %v2982_v24 = vld [vmem:[%s4378_s1 + $0x64] ss:$8 sps:$4 sm:$0xff]   ;;  %v2986_v26 = vld [vmem:[%s4378_s1 + $0x60] ss:$8 sps:$4 sm:$0xff]  }
   0xf   : > { %v2984_v25 = vld [vmem:[%s4378_s1 + $0x464] ss:$8 sps:$4 sm:$0xff]   ;;  %v2987_v27 = vld [vmem:[%s4378_s1 + $0x460] ss:$8 sps:$4 sm:$0xff]   ;;  %v2988_v28 = vld [vmem:[%s4378_s1 + $0x74] ss:$8 sps:$4 sm:$0xff]  }
  0x10   : > { %2068 = vmatpush1.bf16.msra.mxu1 %v2962_v10  ;;  %v2990_v29 = vld [vmem:[%s4378_s1 + $0x474] ss:$8 sps:$4 sm:$0xff]   ;;  %v2992_v30 = vld [vmem:[%s4378_s1 + $0x70] ss:$8 sps:$4 sm:$0xff]   ;;  %v2994_v32 = vld [vmem:[%s4378_s1 + $0x84] ss:$8 sps:$4 sm:$0xff]  }
  0x11   : > { %2240 = vmatpush1.bf16.msra.mxu0 %v2963_v11  ;;  %2069 = vmatprep.subr.bf16.mxu1 %v2964_v12  ;;  %v2993_v31 = vld [vmem:[%s4378_s1 + $0x470] ss:$8 sps:$4 sm:$0xff]   ;;  %v2996_v33 = vld [vmem:[%s4378_s1 + $0x484] ss:$8 sps:$4 sm:$0xff]   ;;  %v2998_v34 = vld [vmem:[%s4378_s1 + $0x80] ss:$8 sps:$4 sm:$0xff]  }
  0x12   : > { %2241 = vmatprep.subr.bf16.mxu0 %v2966_v13  ;;  %v2999_v35 = vld [vmem:[%s4378_s1 + $0x480] ss:$8 sps:$4 sm:$0xff]   ;;  %v3000_v36 = vld [vmem:[%s4378_s1 + $0x94] ss:$8 sps:$4 sm:$0xff]   ;;  %s4386_s12 = smov (!%p194_p4, %s3419_s12), 1 }
  0x13   : > { %v3002_v37 = vld [vmem:[%s4378_s1 + $0x494] ss:$8 sps:$4 sm:$0xff]   ;;  %v3004_v38 = vld [vmem:[%s4378_s1 + $0x90] ss:$8 sps:$4 sm:$0xff]   ;;  %v3006_v40 = vld [vmem:[%s4378_s1 + $0xa4] ss:$8 sps:$4 sm:$0xff]  }
  0x14   : > { %2070 = vmatpush1.bf16.msra.mxu1 %v2968_v14  ;;  %v3005_v39 = vld [vmem:[%s4378_s1 + $0x490] ss:$8 sps:$4 sm:$0xff]   ;;  %s2921_s29 = smul.u32 144, %s4386_s12  ;;  %v3008_v41 = vld [vmem:[%s4378_s1 + $0x4a4] ss:$8 sps:$4 sm:$0xff]  }
  0x15   : > { %2242 = vmatpush1.bf16.msra.mxu0 %v2969_v15  ;;  %2071 = vmatprep.subr.bf16.mxu1 %v2970_v16  ;;  %v3010_v42 = vld [vmem:[%s4378_s1 + $0xa0] ss:$8 sps:$4 sm:$0xff]   ;;  %v3012_v44 = vld [vmem:[%s4378_s1 + $0xb4] ss:$8 sps:$4 sm:$0xff]   ;;  %v3016_v46 = vld [vmem:[%s4378_s1 + $0xb0] ss:$8 sps:$4 sm:$0xff]  }
  0x16   : > { %2243 = vmatprep.subr.bf16.mxu0 %v2972_v17  ;;  %v3011_v43 = vld [vmem:[%s4378_s1 + $0x4a0] ss:$8 sps:$4 sm:$0xff]   ;;  %s3612_s17 = scalar_lea.vmem %s4377_s0, %s2921_s29  ;;  %v3014_v45 = vld [vmem:[%s4378_s1 + $0x4b4] ss:$8 sps:$4 sm:$0xff]   ;;  %v3017_v47 = vld [vmem:[%s4378_s1 + $0x4b0] ss:$8 sps:$4 sm:$0xff]  }
  0x17   : > { %v3044_v48 = vld [vmem:[%s3612_s17 + $0x4] ss:$72 sps:$4 sm:$0xff]   ;;  %v3022_v52 = vld [vmem:[%s4378_s1 + $0xc0] ss:$8 sps:$4 sm:$0xff]   ;;  %v3024_v54 = vld [vmem:[%s4378_s1 + $0xd4] ss:$8 sps:$4 sm:$0xff]  }
  0x18   : > { %2072 = vmatpush1.bf16.msra.mxu1 %v2974_v18  ;;  %v3018_v49 = vld [vmem:[%s4378_s1 + $0xc4] ss:$8 sps:$4 sm:$0xff]   ;;  %2095 = vmatprep.mubr.bf16.mxu1 %v3044_v48  ;;  %v3023_v53 = vld [vmem:[%s4378_s1 + $0x4c0] ss:$8 sps:$4 sm:$0xff]   ;;  %v3026_v55 = vld [vmem:[%s4378_s1 + $0x4d4] ss:$8 sps:$4 sm:$0xff]  }
  0x19   : > { %2244 = vmatpush1.bf16.msra.mxu0 %v2975_v19  ;;  %2073 = vmatprep.subr.bf16.mxu1 %v2976_v20  ;;  %v3020_v50 = vld [vmem:[%s4378_s1 + $0x4c4] ss:$8 sps:$4 sm:$0xff]   ;;  %v3028_v56 = vld [vmem:[%s4378_s1 + $0xd0] ss:$8 sps:$4 sm:$0xff]   ;;  %v3034_v60 = vld [vmem:[%s4378_s1 + $0xe0] ss:$8 sps:$4 sm:$0xff]  }
  0x1a   : > { %2245 = vmatprep.subr.bf16.mxu0 %v2978_v21  ;;  %v3050_v51 = vld [vmem:[%s3612_s17 + $0x24] ss:$72 sps:$4 sm:$0xff]   ;;  %v3029_v57 = vld [vmem:[%s4378_s1 + $0x4d0] ss:$8 sps:$4 sm:$0xff]   ;;  %v3035_v61 = vld [vmem:[%s4378_s1 + $0x4e0] ss:$8 sps:$4 sm:$0xff]  }
  0x1b   : > { %2267 = vmatprep.mubr.bf16.mxu0 %v3050_v51  ;;  %v3030_v58 = vld [vmem:[%s4378_s1 + $0xe4] ss:$8 sps:$4 sm:$0xff]   ;;  %v3036_v62 = vld [vmem:[%s4378_s1 + $0xf4] ss:$8 sps:$4 sm:$0xff]   ;;  %v3040_v0 = vld [vmem:[%s4378_s1 + $0xf0] ss:$8 sps:$4 sm:$0xff]  }
  0x1c   : > { %2074 = vmatpush1.bf16.msra.mxu1 %v2980_v22  ;;  %v3032_v59 = vld [vmem:[%s4378_s1 + $0x4e4] ss:$8 sps:$4 sm:$0xff]   ;;  %v3038_v63 = vld [vmem:[%s4378_s1 + $0x4f4] ss:$8 sps:$4 sm:$0xff]   ;;  %v3041_v1 = vld [vmem:[%s4378_s1 + $0x4f0] ss:$8 sps:$4 sm:$0xff]  }
  0x1d   : > { %2246 = vmatpush1.bf16.msra.mxu0 %v2981_v23  ;;  %2075 = vmatprep.subr.bf16.mxu1 %v2982_v24  ;;  %v3047_v2 = vld [vmem:[%s4378_s1 + $0x104] ss:$8 sps:$4 sm:$0xff]   ;;  %v3042_v4 = vld [vmem:[%s3612_s17] ss:$72 sps:$4 sm:$0xff]   ;;  %v3056_v8 = vld [vmem:[%s4378_s1 + $0x114] ss:$8 sps:$4 sm:$0xff]  }
  0x1e   : > { %2247 = vmatprep.subr.bf16.mxu0 %v2984_v25  ;;  %v3053_v3 = vld [vmem:[%s4378_s1 + $0x504] ss:$8 sps:$4 sm:$0xff]   ;;  %v3045_v5 = vld [vmem:[%s4378_s1 + $0x100] ss:$8 sps:$4 sm:$0xff]   ;;  %v3059_v9 = vld [vmem:[%s4378_s1 + $0x514] ss:$8 sps:$4 sm:$0xff]  }
  0x1f   : > { %v3048_v6 = vld [vmem:[%s3612_s17 + $0x20] ss:$72 sps:$4 sm:$0xff]   ;;  %v3054_v10 = vld [vmem:[%s4378_s1 + $0x110] ss:$8 sps:$4 sm:$0xff]   ;;  %v3062_v12 = vld [vmem:[%s4378_s1 + $0x124] ss:$8 sps:$4 sm:$0xff]  }
  0x20   : > { %2076 = vmatpush1.bf16.msra.mxu1 %v2986_v26  ;;  %v3051_v7 = vld [vmem:[%s4378_s1 + $0x500] ss:$8 sps:$4 sm:$0xff]   ;;  %v3057_v11 = vld [vmem:[%s4378_s1 + $0x510] ss:$8 sps:$4 sm:$0xff]   ;;  %v3065_v13 = vld [vmem:[%s4378_s1 + $0x524] ss:$8 sps:$4 sm:$0xff]  }
  0x21   : > { %2248 = vmatpush1.bf16.msra.mxu0 %v2987_v27  ;;  %2077 = vmatprep.subr.bf16.mxu1 %v2988_v28  ;;  %v3060_v14 = vld [vmem:[%s4378_s1 + $0x120] ss:$8 sps:$4 sm:$0xff]   ;;  %v3068_v16 = vld [vmem:[%s4378_s1 + $0x134] ss:$8 sps:$4 sm:$0xff]   ;;  %v3066_v18 = vld [vmem:[%s4378_s1 + $0x130] ss:$8 sps:$4 sm:$0xff]  }
  0x22   : > { %2249 = vmatprep.subr.bf16.mxu0 %v2990_v29  ;;  %v3063_v15 = vld [vmem:[%s4378_s1 + $0x520] ss:$8 sps:$4 sm:$0xff]   ;;  %v3071_v17 = vld [vmem:[%s4378_s1 + $0x534] ss:$8 sps:$4 sm:$0xff]   ;;  %v3069_v19 = vld [vmem:[%s4378_s1 + $0x530] ss:$8 sps:$4 sm:$0xff]  }
  0x23   : > { %v3074_v20 = vld [vmem:[%s4378_s1 + $0x144] ss:$8 sps:$4 sm:$0xff]   ;;  %v3072_v22 = vld [vmem:[%s4378_s1 + $0x140] ss:$8 sps:$4 sm:$0xff]   ;;  %v3080_v24 = vld [vmem:[%s4378_s1 + $0x154] ss:$8 sps:$4 sm:$0xff]  }
  0x24   : > { %2078 = vmatpush1.bf16.msra.mxu1 %v2992_v30  ;;  %v3077_v21 = vld [vmem:[%s4378_s1 + $0x544] ss:$8 sps:$4 sm:$0xff]   ;;  %v3075_v23 = vld [vmem:[%s4378_s1 + $0x540] ss:$8 sps:$4 sm:$0xff]   ;;  %v3083_v25 = vld [vmem:[%s4378_s1 + $0x554] ss:$8 sps:$4 sm:$0xff]  }
  0x25   : > { %2250 = vmatpush1.bf16.msra.mxu0 %v2993_v31  ;;  %2079 = vmatprep.subr.bf16.mxu1 %v2994_v32  ;;  %v3078_v26 = vld [vmem:[%s4378_s1 + $0x150] ss:$8 sps:$4 sm:$0xff]   ;;  %v3086_v28 = vld [vmem:[%s4378_s1 + $0x164] ss:$8 sps:$4 sm:$0xff]   ;;  %v3084_v30 = vld [vmem:[%s4378_s1 + $0x160] ss:$8 sps:$4 sm:$0xff]  }
  0x26   : > { %2251 = vmatprep.subr.bf16.mxu0 %v2996_v33  ;;  %v3081_v27 = vld [vmem:[%s4378_s1 + $0x550] ss:$8 sps:$4 sm:$0xff]   ;;  %v3089_v29 = vld [vmem:[%s4378_s1 + $0x564] ss:$8 sps:$4 sm:$0xff]   ;;  %v3087_v31 = vld [vmem:[%s4378_s1 + $0x560] ss:$8 sps:$4 sm:$0xff]  }
  0x27   : > { %v3092_v32 = vld [vmem:[%s4378_s1 + $0x174] ss:$8 sps:$4 sm:$0xff]   ;;  %v3108_v48 = vld [vmem:[%s4378_s1 + $0x1a0] ss:$8 sps:$4 sm:$0xff]  }
  0x28   : > { %2080 = vmatpush1.bf16.msra.mxu1 %v2998_v34  ;;  %v3095_v33 = vld [vmem:[%s4378_s1 + $0x574] ss:$8 sps:$4 sm:$0xff]  }
  0x29   : > { %2252 = vmatpush1.bf16.msra.mxu0 %v2999_v35  ;;  %2081 = vmatprep.subr.bf16.mxu1 %v3000_v36  ;;  %v3146_v34 = vld [vmem:[%s3612_s17 + $0xc] ss:$72 sps:$4 sm:$0xff]   ;;  %v3090_v35 = vld [vmem:[%s4378_s1 + $0x170] ss:$8 sps:$4 sm:$0xff]  }
  0x2a   : > { %2253 = vmatprep.subr.bf16.mxu0 %v3002_v37  ;;  %v3093_v36 = vld [vmem:[%s4378_s1 + $0x570] ss:$8 sps:$4 sm:$0xff]   ;;  %v3152_v37 = vld [vmem:[%s3612_s17 + $0x2c] ss:$72 sps:$4 sm:$0xff]  }
  0x2b   : > { %v3119_v51 = vld [vmem:[%s4378_s1 + $0x5b4] ss:$8 sps:$4 sm:$0xff]  }
  0x2c   : > { %2082 = vmatpush1.bf16.msra.mxu1 %v3004_v38  ;;  %v3098_v38 = vld [vmem:[%s4378_s1 + $0x184] ss:$8 sps:$4 sm:$0xff]  }
  0x2d   : > { %2254 = vmatpush1.bf16.msra.mxu0 %v3005_v39  ;;  %2083 = vmatprep.subr.bf16.mxu1 %v3006_v40  ;;  %v3101_v39 = vld [vmem:[%s4378_s1 + $0x584] ss:$8 sps:$4 sm:$0xff]   ;;  %v3096_v40 = vld [vmem:[%s4378_s1 + $0x180] ss:$8 sps:$4 sm:$0xff]  }
  0x2e   : > { %2255 = vmatprep.subr.bf16.mxu0 %v3008_v41  ;;  %v3099_v41 = vld [vmem:[%s4378_s1 + $0x580] ss:$8 sps:$4 sm:$0xff]  }
  0x30   : > { %2084 = vmatpush1.bf16.msra.mxu1 %v3010_v42  ;;  %v3104_v42 = vld [vmem:[%s4378_s1 + $0x194] ss:$8 sps:$4 sm:$0xff]  }
  0x31   : > { %2256 = vmatpush1.bf16.msra.mxu0 %v3011_v43  ;;  %2085 = vmatprep.subr.bf16.mxu1 %v3012_v44  ;;  %v3107_v43 = vld [vmem:[%s4378_s1 + $0x594] ss:$8 sps:$4 sm:$0xff]   ;;  %v3102_v44 = vld [vmem:[%s4378_s1 + $0x190] ss:$8 sps:$4 sm:$0xff]  }
  0x32   : > { %2257 = vmatprep.subr.bf16.mxu0 %v3014_v45  ;;  %v3105_v45 = vld [vmem:[%s4378_s1 + $0x590] ss:$8 sps:$4 sm:$0xff]  }
  0x34   : > { %2086 = vmatpush1.bf16.msra.mxu1 %v3016_v46  ;;  %v3110_v46 = vld [vmem:[%s4378_s1 + $0x1a4] ss:$8 sps:$4 sm:$0xff]  }
  0x35   : > { %2258 = vmatpush1.bf16.msra.mxu0 %v3017_v47  ;;  %2087 = vmatprep.subr.bf16.mxu1 %v3018_v49  ;;  %v3113_v47 = vld [vmem:[%s4378_s1 + $0x5a4] ss:$8 sps:$4 sm:$0xff]   ;;  %v3111_v49 = vld [vmem:[%s4378_s1 + $0x5a0] ss:$8 sps:$4 sm:$0xff]  }
  0x36   : > { %2259 = vmatprep.subr.bf16.mxu0 %v3020_v50  ;;  %v3116_v50 = vld [vmem:[%s4378_s1 + $0x1b4] ss:$8 sps:$4 sm:$0xff]  }
  0x38   : > { %2088 = vmatpush1.bf16.msra.mxu1 %v3022_v52  ;;  %v3114_v52 = vld [vmem:[%s4378_s1 + $0x1b0] ss:$8 sps:$4 sm:$0xff]  }
  0x39   : > { %2260 = vmatpush1.bf16.msra.mxu0 %v3023_v53  ;;  %2089 = vmatprep.subr.bf16.mxu1 %v3024_v54  ;;  %v3117_v53 = vld [vmem:[%s4378_s1 + $0x5b0] ss:$8 sps:$4 sm:$0xff]   ;;  %v3122_v54 = vld [vmem:[%s4378_s1 + $0x1c4] ss:$8 sps:$4 sm:$0xff]  }
  0x3a   : > { %2261 = vmatprep.subr.bf16.mxu0 %v3026_v55  ;;  %v3125_v55 = vld [vmem:[%s4378_s1 + $0x5c4] ss:$8 sps:$4 sm:$0xff]  }
  0x3c   : > { %2090 = vmatpush1.bf16.msra.mxu1 %v3028_v56  ;;  %v3120_v56 = vld [vmem:[%s4378_s1 + $0x1c0] ss:$8 sps:$4 sm:$0xff]  }
  0x3d   : > { %2262 = vmatpush1.bf16.msra.mxu0 %v3029_v57  ;;  %2091 = vmatprep.subr.bf16.mxu1 %v3030_v58  ;;  %v3123_v57 = vld [vmem:[%s4378_s1 + $0x5c0] ss:$8 sps:$4 sm:$0xff]   ;;  %v3128_v58 = vld [vmem:[%s4378_s1 + $0x1d4] ss:$8 sps:$4 sm:$0xff]  }
  0x3e   : > { %2263 = vmatprep.subr.bf16.mxu0 %v3032_v59  ;;  %v3131_v59 = vld [vmem:[%s4378_s1 + $0x5d4] ss:$8 sps:$4 sm:$0xff]  }
  0x40   : > { %2092 = vmatpush1.bf16.msra.mxu1 %v3034_v60  ;;  %v3126_v60 = vld [vmem:[%s4378_s1 + $0x1d0] ss:$8 sps:$4 sm:$0xff]  }
  0x41   : > { %2264 = vmatpush1.bf16.msra.mxu0 %v3035_v61  ;;  %2093 = vmatprep.subr.bf16.mxu1 %v3036_v62  ;;  %v3129_v61 = vld [vmem:[%s4378_s1 + $0x5d0] ss:$8 sps:$4 sm:$0xff]   ;;  %v3134_v62 = vld [vmem:[%s4378_s1 + $0x1e4] ss:$8 sps:$4 sm:$0xff]  }
  0x42   : > { %2265 = vmatprep.subr.bf16.mxu0 %v3038_v63  ;;  %v3137_v63 = vld [vmem:[%s4378_s1 + $0x5e4] ss:$8 sps:$4 sm:$0xff]  }
  0x44   : > { %2094 = vmatpush1.bf16.msra.mxu1 %v3040_v0  ;;  %v3132_v0 = vld [vmem:[%s4378_s1 + $0x1e0] ss:$8 sps:$4 sm:$0xff]  }
  0x45   : > { %2266 = vmatpush1.bf16.msra.mxu0 %v3041_v1  ;;  %2106 = vmatprep.subr.bf16.mxu1 %v3047_v2  ;;  %v3135_v1 = vld [vmem:[%s4378_s1 + $0x5e0] ss:$8 sps:$4 sm:$0xff]   ;;  %v3140_v2 = vld [vmem:[%s4378_s1 + $0x1f4] ss:$8 sps:$4 sm:$0xff]  }
  0x46   : > { %2278 = vmatprep.subr.bf16.mxu0 %v3053_v3  ;;  %v3143_v3 = vld [vmem:[%s4378_s1 + $0x5f4] ss:$8 sps:$4 sm:$0xff]  }
  0x47   : > { %2096 = vmatmul.mubr.bf16.vlgmr.msra.gmra.mrb[0].mxu1 %v3042_v4  ;;  %v3138_v4 = vld [vmem:[%s4378_s1 + $0x1f0] ss:$8 sps:$4 sm:$0xff]  }
  0x48   : > { %2268 = vmatmul.mubr.bf16.vlgmr.msra.gmra.mrb[0].mxu0 %v3048_v6  ;;  %2107 = vmatpush1.bf16.msra.mxu1 %v3045_v5  ;;  %v3141_v5 = vld [vmem:[%s4378_s1 + $0x5f0] ss:$8 sps:$4 sm:$0xff]   ;;  %v3149_v6 = vld [vmem:[%s4378_s1 + $0x204] ss:$8 sps:$4 sm:$0xff]  }
  0x49   : > { %2279 = vmatpush1.bf16.msra.mxu0 %v3051_v7  ;;  %2108 = vmatprep.subr.bf16.mxu1 %v3056_v8  ;;  %v3155_v7 = vld [vmem:[%s4378_s1 + $0x604] ss:$8 sps:$4 sm:$0xff]   ;;  %v3144_v8 = vld [vmem:[%s3612_s17 + $0x8] ss:$72 sps:$4 sm:$0xff]  }
  0x4a   : > { %2280 = vmatprep.subr.bf16.mxu0 %v3059_v9  ;;  %2138 = vmatprep.mubr.bf16.mxu1 %v3146_v34  ;;  %v3147_v9 = vld [vmem:[%s4378_s1 + $0x200] ss:$8 sps:$4 sm:$0xff]   ;;  %v3188_v34 = vld [vmem:[%s4378_s1 + $0x264] ss:$8 sps:$4 sm:$0xff]  }
  0x4b   : > { %2310 = vmatprep.mubr.bf16.mxu0 %v3152_v37  ;;  %v3189_v37 = vld [vmem:[%s4378_s1 + $0x660] ss:$8 sps:$4 sm:$0xff]  }
  0x4c   : > { %2109 = vmatpush1.bf16.msra.mxu1 %v3054_v10  ;;  %v3150_v10 = vld [vmem:[%s3612_s17 + $0x28] ss:$72 sps:$4 sm:$0xff]  }
  0x4d   : > { %2281 = vmatpush1.bf16.msra.mxu0 %v3057_v11  ;;  %2110 = vmatprep.subr.bf16.mxu1 %v3062_v12  ;;  %v3153_v11 = vld [vmem:[%s4378_s1 + $0x600] ss:$8 sps:$4 sm:$0xff]   ;;  %v3158_v12 = vld [vmem:[%s4378_s1 + $0x214] ss:$8 sps:$4 sm:$0xff]  }
  0x4e   : > { %2282 = vmatprep.subr.bf16.mxu0 %v3065_v13  ;;  %v3161_v13 = vld [vmem:[%s4378_s1 + $0x614] ss:$8 sps:$4 sm:$0xff]  }
  0x50   : > { %2111 = vmatpush1.bf16.msra.mxu1 %v3060_v14  ;;  %v3156_v14 = vld [vmem:[%s4378_s1 + $0x210] ss:$8 sps:$4 sm:$0xff]  }
  0x51   : > { %2283 = vmatpush1.bf16.msra.mxu0 %v3063_v15  ;;  %2112 = vmatprep.subr.bf16.mxu1 %v3068_v16  ;;  %v3159_v15 = vld [vmem:[%s4378_s1 + $0x610] ss:$8 sps:$4 sm:$0xff]   ;;  %v3164_v16 = vld [vmem:[%s4378_s1 + $0x224] ss:$8 sps:$4 sm:$0xff]  }
  0x52   : > { %2284 = vmatprep.subr.bf16.mxu0 %v3071_v17  ;;  %v3167_v17 = vld [vmem:[%s4378_s1 + $0x624] ss:$8 sps:$4 sm:$0xff]  }
  0x54   : > { %2113 = vmatpush1.bf16.msra.mxu1 %v3066_v18  ;;  %v3162_v18 = vld [vmem:[%s4378_s1 + $0x220] ss:$8 sps:$4 sm:$0xff]  }
  0x55   : > { %2285 = vmatpush1.bf16.msra.mxu0 %v3069_v19  ;;  %2114 = vmatprep.subr.bf16.mxu1 %v3074_v20  ;;  %v3248_v19 = vld [vmem:[%s3612_s17 + $0x14] ss:$72 sps:$4 sm:$0xff]   ;;  %v3165_v20 = vld [vmem:[%s4378_s1 + $0x620] ss:$8 sps:$4 sm:$0xff]  }
  0x56   : > { %2286 = vmatprep.subr.bf16.mxu0 %v3077_v21  ;;  %v3170_v21 = vld [vmem:[%s4378_s1 + $0x234] ss:$8 sps:$4 sm:$0xff]  }
  0x58   : > { %2115 = vmatpush1.bf16.msra.mxu1 %v3072_v22  ;;  %v3173_v22 = vld [vmem:[%s4378_s1 + $0x634] ss:$8 sps:$4 sm:$0xff]  }
  0x59   : > { %2287 = vmatpush1.bf16.msra.mxu0 %v3075_v23  ;;  %2116 = vmatprep.subr.bf16.mxu1 %v3080_v24  ;;  %v3254_v23 = vld [vmem:[%s3612_s17 + $0x34] ss:$72 sps:$4 sm:$0xff]   ;;  %v3168_v24 = vld [vmem:[%s4378_s1 + $0x230] ss:$8 sps:$4 sm:$0xff]  }
  0x5a   : > { %2288 = vmatprep.subr.bf16.mxu0 %v3083_v25  ;;  %v3171_v25 = vld [vmem:[%s4378_s1 + $0x630] ss:$8 sps:$4 sm:$0xff]  }
  0x5c   : > { %2117 = vmatpush1.bf16.msra.mxu1 %v3078_v26  ;;  %v3176_v26 = vld [vmem:[%s4378_s1 + $0x244] ss:$8 sps:$4 sm:$0xff]  }
  0x5d   : > { %2289 = vmatpush1.bf16.msra.mxu0 %v3081_v27  ;;  %2118 = vmatprep.subr.bf16.mxu1 %v3086_v28  ;;  %v3179_v27 = vld [vmem:[%s4378_s1 + $0x644] ss:$8 sps:$4 sm:$0xff]   ;;  %v3174_v28 = vld [vmem:[%s4378_s1 + $0x240] ss:$8 sps:$4 sm:$0xff]  }
  0x5e   : > { %2290 = vmatprep.subr.bf16.mxu0 %v3089_v29  ;;  %v3177_v29 = vld [vmem:[%s4378_s1 + $0x640] ss:$8 sps:$4 sm:$0xff]  }
  0x60   : > { %2119 = vmatpush1.bf16.msra.mxu1 %v3084_v30  ;;  %v3182_v30 = vld [vmem:[%s4378_s1 + $0x254] ss:$8 sps:$4 sm:$0xff]  }
  0x61   : > { %2291 = vmatpush1.bf16.msra.mxu0 %v3087_v31  ;;  %2120 = vmatprep.subr.bf16.mxu1 %v3092_v32  ;;  %v3185_v31 = vld [vmem:[%s4378_s1 + $0x654] ss:$8 sps:$4 sm:$0xff]   ;;  %v3180_v32 = vld [vmem:[%s4378_s1 + $0x250] ss:$8 sps:$4 sm:$0xff]  }
  0x62   : > { %2292 = vmatprep.subr.bf16.mxu0 %v3095_v33  ;;  %v3183_v33 = vld [vmem:[%s4378_s1 + $0x650] ss:$8 sps:$4 sm:$0xff]  }
  0x64   : > { %2121 = vmatpush1.bf16.msra.mxu1 %v3090_v35  ;;  %v3191_v35 = vld [vmem:[%s4378_s1 + $0x664] ss:$8 sps:$4 sm:$0xff]  }
  0x65   : > { %2293 = vmatpush1.bf16.msra.mxu0 %v3093_v36  ;;  %2122 = vmatprep.subr.bf16.mxu1 %v3098_v38  ;;  %v3186_v36 = vld [vmem:[%s4378_s1 + $0x260] ss:$8 sps:$4 sm:$0xff]   ;;  %v3194_v38 = vld [vmem:[%s4378_s1 + $0x274] ss:$8 sps:$4 sm:$0xff]  }
  0x66   : > { %2294 = vmatprep.subr.bf16.mxu0 %v3101_v39  ;;  %v3197_v39 = vld [vmem:[%s4378_s1 + $0x674] ss:$8 sps:$4 sm:$0xff]  }
  0x68   : > { %2123 = vmatpush1.bf16.msra.mxu1 %v3096_v40  ;;  %v3192_v40 = vld [vmem:[%s4378_s1 + $0x270] ss:$8 sps:$4 sm:$0xff]  }
  0x69   : > { %2295 = vmatpush1.bf16.msra.mxu0 %v3099_v41  ;;  %2124 = vmatprep.subr.bf16.mxu1 %v3104_v42  ;;  %v3195_v41 = vld [vmem:[%s4378_s1 + $0x670] ss:$8 sps:$4 sm:$0xff]   ;;  %v3200_v42 = vld [vmem:[%s4378_s1 + $0x284] ss:$8 sps:$4 sm:$0xff]  }
  0x6a   : > { %2296 = vmatprep.subr.bf16.mxu0 %v3107_v43  ;;  %v3203_v43 = vld [vmem:[%s4378_s1 + $0x684] ss:$8 sps:$4 sm:$0xff]  }
  0x6c   : > { %2125 = vmatpush1.bf16.msra.mxu1 %v3102_v44  ;;  %v3198_v44 = vld [vmem:[%s4378_s1 + $0x280] ss:$8 sps:$4 sm:$0xff]  }
  0x6d   : > { %2297 = vmatpush1.bf16.msra.mxu0 %v3105_v45  ;;  %2126 = vmatprep.subr.bf16.mxu1 %v3110_v46  ;;  %v3201_v45 = vld [vmem:[%s4378_s1 + $0x680] ss:$8 sps:$4 sm:$0xff]   ;;  %v3206_v46 = vld [vmem:[%s4378_s1 + $0x294] ss:$8 sps:$4 sm:$0xff]  }
  0x6e   : > { %2298 = vmatprep.subr.bf16.mxu0 %v3113_v47  ;;  %v3209_v47 = vld [vmem:[%s4378_s1 + $0x694] ss:$8 sps:$4 sm:$0xff]  }
  0x70   : > { %2127 = vmatpush1.bf16.msra.mxu1 %v3108_v48  ;;  %v3204_v48 = vld [vmem:[%s4378_s1 + $0x290] ss:$8 sps:$4 sm:$0xff]  }
  0x71   : > { %2299 = vmatpush1.bf16.msra.mxu0 %v3111_v49  ;;  %2128 = vmatprep.subr.bf16.mxu1 %v3116_v50  ;;  %v3207_v49 = vld [vmem:[%s4378_s1 + $0x690] ss:$8 sps:$4 sm:$0xff]   ;;  %v3212_v50 = vld [vmem:[%s4378_s1 + $0x2a4] ss:$8 sps:$4 sm:$0xff]  }
  0x72   : > { %2300 = vmatprep.subr.bf16.mxu0 %v3119_v51  ;;  %v3215_v51 = vld [vmem:[%s4378_s1 + $0x6a4] ss:$8 sps:$4 sm:$0xff]  }
  0x74   : > { %2129 = vmatpush1.bf16.msra.mxu1 %v3114_v52  ;;  %v3210_v52 = vld [vmem:[%s4378_s1 + $0x2a0] ss:$8 sps:$4 sm:$0xff]  }
  0x75   : > { %2301 = vmatpush1.bf16.msra.mxu0 %v3117_v53  ;;  %2130 = vmatprep.subr.bf16.mxu1 %v3122_v54  ;;  %v3213_v53 = vld [vmem:[%s4378_s1 + $0x6a0] ss:$8 sps:$4 sm:$0xff]   ;;  %v3218_v54 = vld [vmem:[%s4378_s1 + $0x2b4] ss:$8 sps:$4 sm:$0xff]  }
  0x76   : > { %2302 = vmatprep.subr.bf16.mxu0 %v3125_v55  ;;  %v3221_v55 = vld [vmem:[%s4378_s1 + $0x6b4] ss:$8 sps:$4 sm:$0xff]  }
  0x78   : > { %2131 = vmatpush1.bf16.msra.mxu1 %v3120_v56  ;;  %v3216_v56 = vld [vmem:[%s4378_s1 + $0x2b0] ss:$8 sps:$4 sm:$0xff]  }
  0x79   : > { %2303 = vmatpush1.bf16.msra.mxu0 %v3123_v57  ;;  %2132 = vmatprep.subr.bf16.mxu1 %v3128_v58  ;;  %v3219_v57 = vld [vmem:[%s4378_s1 + $0x6b0] ss:$8 sps:$4 sm:$0xff]   ;;  %v3224_v58 = vld [vmem:[%s4378_s1 + $0x2c4] ss:$8 sps:$4 sm:$0xff]  }
  0x7a   : > { %2304 = vmatprep.subr.bf16.mxu0 %v3131_v59  ;;  %v3227_v59 = vld [vmem:[%s4378_s1 + $0x6c4] ss:$8 sps:$4 sm:$0xff]  }
  0x7c   : > { %2133 = vmatpush1.bf16.msra.mxu1 %v3126_v60  ;;  %v3222_v60 = vld [vmem:[%s4378_s1 + $0x2c0] ss:$8 sps:$4 sm:$0xff]  }
  0x7d   : > { %2305 = vmatpush1.bf16.msra.mxu0 %v3129_v61  ;;  %2134 = vmatprep.subr.bf16.mxu1 %v3134_v62  ;;  %v3225_v61 = vld [vmem:[%s4378_s1 + $0x6c0] ss:$8 sps:$4 sm:$0xff]   ;;  %v3230_v62 = vld [vmem:[%s4378_s1 + $0x2d4] ss:$8 sps:$4 sm:$0xff]  }
  0x7e   : > { %2306 = vmatprep.subr.bf16.mxu0 %v3137_v63  ;;  %v3233_v63 = vld [vmem:[%s4378_s1 + $0x6d4] ss:$8 sps:$4 sm:$0xff]  }
  0x80   : > { %2135 = vmatpush1.bf16.msra.mxu1 %v3132_v0  ;;  %v3228_v0 = vld [vmem:[%s4378_s1 + $0x2d0] ss:$8 sps:$4 sm:$0xff]  }
  0x81   : > { %2307 = vmatpush1.bf16.msra.mxu0 %v3135_v1  ;;  %2136 = vmatprep.subr.bf16.mxu1 %v3140_v2  ;;  %v3231_v1 = vld [vmem:[%s4378_s1 + $0x6d0] ss:$8 sps:$4 sm:$0xff]   ;;  %v3236_v2 = vld [vmem:[%s4378_s1 + $0x2e4] ss:$8 sps:$4 sm:$0xff]  }
  0x82   : > { %2308 = vmatprep.subr.bf16.mxu0 %v3143_v3  ;;  %v3239_v3 = vld [vmem:[%s4378_s1 + $0x6e4] ss:$8 sps:$4 sm:$0xff]  }
  0x84   : > { %2137 = vmatpush1.bf16.msra.mxu1 %v3138_v4  ;;  %v3234_v4 = vld [vmem:[%s4378_s1 + $0x2e0] ss:$8 sps:$4 sm:$0xff]  }
  0x85   : > { %2309 = vmatpush1.bf16.msra.mxu0 %v3141_v5  ;;  %2149 = vmatprep.subr.bf16.mxu1 %v3149_v6  ;;  %v3237_v5 = vld [vmem:[%s4378_s1 + $0x6e0] ss:$8 sps:$4 sm:$0xff]   ;;  %v3242_v6 = vld [vmem:[%s4378_s1 + $0x2f4] ss:$8 sps:$4 sm:$0xff]  }
  0x86   : > { %2321 = vmatprep.subr.bf16.mxu0 %v3155_v7  ;;  %v3245_v7 = vld [vmem:[%s4378_s1 + $0x6f4] ss:$8 sps:$4 sm:$0xff]  }
  0x87   : > { %2139 = vmatmul.mubr.bf16.vlgmr.msra.gmra.mrb[0].mxu1 %v3144_v8  ;;  %v3240_v8 = vld [vmem:[%s4378_s1 + $0x2f0] ss:$8 sps:$4 sm:$0xff]  }
  0x88   : > { %2311 = vmatmul.mubr.bf16.vlgmr.msra.gmra.mrb[0].mxu0 %v3150_v10  ;;  %2150 = vmatpush1.bf16.msra.mxu1 %v3147_v9  ;;  %v3243_v9 = vld [vmem:[%s4378_s1 + $0x6f0] ss:$8 sps:$4 sm:$0xff]   ;;  %v3251_v10 = vld [vmem:[%s4378_s1 + $0x304] ss:$8 sps:$4 sm:$0xff]  }
  0x89   : > { %2322 = vmatpush1.bf16.msra.mxu0 %v3153_v11  ;;  %2151 = vmatprep.subr.bf16.mxu1 %v3158_v12  ;;  %v3257_v11 = vld [vmem:[%s4378_s1 + $0x704] ss:$8 sps:$4 sm:$0xff]   ;;  %v3246_v12 = vld [vmem:[%s3612_s17 + $0x10] ss:$72 sps:$4 sm:$0xff]  }
  0x8a   : > { %2323 = vmatprep.subr.bf16.mxu0 %v3161_v13  ;;  %2181 = vmatprep.mubr.bf16.mxu1 %v3248_v19  ;;  %v3249_v13 = vld [vmem:[%s4378_s1 + $0x300] ss:$8 sps:$4 sm:$0xff]   ;;  %v3353_v19 = vld [vmem:[%s3612_s17 + $0x3c] ss:$72 sps:$4 sm:$0xff]  }
  0x8b   : > { %2353 = vmatprep.mubr.bf16.mxu0 %v3254_v23  ;;  %v3269_v23 = vld [vmem:[%s4378_s1 + $0x724] ss:$8 sps:$4 sm:$0xff]  }
  0x8c   : > { %2152 = vmatpush1.bf16.msra.mxu1 %v3156_v14  ;;  %v3252_v14 = vld [vmem:[%s3612_s17 + $0x30] ss:$72 sps:$4 sm:$0xff]  }
  0x8d   : > { %2324 = vmatpush1.bf16.msra.mxu0 %v3159_v15  ;;  %2153 = vmatprep.subr.bf16.mxu1 %v3164_v16  ;;  %v3255_v15 = vld [vmem:[%s4378_s1 + $0x700] ss:$8 sps:$4 sm:$0xff]   ;;  %v3260_v16 = vld [vmem:[%s4378_s1 + $0x314] ss:$8 sps:$4 sm:$0xff]  }
  0x8e   : > { %2325 = vmatprep.subr.bf16.mxu0 %v3167_v17  ;;  %v3263_v17 = vld [vmem:[%s4378_s1 + $0x714] ss:$8 sps:$4 sm:$0xff]  }
  0x90   : > { %2154 = vmatpush1.bf16.msra.mxu1 %v3162_v18  ;;  %v3350_v18 = vld [vmem:[%s3612_s17 + $0x1c] ss:$72 sps:$4 sm:$0xff]  }
  0x91   : > { %2326 = vmatpush1.bf16.msra.mxu0 %v3165_v20  ;;  %2155 = vmatprep.subr.bf16.mxu1 %v3170_v21  ;;  %v3258_v20 = vld [vmem:[%s4378_s1 + $0x310] ss:$8 sps:$4 sm:$0xff]  }
  0x92   : > { %2327 = vmatprep.subr.bf16.mxu0 %v3173_v22  ;;  %v3261_v21 = vld [vmem:[%s4378_s1 + $0x710] ss:$8 sps:$4 sm:$0xff]   ;;  %v3266_v22 = vld [vmem:[%s4378_s1 + $0x324] ss:$8 sps:$4 sm:$0xff]  }
  0x94   : > { %2156 = vmatpush1.bf16.msra.mxu1 %v3168_v24  ;;  %v3264_v24 = vld [vmem:[%s4378_s1 + $0x320] ss:$8 sps:$4 sm:$0xff]  }
  0x95   : > { %2328 = vmatpush1.bf16.msra.mxu0 %v3171_v25  ;;  %2157 = vmatprep.subr.bf16.mxu1 %v3176_v26  ;;  %v3267_v25 = vld [vmem:[%s4378_s1 + $0x720] ss:$8 sps:$4 sm:$0xff]   ;;  %v3272_v26 = vld [vmem:[%s4378_s1 + $0x334] ss:$8 sps:$4 sm:$0xff]  }
  0x96   : > { %2329 = vmatprep.subr.bf16.mxu0 %v3179_v27  ;;  %v3275_v27 = vld [vmem:[%s4378_s1 + $0x734] ss:$8 sps:$4 sm:$0xff]  }
  0x98   : > { %2158 = vmatpush1.bf16.msra.mxu1 %v3174_v28  ;;  %v3270_v28 = vld [vmem:[%s4378_s1 + $0x330] ss:$8 sps:$4 sm:$0xff]  }
  0x99   : > { %2330 = vmatpush1.bf16.msra.mxu0 %v3177_v29  ;;  %2159 = vmatprep.subr.bf16.mxu1 %v3182_v30  ;;  %v3273_v29 = vld [vmem:[%s4378_s1 + $0x730] ss:$8 sps:$4 sm:$0xff]   ;;  %v3278_v30 = vld [vmem:[%s4378_s1 + $0x344] ss:$8 sps:$4 sm:$0xff]  }
  0x9a   : > { %2331 = vmatprep.subr.bf16.mxu0 %v3185_v31  ;;  %v3281_v31 = vld [vmem:[%s4378_s1 + $0x744] ss:$8 sps:$4 sm:$0xff]  }
  0x9c   : > { %2160 = vmatpush1.bf16.msra.mxu1 %v3180_v32  ;;  %v3276_v32 = vld [vmem:[%s4378_s1 + $0x340] ss:$8 sps:$4 sm:$0xff]  }
  0x9d   : > { %2332 = vmatpush1.bf16.msra.mxu0 %v3183_v33  ;;  %2161 = vmatprep.subr.bf16.mxu1 %v3188_v34  ;;  %v3279_v33 = vld [vmem:[%s4378_s1 + $0x740] ss:$8 sps:$4 sm:$0xff]   ;;  %v3284_v34 = vld [vmem:[%s4378_s1 + $0x354] ss:$8 sps:$4 sm:$0xff]  }
  0x9e   : > { %2333 = vmatprep.subr.bf16.mxu0 %v3191_v35  ;;  %v3287_v35 = vld [vmem:[%s4378_s1 + $0x754] ss:$8 sps:$4 sm:$0xff]  }
  0xa0   : > { %2162 = vmatpush1.bf16.msra.mxu1 %v3186_v36  ;;  %v3282_v36 = vld [vmem:[%s4378_s1 + $0x350] ss:$8 sps:$4 sm:$0xff]  }
  0xa1   : > { %2334 = vmatpush1.bf16.msra.mxu0 %v3189_v37  ;;  %2163 = vmatprep.subr.bf16.mxu1 %v3194_v38  ;;  %v3285_v37 = vld [vmem:[%s4378_s1 + $0x750] ss:$8 sps:$4 sm:$0xff]   ;;  %v3290_v38 = vld [vmem:[%s4378_s1 + $0x364] ss:$8 sps:$4 sm:$0xff]  }
  0xa2   : > { %2335 = vmatprep.subr.bf16.mxu0 %v3197_v39  ;;  %v3293_v39 = vld [vmem:[%s4378_s1 + $0x764] ss:$8 sps:$4 sm:$0xff]  }
  0xa4   : > { %2164 = vmatpush1.bf16.msra.mxu1 %v3192_v40  ;;  %v3288_v40 = vld [vmem:[%s4378_s1 + $0x360] ss:$8 sps:$4 sm:$0xff]  }
  0xa5   : > { %2336 = vmatpush1.bf16.msra.mxu0 %v3195_v41  ;;  %2165 = vmatprep.subr.bf16.mxu1 %v3200_v42  ;;  %v3291_v41 = vld [vmem:[%s4378_s1 + $0x760] ss:$8 sps:$4 sm:$0xff]   ;;  %v3296_v42 = vld [vmem:[%s4378_s1 + $0x374] ss:$8 sps:$4 sm:$0xff]  }
  0xa6   : > { %2337 = vmatprep.subr.bf16.mxu0 %v3203_v43  ;;  %v3299_v43 = vld [vmem:[%s4378_s1 + $0x774] ss:$8 sps:$4 sm:$0xff]  }
  0xa8   : > { %2166 = vmatpush1.bf16.msra.mxu1 %v3198_v44  ;;  %v3294_v44 = vld [vmem:[%s4378_s1 + $0x370] ss:$8 sps:$4 sm:$0xff]  }
  0xa9   : > { %2338 = vmatpush1.bf16.msra.mxu0 %v3201_v45  ;;  %2167 = vmatprep.subr.bf16.mxu1 %v3206_v46  ;;  %v3297_v45 = vld [vmem:[%s4378_s1 + $0x770] ss:$8 sps:$4 sm:$0xff]   ;;  %v3302_v46 = vld [vmem:[%s4378_s1 + $0x384] ss:$8 sps:$4 sm:$0xff]  }
  0xaa   : > { %2339 = vmatprep.subr.bf16.mxu0 %v3209_v47  ;;  %v3305_v47 = vld [vmem:[%s4378_s1 + $0x784] ss:$8 sps:$4 sm:$0xff]  }
  0xac   : > { %2168 = vmatpush1.bf16.msra.mxu1 %v3204_v48  ;;  %v3300_v48 = vld [vmem:[%s4378_s1 + $0x380] ss:$8 sps:$4 sm:$0xff]  }
  0xad   : > { %2340 = vmatpush1.bf16.msra.mxu0 %v3207_v49  ;;  %2169 = vmatprep.subr.bf16.mxu1 %v3212_v50  ;;  %v3303_v49 = vld [vmem:[%s4378_s1 + $0x780] ss:$8 sps:$4 sm:$0xff]   ;;  %v3308_v50 = vld [vmem:[%s4378_s1 + $0x394] ss:$8 sps:$4 sm:$0xff]  }
  0xae   : > { %2341 = vmatprep.subr.bf16.mxu0 %v3215_v51  ;;  %v3311_v51 = vld [vmem:[%s4378_s1 + $0x794] ss:$8 sps:$4 sm:$0xff]  }
  0xb0   : > { %2170 = vmatpush1.bf16.msra.mxu1 %v3210_v52  ;;  %v3306_v52 = vld [vmem:[%s4378_s1 + $0x390] ss:$8 sps:$4 sm:$0xff]  }
  0xb1   : > { %2342 = vmatpush1.bf16.msra.mxu0 %v3213_v53  ;;  %2171 = vmatprep.subr.bf16.mxu1 %v3218_v54  ;;  %v3309_v53 = vld [vmem:[%s4378_s1 + $0x790] ss:$8 sps:$4 sm:$0xff]   ;;  %v3314_v54 = vld [vmem:[%s4378_s1 + $0x3a4] ss:$8 sps:$4 sm:$0xff]  }
  0xb2   : > { %2343 = vmatprep.subr.bf16.mxu0 %v3221_v55  ;;  %v3317_v55 = vld [vmem:[%s4378_s1 + $0x7a4] ss:$8 sps:$4 sm:$0xff]  }
  0xb4   : > { %2172 = vmatpush1.bf16.msra.mxu1 %v3216_v56  ;;  %v3312_v56 = vld [vmem:[%s4378_s1 + $0x3a0] ss:$8 sps:$4 sm:$0xff]  }
  0xb5   : > { %2344 = vmatpush1.bf16.msra.mxu0 %v3219_v57  ;;  %2173 = vmatprep.subr.bf16.mxu1 %v3224_v58  ;;  %v3315_v57 = vld [vmem:[%s4378_s1 + $0x7a0] ss:$8 sps:$4 sm:$0xff]   ;;  %v3320_v58 = vld [vmem:[%s4378_s1 + $0x3b4] ss:$8 sps:$4 sm:$0xff]  }
  0xb6   : > { %2345 = vmatprep.subr.bf16.mxu0 %v3227_v59  ;;  %v3323_v59 = vld [vmem:[%s4378_s1 + $0x7b4] ss:$8 sps:$4 sm:$0xff]  }
  0xb8   : > { %2174 = vmatpush1.bf16.msra.mxu1 %v3222_v60  ;;  %v3318_v60 = vld [vmem:[%s4378_s1 + $0x3b0] ss:$8 sps:$4 sm:$0xff]  }
  0xb9   : > { %2346 = vmatpush1.bf16.msra.mxu0 %v3225_v61  ;;  %2175 = vmatprep.subr.bf16.mxu1 %v3230_v62  ;;  %v3321_v61 = vld [vmem:[%s4378_s1 + $0x7b0] ss:$8 sps:$4 sm:$0xff]   ;;  %v3326_v62 = vld [vmem:[%s4378_s1 + $0x3c4] ss:$8 sps:$4 sm:$0xff]  }
  0xba   : > { %2347 = vmatprep.subr.bf16.mxu0 %v3233_v63  ;;  %v3329_v63 = vld [vmem:[%s4378_s1 + $0x7c4] ss:$8 sps:$4 sm:$0xff]  }
  0xbc   : > { %2176 = vmatpush1.bf16.msra.mxu1 %v3228_v0  ;;  %v3324_v0 = vld [vmem:[%s4378_s1 + $0x3c0] ss:$8 sps:$4 sm:$0xff]  }
  0xbd   : > { %2348 = vmatpush1.bf16.msra.mxu0 %v3231_v1  ;;  %2177 = vmatprep.subr.bf16.mxu1 %v3236_v2  ;;  %v3327_v1 = vld [vmem:[%s4378_s1 + $0x7c0] ss:$8 sps:$4 sm:$0xff]   ;;  %v3332_v2 = vld [vmem:[%s4378_s1 + $0x3d4] ss:$8 sps:$4 sm:$0xff]  }
  0xbe   : > { %2349 = vmatprep.subr.bf16.mxu0 %v3239_v3  ;;  %v3335_v3 = vld [vmem:[%s4378_s1 + $0x7d4] ss:$8 sps:$4 sm:$0xff]  }
  0xc0   : > { %2178 = vmatpush1.bf16.msra.mxu1 %v3234_v4  ;;  %v3330_v4 = vld [vmem:[%s4378_s1 + $0x3d0] ss:$8 sps:$4 sm:$0xff]  }
  0xc1   : > { %2350 = vmatpush1.bf16.msra.mxu0 %v3237_v5  ;;  %2179 = vmatprep.subr.bf16.mxu1 %v3242_v6  ;;  %v3333_v5 = vld [vmem:[%s4378_s1 + $0x7d0] ss:$8 sps:$4 sm:$0xff]   ;;  %v3338_v6 = vld [vmem:[%s4378_s1 + $0x3e4] ss:$8 sps:$4 sm:$0xff]  }
  0xc2   : > { %2351 = vmatprep.subr.bf16.mxu0 %v3245_v7  ;;  %v3341_v7 = vld [vmem:[%s4378_s1 + $0x7e4] ss:$8 sps:$4 sm:$0xff]  }
  0xc4   : > { %2180 = vmatpush1.bf16.msra.mxu1 %v3240_v8  ;;  %v3336_v8 = vld [vmem:[%s4378_s1 + $0x3e0] ss:$8 sps:$4 sm:$0xff]  }
  0xc5   : > { %2352 = vmatpush1.bf16.msra.mxu0 %v3243_v9  ;;  %2192 = vmatprep.subr.bf16.mxu1 %v3251_v10  ;;  %v3339_v9 = vld [vmem:[%s4378_s1 + $0x7e0] ss:$8 sps:$4 sm:$0xff]   ;;  %v3344_v10 = vld [vmem:[%s4378_s1 + $0x3f4] ss:$8 sps:$4 sm:$0xff]  }
  0xc6   : > { %2364 = vmatprep.subr.bf16.mxu0 %v3257_v11  ;;  %v3347_v11 = vld [vmem:[%s4378_s1 + $0x7f4] ss:$8 sps:$4 sm:$0xff]  }
  0xc7   : > { %2182 = vmatmul.mubr.bf16.vlgmr.msra.gmra.mrb[0].mxu1 %v3246_v12  ;;  %v3342_v12 = vld [vmem:[%s4378_s1 + $0x3f0] ss:$8 sps:$4 sm:$0xff]  }
  0xc8   : > { %2354 = vmatmul.mubr.bf16.vlgmr.msra.gmra.mrb[0].mxu0 %v3252_v14  ;;  %2193 = vmatpush1.bf16.msra.mxu1 %v3249_v13  ;;  %v3345_v13 = vld [vmem:[%s4378_s1 + $0x7f0] ss:$8 sps:$4 sm:$0xff]   ;;  %v3356_v14 = vld [vmem:[%s4378_s1 + $0x804] ss:$8 sps:$4 sm:$0xff]  }
  0xc9   : > { %2365 = vmatpush1.bf16.msra.mxu0 %v3255_v15  ;;  %2194 = vmatprep.subr.bf16.mxu1 %v3260_v16  ;;  %v3348_v15 = vld [vmem:[%s3612_s17 + $0x18] ss:$72 sps:$4 sm:$0xff]  }
  0xca   : > { %2366 = vmatprep.subr.bf16.mxu0 %v3263_v17  ;;  %2224 = vmatprep.mubr.bf16.mxu1 %v3350_v18  ;;  %v3351_v16 = vld [vmem:[%s3612_s17 + $0x38] ss:$72 sps:$4 sm:$0xff]   ;;  %v3404_v18 = vld [vmem:[%s3612_s17 + $0x44] ss:$72 sps:$4 sm:$0xff]  }
  0xcb   : > { %2396 = vmatprep.mubr.bf16.mxu0 %v3353_v19  ;;  %v3354_v17 = vld [vmem:[%s4378_s1 + $0x800] ss:$8 sps:$4 sm:$0xff]   ;;  %v3359_v19 = vld [vmem:[%s4378_s1 + $0x814] ss:$8 sps:$4 sm:$0xff]  }
  0xcc   : > { %2195 = vmatpush1.bf16.msra.mxu1 %v3258_v20  ;;  %v3357_v20 = vld [vmem:[%s4378_s1 + $0x810] ss:$8 sps:$4 sm:$0xff]  }
  0xcd   : > { %2367 = vmatpush1.bf16.msra.mxu0 %v3261_v21  ;;  %2196 = vmatprep.subr.bf16.mxu1 %v3266_v22  ;;  %v3362_v21 = vld [vmem:[%s4378_s1 + $0x824] ss:$8 sps:$4 sm:$0xff]   ;;  %v3360_v22 = vld [vmem:[%s4378_s1 + $0x820] ss:$8 sps:$4 sm:$0xff]  }
  0xce   : > { %2368 = vmatprep.subr.bf16.mxu0 %v3269_v23  ;;  %v3365_v23 = vld [vmem:[%s4378_s1 + $0x834] ss:$8 sps:$4 sm:$0xff]  }
  0xd0   : > { %2197 = vmatpush1.bf16.msra.mxu1 %v3264_v24  ;;  %v3363_v24 = vld [vmem:[%s4378_s1 + $0x830] ss:$8 sps:$4 sm:$0xff]  }
  0xd1   : > { %2369 = vmatpush1.bf16.msra.mxu0 %v3267_v25  ;;  %2198 = vmatprep.subr.bf16.mxu1 %v3272_v26  ;;  %v3368_v25 = vld [vmem:[%s4378_s1 + $0x844] ss:$8 sps:$4 sm:$0xff]   ;;  %v3366_v26 = vld [vmem:[%s4378_s1 + $0x840] ss:$8 sps:$4 sm:$0xff]  }
  0xd2   : > { %2370 = vmatprep.subr.bf16.mxu0 %v3275_v27  ;;  %v3371_v27 = vld [vmem:[%s4378_s1 + $0x854] ss:$8 sps:$4 sm:$0xff]  }
  0xd4   : > { %2199 = vmatpush1.bf16.msra.mxu1 %v3270_v28  ;;  %v3369_v28 = vld [vmem:[%s4378_s1 + $0x850] ss:$8 sps:$4 sm:$0xff]  }
  0xd5   : > { %2371 = vmatpush1.bf16.msra.mxu0 %v3273_v29  ;;  %2200 = vmatprep.subr.bf16.mxu1 %v3278_v30  ;;  %v3374_v29 = vld [vmem:[%s4378_s1 + $0x864] ss:$8 sps:$4 sm:$0xff]   ;;  %v3372_v30 = vld [vmem:[%s4378_s1 + $0x860] ss:$8 sps:$4 sm:$0xff]  }
  0xd6   : > { %2372 = vmatprep.subr.bf16.mxu0 %v3281_v31  ;;  %v3377_v31 = vld [vmem:[%s4378_s1 + $0x874] ss:$8 sps:$4 sm:$0xff]  }
  0xd8   : > { %2201 = vmatpush1.bf16.msra.mxu1 %v3276_v32  ;;  %v3375_v32 = vld [vmem:[%s4378_s1 + $0x870] ss:$8 sps:$4 sm:$0xff]  }
  0xd9   : > { %2373 = vmatpush1.bf16.msra.mxu0 %v3279_v33  ;;  %2202 = vmatprep.subr.bf16.mxu1 %v3284_v34  ;;  %v3380_v33 = vld [vmem:[%s4378_s1 + $0x884] ss:$8 sps:$4 sm:$0xff]   ;;  %v3378_v34 = vld [vmem:[%s4378_s1 + $0x880] ss:$8 sps:$4 sm:$0xff]  }
  0xda   : > { %2374 = vmatprep.subr.bf16.mxu0 %v3287_v35  ;;  %v3383_v35 = vld [vmem:[%s4378_s1 + $0x894] ss:$8 sps:$4 sm:$0xff]  }
  0xdc   : > { %2203 = vmatpush1.bf16.msra.mxu1 %v3282_v36  ;;  %v3381_v36 = vld [vmem:[%s4378_s1 + $0x890] ss:$8 sps:$4 sm:$0xff]  }
  0xdd   : > { %2375 = vmatpush1.bf16.msra.mxu0 %v3285_v37  ;;  %2204 = vmatprep.subr.bf16.mxu1 %v3290_v38  ;;  %v3386_v37 = vld [vmem:[%s4378_s1 + $0x8a4] ss:$8 sps:$4 sm:$0xff]   ;;  %v3384_v38 = vld [vmem:[%s4378_s1 + $0x8a0] ss:$8 sps:$4 sm:$0xff]  }
  0xde   : > { %2376 = vmatprep.subr.bf16.mxu0 %v3293_v39  ;;  %v3389_v39 = vld [vmem:[%s4378_s1 + $0x8b4] ss:$8 sps:$4 sm:$0xff]  }
  0xe0   : > { %2205 = vmatpush1.bf16.msra.mxu1 %v3288_v40  ;;  %v3387_v40 = vld [vmem:[%s4378_s1 + $0x8b0] ss:$8 sps:$4 sm:$0xff]  }
  0xe1   : > { %2377 = vmatpush1.bf16.msra.mxu0 %v3291_v41  ;;  %2206 = vmatprep.subr.bf16.mxu1 %v3296_v42  ;;  %v3392_v41 = vld [vmem:[%s4378_s1 + $0x8c4] ss:$8 sps:$4 sm:$0xff]   ;;  %v3390_v42 = vld [vmem:[%s4378_s1 + $0x8c0] ss:$8 sps:$4 sm:$0xff]  }
  0xe2   : > { %2378 = vmatprep.subr.bf16.mxu0 %v3299_v43  ;;  %v3395_v43 = vld [vmem:[%s4378_s1 + $0x8d4] ss:$8 sps:$4 sm:$0xff]  }
  0xe4   : > { %2207 = vmatpush1.bf16.msra.mxu1 %v3294_v44  ;;  %v3393_v44 = vld [vmem:[%s4378_s1 + $0x8d0] ss:$8 sps:$4 sm:$0xff]  }
  0xe5   : > { %2379 = vmatpush1.bf16.msra.mxu0 %v3297_v45  ;;  %2208 = vmatprep.subr.bf16.mxu1 %v3302_v46  ;;  %v3398_v45 = vld [vmem:[%s4378_s1 + $0x8e4] ss:$8 sps:$4 sm:$0xff]   ;;  %v3396_v46 = vld [vmem:[%s4378_s1 + $0x8e0] ss:$8 sps:$4 sm:$0xff]  }
  0xe6   : > { %2380 = vmatprep.subr.bf16.mxu0 %v3305_v47  ;;  %v3401_v47 = vld [vmem:[%s4378_s1 + $0x8f4] ss:$8 sps:$4 sm:$0xff]  }
  0xe8   : > { %2209 = vmatpush1.bf16.msra.mxu1 %v3300_v48  ;;  %v3399_v48 = vld [vmem:[%s4378_s1 + $0x8f0] ss:$8 sps:$4 sm:$0xff]  }
  0xe9   : > { %2381 = vmatpush1.bf16.msra.mxu0 %v3303_v49  ;;  %2210 = vmatprep.subr.bf16.mxu1 %v3308_v50  ;;  %v3402_v49 = vld [vmem:[%s3612_s17 + $0x40] ss:$72 sps:$4 sm:$0xff]   ;;  %s2882_s17 = sshll.u32 %s4386_s12, 4 }
  0xea   : > { %2382 = vmatprep.subr.bf16.mxu0 %v3311_v51  ;;  %s213_s24 = scalar_lea.vmem %s4380_s3, %s2882_s17 }
  0xec   : > { %2211 = vmatpush1.bf16.msra.mxu1 %v3306_v52 }
  0xed   : > { %2383 = vmatpush1.bf16.msra.mxu0 %v3309_v53  ;;  %2212 = vmatprep.subr.bf16.mxu1 %v3314_v54  ;;  %v523_v54 = vlaneseq }
  0xee   : > { %2384 = vmatprep.subr.bf16.mxu0 %v3317_v55 }
  0xef   : > { %v524_v55 = vshrl.u32 %v523_v54, 7 }
  0xf0   : > { %2213 = vmatpush1.bf16.msra.mxu1 %v3312_v56 }
  0xf1   : > { %2385 = vmatpush1.bf16.msra.mxu0 %v3315_v57  ;;  %2214 = vmatprep.subr.bf16.mxu1 %v3320_v58  ;;  %v525_v56 = vsub.s32 0, %v524_v55  ;;  %v521_v57 = vld [vmem:[%s4379_s2] sm:$0x3]  ;;  %v529_v58 = vsub.s32 1, %v524_v55 }
  0xf2   : > { %2386 = vmatprep.subr.bf16.mxu0 %v3323_v59 }
  0xf3   : > { %v526_v59 = vrot.slane %v521_v57, %v525_v56 }
  0xf4   : > { %2215 = vmatpush1.bf16.msra.mxu1 %v3318_v60  ;;  %v530_v60 = vrot.slane %v521_v57, %v529_v58 }
  0xf5   : > { %2387 = vmatpush1.bf16.msra.mxu0 %v3321_v61  ;;  %2216 = vmatprep.subr.bf16.mxu1 %v3326_v62 }
  0xf6   : > { %2388 = vmatprep.subr.bf16.mxu0 %v3329_v63 }
  0xf8   : > { %2217 = vmatpush1.bf16.msra.mxu1 %v3324_v0 }
  0xf9   : > { %2389 = vmatpush1.bf16.msra.mxu0 %v3327_v1  ;;  %2218 = vmatprep.subr.bf16.mxu1 %v3332_v2 }
  0xfa   : > { %2390 = vmatprep.subr.bf16.mxu0 %v3335_v3 }
  0xfc   : > { %2219 = vmatpush1.bf16.msra.mxu1 %v3330_v4 }
  0xfd   : > { %2391 = vmatpush1.bf16.msra.mxu0 %v3333_v5  ;;  %2220 = vmatprep.subr.bf16.mxu1 %v3338_v6 }
  0xfe   : > { %2392 = vmatprep.subr.bf16.mxu0 %v3341_v7 }
 0x100   : > { %2221 = vmatpush1.bf16.msra.mxu1 %v3336_v8 }
 0x101   : > { %2393 = vmatpush1.bf16.msra.mxu0 %v3339_v9  ;;  %2222 = vmatprep.subr.bf16.mxu1 %v3344_v10 }
 0x102   : > { %2394 = vmatprep.subr.bf16.mxu0 %v3347_v11 }
 0x104   : > { %2223 = vmatpush1.bf16.msra.mxu1 %v3342_v12 }
 0x105   : > { %2395 = vmatpush1.bf16.msra.mxu0 %v3345_v13 }
 0x106   : > { %2407 = vmatprep.subr.bf16.mxu0 %v3356_v14 }
 0x107   : > { %2225 = vmatmul.mubr.bf16.vlgmr.msra.gmra.mrb[0].mxu1 %v3348_v15 }
 0x108   : > { %2397 = vmatmul.mubr.bf16.vlgmr.msra.gmra.mrb[0].mxu0 %v3351_v16 }
 0x109   : > { %2408 = vmatpush1.bf16.msra.mxu0 %v3354_v17  ;;  %2439 = vmatprep.mubr.bf16.mxu0 %v3404_v18 }
 0x10a   : > { %2409 = vmatprep.subr.bf16.mxu0 %v3359_v19 }
 0x10d   : > { %2410 = vmatpush1.bf16.msra.mxu0 %v3357_v20 }
 0x10e   : > { %2411 = vmatprep.subr.bf16.mxu0 %v3362_v21 }
 0x111   : > { %2412 = vmatpush1.bf16.msra.mxu0 %v3360_v22 }
 0x112   : > { %2413 = vmatprep.subr.bf16.mxu0 %v3365_v23 }
 0x115   : > { %2414 = vmatpush1.bf16.msra.mxu0 %v3363_v24 }
 0x116   : > { %2415 = vmatprep.subr.bf16.mxu0 %v3368_v25 }
 0x119   : > { %2416 = vmatpush1.bf16.msra.mxu0 %v3366_v26 }
 0x11a   : > { %2417 = vmatprep.subr.bf16.mxu0 %v3371_v27 }
 0x11d   : > { %2418 = vmatpush1.bf16.msra.mxu0 %v3369_v28 }
 0x11e   : > { %2419 = vmatprep.subr.bf16.mxu0 %v3374_v29 }
 0x121   : > { %2420 = vmatpush1.bf16.msra.mxu0 %v3372_v30 }
 0x122   : > { %2421 = vmatprep.subr.bf16.mxu0 %v3377_v31 }
 0x125   : > { %2422 = vmatpush1.bf16.msra.mxu0 %v3375_v32 }
 0x126   : > { %2423 = vmatprep.subr.bf16.mxu0 %v3380_v33 }
 0x129   : > { %2424 = vmatpush1.bf16.msra.mxu0 %v3378_v34 }
 0x12a   : > { %2425 = vmatprep.subr.bf16.mxu0 %v3383_v35 }
 0x12d   : > { %2426 = vmatpush1.bf16.msra.mxu0 %v3381_v36 }
 0x12e   : > { %2427 = vmatprep.subr.bf16.mxu0 %v3386_v37 }
 0x131   : > { %2428 = vmatpush1.bf16.msra.mxu0 %v3384_v38 }
 0x132   : > { %2429 = vmatprep.subr.bf16.mxu0 %v3389_v39 }
 0x135   : > { %2430 = vmatpush1.bf16.msra.mxu0 %v3387_v40 }
 0x136   : > { %2431 = vmatprep.subr.bf16.mxu0 %v3392_v41 }
 0x139   : > { %2432 = vmatpush1.bf16.msra.mxu0 %v3390_v42 }
 0x13a   : > { %2433 = vmatprep.subr.bf16.mxu0 %v3395_v43 }
 0x13d   : > { %2434 = vmatpush1.bf16.msra.mxu0 %v3393_v44 }
 0x13e   : > { %2435 = vmatprep.subr.bf16.mxu0 %v3398_v45 }
 0x141   : > { %2436 = vmatpush1.bf16.msra.mxu0 %v3396_v46 }
 0x142   : > { %2437 = vmatprep.subr.bf16.mxu0 %v3401_v47 }
 0x145   : > { %2438 = vmatpush1.bf16.msra.mxu0 %v3399_v48 }
 0x148   : > { %2440 = vmatmul.mubr.bf16.vlgmr.msra.gmra.mrb[0].mxu0 %v3402_v49 }
 0x1da   : > { %v2226_v50 = vpop.f32.mrb[0].mxu1 }
 0x1db   : > { %v2228_v51 = vpop.f32.mrb[1].mxu1  ;;  %v2885_v61 = vadd.f32 %v2226_v50, %v526_v59 }
 0x1dc   : > { %v2230_v52 = vpop.f32.mrb[2].mxu1  ;;  %v2887_v62 = vadd.f32 %v2228_v51, %v530_v60 }
 0x1dd   : > { %v2232_v53 = vpop.f32.mrb[3].mxu1  ;;  %v2889_v0 = vadd.f32 %v2230_v52, %v526_v59 }
 0x1de   : > { %v2891_v3 = vadd.f32 %v2232_v53, %v530_v60 }
 0x21b   : > { %v2441_v63 = vpop.f32.mrb[0].mxu0 }
 0x21c   : > { %v2886_v1 = vadd.f32 %v2885_v61, %v2441_v63  ;;  %v2443_v2 = vpop.f32.mrb[1].mxu0 }
 0x21d   : > { %v2888_v4 = vadd.f32 %v2887_v62, %v2443_v2  ;;  %v2445_v5 = vpop.f32.mrb[2].mxu0 }
 0x21e   : > { %v2450_v6 = vmax.f32 %v2886_v1, 0.0  ;;  %v2890_v7 = vadd.f32 %v2889_v0, %v2445_v5  ;;  %v2447_v8 = vpop.f32.mrb[3].mxu0 }
 0x21f   : > { %v2451_v9 = vmax.f32 %v2888_v4, 0.0  ;;  %v2892_v10 = vadd.f32 %v2891_v3, %v2447_v8 }
 0x220   : > { %v2452_v11 = vmax.f32 %v2890_v7, 0.0 }
 0x221   : > { %v2883_v12 = vpack.c.bf16 %v2451_v9, %v2450_v6  ;;  %v2453_v13 = vmax.f32 %v2892_v10, 0.0 }
 0x223   : > { %2466 = vst [vmem:[%s213_s24] sm:$0xff] %v2883_v12  ;;  %v2884_v14 = vpack.c.bf16 %v2453_v13, %v2452_v11 }
 0x225   : > { %2467 = vst [vmem:[%s213_s24 + $0x8] sm:$0xff] %v2884_v14 }
 0x226 PF: > { %s13_s14 = sadd.s32 1, %s3427_s14   ;;  %s4381_s12 = smov %s3423_s13 }
 0x227   : > { %p10_p5 = scmp.ge.s32.totalorder %s13_s14, 4   ;;  %s4382_s13 = smov %s4384_s15 }
 0x229   :  { %12 = sbr.rel (!%p10_p5) target bundleno = 2 (0x2), region = 62 }

</bundles_post_ra>
